<compile_context>
chip_gen: v7x
topology: tpu7x:2x2x1
jax: 0.10.0
libtpu: 0.0.40
codegen_flags: <defaults>
</compile_context>

<pallas_src>
import functools

import jax
import jax.numpy as jnp
from jax import lax
from jax.experimental import pallas as pl
from jax.experimental.pallas import tpu as pltpu

LANE = 128


def _round_up(x, m):
    return (x + m - 1) // m * m


def _pad2(a, shape):
    return jnp.zeros(shape, a.dtype).at[:a.shape[0], :a.shape[1]].set(a)


def _pad_gate_cols(w_t, rows_p, H, Hp):
    """(rows, 3H) -> (rows_p, 3*Hp): gate block g placed at column offset g*Hp."""
    rows = w_t.shape[0]
    out = jnp.zeros((rows_p, 3 * Hp), w_t.dtype)
    for g in range(3):
        out = out.at[:rows, g * Hp:g * Hp + H].set(w_t[:, g * H:(g + 1) * H])
    return out


# ------------------------------ Pallas kernel ------------------------------- #

def _gru_cell(gx_t, gh, bhn, h_prev, m, Hp):
    """One GRU step (PyTorch gate order r,z,n); masked carry for padded steps."""
    r = jax.nn.sigmoid(gx_t[:, 0:Hp] + gh[:, 0:Hp])
    z = jax.nn.sigmoid(gx_t[:, Hp:2 * Hp] + gh[:, Hp:2 * Hp])
    n = jnp.tanh(gx_t[:, 2 * Hp:3 * Hp] + r * (gh[:, 2 * Hp:3 * Hp] + bhn))
    h_new = n + z * (h_prev - n)                 # == (1-z)*n + z*h_prev
    return h_prev + m * (h_new - h_prev)         # padded step (m=0): keep h_prev


def _rel_encoder_kernel(S, B, Hp, num_layers, *refs):
    """Fully fused RelationEncoder forward.

    refs (inputs, then single output):
      ids   (S*B, 1)  int32   time-major token ids, row = t*B + b
      mask  (S*B, Hp) float32 1.0 where t < length[b], else 0.0
      emb   (Vp, Dp)  bf16    zero-padded embedding table
      per layer, per direction (fwd then bwd):
        wih parts (1 for layer 0: (Dp,3Hp); 2 for layer>0: (Hp,3Hp)) bf16,
        whh (Hp,3Hp) f32, b_gx (1,3Hp) f32, b_hn (1,Hp) f32
      proj: w_f (Hp,Ep) f32, w_b (Hp,Ep) f32, b (1,Ep) f32
      out   (B, Ep)   float32
    """
    it = iter(refs)
    ids_ref, mask_ref, emb_ref = next(it), next(it), next(it)
    layers = []
    for l in range(num_layers):
        n_in = 1 if l == 0 else 2
        dirs = []
        for _ in range(2):
            wih = [next(it) for _ in range(n_in)]
            dirs.append((wih, next(it), next(it), next(it)))   # (wih, whh, b_gx, b_hn)
        layers.append(dirs)
    wpf_ref, wpb_ref, bp_ref = next(it), next(it), next(it)
    out_ref = next(it)

    SB = S * B
    Vp = emb_ref.shape[0]

    # ---- embedding lookup fused as a one-hot matmul (tiny vocab) ----
    # TODO(synk): for large vocabs replace with an XLA gather outside / DMA gather.
    ids = ids_ref[...]                                     # (SB, 1) int32
    onehot = jnp.where(
        lax.broadcasted_iota(jnp.int32, (SB, Vp), 1) == ids, 1.0, 0.0
    ).astype(jnp.bfloat16)
    x0 = jnp.dot(onehot, emb_ref[...], preferred_element_type=jnp.float32)
    x_parts = (x0.astype(jnp.bfloat16),)                   # (SB, Dp) bf16
    # TODO(synk): input / inter-layer dropout is identity here (inference only).

    # ---- per-step (B, Hp) validity masks, hoisted off the serial recurrence ----
    m_steps = [mask_ref[t * B:(t + 1) * B, :] for t in range(S)]

    h_f = h_b = None
    for l in range(num_layers):
        (wih_f, whh_f_ref, bgx_f_ref, bhn_f_ref), \
            (wih_b, whh_b_ref, bgx_b_ref, bhn_b_ref) = layers[l]

        # hoisted input->hidden matmul for ALL timesteps, both directions (bf16 MXU)
        gx_f = bgx_f_ref[...]                              # r/z biases pre-folded here
        gx_b = bgx_b_ref[...]
        for xp, wf_ref, wb_ref in zip(x_parts, wih_f, wih_b):
            gx_f = gx_f + jnp.dot(xp, wf_ref[...], preferred_element_type=jnp.float32)
            gx_b = gx_b + jnp.dot(xp, wb_ref[...], preferred_element_type=jnp.float32)

        # loop-invariant weight/bias reads hoisted out of the recurrence
        # TODO(synk): hold whh in MXU weight registers across the recurrence via
        # pltpu.matmul_push_rhs / matmul_acc_lhs / matmul_pop.
        whh_f, whh_b = whh_f_ref[...], whh_b_ref[...]
        bhn_f = jnp.broadcast_to(bhn_f_ref[...], (B, Hp))
        bhn_b = jnp.broadcast_to(bhn_b_ref[...], (B, Hp))

        h_f = jnp.zeros((B, Hp), jnp.float32)              # h0 = zeros (matches torch)
        h_b = jnp.zeros((B, Hp), jnp.float32)
        emit_seq = l + 1 < num_layers
        yf_steps, yb_steps = [], []

        # Fully unrolled time loop with static slices (S is small); the fwd and
        # bwd half-steps are independent so the scheduler can interleave them.
        # TODO(synk): for large S switch to a bounded-unroll fori_loop with gx in
        # VMEM scratch and pl.multiple_of'd pl.ds slices.
        for t in range(S):
            tb = S - 1 - t                                 # backward walks reversed time
            gh_f = jnp.dot(h_f, whh_f, preferred_element_type=jnp.float32)
            h_f = _gru_cell(gx_f[t * B:(t + 1) * B, :], gh_f, bhn_f, h_f, m_steps[t], Hp)
            gh_b = jnp.dot(h_b, whh_b, preferred_element_type=jnp.float32)
            h_b = _gru_cell(gx_b[tb * B:(tb + 1) * B, :], gh_b, bhn_b, h_b, m_steps[tb], Hp)
            if emit_seq:
                yf_steps.append(h_f)
                yb_steps.append(h_b)

        if emit_seq:
            # time-major (row = t*B + b); bf16 for the next layer's hoisted matmul.
            # Note: rows at padded timesteps hold the carried h (not zeros); the
            # next layer masks those same steps so this never leaks into the output.
            yf = jnp.concatenate(yf_steps, axis=0).astype(jnp.bfloat16)
            yb = jnp.concatenate(yb_steps[::-1], axis=0).astype(jnp.bfloat16)
            x_parts = (yf, yb)

    # out_proj(concat(h_fwd, h_bwd)) == h_f @ Wp[:H] + h_b @ Wp[H:] + b
    out_ref[...] = (jnp.dot(h_f, wpf_ref[...], preferred_element_type=jnp.float32)
                    + jnp.dot(h_b, wpb_ref[...], preferred_element_type=jnp.float32)
                    + bp_ref[...])


# -------------------------------- parameters -------------------------------- #

def init_params(key, vocab_size, padding_idx, rel_dim, embed_dim,
                hidden_size, num_layers, bidirectional=True):
    assert bidirectional  # TODO(synk): unidirectional path not implemented.
    H = hidden_size
    Hp = _round_up(H, LANE)
    Dp = _round_up(rel_dim, LANE)
    Ep = _round_up(embed_dim, LANE)
    Vp = _round_up(vocab_size, LANE)

    keys = iter(jax.random.split(key, 2 + 8 * num_layers))

    emb = 0.02 * jax.random.normal(next(keys), (vocab_size, rel_dim), jnp.float32)
    emb = emb.at[padding_idx].set(0.0)
    emb_p = _pad2(emb, (Vp, Dp)).astype(jnp.bfloat16)      # bf16 MXU operand

    bound = float(H) ** -0.5                               # PyTorch GRU default init
    gru = []
    for l in range(num_layers):
        in_dim = rel_dim if l == 0 else 2 * H
        layer = {}
        for d in ("fwd", "bwd"):
            wih = jax.random.uniform(next(keys), (3 * H, in_dim), jnp.float32, -bound, bound)
            whh = jax.random.uniform(next(keys), (3 * H, H), jnp.float32, -bound, bound)
            b_ih = jax.random.uniform(next(keys), (3 * H,), jnp.float32, -bound, bound)
            b_hh = jax.random.uniform(next(keys), (3 * H,), jnp.float32, -bound, bound)
            wih_t = wih.T                                  # (in_dim, 3H), gate order r,z,n
            if l == 0:
                parts = (_pad_gate_cols(wih_t, Dp, H, Hp).astype(jnp.bfloat16),)
            else:
                # split along the input dim so layer>0 consumes (yf, yb) without concat
                parts = (_pad_gate_cols(wih_t[:H], Hp, H, Hp).astype(jnp.bfloat16),
                         _pad_gate_cols(wih_t[H:], Hp, H, Hp).astype(jnp.bfloat16))
            # pre-fold biases: r,z get b_ih+b_hh inside gx; n keeps b_hn on gh
            b_gx = b_ih + jnp.concatenate([b_hh[:2 * H], jnp.zeros((H,), jnp.float32)])
            layer[d] = dict(
                wih_t_parts=parts,
                whh_t=_pad_gate_cols(whh.T, Hp, H, Hp),               # (Hp, 3Hp) f32
                b_gx=_pad_gate_cols(b_gx.reshape(1, 3 * H), 1, H, Hp),
                b_hn=_pad2(b_hh[2 * H:].reshape(1, H), (1, Hp)))
        gru.append(layer)

    w = 0.02 * jax.random.normal(next(keys), (embed_dim, 2 * H), jnp.float32)
    w_t = w.T                                              # (2H, E): fwd rows, then bwd
    proj = dict(w_f=_pad2(w_t[:H], (Hp, Ep)), w_b=_pad2(w_t[H:], (Hp, Ep)),
                b=jnp.zeros((1, Ep), jnp.float32))         # reset_parameters(): bias = 0
    return dict(rel_embed=emb_p, gru=gru, out_proj=proj)


# --------------------------------- forward ----------------------------------- #

def relation_encoder_forward(params, relation_bank, relation_length,
                             num_layers, embed_dim, bidirectional=True):
    """relation_bank: (S, B) int32; relation_length: (B,) int32 -> (B, embed_dim)."""
    assert bidirectional  # TODO(synk): unidirectional path not implemented.
    S, B = relation_bank.shape
    Hp = params["gru"][0]["fwd"]["whh_t"].shape[0]         # lane-padded hidden
    Ep = params["out_proj"]["w_f"].shape[1]                # lane-padded embed dim

    # torch's sort-by-length / index_select / unsort around pack_padded_sequence
    # cancels for the final hidden state of a masked recurrence, so it is omitted.
    # relation_length == 0 yields h = 0 -> proj(0)+bias (torch would raise).
    ids = relation_bank.astype(jnp.int32).reshape(S * B, 1)          # row = t*B + b
    lens = relation_length.astype(jnp.int32)
    valid = (jnp.arange(S, dtype=jnp.int32)[:, None] < lens[None, :]).astype(jnp.float32)
    mask = jnp.broadcast_to(valid[:, :, None], (S, B, Hp)).reshape(S * B, Hp)

    inputs = [ids, mask, params["rel_embed"]]
    for l in range(num_layers):
        for d in ("fwd", "bwd"):
            p = params["gru"][l][d]
            inputs += [*p["wih_t_parts"], p["whh_t"], p["b_gx"], p["b_hn"]]
    pr = params["out_proj"]
    inputs += [pr["w_f"], pr["w_b"], pr["b"]]

    # advisory cost estimate + explicit VMEM budget
    SB = S * B
    Vp, Dp = params["rel_embed"].shape
    flops = 2 * SB * Vp * Dp + 2 * 2 * B * Hp * Ep
    trans = 0
    for l in range(num_layers):
        din = Dp if l == 0 else 2 * Hp
        flops += 2 * (2 * SB * din * 3 * Hp)               # hoisted input matmuls
        flops += 2 * (S * 2 * B * Hp * 3 * Hp)             # recurrent matmuls
        trans += 2 * SB * 3 * Hp                           # 2x sigmoid + tanh
    io_bytes = sum(int(x.size) * x.dtype.itemsize for x in inputs) + B * Ep * 4
    vmem_limit = int(min(64 * 2**20, max(16 * 2**20, 2 * io_bytes + 4 * 2**20)))

    kernel = functools.partial(_rel_encoder_kernel, S, B, Hp, num_layers)
    # TODO(synk): on v7x add a 2-wide "parallel" grid (batch split across the two
    # TensorCores); with no grid the kernel runs on a single TensorCore.
    out = pl.pallas_call(
        kernel,
        out_shape=jax.ShapeDtypeStruct((B, Ep), jnp.float32),
        compiler_params=pltpu.CompilerParams(vmem_limit_bytes=vmem_limit),
        cost_estimate=pl.CostEstimate(flops=int(flops), transcendentals=int(trans),
                                      bytes_accessed=int(io_bytes)),
    )(*inputs)
    return out[:, :embed_dim]


# ----------------------------------- main ------------------------------------ #

if __name__ == "__main__":
    VOCAB, PAD_IDX = 20, 0
    REL_DIM, EMBED_DIM, HIDDEN, NUM_LAYERS = 16, 32, 32, 2
    SEQ_LEN, BSZ = 8, 8

    key = jax.random.PRNGKey(0)
    kp, kb, kl = jax.random.split(key, 3)

    params = init_params(kp, VOCAB, PAD_IDX, REL_DIM, EMBED_DIM,
                         HIDDEN, NUM_LAYERS, bidirectional=True)

    relation_length = jax.random.randint(kl, (BSZ,), 1, SEQ_LEN + 1, dtype=jnp.int32)
    relation_bank = jax.random.randint(kb, (SEQ_LEN, BSZ), 1, VOCAB, dtype=jnp.int32)
    # zero-out (pad) positions beyond each sequence's length, like a real batch
    valid = jnp.arange(SEQ_LEN)[:, None] < relation_length[None, :]
    relation_bank = jnp.where(valid, relation_bank, PAD_IDX)

    fwd = jax.jit(functools.partial(relation_encoder_forward,
                                    num_layers=NUM_LAYERS, embed_dim=EMBED_DIM,
                                    bidirectional=True))
    out = fwd(params, relation_bank, relation_length)
    out = jax.block_until_ready(out)
    assert out.shape == (BSZ, EMBED_DIM), out.shape
    print("KERNEL_OK")
</pallas_src>

<mosaic_0001>
module attributes {stable_mosaic.version = 11 : i64} {
  func.func @_rel_encoder_kernel(%arg0: memref<64x1xi32, #tpu.memory_space<vmem>>, %arg1: memref<64x128xf32, #tpu.memory_space<vmem>>, %arg2: memref<128x128xbf16, #tpu.memory_space<vmem>>, %arg3: memref<128x384xbf16, #tpu.memory_space<vmem>>, %arg4: memref<128x384xf32, #tpu.memory_space<vmem>>, %arg5: memref<1x384xf32, #tpu.memory_space<vmem>>, %arg6: memref<1x128xf32, #tpu.memory_space<vmem>>, %arg7: memref<128x384xbf16, #tpu.memory_space<vmem>>, %arg8: memref<128x384xf32, #tpu.memory_space<vmem>>, %arg9: memref<1x384xf32, #tpu.memory_space<vmem>>, %arg10: memref<1x128xf32, #tpu.memory_space<vmem>>, %arg11: memref<128x384xbf16, #tpu.memory_space<vmem>>, %arg12: memref<128x384xbf16, #tpu.memory_space<vmem>>, %arg13: memref<128x384xf32, #tpu.memory_space<vmem>>, %arg14: memref<1x384xf32, #tpu.memory_space<vmem>>, %arg15: memref<1x128xf32, #tpu.memory_space<vmem>>, %arg16: memref<128x384xbf16, #tpu.memory_space<vmem>>, %arg17: memref<128x384xbf16, #tpu.memory_space<vmem>>, %arg18: memref<128x384xf32, #tpu.memory_space<vmem>>, %arg19: memref<1x384xf32, #tpu.memory_space<vmem>>, %arg20: memref<1x128xf32, #tpu.memory_space<vmem>>, %arg21: memref<128x128xf32, #tpu.memory_space<vmem>>, %arg22: memref<128x128xf32, #tpu.memory_space<vmem>>, %arg23: memref<1x128xf32, #tpu.memory_space<vmem>>, %arg24: memref<8x128xf32, #tpu.memory_space<vmem>>) attributes {dimension_semantics = [], scalar_prefetch = 0 : i64, scratch_operands = 0 : i64, tpu.core_type = #tpu.core_type<tc>} {
    %c0 = arith.constant 0 : index
    %c0_0 = arith.constant 0 : index
    %0 = vector.load %arg0[%c0, %c0_0] : memref<64x1xi32, #tpu.memory_space<vmem>>, vector<64x1xi32>
    %1 = tpu.iota {dimensions = array<i32: 1>} : vector<64x128xi32>
    %2 = vector.broadcast %0 : vector<64x1xi32> to vector<64x128xi32>
    %3 = arith.cmpi eq, %1, %2 : vector<64x128xi32>
    %cst = arith.constant 1.000000e+00 : f32
    %cst_1 = arith.constant 0.000000e+00 : f32
    %4 = vector.broadcast %cst : f32 to vector<64x128xf32>
    %5 = vector.broadcast %cst_1 : f32 to vector<64x128xf32>
    %6 = arith.select %3, %4, %5 : vector<64x128xi1>, vector<64x128xf32>
    %7 = arith.truncf %6 : vector<64x128xf32> to vector<64x128xbf16>
    %c0_2 = arith.constant 0 : index
    %c0_3 = arith.constant 0 : index
    %8 = vector.load %arg2[%c0_2, %c0_3] : memref<128x128xbf16, #tpu.memory_space<vmem>>, vector<128x128xbf16>
    %cst_4 = arith.constant dense<0.000000e+00> : vector<64x128xf32>
    %9 = tpu.matmul %7, %8, %cst_4 {dimension_numbers = #tpu.dot_dimension_numbers<[1], [0], [0], [1], [0, 0, 1, 1], [], []>} : vector<64x128xbf16>, vector<128x128xbf16>, vector<64x128xf32> -> vector<64x128xf32>
    %10 = arith.truncf %9 : vector<64x128xf32> to vector<64x128xbf16>
    %c0_5 = arith.constant 0 : index
    %c0_6 = arith.constant 0 : index
    %11 = vector.load %arg1[%c0_5, %c0_6] : memref<64x128xf32, #tpu.memory_space<vmem>>, vector<8x128xf32>
    %c8 = arith.constant 8 : index
    %c0_7 = arith.constant 0 : index
    %12 = vector.load %arg1[%c8, %c0_7] : memref<64x128xf32, #tpu.memory_space<vmem>>, vector<8x128xf32>
    %c16 = arith.constant 16 : index
    %c0_8 = arith.constant 0 : index
    %13 = vector.load %arg1[%c16, %c0_8] : memref<64x128xf32, #tpu.memory_space<vmem>>, vector<8x128xf32>
    %c24 = arith.constant 24 : index
    %c0_9 = arith.constant 0 : index
    %14 = vector.load %arg1[%c24, %c0_9] : memref<64x128xf32, #tpu.memory_space<vmem>>, vector<8x128xf32>
    %c32 = arith.constant 32 : index
    %c0_10 = arith.constant 0 : index
    %15 = vector.load %arg1[%c32, %c0_10] : memref<64x128xf32, #tpu.memory_space<vmem>>, vector<8x128xf32>
    %c40 = arith.constant 40 : index
    %c0_11 = arith.constant 0 : index
    %16 = vector.load %arg1[%c40, %c0_11] : memref<64x128xf32, #tpu.memory_space<vmem>>, vector<8x128xf32>
    %c48 = arith.constant 48 : index
    %c0_12 = arith.constant 0 : index
    %17 = vector.load %arg1[%c48, %c0_12] : memref<64x128xf32, #tpu.memory_space<vmem>>, vector<8x128xf32>
    %c56 = arith.constant 56 : index
    %c0_13 = arith.constant 0 : index
    %18 = vector.load %arg1[%c56, %c0_13] : memref<64x128xf32, #tpu.memory_space<vmem>>, vector<8x128xf32>
    %c0_14 = arith.constant 0 : index
    %c0_15 = arith.constant 0 : index
    %19 = vector.load %arg5[%c0_14, %c0_15] : memref<1x384xf32, #tpu.memory_space<vmem>>, vector<1x384xf32>
    %c0_16 = arith.constant 0 : index
    %c0_17 = arith.constant 0 : index
    %20 = vector.load %arg9[%c0_16, %c0_17] : memref<1x384xf32, #tpu.memory_space<vmem>>, vector<1x384xf32>
    %c0_18 = arith.constant 0 : index
    %c0_19 = arith.constant 0 : index
    %21 = vector.load %arg3[%c0_18, %c0_19] : memref<128x384xbf16, #tpu.memory_space<vmem>>, vector<128x384xbf16>
    %cst_20 = arith.constant dense<0.000000e+00> : vector<64x384xf32>
    %22 = tpu.matmul %10, %21, %cst_20 {dimension_numbers = #tpu.dot_dimension_numbers<[1], [0], [0], [1], [0, 0, 1, 1], [], []>} : vector<64x128xbf16>, vector<128x384xbf16>, vector<64x384xf32> -> vector<64x384xf32>
    %23 = vector.broadcast %19 : vector<1x384xf32> to vector<64x384xf32>
    %24 = arith.addf %23, %22 : vector<64x384xf32>
    %c0_21 = arith.constant 0 : index
    %c0_22 = arith.constant 0 : index
    %25 = vector.load %arg7[%c0_21, %c0_22] : memref<128x384xbf16, #tpu.memory_space<vmem>>, vector<128x384xbf16>
    %cst_23 = arith.constant dense<0.000000e+00> : vector<64x384xf32>
    %26 = tpu.matmul %10, %25, %cst_23 {dimension_numbers = #tpu.dot_dimension_numbers<[1], [0], [0], [1], [0, 0, 1, 1], [], []>} : vector<64x128xbf16>, vector<128x384xbf16>, vector<64x384xf32> -> vector<64x384xf32>
    %27 = vector.broadcast %20 : vector<1x384xf32> to vector<64x384xf32>
    %28 = arith.addf %27, %26 : vector<64x384xf32>
    %c0_24 = arith.constant 0 : index
    %c0_25 = arith.constant 0 : index
    %29 = vector.load %arg4[%c0_24, %c0_25] : memref<128x384xf32, #tpu.memory_space<vmem>>, vector<128x384xf32>
    %c0_26 = arith.constant 0 : index
    %c0_27 = arith.constant 0 : index
    %30 = vector.load %arg8[%c0_26, %c0_27] : memref<128x384xf32, #tpu.memory_space<vmem>>, vector<128x384xf32>
    %c0_28 = arith.constant 0 : index
    %c0_29 = arith.constant 0 : index
    %31 = vector.load %arg6[%c0_28, %c0_29] : memref<1x128xf32, #tpu.memory_space<vmem>>, vector<1x128xf32>
    %32 = vector.shape_cast %31 : vector<1x128xf32> to vector<1x128xf32>
    %33 = vector.broadcast %32 : vector<1x128xf32> to vector<8x128xf32>
    %c0_30 = arith.constant 0 : index
    %c0_31 = arith.constant 0 : index
    %34 = vector.load %arg10[%c0_30, %c0_31] : memref<1x128xf32, #tpu.memory_space<vmem>>, vector<1x128xf32>
    %35 = vector.shape_cast %34 : vector<1x128xf32> to vector<1x128xf32>
    %36 = vector.broadcast %35 : vector<1x128xf32> to vector<8x128xf32>
    %cst_32 = arith.constant 0.000000e+00 : f32
    %37 = vector.broadcast %cst_32 : f32 to vector<8x128xf32>
    %cst_33 = arith.constant 0.000000e+00 : f32
    %38 = vector.broadcast %cst_33 : f32 to vector<8x128xf32>
    %cst_34 = arith.constant dense<0.000000e+00> : vector<8x384xf32>
    %39 = tpu.matmul %37, %29, %cst_34 {dimension_numbers = #tpu.dot_dimension_numbers<[1], [0], [0], [1], [0, 0, 1, 1], [], []>} : vector<8x128xf32>, vector<128x384xf32>, vector<8x384xf32> -> vector<8x384xf32>
    %40 = vector.extract_strided_slice %24 {offsets = [0, 0], sizes = [8, 384], strides = [1, 1]} : vector<64x384xf32> to vector<8x384xf32>
    %41 = vector.extract_strided_slice %40 {offsets = [0, 0], sizes = [8, 128], strides = [1, 1]} : vector<8x384xf32> to vector<8x128xf32>
    %42 = vector.extract_strided_slice %39 {offsets = [0, 0], sizes = [8, 128], strides = [1, 1]} : vector<8x384xf32> to vector<8x128xf32>
    %43 = arith.addf %41, %42 : vector<8x128xf32>
    %44 = arith.negf %43 : vector<8x128xf32>
    %45 = math.exp %44 : vector<8x128xf32>
    %cst_35 = arith.constant 1.000000e+00 : f32
    %46 = vector.broadcast %cst_35 : f32 to vector<8x128xf32>
    %47 = arith.addf %46, %45 : vector<8x128xf32>
    %48 = arith.divf %46, %47 : vector<8x128xf32>
    %49 = vector.extract_strided_slice %40 {offsets = [0, 128], sizes = [8, 128], strides = [1, 1]} : vector<8x384xf32> to vector<8x128xf32>
    %50 = vector.extract_strided_slice %39 {offsets = [0, 128], sizes = [8, 128], strides = [1, 1]} : vector<8x384xf32> to vector<8x128xf32>
    %51 = arith.addf %49, %50 : vector<8x128xf32>
    %52 = arith.negf %51 : vector<8x128xf32>
    %53 = math.exp %52 : vector<8x128xf32>
    %cst_36 = arith.constant 1.000000e+00 : f32
    %54 = vector.broadcast %cst_36 : f32 to vector<8x128xf32>
    %55 = arith.addf %54, %53 : vector<8x128xf32>
    %56 = arith.divf %54, %55 : vector<8x128xf32>
    %57 = vector.extract_strided_slice %40 {offsets = [0, 256], sizes = [8, 128], strides = [1, 1]} : vector<8x384xf32> to vector<8x128xf32>
    %58 = vector.extract_strided_slice %39 {offsets = [0, 256], sizes = [8, 128], strides = [1, 1]} : vector<8x384xf32> to vector<8x128xf32>
    %59 = arith.addf %58, %33 : vector<8x128xf32>
    %60 = arith.mulf %48, %59 : vector<8x128xf32>
    %61 = arith.addf %57, %60 : vector<8x128xf32>
    %62 = math.tanh %61 : vector<8x128xf32>
    %63 = arith.subf %37, %62 : vector<8x128xf32>
    %64 = arith.mulf %56, %63 : vector<8x128xf32>
    %65 = arith.addf %62, %64 : vector<8x128xf32>
    %66 = arith.subf %65, %37 : vector<8x128xf32>
    %67 = arith.mulf %11, %66 : vector<8x128xf32>
    %68 = arith.addf %37, %67 : vector<8x128xf32>
    %cst_37 = arith.constant dense<0.000000e+00> : vector<8x384xf32>
    %69 = tpu.matmul %38, %30, %cst_37 {dimension_numbers = #tpu.dot_dimension_numbers<[1], [0], [0], [1], [0, 0, 1, 1], [], []>} : vector<8x128xf32>, vector<128x384xf32>, vector<8x384xf32> -> vector<8x384xf32>
    %70 = vector.extract_strided_slice %28 {offsets = [56, 0], sizes = [8, 384], strides = [1, 1]} : vector<64x384xf32> to vector<8x384xf32>
    %71 = vector.extract_strided_slice %70 {offsets = [0, 0], sizes = [8, 128], strides = [1, 1]} : vector<8x384xf32> to vector<8x128xf32>
    %72 = vector.extract_strided_slice %69 {offsets = [0, 0], sizes = [8, 128], strides = [1, 1]} : vector<8x384xf32> to vector<8x128xf32>
    %73 = arith.addf %71, %72 : vector<8x128xf32>
    %74 = arith.negf %73 : vector<8x128xf32>
    %75 = math.exp %74 : vector<8x128xf32>
    %cst_38 = arith.constant 1.000000e+00 : f32
    %76 = vector.broadcast %cst_38 : f32 to vector<8x128xf32>
    %77 = arith.addf %76, %75 : vector<8x128xf32>
    %78 = arith.divf %76, %77 : vector<8x128xf32>
    %79 = vector.extract_strided_slice %70 {offsets = [0, 128], sizes = [8, 128], strides = [1, 1]} : vector<8x384xf32> to vector<8x128xf32>
    %80 = vector.extract_strided_slice %69 {offsets = [0, 128], sizes = [8, 128], strides = [1, 1]} : vector<8x384xf32> to vector<8x128xf32>
    %81 = arith.addf %79, %80 : vector<8x128xf32>
    %82 = arith.negf %81 : vector<8x128xf32>
    %83 = math.exp %82 : vector<8x128xf32>
    %cst_39 = arith.constant 1.000000e+00 : f32
    %84 = vector.broadcast %cst_39 : f32 to vector<8x128xf32>
    %85 = arith.addf %84, %83 : vector<8x128xf32>
    %86 = arith.divf %84, %85 : vector<8x128xf32>
    %87 = vector.extract_strided_slice %70 {offsets = [0, 256], sizes = [8, 128], strides = [1, 1]} : vector<8x384xf32> to vector<8x128xf32>
    %88 = vector.extract_strided_slice %69 {offsets = [0, 256], sizes = [8, 128], strides = [1, 1]} : vector<8x384xf32> to vector<8x128xf32>
    %89 = arith.addf %88, %36 : vector<8x128xf32>
    %90 = arith.mulf %78, %89 : vector<8x128xf32>
    %91 = arith.addf %87, %90 : vector<8x128xf32>
    %92 = math.tanh %91 : vector<8x128xf32>
    %93 = arith.subf %38, %92 : vector<8x128xf32>
    %94 = arith.mulf %86, %93 : vector<8x128xf32>
    %95 = arith.addf %92, %94 : vector<8x128xf32>
    %96 = arith.subf %95, %38 : vector<8x128xf32>
    %97 = arith.mulf %18, %96 : vector<8x128xf32>
    %98 = arith.addf %38, %97 : vector<8x128xf32>
    %cst_40 = arith.constant dense<0.000000e+00> : vector<8x384xf32>
    %99 = tpu.matmul %68, %29, %cst_40 {dimension_numbers = #tpu.dot_dimension_numbers<[1], [0], [0], [1], [0, 0, 1, 1], [], []>} : vector<8x128xf32>, vector<128x384xf32>, vector<8x384xf32> -> vector<8x384xf32>
    %100 = vector.extract_strided_slice %24 {offsets = [8, 0], sizes = [8, 384], strides = [1, 1]} : vector<64x384xf32> to vector<8x384xf32>
    %101 = vector.extract_strided_slice %100 {offsets = [0, 0], sizes = [8, 128], strides = [1, 1]} : vector<8x384xf32> to vector<8x128xf32>
    %102 = vector.extract_strided_slice %99 {offsets = [0, 0], sizes = [8, 128], strides = [1, 1]} : vector<8x384xf32> to vector<8x128xf32>
    %103 = arith.addf %101, %102 : vector<8x128xf32>
    %104 = arith.negf %103 : vector<8x128xf32>
    %105 = math.exp %104 : vector<8x128xf32>
    %cst_41 = arith.constant 1.000000e+00 : f32
    %106 = vector.broadcast %cst_41 : f32 to vector<8x128xf32>
    %107 = arith.addf %106, %105 : vector<8x128xf32>
    %108 = arith.divf %106, %107 : vector<8x128xf32>
    %109 = vector.extract_strided_slice %100 {offsets = [0, 128], sizes = [8, 128], strides = [1, 1]} : vector<8x384xf32> to vector<8x128xf32>
    %110 = vector.extract_strided_slice %99 {offsets = [0, 128], sizes = [8, 128], strides = [1, 1]} : vector<8x384xf32> to vector<8x128xf32>
    %111 = arith.addf %109, %110 : vector<8x128xf32>
    %112 = arith.negf %111 : vector<8x128xf32>
    %113 = math.exp %112 : vector<8x128xf32>
    %cst_42 = arith.constant 1.000000e+00 : f32
    %114 = vector.broadcast %cst_42 : f32 to vector<8x128xf32>
    %115 = arith.addf %114, %113 : vector<8x128xf32>
    %116 = arith.divf %114, %115 : vector<8x128xf32>
    %117 = vector.extract_strided_slice %100 {offsets = [0, 256], sizes = [8, 128], strides = [1, 1]} : vector<8x384xf32> to vector<8x128xf32>
    %118 = vector.extract_strided_slice %99 {offsets = [0, 256], sizes = [8, 128], strides = [1, 1]} : vector<8x384xf32> to vector<8x128xf32>
    %119 = arith.addf %118, %33 : vector<8x128xf32>
    %120 = arith.mulf %108, %119 : vector<8x128xf32>
    %121 = arith.addf %117, %120 : vector<8x128xf32>
    %122 = math.tanh %121 : vector<8x128xf32>
    %123 = arith.subf %68, %122 : vector<8x128xf32>
    %124 = arith.mulf %116, %123 : vector<8x128xf32>
    %125 = arith.addf %122, %124 : vector<8x128xf32>
    %126 = arith.subf %125, %68 : vector<8x128xf32>
    %127 = arith.mulf %12, %126 : vector<8x128xf32>
    %128 = arith.addf %68, %127 : vector<8x128xf32>
    %cst_43 = arith.constant dense<0.000000e+00> : vector<8x384xf32>
    %129 = tpu.matmul %98, %30, %cst_43 {dimension_numbers = #tpu.dot_dimension_numbers<[1], [0], [0], [1], [0, 0, 1, 1], [], []>} : vector<8x128xf32>, vector<128x384xf32>, vector<8x384xf32> -> vector<8x384xf32>
    %130 = vector.extract_strided_slice %28 {offsets = [48, 0], sizes = [8, 384], strides = [1, 1]} : vector<64x384xf32> to vector<8x384xf32>
    %131 = vector.extract_strided_slice %130 {offsets = [0, 0], sizes = [8, 128], strides = [1, 1]} : vector<8x384xf32> to vector<8x128xf32>
    %132 = vector.extract_strided_slice %129 {offsets = [0, 0], sizes = [8, 128], strides = [1, 1]} : vector<8x384xf32> to vector<8x128xf32>
    %133 = arith.addf %131, %132 : vector<8x128xf32>
    %134 = arith.negf %133 : vector<8x128xf32>
    %135 = math.exp %134 : vector<8x128xf32>
    %cst_44 = arith.constant 1.000000e+00 : f32
    %136 = vector.broadcast %cst_44 : f32 to vector<8x128xf32>
    %137 = arith.addf %136, %135 : vector<8x128xf32>
    %138 = arith.divf %136, %137 : vector<8x128xf32>
    %139 = vector.extract_strided_slice %130 {offsets = [0, 128], sizes = [8, 128], strides = [1, 1]} : vector<8x384xf32> to vector<8x128xf32>
    %140 = vector.extract_strided_slice %129 {offsets = [0, 128], sizes = [8, 128], strides = [1, 1]} : vector<8x384xf32> to vector<8x128xf32>
    %141 = arith.addf %139, %140 : vector<8x128xf32>
    %142 = arith.negf %141 : vector<8x128xf32>
    %143 = math.exp %142 : vector<8x128xf32>
    %cst_45 = arith.constant 1.000000e+00 : f32
    %144 = vector.broadcast %cst_45 : f32 to vector<8x128xf32>
    %145 = arith.addf %144, %143 : vector<8x128xf32>
    %146 = arith.divf %144, %145 : vector<8x128xf32>
    %147 = vector.extract_strided_slice %130 {offsets = [0, 256], sizes = [8, 128], strides = [1, 1]} : vector<8x384xf32> to vector<8x128xf32>
    %148 = vector.extract_strided_slice %129 {offsets = [0, 256], sizes = [8, 128], strides = [1, 1]} : vector<8x384xf32> to vector<8x128xf32>
    %149 = arith.addf %148, %36 : vector<8x128xf32>
    %150 = arith.mulf %138, %149 : vector<8x128xf32>
    %151 = arith.addf %147, %150 : vector<8x128xf32>
    %152 = math.tanh %151 : vector<8x128xf32>
    %153 = arith.subf %98, %152 : vector<8x128xf32>
    %154 = arith.mulf %146, %153 : vector<8x128xf32>
    %155 = arith.addf %152, %154 : vector<8x128xf32>
    %156 = arith.subf %155, %98 : vector<8x128xf32>
    %157 = arith.mulf %17, %156 : vector<8x128xf32>
    %158 = arith.addf %98, %157 : vector<8x128xf32>
    %cst_46 = arith.constant dense<0.000000e+00> : vector<8x384xf32>
    %159 = tpu.matmul %128, %29, %cst_46 {dimension_numbers = #tpu.dot_dimension_numbers<[1], [0], [0], [1], [0, 0, 1, 1], [], []>} : vector<8x128xf32>, vector<128x384xf32>, vector<8x384xf32> -> vector<8x384xf32>
    %160 = vector.extract_strided_slice %24 {offsets = [16, 0], sizes = [8, 384], strides = [1, 1]} : vector<64x384xf32> to vector<8x384xf32>
    %161 = vector.extract_strided_slice %160 {offsets = [0, 0], sizes = [8, 128], strides = [1, 1]} : vector<8x384xf32> to vector<8x128xf32>
    %162 = vector.extract_strided_slice %159 {offsets = [0, 0], sizes = [8, 128], strides = [1, 1]} : vector<8x384xf32> to vector<8x128xf32>
    %163 = arith.addf %161, %162 : vector<8x128xf32>
    %164 = arith.negf %163 : vector<8x128xf32>
    %165 = math.exp %164 : vector<8x128xf32>
    %cst_47 = arith.constant 1.000000e+00 : f32
    %166 = vector.broadcast %cst_47 : f32 to vector<8x128xf32>
    %167 = arith.addf %166, %165 : vector<8x128xf32>
    %168 = arith.divf %166, %167 : vector<8x128xf32>
    %169 = vector.extract_strided_slice %160 {offsets = [0, 128], sizes = [8, 128], strides = [1, 1]} : vector<8x384xf32> to vector<8x128xf32>
    %170 = vector.extract_strided_slice %159 {offsets = [0, 128], sizes = [8, 128], strides = [1, 1]} : vector<8x384xf32> to vector<8x128xf32>
    %171 = arith.addf %169, %170 : vector<8x128xf32>
    %172 = arith.negf %171 : vector<8x128xf32>
    %173 = math.exp %172 : vector<8x128xf32>
    %cst_48 = arith.constant 1.000000e+00 : f32
    %174 = vector.broadcast %cst_48 : f32 to vector<8x128xf32>
    %175 = arith.addf %174, %173 : vector<8x128xf32>
    %176 = arith.divf %174, %175 : vector<8x128xf32>
    %177 = vector.extract_strided_slice %160 {offsets = [0, 256], sizes = [8, 128], strides = [1, 1]} : vector<8x384xf32> to vector<8x128xf32>
    %178 = vector.extract_strided_slice %159 {offsets = [0, 256], sizes = [8, 128], strides = [1, 1]} : vector<8x384xf32> to vector<8x128xf32>
    %179 = arith.addf %178, %33 : vector<8x128xf32>
    %180 = arith.mulf %168, %179 : vector<8x128xf32>
    %181 = arith.addf %177, %180 : vector<8x128xf32>
    %182 = math.tanh %181 : vector<8x128xf32>
    %183 = arith.subf %128, %182 : vector<8x128xf32>
    %184 = arith.mulf %176, %183 : vector<8x128xf32>
    %185 = arith.addf %182, %184 : vector<8x128xf32>
    %186 = arith.subf %185, %128 : vector<8x128xf32>
    %187 = arith.mulf %13, %186 : vector<8x128xf32>
    %188 = arith.addf %128, %187 : vector<8x128xf32>
    %cst_49 = arith.constant dense<0.000000e+00> : vector<8x384xf32>
    %189 = tpu.matmul %158, %30, %cst_49 {dimension_numbers = #tpu.dot_dimension_numbers<[1], [0], [0], [1], [0, 0, 1, 1], [], []>} : vector<8x128xf32>, vector<128x384xf32>, vector<8x384xf32> -> vector<8x384xf32>
    %190 = vector.extract_strided_slice %28 {offsets = [40, 0], sizes = [8, 384], strides = [1, 1]} : vector<64x384xf32> to vector<8x384xf32>
    %191 = vector.extract_strided_slice %190 {offsets = [0, 0], sizes = [8, 128], strides = [1, 1]} : vector<8x384xf32> to vector<8x128xf32>
    %192 = vector.extract_strided_slice %189 {offsets = [0, 0], sizes = [8, 128], strides = [1, 1]} : vector<8x384xf32> to vector<8x128xf32>
    %193 = arith.addf %191, %192 : vector<8x128xf32>
    %194 = arith.negf %193 : vector<8x128xf32>
    %195 = math.exp %194 : vector<8x128xf32>
    %cst_50 = arith.constant 1.000000e+00 : f32
    %196 = vector.broadcast %cst_50 : f32 to vector<8x128xf32>
    %197 = arith.addf %196, %195 : vector<8x128xf32>
    %198 = arith.divf %196, %197 : vector<8x128xf32>
    %199 = vector.extract_strided_slice %190 {offsets = [0, 128], sizes = [8, 128], strides = [1, 1]} : vector<8x384xf32> to vector<8x128xf32>
    %200 = vector.extract_strided_slice %189 {offsets = [0, 128], sizes = [8, 128], strides = [1, 1]} : vector<8x384xf32> to vector<8x128xf32>
    %201 = arith.addf %199, %200 : vector<8x128xf32>
    %202 = arith.negf %201 : vector<8x128xf32>
    %203 = math.exp %202 : vector<8x128xf32>
    %cst_51 = arith.constant 1.000000e+00 : f32
    %204 = vector.broadcast %cst_51 : f32 to vector<8x128xf32>
    %205 = arith.addf %204, %203 : vector<8x128xf32>
    %206 = arith.divf %204, %205 : vector<8x128xf32>
    %207 = vector.extract_strided_slice %190 {offsets = [0, 256], sizes = [8, 128], strides = [1, 1]} : vector<8x384xf32> to vector<8x128xf32>
    %208 = vector.extract_strided_slice %189 {offsets = [0, 256], sizes = [8, 128], strides = [1, 1]} : vector<8x384xf32> to vector<8x128xf32>
    %209 = arith.addf %208, %36 : vector<8x128xf32>
    %210 = arith.mulf %198, %209 : vector<8x128xf32>
    %211 = arith.addf %207, %210 : vector<8x128xf32>
    %212 = math.tanh %211 : vector<8x128xf32>
    %213 = arith.subf %158, %212 : vector<8x128xf32>
    %214 = arith.mulf %206, %213 : vector<8x128xf32>
    %215 = arith.addf %212, %214 : vector<8x128xf32>
    %216 = arith.subf %215, %158 : vector<8x128xf32>
    %217 = arith.mulf %16, %216 : vector<8x128xf32>
    %218 = arith.addf %158, %217 : vector<8x128xf32>
    %cst_52 = arith.constant dense<0.000000e+00> : vector<8x384xf32>
    %219 = tpu.matmul %188, %29, %cst_52 {dimension_numbers = #tpu.dot_dimension_numbers<[1], [0], [0], [1], [0, 0, 1, 1], [], []>} : vector<8x128xf32>, vector<128x384xf32>, vector<8x384xf32> -> vector<8x384xf32>
    %220 = vector.extract_strided_slice %24 {offsets = [24, 0], sizes = [8, 384], strides = [1, 1]} : vector<64x384xf32> to vector<8x384xf32>
    %221 = vector.extract_strided_slice %220 {offsets = [0, 0], sizes = [8, 128], strides = [1, 1]} : vector<8x384xf32> to vector<8x128xf32>
    %222 = vector.extract_strided_slice %219 {offsets = [0, 0], sizes = [8, 128], strides = [1, 1]} : vector<8x384xf32> to vector<8x128xf32>
    %223 = arith.addf %221, %222 : vector<8x128xf32>
    %224 = arith.negf %223 : vector<8x128xf32>
    %225 = math.exp %224 : vector<8x128xf32>
    %cst_53 = arith.constant 1.000000e+00 : f32
    %226 = vector.broadcast %cst_53 : f32 to vector<8x128xf32>
    %227 = arith.addf %226, %225 : vector<8x128xf32>
    %228 = arith.divf %226, %227 : vector<8x128xf32>
    %229 = vector.extract_strided_slice %220 {offsets = [0, 128], sizes = [8, 128], strides = [1, 1]} : vector<8x384xf32> to vector<8x128xf32>
    %230 = vector.extract_strided_slice %219 {offsets = [0, 128], sizes = [8, 128], strides = [1, 1]} : vector<8x384xf32> to vector<8x128xf32>
    %231 = arith.addf %229, %230 : vector<8x128xf32>
    %232 = arith.negf %231 : vector<8x128xf32>
    %233 = math.exp %232 : vector<8x128xf32>
    %cst_54 = arith.constant 1.000000e+00 : f32
    %234 = vector.broadcast %cst_54 : f32 to vector<8x128xf32>
    %235 = arith.addf %234, %233 : vector<8x128xf32>
    %236 = arith.divf %234, %235 : vector<8x128xf32>
    %237 = vector.extract_strided_slice %220 {offsets = [0, 256], sizes = [8, 128], strides = [1, 1]} : vector<8x384xf32> to vector<8x128xf32>
    %238 = vector.extract_strided_slice %219 {offsets = [0, 256], sizes = [8, 128], strides = [1, 1]} : vector<8x384xf32> to vector<8x128xf32>
    %239 = arith.addf %238, %33 : vector<8x128xf32>
    %240 = arith.mulf %228, %239 : vector<8x128xf32>
    %241 = arith.addf %237, %240 : vector<8x128xf32>
    %242 = math.tanh %241 : vector<8x128xf32>
    %243 = arith.subf %188, %242 : vector<8x128xf32>
    %244 = arith.mulf %236, %243 : vector<8x128xf32>
    %245 = arith.addf %242, %244 : vector<8x128xf32>
    %246 = arith.subf %245, %188 : vector<8x128xf32>
    %247 = arith.mulf %14, %246 : vector<8x128xf32>
    %248 = arith.addf %188, %247 : vector<8x128xf32>
    %cst_55 = arith.constant dense<0.000000e+00> : vector<8x384xf32>
    %249 = tpu.matmul %218, %30, %cst_55 {dimension_numbers = #tpu.dot_dimension_numbers<[1], [0], [0], [1], [0, 0, 1, 1], [], []>} : vector<8x128xf32>, vector<128x384xf32>, vector<8x384xf32> -> vector<8x384xf32>
    %250 = vector.extract_strided_slice %28 {offsets = [32, 0], sizes = [8, 384], strides = [1, 1]} : vector<64x384xf32> to vector<8x384xf32>
    %251 = vector.extract_strided_slice %250 {offsets = [0, 0], sizes = [8, 128], strides = [1, 1]} : vector<8x384xf32> to vector<8x128xf32>
    %252 = vector.extract_strided_slice %249 {offsets = [0, 0], sizes = [8, 128], strides = [1, 1]} : vector<8x384xf32> to vector<8x128xf32>
    %253 = arith.addf %251, %252 : vector<8x128xf32>
    %254 = arith.negf %253 : vector<8x128xf32>
    %255 = math.exp %254 : vector<8x128xf32>
    %cst_56 = arith.constant 1.000000e+00 : f32
    %256 = vector.broadcast %cst_56 : f32 to vector<8x128xf32>
    %257 = arith.addf %256, %255 : vector<8x128xf32>
    %258 = arith.divf %256, %257 : vector<8x128xf32>
    %259 = vector.extract_strided_slice %250 {offsets = [0, 128], sizes = [8, 128], strides = [1, 1]} : vector<8x384xf32> to vector<8x128xf32>
    %260 = vector.extract_strided_slice %249 {offsets = [0, 128], sizes = [8, 128], strides = [1, 1]} : vector<8x384xf32> to vector<8x128xf32>
    %261 = arith.addf %259, %260 : vector<8x128xf32>
    %262 = arith.negf %261 : vector<8x128xf32>
    %263 = math.exp %262 : vector<8x128xf32>
    %cst_57 = arith.constant 1.000000e+00 : f32
    %264 = vector.broadcast %cst_57 : f32 to vector<8x128xf32>
    %265 = arith.addf %264, %263 : vector<8x128xf32>
    %266 = arith.divf %264, %265 : vector<8x128xf32>
    %267 = vector.extract_strided_slice %250 {offsets = [0, 256], sizes = [8, 128], strides = [1, 1]} : vector<8x384xf32> to vector<8x128xf32>
    %268 = vector.extract_strided_slice %249 {offsets = [0, 256], sizes = [8, 128], strides = [1, 1]} : vector<8x384xf32> to vector<8x128xf32>
    %269 = arith.addf %268, %36 : vector<8x128xf32>
    %270 = arith.mulf %258, %269 : vector<8x128xf32>
    %271 = arith.addf %267, %270 : vector<8x128xf32>
    %272 = math.tanh %271 : vector<8x128xf32>
    %273 = arith.subf %218, %272 : vector<8x128xf32>
    %274 = arith.mulf %266, %273 : vector<8x128xf32>
    %275 = arith.addf %272, %274 : vector<8x128xf32>
    %276 = arith.subf %275, %218 : vector<8x128xf32>
    %277 = arith.mulf %15, %276 : vector<8x128xf32>
    %278 = arith.addf %218, %277 : vector<8x128xf32>
    %cst_58 = arith.constant dense<0.000000e+00> : vector<8x384xf32>
    %279 = tpu.matmul %248, %29, %cst_58 {dimension_numbers = #tpu.dot_dimension_numbers<[1], [0], [0], [1], [0, 0, 1, 1], [], []>} : vector<8x128xf32>, vector<128x384xf32>, vector<8x384xf32> -> vector<8x384xf32>
    %280 = vector.extract_strided_slice %24 {offsets = [32, 0], sizes = [8, 384], strides = [1, 1]} : vector<64x384xf32> to vector<8x384xf32>
    %281 = vector.extract_strided_slice %280 {offsets = [0, 0], sizes = [8, 128], strides = [1, 1]} : vector<8x384xf32> to vector<8x128xf32>
    %282 = vector.extract_strided_slice %279 {offsets = [0, 0], sizes = [8, 128], strides = [1, 1]} : vector<8x384xf32> to vector<8x128xf32>
    %283 = arith.addf %281, %282 : vector<8x128xf32>
    %284 = arith.negf %283 : vector<8x128xf32>
    %285 = math.exp %284 : vector<8x128xf32>
    %cst_59 = arith.constant 1.000000e+00 : f32
    %286 = vector.broadcast %cst_59 : f32 to vector<8x128xf32>
    %287 = arith.addf %286, %285 : vector<8x128xf32>
    %288 = arith.divf %286, %287 : vector<8x128xf32>
    %289 = vector.extract_strided_slice %280 {offsets = [0, 128], sizes = [8, 128], strides = [1, 1]} : vector<8x384xf32> to vector<8x128xf32>
    %290 = vector.extract_strided_slice %279 {offsets = [0, 128], sizes = [8, 128], strides = [1, 1]} : vector<8x384xf32> to vector<8x128xf32>
    %291 = arith.addf %289, %290 : vector<8x128xf32>
    %292 = arith.negf %291 : vector<8x128xf32>
    %293 = math.exp %292 : vector<8x128xf32>
    %cst_60 = arith.constant 1.000000e+00 : f32
    %294 = vector.broadcast %cst_60 : f32 to vector<8x128xf32>
    %295 = arith.addf %294, %293 : vector<8x128xf32>
    %296 = arith.divf %294, %295 : vector<8x128xf32>
    %297 = vector.extract_strided_slice %280 {offsets = [0, 256], sizes = [8, 128], strides = [1, 1]} : vector<8x384xf32> to vector<8x128xf32>
    %298 = vector.extract_strided_slice %279 {offsets = [0, 256], sizes = [8, 128], strides = [1, 1]} : vector<8x384xf32> to vector<8x128xf32>
    %299 = arith.addf %298, %33 : vector<8x128xf32>
    %300 = arith.mulf %288, %299 : vector<8x128xf32>
    %301 = arith.addf %297, %300 : vector<8x128xf32>
    %302 = math.tanh %301 : vector<8x128xf32>
    %303 = arith.subf %248, %302 : vector<8x128xf32>
    %304 = arith.mulf %296, %303 : vector<8x128xf32>
    %305 = arith.addf %302, %304 : vector<8x128xf32>
    %306 = arith.subf %305, %248 : vector<8x128xf32>
    %307 = arith.mulf %15, %306 : vector<8x128xf32>
    %308 = arith.addf %248, %307 : vector<8x128xf32>
    %cst_61 = arith.constant dense<0.000000e+00> : vector<8x384xf32>
    %309 = tpu.matmul %278, %30, %cst_61 {dimension_numbers = #tpu.dot_dimension_numbers<[1], [0], [0], [1], [0, 0, 1, 1], [], []>} : vector<8x128xf32>, vector<128x384xf32>, vector<8x384xf32> -> vector<8x384xf32>
    %310 = vector.extract_strided_slice %28 {offsets = [24, 0], sizes = [8, 384], strides = [1, 1]} : vector<64x384xf32> to vector<8x384xf32>
    %311 = vector.extract_strided_slice %310 {offsets = [0, 0], sizes = [8, 128], strides = [1, 1]} : vector<8x384xf32> to vector<8x128xf32>
    %312 = vector.extract_strided_slice %309 {offsets = [0, 0], sizes = [8, 128], strides = [1, 1]} : vector<8x384xf32> to vector<8x128xf32>
    %313 = arith.addf %311, %312 : vector<8x128xf32>
    %314 = arith.negf %313 : vector<8x128xf32>
    %315 = math.exp %314 : vector<8x128xf32>
    %cst_62 = arith.constant 1.000000e+00 : f32
    %316 = vector.broadcast %cst_62 : f32 to vector<8x128xf32>
    %317 = arith.addf %316, %315 : vector<8x128xf32>
    %318 = arith.divf %316, %317 : vector<8x128xf32>
    %319 = vector.extract_strided_slice %310 {offsets = [0, 128], sizes = [8, 128], strides = [1, 1]} : vector<8x384xf32> to vector<8x128xf32>
    %320 = vector.extract_strided_slice %309 {offsets = [0, 128], sizes = [8, 128], strides = [1, 1]} : vector<8x384xf32> to vector<8x128xf32>
    %321 = arith.addf %319, %320 : vector<8x128xf32>
    %322 = arith.negf %321 : vector<8x128xf32>
    %323 = math.exp %322 : vector<8x128xf32>
    %cst_63 = arith.constant 1.000000e+00 : f32
    %324 = vector.broadcast %cst_63 : f32 to vector<8x128xf32>
    %325 = arith.addf %324, %323 : vector<8x128xf32>
    %326 = arith.divf %324, %325 : vector<8x128xf32>
    %327 = vector.extract_strided_slice %310 {offsets = [0, 256], sizes = [8, 128], strides = [1, 1]} : vector<8x384xf32> to vector<8x128xf32>
    %328 = vector.extract_strided_slice %309 {offsets = [0, 256], sizes = [8, 128], strides = [1, 1]} : vector<8x384xf32> to vector<8x128xf32>
    %329 = arith.addf %328, %36 : vector<8x128xf32>
    %330 = arith.mulf %318, %329 : vector<8x128xf32>
    %331 = arith.addf %327, %330 : vector<8x128xf32>
    %332 = math.tanh %331 : vector<8x128xf32>
    %333 = arith.subf %278, %332 : vector<8x128xf32>
    %334 = arith.mulf %326, %333 : vector<8x128xf32>
    %335 = arith.addf %332, %334 : vector<8x128xf32>
    %336 = arith.subf %335, %278 : vector<8x128xf32>
    %337 = arith.mulf %14, %336 : vector<8x128xf32>
    %338 = arith.addf %278, %337 : vector<8x128xf32>
    %cst_64 = arith.constant dense<0.000000e+00> : vector<8x384xf32>
    %339 = tpu.matmul %308, %29, %cst_64 {dimension_numbers = #tpu.dot_dimension_numbers<[1], [0], [0], [1], [0, 0, 1, 1], [], []>} : vector<8x128xf32>, vector<128x384xf32>, vector<8x384xf32> -> vector<8x384xf32>
    %340 = vector.extract_strided_slice %24 {offsets = [40, 0], sizes = [8, 384], strides = [1, 1]} : vector<64x384xf32> to vector<8x384xf32>
    %341 = vector.extract_strided_slice %340 {offsets = [0, 0], sizes = [8, 128], strides = [1, 1]} : vector<8x384xf32> to vector<8x128xf32>
    %342 = vector.extract_strided_slice %339 {offsets = [0, 0], sizes = [8, 128], strides = [1, 1]} : vector<8x384xf32> to vector<8x128xf32>
    %343 = arith.addf %341, %342 : vector<8x128xf32>
    %344 = arith.negf %343 : vector<8x128xf32>
    %345 = math.exp %344 : vector<8x128xf32>
    %cst_65 = arith.constant 1.000000e+00 : f32
    %346 = vector.broadcast %cst_65 : f32 to vector<8x128xf32>
    %347 = arith.addf %346, %345 : vector<8x128xf32>
    %348 = arith.divf %346, %347 : vector<8x128xf32>
    %349 = vector.extract_strided_slice %340 {offsets = [0, 128], sizes = [8, 128], strides = [1, 1]} : vector<8x384xf32> to vector<8x128xf32>
    %350 = vector.extract_strided_slice %339 {offsets = [0, 128], sizes = [8, 128], strides = [1, 1]} : vector<8x384xf32> to vector<8x128xf32>
    %351 = arith.addf %349, %350 : vector<8x128xf32>
    %352 = arith.negf %351 : vector<8x128xf32>
    %353 = math.exp %352 : vector<8x128xf32>
    %cst_66 = arith.constant 1.000000e+00 : f32
    %354 = vector.broadcast %cst_66 : f32 to vector<8x128xf32>
    %355 = arith.addf %354, %353 : vector<8x128xf32>
    %356 = arith.divf %354, %355 : vector<8x128xf32>
    %357 = vector.extract_strided_slice %340 {offsets = [0, 256], sizes = [8, 128], strides = [1, 1]} : vector<8x384xf32> to vector<8x128xf32>
    %358 = vector.extract_strided_slice %339 {offsets = [0, 256], sizes = [8, 128], strides = [1, 1]} : vector<8x384xf32> to vector<8x128xf32>
    %359 = arith.addf %358, %33 : vector<8x128xf32>
    %360 = arith.mulf %348, %359 : vector<8x128xf32>
    %361 = arith.addf %357, %360 : vector<8x128xf32>
    %362 = math.tanh %361 : vector<8x128xf32>
    %363 = arith.subf %308, %362 : vector<8x128xf32>
    %364 = arith.mulf %356, %363 : vector<8x128xf32>
    %365 = arith.addf %362, %364 : vector<8x128xf32>
    %366 = arith.subf %365, %308 : vector<8x128xf32>
    %367 = arith.mulf %16, %366 : vector<8x128xf32>
    %368 = arith.addf %308, %367 : vector<8x128xf32>
    %cst_67 = arith.constant dense<0.000000e+00> : vector<8x384xf32>
    %369 = tpu.matmul %338, %30, %cst_67 {dimension_numbers = #tpu.dot_dimension_numbers<[1], [0], [0], [1], [0, 0, 1, 1], [], []>} : vector<8x128xf32>, vector<128x384xf32>, vector<8x384xf32> -> vector<8x384xf32>
    %370 = vector.extract_strided_slice %28 {offsets = [16, 0], sizes = [8, 384], strides = [1, 1]} : vector<64x384xf32> to vector<8x384xf32>
    %371 = vector.extract_strided_slice %370 {offsets = [0, 0], sizes = [8, 128], strides = [1, 1]} : vector<8x384xf32> to vector<8x128xf32>
    %372 = vector.extract_strided_slice %369 {offsets = [0, 0], sizes = [8, 128], strides = [1, 1]} : vector<8x384xf32> to vector<8x128xf32>
    %373 = arith.addf %371, %372 : vector<8x128xf32>
    %374 = arith.negf %373 : vector<8x128xf32>
    %375 = math.exp %374 : vector<8x128xf32>
    %cst_68 = arith.constant 1.000000e+00 : f32
    %376 = vector.broadcast %cst_68 : f32 to vector<8x128xf32>
    %377 = arith.addf %376, %375 : vector<8x128xf32>
    %378 = arith.divf %376, %377 : vector<8x128xf32>
    %379 = vector.extract_strided_slice %370 {offsets = [0, 128], sizes = [8, 128], strides = [1, 1]} : vector<8x384xf32> to vector<8x128xf32>
    %380 = vector.extract_strided_slice %369 {offsets = [0, 128], sizes = [8, 128], strides = [1, 1]} : vector<8x384xf32> to vector<8x128xf32>
    %381 = arith.addf %379, %380 : vector<8x128xf32>
    %382 = arith.negf %381 : vector<8x128xf32>
    %383 = math.exp %382 : vector<8x128xf32>
    %cst_69 = arith.constant 1.000000e+00 : f32
    %384 = vector.broadcast %cst_69 : f32 to vector<8x128xf32>
    %385 = arith.addf %384, %383 : vector<8x128xf32>
    %386 = arith.divf %384, %385 : vector<8x128xf32>
    %387 = vector.extract_strided_slice %370 {offsets = [0, 256], sizes = [8, 128], strides = [1, 1]} : vector<8x384xf32> to vector<8x128xf32>
    %388 = vector.extract_strided_slice %369 {offsets = [0, 256], sizes = [8, 128], strides = [1, 1]} : vector<8x384xf32> to vector<8x128xf32>
    %389 = arith.addf %388, %36 : vector<8x128xf32>
    %390 = arith.mulf %378, %389 : vector<8x128xf32>
    %391 = arith.addf %387, %390 : vector<8x128xf32>
    %392 = math.tanh %391 : vector<8x128xf32>
    %393 = arith.subf %338, %392 : vector<8x128xf32>
    %394 = arith.mulf %386, %393 : vector<8x128xf32>
    %395 = arith.addf %392, %394 : vector<8x128xf32>
    %396 = arith.subf %395, %338 : vector<8x128xf32>
    %397 = arith.mulf %13, %396 : vector<8x128xf32>
    %398 = arith.addf %338, %397 : vector<8x128xf32>
    %cst_70 = arith.constant dense<0.000000e+00> : vector<8x384xf32>
    %399 = tpu.matmul %368, %29, %cst_70 {dimension_numbers = #tpu.dot_dimension_numbers<[1], [0], [0], [1], [0, 0, 1, 1], [], []>} : vector<8x128xf32>, vector<128x384xf32>, vector<8x384xf32> -> vector<8x384xf32>
    %400 = vector.extract_strided_slice %24 {offsets = [48, 0], sizes = [8, 384], strides = [1, 1]} : vector<64x384xf32> to vector<8x384xf32>
    %401 = vector.extract_strided_slice %400 {offsets = [0, 0], sizes = [8, 128], strides = [1, 1]} : vector<8x384xf32> to vector<8x128xf32>
    %402 = vector.extract_strided_slice %399 {offsets = [0, 0], sizes = [8, 128], strides = [1, 1]} : vector<8x384xf32> to vector<8x128xf32>
    %403 = arith.addf %401, %402 : vector<8x128xf32>
    %404 = arith.negf %403 : vector<8x128xf32>
    %405 = math.exp %404 : vector<8x128xf32>
    %cst_71 = arith.constant 1.000000e+00 : f32
    %406 = vector.broadcast %cst_71 : f32 to vector<8x128xf32>
    %407 = arith.addf %406, %405 : vector<8x128xf32>
    %408 = arith.divf %406, %407 : vector<8x128xf32>
    %409 = vector.extract_strided_slice %400 {offsets = [0, 128], sizes = [8, 128], strides = [1, 1]} : vector<8x384xf32> to vector<8x128xf32>
    %410 = vector.extract_strided_slice %399 {offsets = [0, 128], sizes = [8, 128], strides = [1, 1]} : vector<8x384xf32> to vector<8x128xf32>
    %411 = arith.addf %409, %410 : vector<8x128xf32>
    %412 = arith.negf %411 : vector<8x128xf32>
    %413 = math.exp %412 : vector<8x128xf32>
    %cst_72 = arith.constant 1.000000e+00 : f32
    %414 = vector.broadcast %cst_72 : f32 to vector<8x128xf32>
    %415 = arith.addf %414, %413 : vector<8x128xf32>
    %416 = arith.divf %414, %415 : vector<8x128xf32>
    %417 = vector.extract_strided_slice %400 {offsets = [0, 256], sizes = [8, 128], strides = [1, 1]} : vector<8x384xf32> to vector<8x128xf32>
    %418 = vector.extract_strided_slice %399 {offsets = [0, 256], sizes = [8, 128], strides = [1, 1]} : vector<8x384xf32> to vector<8x128xf32>
    %419 = arith.addf %418, %33 : vector<8x128xf32>
    %420 = arith.mulf %408, %419 : vector<8x128xf32>
    %421 = arith.addf %417, %420 : vector<8x128xf32>
    %422 = math.tanh %421 : vector<8x128xf32>
    %423 = arith.subf %368, %422 : vector<8x128xf32>
    %424 = arith.mulf %416, %423 : vector<8x128xf32>
    %425 = arith.addf %422, %424 : vector<8x128xf32>
    %426 = arith.subf %425, %368 : vector<8x128xf32>
    %427 = arith.mulf %17, %426 : vector<8x128xf32>
    %428 = arith.addf %368, %427 : vector<8x128xf32>
    %cst_73 = arith.constant dense<0.000000e+00> : vector<8x384xf32>
    %429 = tpu.matmul %398, %30, %cst_73 {dimension_numbers = #tpu.dot_dimension_numbers<[1], [0], [0], [1], [0, 0, 1, 1], [], []>} : vector<8x128xf32>, vector<128x384xf32>, vector<8x384xf32> -> vector<8x384xf32>
    %430 = vector.extract_strided_slice %28 {offsets = [8, 0], sizes = [8, 384], strides = [1, 1]} : vector<64x384xf32> to vector<8x384xf32>
    %431 = vector.extract_strided_slice %430 {offsets = [0, 0], sizes = [8, 128], strides = [1, 1]} : vector<8x384xf32> to vector<8x128xf32>
    %432 = vector.extract_strided_slice %429 {offsets = [0, 0], sizes = [8, 128], strides = [1, 1]} : vector<8x384xf32> to vector<8x128xf32>
    %433 = arith.addf %431, %432 : vector<8x128xf32>
    %434 = arith.negf %433 : vector<8x128xf32>
    %435 = math.exp %434 : vector<8x128xf32>
    %cst_74 = arith.constant 1.000000e+00 : f32
    %436 = vector.broadcast %cst_74 : f32 to vector<8x128xf32>
    %437 = arith.addf %436, %435 : vector<8x128xf32>
    %438 = arith.divf %436, %437 : vector<8x128xf32>
    %439 = vector.extract_strided_slice %430 {offsets = [0, 128], sizes = [8, 128], strides = [1, 1]} : vector<8x384xf32> to vector<8x128xf32>
    %440 = vector.extract_strided_slice %429 {offsets = [0, 128], sizes = [8, 128], strides = [1, 1]} : vector<8x384xf32> to vector<8x128xf32>
    %441 = arith.addf %439, %440 : vector<8x128xf32>
    %442 = arith.negf %441 : vector<8x128xf32>
    %443 = math.exp %442 : vector<8x128xf32>
    %cst_75 = arith.constant 1.000000e+00 : f32
    %444 = vector.broadcast %cst_75 : f32 to vector<8x128xf32>
    %445 = arith.addf %444, %443 : vector<8x128xf32>
    %446 = arith.divf %444, %445 : vector<8x128xf32>
    %447 = vector.extract_strided_slice %430 {offsets = [0, 256], sizes = [8, 128], strides = [1, 1]} : vector<8x384xf32> to vector<8x128xf32>
    %448 = vector.extract_strided_slice %429 {offsets = [0, 256], sizes = [8, 128], strides = [1, 1]} : vector<8x384xf32> to vector<8x128xf32>
    %449 = arith.addf %448, %36 : vector<8x128xf32>
    %450 = arith.mulf %438, %449 : vector<8x128xf32>
    %451 = arith.addf %447, %450 : vector<8x128xf32>
    %452 = math.tanh %451 : vector<8x128xf32>
    %453 = arith.subf %398, %452 : vector<8x128xf32>
    %454 = arith.mulf %446, %453 : vector<8x128xf32>
    %455 = arith.addf %452, %454 : vector<8x128xf32>
    %456 = arith.subf %455, %398 : vector<8x128xf32>
    %457 = arith.mulf %12, %456 : vector<8x128xf32>
    %458 = arith.addf %398, %457 : vector<8x128xf32>
    %cst_76 = arith.constant dense<0.000000e+00> : vector<8x384xf32>
    %459 = tpu.matmul %428, %29, %cst_76 {dimension_numbers = #tpu.dot_dimension_numbers<[1], [0], [0], [1], [0, 0, 1, 1], [], []>} : vector<8x128xf32>, vector<128x384xf32>, vector<8x384xf32> -> vector<8x384xf32>
    %460 = vector.extract_strided_slice %24 {offsets = [56, 0], sizes = [8, 384], strides = [1, 1]} : vector<64x384xf32> to vector<8x384xf32>
    %461 = vector.extract_strided_slice %460 {offsets = [0, 0], sizes = [8, 128], strides = [1, 1]} : vector<8x384xf32> to vector<8x128xf32>
    %462 = vector.extract_strided_slice %459 {offsets = [0, 0], sizes = [8, 128], strides = [1, 1]} : vector<8x384xf32> to vector<8x128xf32>
    %463 = arith.addf %461, %462 : vector<8x128xf32>
    %464 = arith.negf %463 : vector<8x128xf32>
    %465 = math.exp %464 : vector<8x128xf32>
    %cst_77 = arith.constant 1.000000e+00 : f32
    %466 = vector.broadcast %cst_77 : f32 to vector<8x128xf32>
    %467 = arith.addf %466, %465 : vector<8x128xf32>
    %468 = arith.divf %466, %467 : vector<8x128xf32>
    %469 = vector.extract_strided_slice %460 {offsets = [0, 128], sizes = [8, 128], strides = [1, 1]} : vector<8x384xf32> to vector<8x128xf32>
    %470 = vector.extract_strided_slice %459 {offsets = [0, 128], sizes = [8, 128], strides = [1, 1]} : vector<8x384xf32> to vector<8x128xf32>
    %471 = arith.addf %469, %470 : vector<8x128xf32>
    %472 = arith.negf %471 : vector<8x128xf32>
    %473 = math.exp %472 : vector<8x128xf32>
    %cst_78 = arith.constant 1.000000e+00 : f32
    %474 = vector.broadcast %cst_78 : f32 to vector<8x128xf32>
    %475 = arith.addf %474, %473 : vector<8x128xf32>
    %476 = arith.divf %474, %475 : vector<8x128xf32>
    %477 = vector.extract_strided_slice %460 {offsets = [0, 256], sizes = [8, 128], strides = [1, 1]} : vector<8x384xf32> to vector<8x128xf32>
    %478 = vector.extract_strided_slice %459 {offsets = [0, 256], sizes = [8, 128], strides = [1, 1]} : vector<8x384xf32> to vector<8x128xf32>
    %479 = arith.addf %478, %33 : vector<8x128xf32>
    %480 = arith.mulf %468, %479 : vector<8x128xf32>
    %481 = arith.addf %477, %480 : vector<8x128xf32>
    %482 = math.tanh %481 : vector<8x128xf32>
    %483 = arith.subf %428, %482 : vector<8x128xf32>
    %484 = arith.mulf %476, %483 : vector<8x128xf32>
    %485 = arith.addf %482, %484 : vector<8x128xf32>
    %486 = arith.subf %485, %428 : vector<8x128xf32>
    %487 = arith.mulf %18, %486 : vector<8x128xf32>
    %488 = arith.addf %428, %487 : vector<8x128xf32>
    %cst_79 = arith.constant dense<0.000000e+00> : vector<8x384xf32>
    %489 = tpu.matmul %458, %30, %cst_79 {dimension_numbers = #tpu.dot_dimension_numbers<[1], [0], [0], [1], [0, 0, 1, 1], [], []>} : vector<8x128xf32>, vector<128x384xf32>, vector<8x384xf32> -> vector<8x384xf32>
    %490 = vector.extract_strided_slice %28 {offsets = [0, 0], sizes = [8, 384], strides = [1, 1]} : vector<64x384xf32> to vector<8x384xf32>
    %491 = vector.extract_strided_slice %490 {offsets = [0, 0], sizes = [8, 128], strides = [1, 1]} : vector<8x384xf32> to vector<8x128xf32>
    %492 = vector.extract_strided_slice %489 {offsets = [0, 0], sizes = [8, 128], strides = [1, 1]} : vector<8x384xf32> to vector<8x128xf32>
    %493 = arith.addf %491, %492 : vector<8x128xf32>
    %494 = arith.negf %493 : vector<8x128xf32>
    %495 = math.exp %494 : vector<8x128xf32>
    %cst_80 = arith.constant 1.000000e+00 : f32
    %496 = vector.broadcast %cst_80 : f32 to vector<8x128xf32>
    %497 = arith.addf %496, %495 : vector<8x128xf32>
    %498 = arith.divf %496, %497 : vector<8x128xf32>
    %499 = vector.extract_strided_slice %490 {offsets = [0, 128], sizes = [8, 128], strides = [1, 1]} : vector<8x384xf32> to vector<8x128xf32>
    %500 = vector.extract_strided_slice %489 {offsets = [0, 128], sizes = [8, 128], strides = [1, 1]} : vector<8x384xf32> to vector<8x128xf32>
    %501 = arith.addf %499, %500 : vector<8x128xf32>
    %502 = arith.negf %501 : vector<8x128xf32>
    %503 = math.exp %502 : vector<8x128xf32>
    %cst_81 = arith.constant 1.000000e+00 : f32
    %504 = vector.broadcast %cst_81 : f32 to vector<8x128xf32>
    %505 = arith.addf %504, %503 : vector<8x128xf32>
    %506 = arith.divf %504, %505 : vector<8x128xf32>
    %507 = vector.extract_strided_slice %490 {offsets = [0, 256], sizes = [8, 128], strides = [1, 1]} : vector<8x384xf32> to vector<8x128xf32>
    %508 = vector.extract_strided_slice %489 {offsets = [0, 256], sizes = [8, 128], strides = [1, 1]} : vector<8x384xf32> to vector<8x128xf32>
    %509 = arith.addf %508, %36 : vector<8x128xf32>
    %510 = arith.mulf %498, %509 : vector<8x128xf32>
    %511 = arith.addf %507, %510 : vector<8x128xf32>
    %512 = math.tanh %511 : vector<8x128xf32>
    %513 = arith.subf %458, %512 : vector<8x128xf32>
    %514 = arith.mulf %506, %513 : vector<8x128xf32>
    %515 = arith.addf %512, %514 : vector<8x128xf32>
    %516 = arith.subf %515, %458 : vector<8x128xf32>
    %517 = arith.mulf %11, %516 : vector<8x128xf32>
    %518 = arith.addf %458, %517 : vector<8x128xf32>
    %519 = tpu.concatenate %68, %128, %188, %248, %308, %368, %428, %488 in 0 : vector<8x128xf32>, vector<8x128xf32>, vector<8x128xf32>, vector<8x128xf32>, vector<8x128xf32>, vector<8x128xf32>, vector<8x128xf32>, vector<8x128xf32> -> vector<64x128xf32>
    %520 = arith.truncf %519 : vector<64x128xf32> to vector<64x128xbf16>
    %521 = tpu.concatenate %518, %458, %398, %338, %278, %218, %158, %98 in 0 : vector<8x128xf32>, vector<8x128xf32>, vector<8x128xf32>, vector<8x128xf32>, vector<8x128xf32>, vector<8x128xf32>, vector<8x128xf32>, vector<8x128xf32> -> vector<64x128xf32>
    %522 = arith.truncf %521 : vector<64x128xf32> to vector<64x128xbf16>
    %c0_82 = arith.constant 0 : index
    %c0_83 = arith.constant 0 : index
    %523 = vector.load %arg14[%c0_82, %c0_83] : memref<1x384xf32, #tpu.memory_space<vmem>>, vector<1x384xf32>
    %c0_84 = arith.constant 0 : index
    %c0_85 = arith.constant 0 : index
    %524 = vector.load %arg19[%c0_84, %c0_85] : memref<1x384xf32, #tpu.memory_space<vmem>>, vector<1x384xf32>
    %c0_86 = arith.constant 0 : index
    %c0_87 = arith.constant 0 : index
    %525 = vector.load %arg11[%c0_86, %c0_87] : memref<128x384xbf16, #tpu.memory_space<vmem>>, vector<128x384xbf16>
    %cst_88 = arith.constant dense<0.000000e+00> : vector<64x384xf32>
    %526 = tpu.matmul %520, %525, %cst_88 {dimension_numbers = #tpu.dot_dimension_numbers<[1], [0], [0], [1], [0, 0, 1, 1], [], []>} : vector<64x128xbf16>, vector<128x384xbf16>, vector<64x384xf32> -> vector<64x384xf32>
    %527 = vector.broadcast %523 : vector<1x384xf32> to vector<64x384xf32>
    %528 = arith.addf %527, %526 : vector<64x384xf32>
    %c0_89 = arith.constant 0 : index
    %c0_90 = arith.constant 0 : index
    %529 = vector.load %arg16[%c0_89, %c0_90] : memref<128x384xbf16, #tpu.memory_space<vmem>>, vector<128x384xbf16>
    %cst_91 = arith.constant dense<0.000000e+00> : vector<64x384xf32>
    %530 = tpu.matmul %520, %529, %cst_91 {dimension_numbers = #tpu.dot_dimension_numbers<[1], [0], [0], [1], [0, 0, 1, 1], [], []>} : vector<64x128xbf16>, vector<128x384xbf16>, vector<64x384xf32> -> vector<64x384xf32>
    %531 = vector.broadcast %524 : vector<1x384xf32> to vector<64x384xf32>
    %532 = arith.addf %531, %530 : vector<64x384xf32>
    %c0_92 = arith.constant 0 : index
    %c0_93 = arith.constant 0 : index
    %533 = vector.load %arg12[%c0_92, %c0_93] : memref<128x384xbf16, #tpu.memory_space<vmem>>, vector<128x384xbf16>
    %cst_94 = arith.constant dense<0.000000e+00> : vector<64x384xf32>
    %534 = tpu.matmul %522, %533, %cst_94 {dimension_numbers = #tpu.dot_dimension_numbers<[1], [0], [0], [1], [0, 0, 1, 1], [], []>} : vector<64x128xbf16>, vector<128x384xbf16>, vector<64x384xf32> -> vector<64x384xf32>
    %535 = arith.addf %528, %534 : vector<64x384xf32>
    %c0_95 = arith.constant 0 : index
    %c0_96 = arith.constant 0 : index
    %536 = vector.load %arg17[%c0_95, %c0_96] : memref<128x384xbf16, #tpu.memory_space<vmem>>, vector<128x384xbf16>
    %cst_97 = arith.constant dense<0.000000e+00> : vector<64x384xf32>
    %537 = tpu.matmul %522, %536, %cst_97 {dimension_numbers = #tpu.dot_dimension_numbers<[1], [0], [0], [1], [0, 0, 1, 1], [], []>} : vector<64x128xbf16>, vector<128x384xbf16>, vector<64x384xf32> -> vector<64x384xf32>
    %538 = arith.addf %532, %537 : vector<64x384xf32>
    %c0_98 = arith.constant 0 : index
    %c0_99 = arith.constant 0 : index
    %539 = vector.load %arg13[%c0_98, %c0_99] : memref<128x384xf32, #tpu.memory_space<vmem>>, vector<128x384xf32>
    %c0_100 = arith.constant 0 : index
    %c0_101 = arith.constant 0 : index
    %540 = vector.load %arg18[%c0_100, %c0_101] : memref<128x384xf32, #tpu.memory_space<vmem>>, vector<128x384xf32>
    %c0_102 = arith.constant 0 : index
    %c0_103 = arith.constant 0 : index
    %541 = vector.load %arg15[%c0_102, %c0_103] : memref<1x128xf32, #tpu.memory_space<vmem>>, vector<1x128xf32>
    %542 = vector.shape_cast %541 : vector<1x128xf32> to vector<1x128xf32>
    %543 = vector.broadcast %542 : vector<1x128xf32> to vector<8x128xf32>
    %c0_104 = arith.constant 0 : index
    %c0_105 = arith.constant 0 : index
    %544 = vector.load %arg20[%c0_104, %c0_105] : memref<1x128xf32, #tpu.memory_space<vmem>>, vector<1x128xf32>
    %545 = vector.shape_cast %544 : vector<1x128xf32> to vector<1x128xf32>
    %546 = vector.broadcast %545 : vector<1x128xf32> to vector<8x128xf32>
    %cst_106 = arith.constant 0.000000e+00 : f32
    %547 = vector.broadcast %cst_106 : f32 to vector<8x128xf32>
    %cst_107 = arith.constant 0.000000e+00 : f32
    %548 = vector.broadcast %cst_107 : f32 to vector<8x128xf32>
    %cst_108 = arith.constant dense<0.000000e+00> : vector<8x384xf32>
    %549 = tpu.matmul %547, %539, %cst_108 {dimension_numbers = #tpu.dot_dimension_numbers<[1], [0], [0], [1], [0, 0, 1, 1], [], []>} : vector<8x128xf32>, vector<128x384xf32>, vector<8x384xf32> -> vector<8x384xf32>
    %550 = vector.extract_strided_slice %535 {offsets = [0, 0], sizes = [8, 384], strides = [1, 1]} : vector<64x384xf32> to vector<8x384xf32>
    %551 = vector.extract_strided_slice %550 {offsets = [0, 0], sizes = [8, 128], strides = [1, 1]} : vector<8x384xf32> to vector<8x128xf32>
    %552 = vector.extract_strided_slice %549 {offsets = [0, 0], sizes = [8, 128], strides = [1, 1]} : vector<8x384xf32> to vector<8x128xf32>
    %553 = arith.addf %551, %552 : vector<8x128xf32>
    %554 = arith.negf %553 : vector<8x128xf32>
    %555 = math.exp %554 : vector<8x128xf32>
    %cst_109 = arith.constant 1.000000e+00 : f32
    %556 = vector.broadcast %cst_109 : f32 to vector<8x128xf32>
    %557 = arith.addf %556, %555 : vector<8x128xf32>
    %558 = arith.divf %556, %557 : vector<8x128xf32>
    %559 = vector.extract_strided_slice %550 {offsets = [0, 128], sizes = [8, 128], strides = [1, 1]} : vector<8x384xf32> to vector<8x128xf32>
    %560 = vector.extract_strided_slice %549 {offsets = [0, 128], sizes = [8, 128], strides = [1, 1]} : vector<8x384xf32> to vector<8x128xf32>
    %561 = arith.addf %559, %560 : vector<8x128xf32>
    %562 = arith.negf %561 : vector<8x128xf32>
    %563 = math.exp %562 : vector<8x128xf32>
    %cst_110 = arith.constant 1.000000e+00 : f32
    %564 = vector.broadcast %cst_110 : f32 to vector<8x128xf32>
    %565 = arith.addf %564, %563 : vector<8x128xf32>
    %566 = arith.divf %564, %565 : vector<8x128xf32>
    %567 = vector.extract_strided_slice %550 {offsets = [0, 256], sizes = [8, 128], strides = [1, 1]} : vector<8x384xf32> to vector<8x128xf32>
    %568 = vector.extract_strided_slice %549 {offsets = [0, 256], sizes = [8, 128], strides = [1, 1]} : vector<8x384xf32> to vector<8x128xf32>
    %569 = arith.addf %568, %543 : vector<8x128xf32>
    %570 = arith.mulf %558, %569 : vector<8x128xf32>
    %571 = arith.addf %567, %570 : vector<8x128xf32>
    %572 = math.tanh %571 : vector<8x128xf32>
    %573 = arith.subf %547, %572 : vector<8x128xf32>
    %574 = arith.mulf %566, %573 : vector<8x128xf32>
    %575 = arith.addf %572, %574 : vector<8x128xf32>
    %576 = arith.subf %575, %547 : vector<8x128xf32>
    %577 = arith.mulf %11, %576 : vector<8x128xf32>
    %578 = arith.addf %547, %577 : vector<8x128xf32>
    %cst_111 = arith.constant dense<0.000000e+00> : vector<8x384xf32>
    %579 = tpu.matmul %548, %540, %cst_111 {dimension_numbers = #tpu.dot_dimension_numbers<[1], [0], [0], [1], [0, 0, 1, 1], [], []>} : vector<8x128xf32>, vector<128x384xf32>, vector<8x384xf32> -> vector<8x384xf32>
    %580 = vector.extract_strided_slice %538 {offsets = [56, 0], sizes = [8, 384], strides = [1, 1]} : vector<64x384xf32> to vector<8x384xf32>
    %581 = vector.extract_strided_slice %580 {offsets = [0, 0], sizes = [8, 128], strides = [1, 1]} : vector<8x384xf32> to vector<8x128xf32>
    %582 = vector.extract_strided_slice %579 {offsets = [0, 0], sizes = [8, 128], strides = [1, 1]} : vector<8x384xf32> to vector<8x128xf32>
    %583 = arith.addf %581, %582 : vector<8x128xf32>
    %584 = arith.negf %583 : vector<8x128xf32>
    %585 = math.exp %584 : vector<8x128xf32>
    %cst_112 = arith.constant 1.000000e+00 : f32
    %586 = vector.broadcast %cst_112 : f32 to vector<8x128xf32>
    %587 = arith.addf %586, %585 : vector<8x128xf32>
    %588 = arith.divf %586, %587 : vector<8x128xf32>
    %589 = vector.extract_strided_slice %580 {offsets = [0, 128], sizes = [8, 128], strides = [1, 1]} : vector<8x384xf32> to vector<8x128xf32>
    %590 = vector.extract_strided_slice %579 {offsets = [0, 128], sizes = [8, 128], strides = [1, 1]} : vector<8x384xf32> to vector<8x128xf32>
    %591 = arith.addf %589, %590 : vector<8x128xf32>
    %592 = arith.negf %591 : vector<8x128xf32>
    %593 = math.exp %592 : vector<8x128xf32>
    %cst_113 = arith.constant 1.000000e+00 : f32
    %594 = vector.broadcast %cst_113 : f32 to vector<8x128xf32>
    %595 = arith.addf %594, %593 : vector<8x128xf32>
    %596 = arith.divf %594, %595 : vector<8x128xf32>
    %597 = vector.extract_strided_slice %580 {offsets = [0, 256], sizes = [8, 128], strides = [1, 1]} : vector<8x384xf32> to vector<8x128xf32>
    %598 = vector.extract_strided_slice %579 {offsets = [0, 256], sizes = [8, 128], strides = [1, 1]} : vector<8x384xf32> to vector<8x128xf32>
    %599 = arith.addf %598, %546 : vector<8x128xf32>
    %600 = arith.mulf %588, %599 : vector<8x128xf32>
    %601 = arith.addf %597, %600 : vector<8x128xf32>
    %602 = math.tanh %601 : vector<8x128xf32>
    %603 = arith.subf %548, %602 : vector<8x128xf32>
    %604 = arith.mulf %596, %603 : vector<8x128xf32>
    %605 = arith.addf %602, %604 : vector<8x128xf32>
    %606 = arith.subf %605, %548 : vector<8x128xf32>
    %607 = arith.mulf %18, %606 : vector<8x128xf32>
    %608 = arith.addf %548, %607 : vector<8x128xf32>
    %cst_114 = arith.constant dense<0.000000e+00> : vector<8x384xf32>
    %609 = tpu.matmul %578, %539, %cst_114 {dimension_numbers = #tpu.dot_dimension_numbers<[1], [0], [0], [1], [0, 0, 1, 1], [], []>} : vector<8x128xf32>, vector<128x384xf32>, vector<8x384xf32> -> vector<8x384xf32>
    %610 = vector.extract_strided_slice %535 {offsets = [8, 0], sizes = [8, 384], strides = [1, 1]} : vector<64x384xf32> to vector<8x384xf32>
    %611 = vector.extract_strided_slice %610 {offsets = [0, 0], sizes = [8, 128], strides = [1, 1]} : vector<8x384xf32> to vector<8x128xf32>
    %612 = vector.extract_strided_slice %609 {offsets = [0, 0], sizes = [8, 128], strides = [1, 1]} : vector<8x384xf32> to vector<8x128xf32>
    %613 = arith.addf %611, %612 : vector<8x128xf32>
    %614 = arith.negf %613 : vector<8x128xf32>
    %615 = math.exp %614 : vector<8x128xf32>
    %cst_115 = arith.constant 1.000000e+00 : f32
    %616 = vector.broadcast %cst_115 : f32 to vector<8x128xf32>
    %617 = arith.addf %616, %615 : vector<8x128xf32>
    %618 = arith.divf %616, %617 : vector<8x128xf32>
    %619 = vector.extract_strided_slice %610 {offsets = [0, 128], sizes = [8, 128], strides = [1, 1]} : vector<8x384xf32> to vector<8x128xf32>
    %620 = vector.extract_strided_slice %609 {offsets = [0, 128], sizes = [8, 128], strides = [1, 1]} : vector<8x384xf32> to vector<8x128xf32>
    %621 = arith.addf %619, %620 : vector<8x128xf32>
    %622 = arith.negf %621 : vector<8x128xf32>
    %623 = math.exp %622 : vector<8x128xf32>
    %cst_116 = arith.constant 1.000000e+00 : f32
    %624 = vector.broadcast %cst_116 : f32 to vector<8x128xf32>
    %625 = arith.addf %624, %623 : vector<8x128xf32>
    %626 = arith.divf %624, %625 : vector<8x128xf32>
    %627 = vector.extract_strided_slice %610 {offsets = [0, 256], sizes = [8, 128], strides = [1, 1]} : vector<8x384xf32> to vector<8x128xf32>
    %628 = vector.extract_strided_slice %609 {offsets = [0, 256], sizes = [8, 128], strides = [1, 1]} : vector<8x384xf32> to vector<8x128xf32>
    %629 = arith.addf %628, %543 : vector<8x128xf32>
    %630 = arith.mulf %618, %629 : vector<8x128xf32>
    %631 = arith.addf %627, %630 : vector<8x128xf32>
    %632 = math.tanh %631 : vector<8x128xf32>
    %633 = arith.subf %578, %632 : vector<8x128xf32>
    %634 = arith.mulf %626, %633 : vector<8x128xf32>
    %635 = arith.addf %632, %634 : vector<8x128xf32>
    %636 = arith.subf %635, %578 : vector<8x128xf32>
    %637 = arith.mulf %12, %636 : vector<8x128xf32>
    %638 = arith.addf %578, %637 : vector<8x128xf32>
    %cst_117 = arith.constant dense<0.000000e+00> : vector<8x384xf32>
    %639 = tpu.matmul %608, %540, %cst_117 {dimension_numbers = #tpu.dot_dimension_numbers<[1], [0], [0], [1], [0, 0, 1, 1], [], []>} : vector<8x128xf32>, vector<128x384xf32>, vector<8x384xf32> -> vector<8x384xf32>
    %640 = vector.extract_strided_slice %538 {offsets = [48, 0], sizes = [8, 384], strides = [1, 1]} : vector<64x384xf32> to vector<8x384xf32>
    %641 = vector.extract_strided_slice %640 {offsets = [0, 0], sizes = [8, 128], strides = [1, 1]} : vector<8x384xf32> to vector<8x128xf32>
    %642 = vector.extract_strided_slice %639 {offsets = [0, 0], sizes = [8, 128], strides = [1, 1]} : vector<8x384xf32> to vector<8x128xf32>
    %643 = arith.addf %641, %642 : vector<8x128xf32>
    %644 = arith.negf %643 : vector<8x128xf32>
    %645 = math.exp %644 : vector<8x128xf32>
    %cst_118 = arith.constant 1.000000e+00 : f32
    %646 = vector.broadcast %cst_118 : f32 to vector<8x128xf32>
    %647 = arith.addf %646, %645 : vector<8x128xf32>
    %648 = arith.divf %646, %647 : vector<8x128xf32>
    %649 = vector.extract_strided_slice %640 {offsets = [0, 128], sizes = [8, 128], strides = [1, 1]} : vector<8x384xf32> to vector<8x128xf32>
    %650 = vector.extract_strided_slice %639 {offsets = [0, 128], sizes = [8, 128], strides = [1, 1]} : vector<8x384xf32> to vector<8x128xf32>
    %651 = arith.addf %649, %650 : vector<8x128xf32>
    %652 = arith.negf %651 : vector<8x128xf32>
    %653 = math.exp %652 : vector<8x128xf32>
    %cst_119 = arith.constant 1.000000e+00 : f32
    %654 = vector.broadcast %cst_119 : f32 to vector<8x128xf32>
    %655 = arith.addf %654, %653 : vector<8x128xf32>
    %656 = arith.divf %654, %655 : vector<8x128xf32>
    %657 = vector.extract_strided_slice %640 {offsets = [0, 256], sizes = [8, 128], strides = [1, 1]} : vector<8x384xf32> to vector<8x128xf32>
    %658 = vector.extract_strided_slice %639 {offsets = [0, 256], sizes = [8, 128], strides = [1, 1]} : vector<8x384xf32> to vector<8x128xf32>
    %659 = arith.addf %658, %546 : vector<8x128xf32>
    %660 = arith.mulf %648, %659 : vector<8x128xf32>
    %661 = arith.addf %657, %660 : vector<8x128xf32>
    %662 = math.tanh %661 : vector<8x128xf32>
    %663 = arith.subf %608, %662 : vector<8x128xf32>
    %664 = arith.mulf %656, %663 : vector<8x128xf32>
    %665 = arith.addf %662, %664 : vector<8x128xf32>
    %666 = arith.subf %665, %608 : vector<8x128xf32>
    %667 = arith.mulf %17, %666 : vector<8x128xf32>
    %668 = arith.addf %608, %667 : vector<8x128xf32>
    %cst_120 = arith.constant dense<0.000000e+00> : vector<8x384xf32>
    %669 = tpu.matmul %638, %539, %cst_120 {dimension_numbers = #tpu.dot_dimension_numbers<[1], [0], [0], [1], [0, 0, 1, 1], [], []>} : vector<8x128xf32>, vector<128x384xf32>, vector<8x384xf32> -> vector<8x384xf32>
    %670 = vector.extract_strided_slice %535 {offsets = [16, 0], sizes = [8, 384], strides = [1, 1]} : vector<64x384xf32> to vector<8x384xf32>
    %671 = vector.extract_strided_slice %670 {offsets = [0, 0], sizes = [8, 128], strides = [1, 1]} : vector<8x384xf32> to vector<8x128xf32>
    %672 = vector.extract_strided_slice %669 {offsets = [0, 0], sizes = [8, 128], strides = [1, 1]} : vector<8x384xf32> to vector<8x128xf32>
    %673 = arith.addf %671, %672 : vector<8x128xf32>
    %674 = arith.negf %673 : vector<8x128xf32>
    %675 = math.exp %674 : vector<8x128xf32>
    %cst_121 = arith.constant 1.000000e+00 : f32
    %676 = vector.broadcast %cst_121 : f32 to vector<8x128xf32>
    %677 = arith.addf %676, %675 : vector<8x128xf32>
    %678 = arith.divf %676, %677 : vector<8x128xf32>
    %679 = vector.extract_strided_slice %670 {offsets = [0, 128], sizes = [8, 128], strides = [1, 1]} : vector<8x384xf32> to vector<8x128xf32>
    %680 = vector.extract_strided_slice %669 {offsets = [0, 128], sizes = [8, 128], strides = [1, 1]} : vector<8x384xf32> to vector<8x128xf32>
    %681 = arith.addf %679, %680 : vector<8x128xf32>
    %682 = arith.negf %681 : vector<8x128xf32>
    %683 = math.exp %682 : vector<8x128xf32>
    %cst_122 = arith.constant 1.000000e+00 : f32
    %684 = vector.broadcast %cst_122 : f32 to vector<8x128xf32>
    %685 = arith.addf %684, %683 : vector<8x128xf32>
    %686 = arith.divf %684, %685 : vector<8x128xf32>
    %687 = vector.extract_strided_slice %670 {offsets = [0, 256], sizes = [8, 128], strides = [1, 1]} : vector<8x384xf32> to vector<8x128xf32>
    %688 = vector.extract_strided_slice %669 {offsets = [0, 256], sizes = [8, 128], strides = [1, 1]} : vector<8x384xf32> to vector<8x128xf32>
    %689 = arith.addf %688, %543 : vector<8x128xf32>
    %690 = arith.mulf %678, %689 : vector<8x128xf32>
    %691 = arith.addf %687, %690 : vector<8x128xf32>
    %692 = math.tanh %691 : vector<8x128xf32>
    %693 = arith.subf %638, %692 : vector<8x128xf32>
    %694 = arith.mulf %686, %693 : vector<8x128xf32>
    %695 = arith.addf %692, %694 : vector<8x128xf32>
    %696 = arith.subf %695, %638 : vector<8x128xf32>
    %697 = arith.mulf %13, %696 : vector<8x128xf32>
    %698 = arith.addf %638, %697 : vector<8x128xf32>
    %cst_123 = arith.constant dense<0.000000e+00> : vector<8x384xf32>
    %699 = tpu.matmul %668, %540, %cst_123 {dimension_numbers = #tpu.dot_dimension_numbers<[1], [0], [0], [1], [0, 0, 1, 1], [], []>} : vector<8x128xf32>, vector<128x384xf32>, vector<8x384xf32> -> vector<8x384xf32>
    %700 = vector.extract_strided_slice %538 {offsets = [40, 0], sizes = [8, 384], strides = [1, 1]} : vector<64x384xf32> to vector<8x384xf32>
    %701 = vector.extract_strided_slice %700 {offsets = [0, 0], sizes = [8, 128], strides = [1, 1]} : vector<8x384xf32> to vector<8x128xf32>
    %702 = vector.extract_strided_slice %699 {offsets = [0, 0], sizes = [8, 128], strides = [1, 1]} : vector<8x384xf32> to vector<8x128xf32>
    %703 = arith.addf %701, %702 : vector<8x128xf32>
    %704 = arith.negf %703 : vector<8x128xf32>
    %705 = math.exp %704 : vector<8x128xf32>
    %cst_124 = arith.constant 1.000000e+00 : f32
    %706 = vector.broadcast %cst_124 : f32 to vector<8x128xf32>
    %707 = arith.addf %706, %705 : vector<8x128xf32>
    %708 = arith.divf %706, %707 : vector<8x128xf32>
    %709 = vector.extract_strided_slice %700 {offsets = [0, 128], sizes = [8, 128], strides = [1, 1]} : vector<8x384xf32> to vector<8x128xf32>
    %710 = vector.extract_strided_slice %699 {offsets = [0, 128], sizes = [8, 128], strides = [1, 1]} : vector<8x384xf32> to vector<8x128xf32>
    %711 = arith.addf %709, %710 : vector<8x128xf32>
    %712 = arith.negf %711 : vector<8x128xf32>
    %713 = math.exp %712 : vector<8x128xf32>
    %cst_125 = arith.constant 1.000000e+00 : f32
    %714 = vector.broadcast %cst_125 : f32 to vector<8x128xf32>
    %715 = arith.addf %714, %713 : vector<8x128xf32>
    %716 = arith.divf %714, %715 : vector<8x128xf32>
    %717 = vector.extract_strided_slice %700 {offsets = [0, 256], sizes = [8, 128], strides = [1, 1]} : vector<8x384xf32> to vector<8x128xf32>
    %718 = vector.extract_strided_slice %699 {offsets = [0, 256], sizes = [8, 128], strides = [1, 1]} : vector<8x384xf32> to vector<8x128xf32>
    %719 = arith.addf %718, %546 : vector<8x128xf32>
    %720 = arith.mulf %708, %719 : vector<8x128xf32>
    %721 = arith.addf %717, %720 : vector<8x128xf32>
    %722 = math.tanh %721 : vector<8x128xf32>
    %723 = arith.subf %668, %722 : vector<8x128xf32>
    %724 = arith.mulf %716, %723 : vector<8x128xf32>
    %725 = arith.addf %722, %724 : vector<8x128xf32>
    %726 = arith.subf %725, %668 : vector<8x128xf32>
    %727 = arith.mulf %16, %726 : vector<8x128xf32>
    %728 = arith.addf %668, %727 : vector<8x128xf32>
    %cst_126 = arith.constant dense<0.000000e+00> : vector<8x384xf32>
    %729 = tpu.matmul %698, %539, %cst_126 {dimension_numbers = #tpu.dot_dimension_numbers<[1], [0], [0], [1], [0, 0, 1, 1], [], []>} : vector<8x128xf32>, vector<128x384xf32>, vector<8x384xf32> -> vector<8x384xf32>
    %730 = vector.extract_strided_slice %535 {offsets = [24, 0], sizes = [8, 384], strides = [1, 1]} : vector<64x384xf32> to vector<8x384xf32>
    %731 = vector.extract_strided_slice %730 {offsets = [0, 0], sizes = [8, 128], strides = [1, 1]} : vector<8x384xf32> to vector<8x128xf32>
    %732 = vector.extract_strided_slice %729 {offsets = [0, 0], sizes = [8, 128], strides = [1, 1]} : vector<8x384xf32> to vector<8x128xf32>
    %733 = arith.addf %731, %732 : vector<8x128xf32>
    %734 = arith.negf %733 : vector<8x128xf32>
    %735 = math.exp %734 : vector<8x128xf32>
    %cst_127 = arith.constant 1.000000e+00 : f32
    %736 = vector.broadcast %cst_127 : f32 to vector<8x128xf32>
    %737 = arith.addf %736, %735 : vector<8x128xf32>
    %738 = arith.divf %736, %737 : vector<8x128xf32>
    %739 = vector.extract_strided_slice %730 {offsets = [0, 128], sizes = [8, 128], strides = [1, 1]} : vector<8x384xf32> to vector<8x128xf32>
    %740 = vector.extract_strided_slice %729 {offsets = [0, 128], sizes = [8, 128], strides = [1, 1]} : vector<8x384xf32> to vector<8x128xf32>
    %741 = arith.addf %739, %740 : vector<8x128xf32>
    %742 = arith.negf %741 : vector<8x128xf32>
    %743 = math.exp %742 : vector<8x128xf32>
    %cst_128 = arith.constant 1.000000e+00 : f32
    %744 = vector.broadcast %cst_128 : f32 to vector<8x128xf32>
    %745 = arith.addf %744, %743 : vector<8x128xf32>
    %746 = arith.divf %744, %745 : vector<8x128xf32>
    %747 = vector.extract_strided_slice %730 {offsets = [0, 256], sizes = [8, 128], strides = [1, 1]} : vector<8x384xf32> to vector<8x128xf32>
    %748 = vector.extract_strided_slice %729 {offsets = [0, 256], sizes = [8, 128], strides = [1, 1]} : vector<8x384xf32> to vector<8x128xf32>
    %749 = arith.addf %748, %543 : vector<8x128xf32>
    %750 = arith.mulf %738, %749 : vector<8x128xf32>
    %751 = arith.addf %747, %750 : vector<8x128xf32>
    %752 = math.tanh %751 : vector<8x128xf32>
    %753 = arith.subf %698, %752 : vector<8x128xf32>
    %754 = arith.mulf %746, %753 : vector<8x128xf32>
    %755 = arith.addf %752, %754 : vector<8x128xf32>
    %756 = arith.subf %755, %698 : vector<8x128xf32>
    %757 = arith.mulf %14, %756 : vector<8x128xf32>
    %758 = arith.addf %698, %757 : vector<8x128xf32>
    %cst_129 = arith.constant dense<0.000000e+00> : vector<8x384xf32>
    %759 = tpu.matmul %728, %540, %cst_129 {dimension_numbers = #tpu.dot_dimension_numbers<[1], [0], [0], [1], [0, 0, 1, 1], [], []>} : vector<8x128xf32>, vector<128x384xf32>, vector<8x384xf32> -> vector<8x384xf32>
    %760 = vector.extract_strided_slice %538 {offsets = [32, 0], sizes = [8, 384], strides = [1, 1]} : vector<64x384xf32> to vector<8x384xf32>
    %761 = vector.extract_strided_slice %760 {offsets = [0, 0], sizes = [8, 128], strides = [1, 1]} : vector<8x384xf32> to vector<8x128xf32>
    %762 = vector.extract_strided_slice %759 {offsets = [0, 0], sizes = [8, 128], strides = [1, 1]} : vector<8x384xf32> to vector<8x128xf32>
    %763 = arith.addf %761, %762 : vector<8x128xf32>
    %764 = arith.negf %763 : vector<8x128xf32>
    %765 = math.exp %764 : vector<8x128xf32>
    %cst_130 = arith.constant 1.000000e+00 : f32
    %766 = vector.broadcast %cst_130 : f32 to vector<8x128xf32>
    %767 = arith.addf %766, %765 : vector<8x128xf32>
    %768 = arith.divf %766, %767 : vector<8x128xf32>
    %769 = vector.extract_strided_slice %760 {offsets = [0, 128], sizes = [8, 128], strides = [1, 1]} : vector<8x384xf32> to vector<8x128xf32>
    %770 = vector.extract_strided_slice %759 {offsets = [0, 128], sizes = [8, 128], strides = [1, 1]} : vector<8x384xf32> to vector<8x128xf32>
    %771 = arith.addf %769, %770 : vector<8x128xf32>
    %772 = arith.negf %771 : vector<8x128xf32>
    %773 = math.exp %772 : vector<8x128xf32>
    %cst_131 = arith.constant 1.000000e+00 : f32
    %774 = vector.broadcast %cst_131 : f32 to vector<8x128xf32>
    %775 = arith.addf %774, %773 : vector<8x128xf32>
    %776 = arith.divf %774, %775 : vector<8x128xf32>
    %777 = vector.extract_strided_slice %760 {offsets = [0, 256], sizes = [8, 128], strides = [1, 1]} : vector<8x384xf32> to vector<8x128xf32>
    %778 = vector.extract_strided_slice %759 {offsets = [0, 256], sizes = [8, 128], strides = [1, 1]} : vector<8x384xf32> to vector<8x128xf32>
    %779 = arith.addf %778, %546 : vector<8x128xf32>
    %780 = arith.mulf %768, %779 : vector<8x128xf32>
    %781 = arith.addf %777, %780 : vector<8x128xf32>
    %782 = math.tanh %781 : vector<8x128xf32>
    %783 = arith.subf %728, %782 : vector<8x128xf32>
    %784 = arith.mulf %776, %783 : vector<8x128xf32>
    %785 = arith.addf %782, %784 : vector<8x128xf32>
    %786 = arith.subf %785, %728 : vector<8x128xf32>
    %787 = arith.mulf %15, %786 : vector<8x128xf32>
    %788 = arith.addf %728, %787 : vector<8x128xf32>
    %cst_132 = arith.constant dense<0.000000e+00> : vector<8x384xf32>
    %789 = tpu.matmul %758, %539, %cst_132 {dimension_numbers = #tpu.dot_dimension_numbers<[1], [0], [0], [1], [0, 0, 1, 1], [], []>} : vector<8x128xf32>, vector<128x384xf32>, vector<8x384xf32> -> vector<8x384xf32>
    %790 = vector.extract_strided_slice %535 {offsets = [32, 0], sizes = [8, 384], strides = [1, 1]} : vector<64x384xf32> to vector<8x384xf32>
    %791 = vector.extract_strided_slice %790 {offsets = [0, 0], sizes = [8, 128], strides = [1, 1]} : vector<8x384xf32> to vector<8x128xf32>
    %792 = vector.extract_strided_slice %789 {offsets = [0, 0], sizes = [8, 128], strides = [1, 1]} : vector<8x384xf32> to vector<8x128xf32>
    %793 = arith.addf %791, %792 : vector<8x128xf32>
    %794 = arith.negf %793 : vector<8x128xf32>
    %795 = math.exp %794 : vector<8x128xf32>
    %cst_133 = arith.constant 1.000000e+00 : f32
    %796 = vector.broadcast %cst_133 : f32 to vector<8x128xf32>
    %797 = arith.addf %796, %795 : vector<8x128xf32>
    %798 = arith.divf %796, %797 : vector<8x128xf32>
    %799 = vector.extract_strided_slice %790 {offsets = [0, 128], sizes = [8, 128], strides = [1, 1]} : vector<8x384xf32> to vector<8x128xf32>
    %800 = vector.extract_strided_slice %789 {offsets = [0, 128], sizes = [8, 128], strides = [1, 1]} : vector<8x384xf32> to vector<8x128xf32>
    %801 = arith.addf %799, %800 : vector<8x128xf32>
    %802 = arith.negf %801 : vector<8x128xf32>
    %803 = math.exp %802 : vector<8x128xf32>
    %cst_134 = arith.constant 1.000000e+00 : f32
    %804 = vector.broadcast %cst_134 : f32 to vector<8x128xf32>
    %805 = arith.addf %804, %803 : vector<8x128xf32>
    %806 = arith.divf %804, %805 : vector<8x128xf32>
    %807 = vector.extract_strided_slice %790 {offsets = [0, 256], sizes = [8, 128], strides = [1, 1]} : vector<8x384xf32> to vector<8x128xf32>
    %808 = vector.extract_strided_slice %789 {offsets = [0, 256], sizes = [8, 128], strides = [1, 1]} : vector<8x384xf32> to vector<8x128xf32>
    %809 = arith.addf %808, %543 : vector<8x128xf32>
    %810 = arith.mulf %798, %809 : vector<8x128xf32>
    %811 = arith.addf %807, %810 : vector<8x128xf32>
    %812 = math.tanh %811 : vector<8x128xf32>
    %813 = arith.subf %758, %812 : vector<8x128xf32>
    %814 = arith.mulf %806, %813 : vector<8x128xf32>
    %815 = arith.addf %812, %814 : vector<8x128xf32>
    %816 = arith.subf %815, %758 : vector<8x128xf32>
    %817 = arith.mulf %15, %816 : vector<8x128xf32>
    %818 = arith.addf %758, %817 : vector<8x128xf32>
    %cst_135 = arith.constant dense<0.000000e+00> : vector<8x384xf32>
    %819 = tpu.matmul %788, %540, %cst_135 {dimension_numbers = #tpu.dot_dimension_numbers<[1], [0], [0], [1], [0, 0, 1, 1], [], []>} : vector<8x128xf32>, vector<128x384xf32>, vector<8x384xf32> -> vector<8x384xf32>
    %820 = vector.extract_strided_slice %538 {offsets = [24, 0], sizes = [8, 384], strides = [1, 1]} : vector<64x384xf32> to vector<8x384xf32>
    %821 = vector.extract_strided_slice %820 {offsets = [0, 0], sizes = [8, 128], strides = [1, 1]} : vector<8x384xf32> to vector<8x128xf32>
    %822 = vector.extract_strided_slice %819 {offsets = [0, 0], sizes = [8, 128], strides = [1, 1]} : vector<8x384xf32> to vector<8x128xf32>
    %823 = arith.addf %821, %822 : vector<8x128xf32>
    %824 = arith.negf %823 : vector<8x128xf32>
    %825 = math.exp %824 : vector<8x128xf32>
    %cst_136 = arith.constant 1.000000e+00 : f32
    %826 = vector.broadcast %cst_136 : f32 to vector<8x128xf32>
    %827 = arith.addf %826, %825 : vector<8x128xf32>
    %828 = arith.divf %826, %827 : vector<8x128xf32>
    %829 = vector.extract_strided_slice %820 {offsets = [0, 128], sizes = [8, 128], strides = [1, 1]} : vector<8x384xf32> to vector<8x128xf32>
    %830 = vector.extract_strided_slice %819 {offsets = [0, 128], sizes = [8, 128], strides = [1, 1]} : vector<8x384xf32> to vector<8x128xf32>
    %831 = arith.addf %829, %830 : vector<8x128xf32>
    %832 = arith.negf %831 : vector<8x128xf32>
    %833 = math.exp %832 : vector<8x128xf32>
    %cst_137 = arith.constant 1.000000e+00 : f32
    %834 = vector.broadcast %cst_137 : f32 to vector<8x128xf32>
    %835 = arith.addf %834, %833 : vector<8x128xf32>
    %836 = arith.divf %834, %835 : vector<8x128xf32>
    %837 = vector.extract_strided_slice %820 {offsets = [0, 256], sizes = [8, 128], strides = [1, 1]} : vector<8x384xf32> to vector<8x128xf32>
    %838 = vector.extract_strided_slice %819 {offsets = [0, 256], sizes = [8, 128], strides = [1, 1]} : vector<8x384xf32> to vector<8x128xf32>
    %839 = arith.addf %838, %546 : vector<8x128xf32>
    %840 = arith.mulf %828, %839 : vector<8x128xf32>
    %841 = arith.addf %837, %840 : vector<8x128xf32>
    %842 = math.tanh %841 : vector<8x128xf32>
    %843 = arith.subf %788, %842 : vector<8x128xf32>
    %844 = arith.mulf %836, %843 : vector<8x128xf32>
    %845 = arith.addf %842, %844 : vector<8x128xf32>
    %846 = arith.subf %845, %788 : vector<8x128xf32>
    %847 = arith.mulf %14, %846 : vector<8x128xf32>
    %848 = arith.addf %788, %847 : vector<8x128xf32>
    %cst_138 = arith.constant dense<0.000000e+00> : vector<8x384xf32>
    %849 = tpu.matmul %818, %539, %cst_138 {dimension_numbers = #tpu.dot_dimension_numbers<[1], [0], [0], [1], [0, 0, 1, 1], [], []>} : vector<8x128xf32>, vector<128x384xf32>, vector<8x384xf32> -> vector<8x384xf32>
    %850 = vector.extract_strided_slice %535 {offsets = [40, 0], sizes = [8, 384], strides = [1, 1]} : vector<64x384xf32> to vector<8x384xf32>
    %851 = vector.extract_strided_slice %850 {offsets = [0, 0], sizes = [8, 128], strides = [1, 1]} : vector<8x384xf32> to vector<8x128xf32>
    %852 = vector.extract_strided_slice %849 {offsets = [0, 0], sizes = [8, 128], strides = [1, 1]} : vector<8x384xf32> to vector<8x128xf32>
    %853 = arith.addf %851, %852 : vector<8x128xf32>
    %854 = arith.negf %853 : vector<8x128xf32>
    %855 = math.exp %854 : vector<8x128xf32>
    %cst_139 = arith.constant 1.000000e+00 : f32
    %856 = vector.broadcast %cst_139 : f32 to vector<8x128xf32>
    %857 = arith.addf %856, %855 : vector<8x128xf32>
    %858 = arith.divf %856, %857 : vector<8x128xf32>
    %859 = vector.extract_strided_slice %850 {offsets = [0, 128], sizes = [8, 128], strides = [1, 1]} : vector<8x384xf32> to vector<8x128xf32>
    %860 = vector.extract_strided_slice %849 {offsets = [0, 128], sizes = [8, 128], strides = [1, 1]} : vector<8x384xf32> to vector<8x128xf32>
    %861 = arith.addf %859, %860 : vector<8x128xf32>
    %862 = arith.negf %861 : vector<8x128xf32>
    %863 = math.exp %862 : vector<8x128xf32>
    %cst_140 = arith.constant 1.000000e+00 : f32
    %864 = vector.broadcast %cst_140 : f32 to vector<8x128xf32>
    %865 = arith.addf %864, %863 : vector<8x128xf32>
    %866 = arith.divf %864, %865 : vector<8x128xf32>
    %867 = vector.extract_strided_slice %850 {offsets = [0, 256], sizes = [8, 128], strides = [1, 1]} : vector<8x384xf32> to vector<8x128xf32>
    %868 = vector.extract_strided_slice %849 {offsets = [0, 256], sizes = [8, 128], strides = [1, 1]} : vector<8x384xf32> to vector<8x128xf32>
    %869 = arith.addf %868, %543 : vector<8x128xf32>
    %870 = arith.mulf %858, %869 : vector<8x128xf32>
    %871 = arith.addf %867, %870 : vector<8x128xf32>
    %872 = math.tanh %871 : vector<8x128xf32>
    %873 = arith.subf %818, %872 : vector<8x128xf32>
    %874 = arith.mulf %866, %873 : vector<8x128xf32>
    %875 = arith.addf %872, %874 : vector<8x128xf32>
    %876 = arith.subf %875, %818 : vector<8x128xf32>
    %877 = arith.mulf %16, %876 : vector<8x128xf32>
    %878 = arith.addf %818, %877 : vector<8x128xf32>
    %cst_141 = arith.constant dense<0.000000e+00> : vector<8x384xf32>
    %879 = tpu.matmul %848, %540, %cst_141 {dimension_numbers = #tpu.dot_dimension_numbers<[1], [0], [0], [1], [0, 0, 1, 1], [], []>} : vector<8x128xf32>, vector<128x384xf32>, vector<8x384xf32> -> vector<8x384xf32>
    %880 = vector.extract_strided_slice %538 {offsets = [16, 0], sizes = [8, 384], strides = [1, 1]} : vector<64x384xf32> to vector<8x384xf32>
    %881 = vector.extract_strided_slice %880 {offsets = [0, 0], sizes = [8, 128], strides = [1, 1]} : vector<8x384xf32> to vector<8x128xf32>
    %882 = vector.extract_strided_slice %879 {offsets = [0, 0], sizes = [8, 128], strides = [1, 1]} : vector<8x384xf32> to vector<8x128xf32>
    %883 = arith.addf %881, %882 : vector<8x128xf32>
    %884 = arith.negf %883 : vector<8x128xf32>
    %885 = math.exp %884 : vector<8x128xf32>
    %cst_142 = arith.constant 1.000000e+00 : f32
    %886 = vector.broadcast %cst_142 : f32 to vector<8x128xf32>
    %887 = arith.addf %886, %885 : vector<8x128xf32>
    %888 = arith.divf %886, %887 : vector<8x128xf32>
    %889 = vector.extract_strided_slice %880 {offsets = [0, 128], sizes = [8, 128], strides = [1, 1]} : vector<8x384xf32> to vector<8x128xf32>
    %890 = vector.extract_strided_slice %879 {offsets = [0, 128], sizes = [8, 128], strides = [1, 1]} : vector<8x384xf32> to vector<8x128xf32>
    %891 = arith.addf %889, %890 : vector<8x128xf32>
    %892 = arith.negf %891 : vector<8x128xf32>
    %893 = math.exp %892 : vector<8x128xf32>
    %cst_143 = arith.constant 1.000000e+00 : f32
    %894 = vector.broadcast %cst_143 : f32 to vector<8x128xf32>
    %895 = arith.addf %894, %893 : vector<8x128xf32>
    %896 = arith.divf %894, %895 : vector<8x128xf32>
    %897 = vector.extract_strided_slice %880 {offsets = [0, 256], sizes = [8, 128], strides = [1, 1]} : vector<8x384xf32> to vector<8x128xf32>
    %898 = vector.extract_strided_slice %879 {offsets = [0, 256], sizes = [8, 128], strides = [1, 1]} : vector<8x384xf32> to vector<8x128xf32>
    %899 = arith.addf %898, %546 : vector<8x128xf32>
    %900 = arith.mulf %888, %899 : vector<8x128xf32>
    %901 = arith.addf %897, %900 : vector<8x128xf32>
    %902 = math.tanh %901 : vector<8x128xf32>
    %903 = arith.subf %848, %902 : vector<8x128xf32>
    %904 = arith.mulf %896, %903 : vector<8x128xf32>
    %905 = arith.addf %902, %904 : vector<8x128xf32>
    %906 = arith.subf %905, %848 : vector<8x128xf32>
    %907 = arith.mulf %13, %906 : vector<8x128xf32>
    %908 = arith.addf %848, %907 : vector<8x128xf32>
    %cst_144 = arith.constant dense<0.000000e+00> : vector<8x384xf32>
    %909 = tpu.matmul %878, %539, %cst_144 {dimension_numbers = #tpu.dot_dimension_numbers<[1], [0], [0], [1], [0, 0, 1, 1], [], []>} : vector<8x128xf32>, vector<128x384xf32>, vector<8x384xf32> -> vector<8x384xf32>
    %910 = vector.extract_strided_slice %535 {offsets = [48, 0], sizes = [8, 384], strides = [1, 1]} : vector<64x384xf32> to vector<8x384xf32>
    %911 = vector.extract_strided_slice %910 {offsets = [0, 0], sizes = [8, 128], strides = [1, 1]} : vector<8x384xf32> to vector<8x128xf32>
    %912 = vector.extract_strided_slice %909 {offsets = [0, 0], sizes = [8, 128], strides = [1, 1]} : vector<8x384xf32> to vector<8x128xf32>
    %913 = arith.addf %911, %912 : vector<8x128xf32>
    %914 = arith.negf %913 : vector<8x128xf32>
    %915 = math.exp %914 : vector<8x128xf32>
    %cst_145 = arith.constant 1.000000e+00 : f32
    %916 = vector.broadcast %cst_145 : f32 to vector<8x128xf32>
    %917 = arith.addf %916, %915 : vector<8x128xf32>
    %918 = arith.divf %916, %917 : vector<8x128xf32>
    %919 = vector.extract_strided_slice %910 {offsets = [0, 128], sizes = [8, 128], strides = [1, 1]} : vector<8x384xf32> to vector<8x128xf32>
    %920 = vector.extract_strided_slice %909 {offsets = [0, 128], sizes = [8, 128], strides = [1, 1]} : vector<8x384xf32> to vector<8x128xf32>
    %921 = arith.addf %919, %920 : vector<8x128xf32>
    %922 = arith.negf %921 : vector<8x128xf32>
    %923 = math.exp %922 : vector<8x128xf32>
    %cst_146 = arith.constant 1.000000e+00 : f32
    %924 = vector.broadcast %cst_146 : f32 to vector<8x128xf32>
    %925 = arith.addf %924, %923 : vector<8x128xf32>
    %926 = arith.divf %924, %925 : vector<8x128xf32>
    %927 = vector.extract_strided_slice %910 {offsets = [0, 256], sizes = [8, 128], strides = [1, 1]} : vector<8x384xf32> to vector<8x128xf32>
    %928 = vector.extract_strided_slice %909 {offsets = [0, 256], sizes = [8, 128], strides = [1, 1]} : vector<8x384xf32> to vector<8x128xf32>
    %929 = arith.addf %928, %543 : vector<8x128xf32>
    %930 = arith.mulf %918, %929 : vector<8x128xf32>
    %931 = arith.addf %927, %930 : vector<8x128xf32>
    %932 = math.tanh %931 : vector<8x128xf32>
    %933 = arith.subf %878, %932 : vector<8x128xf32>
    %934 = arith.mulf %926, %933 : vector<8x128xf32>
    %935 = arith.addf %932, %934 : vector<8x128xf32>
    %936 = arith.subf %935, %878 : vector<8x128xf32>
    %937 = arith.mulf %17, %936 : vector<8x128xf32>
    %938 = arith.addf %878, %937 : vector<8x128xf32>
    %cst_147 = arith.constant dense<0.000000e+00> : vector<8x384xf32>
    %939 = tpu.matmul %908, %540, %cst_147 {dimension_numbers = #tpu.dot_dimension_numbers<[1], [0], [0], [1], [0, 0, 1, 1], [], []>} : vector<8x128xf32>, vector<128x384xf32>, vector<8x384xf32> -> vector<8x384xf32>
    %940 = vector.extract_strided_slice %538 {offsets = [8, 0], sizes = [8, 384], strides = [1, 1]} : vector<64x384xf32> to vector<8x384xf32>
    %941 = vector.extract_strided_slice %940 {offsets = [0, 0], sizes = [8, 128], strides = [1, 1]} : vector<8x384xf32> to vector<8x128xf32>
    %942 = vector.extract_strided_slice %939 {offsets = [0, 0], sizes = [8, 128], strides = [1, 1]} : vector<8x384xf32> to vector<8x128xf32>
    %943 = arith.addf %941, %942 : vector<8x128xf32>
    %944 = arith.negf %943 : vector<8x128xf32>
    %945 = math.exp %944 : vector<8x128xf32>
    %cst_148 = arith.constant 1.000000e+00 : f32
    %946 = vector.broadcast %cst_148 : f32 to vector<8x128xf32>
    %947 = arith.addf %946, %945 : vector<8x128xf32>
    %948 = arith.divf %946, %947 : vector<8x128xf32>
    %949 = vector.extract_strided_slice %940 {offsets = [0, 128], sizes = [8, 128], strides = [1, 1]} : vector<8x384xf32> to vector<8x128xf32>
    %950 = vector.extract_strided_slice %939 {offsets = [0, 128], sizes = [8, 128], strides = [1, 1]} : vector<8x384xf32> to vector<8x128xf32>
    %951 = arith.addf %949, %950 : vector<8x128xf32>
    %952 = arith.negf %951 : vector<8x128xf32>
    %953 = math.exp %952 : vector<8x128xf32>
    %cst_149 = arith.constant 1.000000e+00 : f32
    %954 = vector.broadcast %cst_149 : f32 to vector<8x128xf32>
    %955 = arith.addf %954, %953 : vector<8x128xf32>
    %956 = arith.divf %954, %955 : vector<8x128xf32>
    %957 = vector.extract_strided_slice %940 {offsets = [0, 256], sizes = [8, 128], strides = [1, 1]} : vector<8x384xf32> to vector<8x128xf32>
    %958 = vector.extract_strided_slice %939 {offsets = [0, 256], sizes = [8, 128], strides = [1, 1]} : vector<8x384xf32> to vector<8x128xf32>
    %959 = arith.addf %958, %546 : vector<8x128xf32>
    %960 = arith.mulf %948, %959 : vector<8x128xf32>
    %961 = arith.addf %957, %960 : vector<8x128xf32>
    %962 = math.tanh %961 : vector<8x128xf32>
    %963 = arith.subf %908, %962 : vector<8x128xf32>
    %964 = arith.mulf %956, %963 : vector<8x128xf32>
    %965 = arith.addf %962, %964 : vector<8x128xf32>
    %966 = arith.subf %965, %908 : vector<8x128xf32>
    %967 = arith.mulf %12, %966 : vector<8x128xf32>
    %968 = arith.addf %908, %967 : vector<8x128xf32>
    %cst_150 = arith.constant dense<0.000000e+00> : vector<8x384xf32>
    %969 = tpu.matmul %938, %539, %cst_150 {dimension_numbers = #tpu.dot_dimension_numbers<[1], [0], [0], [1], [0, 0, 1, 1], [], []>} : vector<8x128xf32>, vector<128x384xf32>, vector<8x384xf32> -> vector<8x384xf32>
    %970 = vector.extract_strided_slice %535 {offsets = [56, 0], sizes = [8, 384], strides = [1, 1]} : vector<64x384xf32> to vector<8x384xf32>
    %971 = vector.extract_strided_slice %970 {offsets = [0, 0], sizes = [8, 128], strides = [1, 1]} : vector<8x384xf32> to vector<8x128xf32>
    %972 = vector.extract_strided_slice %969 {offsets = [0, 0], sizes = [8, 128], strides = [1, 1]} : vector<8x384xf32> to vector<8x128xf32>
    %973 = arith.addf %971, %972 : vector<8x128xf32>
    %974 = arith.negf %973 : vector<8x128xf32>
    %975 = math.exp %974 : vector<8x128xf32>
    %cst_151 = arith.constant 1.000000e+00 : f32
    %976 = vector.broadcast %cst_151 : f32 to vector<8x128xf32>
    %977 = arith.addf %976, %975 : vector<8x128xf32>
    %978 = arith.divf %976, %977 : vector<8x128xf32>
    %979 = vector.extract_strided_slice %970 {offsets = [0, 128], sizes = [8, 128], strides = [1, 1]} : vector<8x384xf32> to vector<8x128xf32>
    %980 = vector.extract_strided_slice %969 {offsets = [0, 128], sizes = [8, 128], strides = [1, 1]} : vector<8x384xf32> to vector<8x128xf32>
    %981 = arith.addf %979, %980 : vector<8x128xf32>
    %982 = arith.negf %981 : vector<8x128xf32>
    %983 = math.exp %982 : vector<8x128xf32>
    %cst_152 = arith.constant 1.000000e+00 : f32
    %984 = vector.broadcast %cst_152 : f32 to vector<8x128xf32>
    %985 = arith.addf %984, %983 : vector<8x128xf32>
    %986 = arith.divf %984, %985 : vector<8x128xf32>
    %987 = vector.extract_strided_slice %970 {offsets = [0, 256], sizes = [8, 128], strides = [1, 1]} : vector<8x384xf32> to vector<8x128xf32>
    %988 = vector.extract_strided_slice %969 {offsets = [0, 256], sizes = [8, 128], strides = [1, 1]} : vector<8x384xf32> to vector<8x128xf32>
    %989 = arith.addf %988, %543 : vector<8x128xf32>
    %990 = arith.mulf %978, %989 : vector<8x128xf32>
    %991 = arith.addf %987, %990 : vector<8x128xf32>
    %992 = math.tanh %991 : vector<8x128xf32>
    %993 = arith.subf %938, %992 : vector<8x128xf32>
    %994 = arith.mulf %986, %993 : vector<8x128xf32>
    %995 = arith.addf %992, %994 : vector<8x128xf32>
    %996 = arith.subf %995, %938 : vector<8x128xf32>
    %997 = arith.mulf %18, %996 : vector<8x128xf32>
    %998 = arith.addf %938, %997 : vector<8x128xf32>
    %cst_153 = arith.constant dense<0.000000e+00> : vector<8x384xf32>
    %999 = tpu.matmul %968, %540, %cst_153 {dimension_numbers = #tpu.dot_dimension_numbers<[1], [0], [0], [1], [0, 0, 1, 1], [], []>} : vector<8x128xf32>, vector<128x384xf32>, vector<8x384xf32> -> vector<8x384xf32>
    %1000 = vector.extract_strided_slice %538 {offsets = [0, 0], sizes = [8, 384], strides = [1, 1]} : vector<64x384xf32> to vector<8x384xf32>
    %1001 = vector.extract_strided_slice %1000 {offsets = [0, 0], sizes = [8, 128], strides = [1, 1]} : vector<8x384xf32> to vector<8x128xf32>
    %1002 = vector.extract_strided_slice %999 {offsets = [0, 0], sizes = [8, 128], strides = [1, 1]} : vector<8x384xf32> to vector<8x128xf32>
    %1003 = arith.addf %1001, %1002 : vector<8x128xf32>
    %1004 = arith.negf %1003 : vector<8x128xf32>
    %1005 = math.exp %1004 : vector<8x128xf32>
    %cst_154 = arith.constant 1.000000e+00 : f32
    %1006 = vector.broadcast %cst_154 : f32 to vector<8x128xf32>
    %1007 = arith.addf %1006, %1005 : vector<8x128xf32>
    %1008 = arith.divf %1006, %1007 : vector<8x128xf32>
    %1009 = vector.extract_strided_slice %1000 {offsets = [0, 128], sizes = [8, 128], strides = [1, 1]} : vector<8x384xf32> to vector<8x128xf32>
    %1010 = vector.extract_strided_slice %999 {offsets = [0, 128], sizes = [8, 128], strides = [1, 1]} : vector<8x384xf32> to vector<8x128xf32>
    %1011 = arith.addf %1009, %1010 : vector<8x128xf32>
    %1012 = arith.negf %1011 : vector<8x128xf32>
    %1013 = math.exp %1012 : vector<8x128xf32>
    %cst_155 = arith.constant 1.000000e+00 : f32
    %1014 = vector.broadcast %cst_155 : f32 to vector<8x128xf32>
    %1015 = arith.addf %1014, %1013 : vector<8x128xf32>
    %1016 = arith.divf %1014, %1015 : vector<8x128xf32>
    %1017 = vector.extract_strided_slice %1000 {offsets = [0, 256], sizes = [8, 128], strides = [1, 1]} : vector<8x384xf32> to vector<8x128xf32>
    %1018 = vector.extract_strided_slice %999 {offsets = [0, 256], sizes = [8, 128], strides = [1, 1]} : vector<8x384xf32> to vector<8x128xf32>
    %1019 = arith.addf %1018, %546 : vector<8x128xf32>
    %1020 = arith.mulf %1008, %1019 : vector<8x128xf32>
    %1021 = arith.addf %1017, %1020 : vector<8x128xf32>
    %1022 = math.tanh %1021 : vector<8x128xf32>
    %1023 = arith.subf %968, %1022 : vector<8x128xf32>
    %1024 = arith.mulf %1016, %1023 : vector<8x128xf32>
    %1025 = arith.addf %1022, %1024 : vector<8x128xf32>
    %1026 = arith.subf %1025, %968 : vector<8x128xf32>
    %1027 = arith.mulf %11, %1026 : vector<8x128xf32>
    %1028 = arith.addf %968, %1027 : vector<8x128xf32>
    %c0_156 = arith.constant 0 : index
    %c0_157 = arith.constant 0 : index
    %1029 = vector.load %arg21[%c0_156, %c0_157] : memref<128x128xf32, #tpu.memory_space<vmem>>, vector<128x128xf32>
    %cst_158 = arith.constant dense<0.000000e+00> : vector<8x128xf32>
    %1030 = tpu.matmul %998, %1029, %cst_158 {dimension_numbers = #tpu.dot_dimension_numbers<[1], [0], [0], [1], [0, 0, 1, 1], [], []>} : vector<8x128xf32>, vector<128x128xf32>, vector<8x128xf32> -> vector<8x128xf32>
    %c0_159 = arith.constant 0 : index
    %c0_160 = arith.constant 0 : index
    %1031 = vector.load %arg22[%c0_159, %c0_160] : memref<128x128xf32, #tpu.memory_space<vmem>>, vector<128x128xf32>
    %cst_161 = arith.constant dense<0.000000e+00> : vector<8x128xf32>
    %1032 = tpu.matmul %1028, %1031, %cst_161 {dimension_numbers = #tpu.dot_dimension_numbers<[1], [0], [0], [1], [0, 0, 1, 1], [], []>} : vector<8x128xf32>, vector<128x128xf32>, vector<8x128xf32> -> vector<8x128xf32>
    %1033 = arith.addf %1030, %1032 : vector<8x128xf32>
    %c0_162 = arith.constant 0 : index
    %c0_163 = arith.constant 0 : index
    %1034 = vector.load %arg23[%c0_162, %c0_163] : memref<1x128xf32, #tpu.memory_space<vmem>>, vector<1x128xf32>
    %1035 = vector.broadcast %1034 : vector<1x128xf32> to vector<8x128xf32>
    %1036 = arith.addf %1033, %1035 : vector<8x128xf32>
    %c0_164 = arith.constant 0 : index
    %c0_165 = arith.constant 0 : index
    %1037 = vector.load %arg24[%c0_164, %c0_165] : memref<8x128xf32, #tpu.memory_space<vmem>>, vector<8x128xf32>
    tpu.vector_store %arg24[%c0_164, %c0_165], %1036 {strides = array<i32>} : memref<8x128xf32, #tpu.memory_space<vmem>>, vector<8x128xf32>,
    return
  }
}

</mosaic_0001>

<bundles_post_ra>
// kernel: relation_encoder_forward.1
= control target key start
LH: loop header
LB: loop body
LE: loop exit
PB: predicated region body
PF: predicated region fallthrough
CT: control target
= control target key end

     0   :  { %s16097_s0 = inlined_call_operand.vmem [shape: s32[64,1], index: 0, kind: input, shape index: {}]   ;;  %s16098_s1 = inlined_call_operand.vmem [shape: f32[64,128], index: 1, kind: input, shape index: {}]   ;;  %s16099_s2 = inlined_call_operand.hbm [shape: bf16[128,128], index: 2, kind: input, shape index: {}]   ;;  %s16100_s3 = inlined_call_operand.vmem [shape: bf16[128,384], index: 3, kind: input, shape index: {}]   ;;  %s16101_s4 = inlined_call_operand.hbm [shape: f32[128,384], index: 4, kind: input, shape index: {}]   ;;  %s16102_s5 = inlined_call_operand.vmem [shape: f32[1,384], index: 5, kind: input, shape index: {}]   ;;  %s16103_s6 = inlined_call_operand.hbm [shape: f32[1,128], index: 6, kind: input, shape index: {}]   ;;  %s16104_s7 = inlined_call_operand.hbm [shape: bf16[128,384], index: 7, kind: input, shape index: {}]   ;;  %s16105_s8 = inlined_call_operand.hbm [shape: f32[128,384], index: 8, kind: input, shape index: {}]   ;;  %s16106_s9 = inlined_call_operand.vmem [shape: f32[1,384], index: 9, kind: input, shape index: {}]   ;;  %s16107_s10 = inlined_call_operand.hbm [shape: f32[1,128], index: 10, kind: input, shape index: {}]   ;;  %s16108_s11 = inlined_call_operand.hbm [shape: bf16[128,384], index: 11, kind: input, shape index: {}]   ;;  %s16109_s12 = inlined_call_operand.hbm [shape: bf16[128,384], index: 12, kind: input, shape index: {}]   ;;  %s16110_s13 = inlined_call_operand.hbm [shape: f32[128,384], index: 13, kind: input, shape index: {}]   ;;  %s16111_s14 = inlined_call_operand.vmem [shape: f32[1,384], index: 14, kind: input, shape index: {}]   ;;  %s16112_s15 = inlined_call_operand.vmem [shape: f32[1,128], index: 15, kind: input, shape index: {}]   ;;  %s16113_s16 = inlined_call_operand.hbm [shape: bf16[128,384], index: 16, kind: input, shape index: {}]   ;;  %s16114_s17 = inlined_call_operand.hbm [shape: bf16[128,384], index: 17, kind: input, shape index: {}]   ;;  %s16115_s18 = inlined_call_operand.hbm [shape: f32[128,384], index: 18, kind: input, shape index: {}]   ;;  %s16116_s19 = inlined_call_operand.hbm [shape: f32[1,384], index: 19, kind: input, shape index: {}]   ;;  %s16117_s20 = inlined_call_operand.hbm [shape: f32[1,128], index: 20, kind: input, shape index: {}]   ;;  %s16118_s21 = inlined_call_operand.hbm [shape: f32[128,128], index: 21, kind: input, shape index: {}]   ;;  %s16119_s22 = inlined_call_operand.hbm [shape: f32[128,128], index: 22, kind: input, shape index: {}]   ;;  %s16120_s23 = inlined_call_operand.vmem [shape: f32[1,128], index: 23, kind: input, shape index: {}]   ;;  %s16121_s24 = inlined_call_operand.hbm [shape: f32[8,128], index: 24, kind: output, shape index: {}]  }
   0x1   :  { %16213 = sst [smem:[#allocation97_spill]] %s16097_s0 }
   0x2   :  { %16214 = sst [smem:[#allocation98_spill]] %s16098_s1 }
   0x3   :  { %16215 = sst [smem:[#allocation99_spill]] %s16099_s2 }
   0x4   :  { %16216 = sst [smem:[#allocation100_spill]] %s16100_s3 }
   0x5   :  { %16217 = sst [smem:[#allocation101_spill]] %s16101_s4 }
   0x6   :  { %16218 = sst [smem:[#allocation102_spill]] %s16102_s5 }
   0x7   :  { %16219 = sst [smem:[#allocation103_spill]] %s16103_s6 }
   0x8   :  { %16220 = sst [smem:[#allocation104_spill]] %s16104_s7 }
   0x9   :  { %16221 = sst [smem:[#allocation105_spill]] %s16105_s8 }
   0xa   :  { %16222 = sst [smem:[#allocation106_spill]] %s16120_s23 }
   0xb   :  { %16223 = sst [smem:[#allocation107_spill]] %s16121_s24 }
   0xc   :  { %29 = vsyncpa [#allocation3], 0 }
   0xd   :  { %30 = vsyncpa [#allocation6], 0 }
   0xe   :  { %31 = vsyncpa [#allocation9], 0 }
   0xf   :  { %32 = vsyncpa [#allocation12], 0 }
  0x10   :  { %33 = vsyncpa [#allocation15], 0 }
  0x11   :  { %34 = vsyncpa [#allocation18], 0 }
  0x12   :  { %35 = vsyncpa [#allocation21], 0 }
  0x13   :  { %36 = vsyncpa [#allocation24], 0 }
  0x14   :  { %37 = vsyncpa [#allocation27], 0 }
  0x15   :  { %38 = vsyncpa [#allocation4], 0  ;;  %s13341_s5 = smov [#allocation5]   ;;  %s16224_s6 = sld [smem:[#allocation101_spill]] }
  0x16   :  { %s62_s26 = sshll.u32 %s13341_s5, 4  ;;  %s63_s26 = int_to_ptr.vmem [resolvable:$true] %s62_s26 }
  0x1b   :  { %s12947_s2 = scalar_lea.hbm %s16224_s6, 6144 }
  0x1c   :  { %p12948_p0 = scmp.ne.s32.totalorder %s16224_s6, %s12947_s2  ;;  %p12951_p1 = scmp.lt.u32.totalorder %s12947_s2, %s16224_s6 }
  0x1e   :  { %p12953_p2 = pnand %p12951_p1, %p12948_p0 }
  0x20   :  { %12956 = shalt.err (!%p12953_p2)
}
  0x21   :  { %s12957_s3 = scalar_lea.vmem %s63_s26, 6144  ;;  %p12962_p4 = scmp.lt.s32.totalorder %s63_s26, %s63_s26 }
  0x22   :  { %p12958_p3 = scmp.ne.s32.totalorder %s63_s26, %s12957_s3  ;;  %p12963_p5 = scmp.lt.s32.totalorder %s12957_s3, %s12957_s3 }
  0x24   :  { %p12964_p6 = por %p12963_p5, %p12962_p4 }
  0x26   :  { %p12965_p7 = pnand %p12964_p6, %p12958_p3 }
  0x28   :  { %12968 = shalt.err (!%p12965_p7)
}
  0x29   :  { %s16131_s25 = smov 384   ;;  %s16133_s8 = smov 24  }
  0x2a   :  { %68 = dma.hbm_to_vmem [thread:$0]  %s16224_s6, 6144, %s63_s26, [#allocation6], %s16131_s25, %s16131_s25, %s16133_s8  }
  0x2b   :  { %s13344_s5 = smov [#allocation8]   ;;  %s16225_s29 = sld [smem:[#allocation104_spill]] }
  0x2c   :  { %s86_s27 = sshll.u32 %s13344_s5, 4  ;;  %s87_s27 = int_to_ptr.vmem [resolvable:$true] %s86_s27 }
  0x31   :  { %s12969_s0 = scalar_lea.hbm %s16225_s29, 3072 }
  0x32   :  { %p12970_p8 = scmp.ne.s32.totalorder %s16225_s29, %s12969_s0  ;;  %p12973_p9 = scmp.lt.u32.totalorder %s12969_s0, %s16225_s29 }
  0x34   :  { %p12975_p10 = pnand %p12973_p9, %p12970_p8 }
  0x36   :  { %12978 = shalt.err (!%p12975_p10)
}
  0x37   :  { %s12979_s23 = scalar_lea.vmem %s87_s27, 3072  ;;  %p12984_p12 = scmp.lt.s32.totalorder %s87_s27, %s87_s27 }
  0x38   :  { %p12980_p11 = scmp.ne.s32.totalorder %s87_s27, %s12979_s23  ;;  %p12985_p13 = scmp.lt.s32.totalorder %s12979_s23, %s12979_s23 }
  0x3a   :  { %p12986_p0 = por %p12985_p13, %p12984_p12 }
  0x3c   :  { %p12987_p1 = pnand %p12986_p0, %p12980_p11 }
  0x3e   :  { %12990 = shalt.err (!%p12987_p1)
}
  0x3f   :  { %s13345_s26 = smov 192   ;;  %s13346_s6 = smov 12  }
  0x40   :  { %92 = dma.hbm_to_vmem [thread:$0]  %s16225_s29, 3072, %s87_s27, [#allocation9], %s13345_s26, %s13345_s26, %s13346_s6  }
  0x41   :  { %s13347_s24 = smov [#allocation11]   ;;  %s13348_s28 = smov [#allocation14]  }
  0x42   :  { %s113_s5 = sshll.u32 %s13347_s24, 4  ;;  %s134_s2 = sshll.u32 %s13348_s28, 4  ;;  %s114_s5 = int_to_ptr.vmem [resolvable:$true] %s113_s5  ;;  %s13526_s2 = int_to_ptr.vmem [resolvable:$true] %s134_s2 }
  0x43   :  { %s12991_s7 = scalar_lea.hbm %s16107_s10, 16 }
  0x44   :  { %p12992_p2 = scmp.ne.s32.totalorder %s16107_s10, %s12991_s7  ;;  %p12995_p3 = scmp.lt.u32.totalorder %s12991_s7, %s16107_s10 }
  0x46   :  { %p12997_p4 = pnand %p12995_p3, %p12992_p2 }
  0x48   :  { %13000 = shalt.err (!%p12997_p4)
}
  0x49   :  { %s13001_s27 = scalar_lea.vmem %s114_s5, 16  ;;  %s13005_s29 = scalar_lea.vmem %s114_s5, 32 }
  0x4a   :  { %p13002_p5 = scmp.ne.s32.totalorder %s114_s5, %s13001_s27  ;;  %p13006_p6 = scmp.lt.s32.totalorder %s114_s5, %s114_s5 }
  0x4b   :  { %p13007_p7 = scmp.lt.s32.totalorder %s13005_s29, %s13001_s27 }
  0x4d   :  { %p13008_p8 = por %p13007_p7, %p13006_p6 }
  0x4f   :  { %p13009_p9 = pnand %p13008_p8, %p13002_p5 }
  0x51   :  { %13012 = shalt.err (!%p13009_p9)
}
  0x52   :  { %116 = dma.hbm_to_vmem [thread:$0]  %s16107_s10, 16, %s114_s5, [#allocation12]  }
  0x53   :  { %s13013_s23 = scalar_lea.hbm %s16109_s12, 3072 }
  0x54   :  { %p13014_p10 = scmp.ne.s32.totalorder %s16109_s12, %s13013_s23  ;;  %p13017_p11 = scmp.lt.u32.totalorder %s13013_s23, %s16109_s12 }
  0x56   :  { %p13019_p12 = pnand %p13017_p11, %p13014_p10 }
  0x58   :  { %13022 = shalt.err (!%p13019_p12)
}
  0x59   :  { %s13023_s30 = scalar_lea.vmem %s13526_s2, 3072  ;;  %p13028_p0 = scmp.lt.s32.totalorder %s13526_s2, %s13526_s2 }
  0x5a   :  { %p13024_p13 = scmp.ne.s32.totalorder %s13526_s2, %s13023_s30  ;;  %p13029_p1 = scmp.lt.s32.totalorder %s13023_s30, %s13023_s30 }
  0x5c   :  { %p13030_p2 = por %p13029_p1, %p13028_p0 }
  0x5e   :  { %p13031_p3 = pnand %p13030_p2, %p13024_p13 }
  0x60   :  { %13034 = shalt.err (!%p13031_p3)
}
  0x61   :  { %140 = dma.hbm_to_vmem [thread:$0]  %s16109_s12, 3072, %s13526_s2, [#allocation15], %s13345_s26, %s13345_s26, %s13346_s6  }
  0x62   :  { %s13349_s3 = smov [#allocation17]   ;;  %s13350_s29 = smov [#allocation20]  }
  0x63   :  { %s162_s27 = sshll.u32 %s13349_s3, 4  ;;  %s186_s4 = sshll.u32 %s13350_s29, 4  ;;  %s163_s27 = int_to_ptr.vmem [resolvable:$true] %s162_s27  ;;  %s13560_s4 = int_to_ptr.vmem [resolvable:$true] %s186_s4 }
  0x64   :  { %s13035_s28 = scalar_lea.hbm %s16113_s16, 3072 }
  0x65   :  { %p13036_p4 = scmp.ne.s32.totalorder %s16113_s16, %s13035_s28  ;;  %p13039_p5 = scmp.lt.u32.totalorder %s13035_s28, %s16113_s16 }
  0x67   :  { %p13041_p6 = pnand %p13039_p5, %p13036_p4 }
  0x69   :  { %13044 = shalt.err (!%p13041_p6)
}
  0x6a   :  { %s13045_s12 = scalar_lea.vmem %s163_s27, 3072  ;;  %p13050_p8 = scmp.lt.s32.totalorder %s163_s27, %s163_s27 }
  0x6b   :  { %p13046_p7 = scmp.ne.s32.totalorder %s163_s27, %s13045_s12  ;;  %p13051_p9 = scmp.lt.s32.totalorder %s13045_s12, %s13045_s12 }
  0x6d   :  { %p13052_p10 = por %p13051_p9, %p13050_p8 }
  0x6f   :  { %p13053_p11 = pnand %p13052_p10, %p13046_p7 }
  0x71   :  { %13056 = shalt.err (!%p13053_p11)
}
  0x72   :  { %168 = dma.hbm_to_vmem [thread:$0]  %s16113_s16, 3072, %s163_s27, [#allocation18], %s13345_s26, %s13345_s26, %s13346_s6  }
  0x73   :  { %s13057_s5 = scalar_lea.hbm %s16115_s18, 6144 }
  0x74   :  { %p13058_p12 = scmp.ne.s32.totalorder %s16115_s18, %s13057_s5  ;;  %p13061_p13 = scmp.lt.u32.totalorder %s13057_s5, %s16115_s18 }
  0x76   :  { %p13063_p0 = pnand %p13061_p13, %p13058_p12 }
  0x78   :  { %13066 = shalt.err (!%p13063_p0)
}
  0x79   :  { %s13067_s28 = scalar_lea.vmem %s13560_s4, 6144  ;;  %p13072_p2 = scmp.lt.s32.totalorder %s13560_s4, %s13560_s4 }
  0x7a   :  { %p13068_p1 = scmp.ne.s32.totalorder %s13560_s4, %s13067_s28  ;;  %p13073_p3 = scmp.lt.s32.totalorder %s13067_s28, %s13067_s28 }
  0x7c   :  { %p13074_p4 = por %p13073_p3, %p13072_p2 }
  0x7e   :  { %p13075_p5 = pnand %p13074_p4, %p13068_p1 }
  0x80   :  { %13078 = shalt.err (!%p13075_p5)
}
  0x81   :  { %s16226_s16 = smov 24   ;;  %s16227_s27 = smov 384  }
  0x82   :  { %192 = dma.hbm_to_vmem [thread:$0]  %s16115_s18, 6144, %s13560_s4, [#allocation21], %s16227_s27, %s16227_s27, %s16226_s16  }
  0x83   :  { %s13351_s8 = smov [#allocation23]   ;;  %s13352_s12 = smov [#allocation2]  }
  0x84   :  { %s209_s0 = sshll.u32 %s13351_s8, 4  ;;  %s48_s2 = sshll.u32 %s13352_s12, 4  ;;  %s210_s0 = int_to_ptr.vmem [resolvable:$true] %s209_s0  ;;  %s13597_s2 = int_to_ptr.vmem [resolvable:$true] %s48_s2 }
  0x85   :  { %s13079_s10 = scalar_lea.hbm %s16117_s20, 16 }
  0x86   :  { %p13080_p6 = scmp.ne.s32.totalorder %s16117_s20, %s13079_s10  ;;  %p13083_p7 = scmp.lt.u32.totalorder %s13079_s10, %s16117_s20 }
  0x88   :  { %p13085_p8 = pnand %p13083_p7, %p13080_p6 }
  0x8a   :  { %13088 = shalt.err (!%p13085_p8)
}
  0x8b   :  { %s13089_s18 = scalar_lea.vmem %s210_s0, 16  ;;  %s13093_s4 = scalar_lea.vmem %s210_s0, 32 }
  0x8c   :  { %p13090_p9 = scmp.ne.s32.totalorder %s210_s0, %s13089_s18  ;;  %p13094_p10 = scmp.lt.s32.totalorder %s210_s0, %s210_s0 }
  0x8d   :  { %p13095_p11 = scmp.lt.s32.totalorder %s13093_s4, %s13089_s18 }
  0x8f   :  { %p13096_p12 = por %p13095_p11, %p13094_p10 }
  0x91   :  { %p13097_p13 = pnand %p13096_p12, %p13090_p9 }
  0x93   :  { %13100 = shalt.err (!%p13097_p13)
}
  0x94   :  { %212 = dma.hbm_to_vmem [thread:$0]  %s16117_s20, 16, %s210_s0, [#allocation24]  }
  0x95   :  { %s16228_s8 = sld [smem:[#allocation99_spill]] }
  0x9b   :  { %s13101_s12 = scalar_lea.hbm %s16228_s8, 1024 }
  0x9c   :  { %p13102_p0 = scmp.ne.s32.totalorder %s16228_s8, %s13101_s12  ;;  %p13105_p1 = scmp.lt.u32.totalorder %s13101_s12, %s16228_s8 }
  0x9e   :  { %p13107_p2 = pnand %p13105_p1, %p13102_p0 }
  0xa0   :  { %13110 = shalt.err (!%p13107_p2)
}
  0xa1   :  { %s13111_s3 = scalar_lea.vmem %s13597_s2, 1024  ;;  %p13116_p4 = scmp.lt.s32.totalorder %s13597_s2, %s13597_s2 }
  0xa2   :  { %p13112_p3 = scmp.ne.s32.totalorder %s13597_s2, %s13111_s3  ;;  %p13117_p5 = scmp.lt.s32.totalorder %s13111_s3, %s13111_s3 }
  0xa4   :  { %p13118_p6 = por %p13117_p5, %p13116_p4 }
  0xa6   :  { %p13119_p7 = pnand %p13118_p6, %p13112_p3 }
  0xa8   :  { %13122 = shalt.err (!%p13119_p7)
}
  0xa9   :  { %s13353_s20 = smov 64   ;;  %s13354_s0 = smov 4  }
  0xaa   :  { %54 = dma.hbm_to_vmem [thread:$0]  %s16228_s8, 1024, %s13597_s2, [#allocation3], %s13353_s20, %s13353_s20, %s13354_s0  }
  0xab   :  { %s13355_s18 = smov [#allocation7]   ;;  %s13356_s24 = smov [#allocation10]  }
  0xac   :  { %s77_s4 = sshll.u32 %s13355_s18, 4  ;;  %s98_s28 = sshll.u32 %s13356_s24, 4  ;;  %s78_s4 = int_to_ptr.vmem [resolvable:$true] %s77_s4  ;;  %s13628_s28 = int_to_ptr.vmem [resolvable:$true] %s98_s28 }
  0xad   :  { %s16229_s12 = sld [smem:[#allocation103_spill]] }
  0xb3   :  { %s13123_s7 = scalar_lea.hbm %s16229_s12, 16 }
  0xb4   :  { %p13124_p8 = scmp.ne.s32.totalorder %s16229_s12, %s13123_s7  ;;  %p13127_p9 = scmp.lt.u32.totalorder %s13123_s7, %s16229_s12 }
  0xb6   :  { %p13129_p10 = pnand %p13127_p9, %p13124_p8 }
  0xb8   :  { %13132 = shalt.err (!%p13129_p10)
}
  0xb9   :  { %s13133_s2 = scalar_lea.vmem %s78_s4, 16  ;;  %s13137_s8 = scalar_lea.vmem %s78_s4, 32 }
  0xba   :  { %p13134_p11 = scmp.ne.s32.totalorder %s78_s4, %s13133_s2  ;;  %p13138_p12 = scmp.lt.s32.totalorder %s78_s4, %s78_s4 }
  0xbb   :  { %p13139_p13 = scmp.lt.s32.totalorder %s13137_s8, %s13133_s2 }
  0xbd   :  { %p13140_p0 = por %p13139_p13, %p13138_p12 }
  0xbf   :  { %p13141_p1 = pnand %p13140_p0, %p13134_p11 }
  0xc1   :  { %13144 = shalt.err (!%p13141_p1)
}
  0xc2   :  { %80 = dma.hbm_to_vmem [thread:$0]  %s16229_s12, 16, %s78_s4, [#allocation6]  }
  0xc3   :  { %s16230_s18 = sld [smem:[#allocation105_spill]] }
  0xc9   :  { %s13145_s24 = scalar_lea.hbm %s16230_s18, 6144 }
  0xca   :  { %p13146_p2 = scmp.ne.s32.totalorder %s16230_s18, %s13145_s24  ;;  %p13149_p3 = scmp.lt.u32.totalorder %s13145_s24, %s16230_s18 }
  0xcc   :  { %p13151_p4 = pnand %p13149_p3, %p13146_p2 }
  0xce   :  { %13154 = shalt.err (!%p13151_p4)
}
  0xcf   :  { %s13155_s10 = scalar_lea.vmem %s13628_s28, 6144  ;;  %p13160_p6 = scmp.lt.s32.totalorder %s13628_s28, %s13628_s28 }
  0xd0   :  { %p13156_p5 = scmp.ne.s32.totalorder %s13628_s28, %s13155_s10  ;;  %p13161_p7 = scmp.lt.s32.totalorder %s13155_s10, %s13155_s10 }
  0xd2   :  { %p13162_p8 = por %p13161_p7, %p13160_p6 }
  0xd4   :  { %p13163_p9 = pnand %p13162_p8, %p13156_p5 }
  0xd6   :  { %13166 = shalt.err (!%p13163_p9)
}
  0xd7   :  { %104 = dma.hbm_to_vmem [thread:$0]  %s16230_s18, 6144, %s13628_s28, [#allocation9], %s16227_s27, %s16227_s27, %s16226_s16  }
  0xd8   :  { %s13357_s5 = smov [#allocation13]   ;;  %s13358_s2 = smov [#allocation16]  }
  0xd9   :  { %s122_s3 = sshll.u32 %s13357_s5, 4  ;;  %s146_s8 = sshll.u32 %s13358_s2, 4  ;;  %s123_s3 = int_to_ptr.vmem [resolvable:$true] %s122_s3  ;;  %s13662_s8 = int_to_ptr.vmem [resolvable:$true] %s146_s8 }
  0xda   :  { %s13167_s29 = scalar_lea.hbm %s16108_s11, 3072 }
  0xdb   :  { %p13168_p10 = scmp.ne.s32.totalorder %s16108_s11, %s13167_s29  ;;  %p13171_p11 = scmp.lt.u32.totalorder %s13167_s29, %s16108_s11 }
  0xdd   :  { %p13173_p12 = pnand %p13171_p11, %p13168_p10 }
  0xdf   :  { %13176 = shalt.err (!%p13173_p12)
}
  0xe0   :  { %s13177_s28 = scalar_lea.vmem %s123_s3, 3072  ;;  %p13182_p0 = scmp.lt.s32.totalorder %s123_s3, %s123_s3 }
  0xe1   :  { %p13178_p13 = scmp.ne.s32.totalorder %s123_s3, %s13177_s28  ;;  %p13183_p1 = scmp.lt.s32.totalorder %s13177_s28, %s13177_s28 }
  0xe3   :  { %p13184_p2 = por %p13183_p1, %p13182_p0 }
  0xe5   :  { %p13185_p3 = pnand %p13184_p2, %p13178_p13 }
  0xe7   :  { %13188 = shalt.err (!%p13185_p3)
}
  0xe8   :  { %128 = dma.hbm_to_vmem [thread:$0]  %s16108_s11, 3072, %s123_s3, [#allocation12], %s13345_s26, %s13345_s26, %s13346_s6  }
  0xe9   :  { %s13189_s4 = scalar_lea.hbm %s16110_s13, 6144 }
  0xea   :  { %p13190_p4 = scmp.ne.s32.totalorder %s16110_s13, %s13189_s4  ;;  %p13193_p5 = scmp.lt.u32.totalorder %s13189_s4, %s16110_s13 }
  0xec   :  { %p13195_p6 = pnand %p13193_p5, %p13190_p4 }
  0xee   :  { %13198 = shalt.err (!%p13195_p6)
}
  0xef   :  { %s13199_s0 = scalar_lea.vmem %s13662_s8, 6144  ;;  %p13204_p8 = scmp.lt.s32.totalorder %s13662_s8, %s13662_s8 }
  0xf0   :  { %p13200_p7 = scmp.ne.s32.totalorder %s13662_s8, %s13199_s0  ;;  %p13205_p9 = scmp.lt.s32.totalorder %s13199_s0, %s13199_s0 }
  0xf2   :  { %p13206_p10 = por %p13205_p9, %p13204_p8 }
  0xf4   :  { %p13207_p11 = pnand %p13206_p10, %p13200_p7 }
  0xf6   :  { %13210 = shalt.err (!%p13207_p11)
}
  0xf7   :  { %152 = dma.hbm_to_vmem [thread:$0]  %s16110_s13, 6144, %s13662_s8, [#allocation15], %s16227_s27, %s16227_s27, %s16226_s16  }
  0xf8   :  { %s13359_s29 = smov [#allocation19]   ;;  %s13360_s24 = smov [#allocation22]  }
  0xf9   :  { %s174_s1 = sshll.u32 %s13359_s29, 4  ;;  %s199_s23 = sshll.u32 %s13360_s24, 4  ;;  %s175_s1 = int_to_ptr.vmem [resolvable:$true] %s174_s1  ;;  %s200_s23 = int_to_ptr.vmem [resolvable:$true] %s199_s23 }
  0xfa   :  { %s13211_s18 = scalar_lea.hbm %s16114_s17, 3072 }
  0xfb   :  { %p13212_p12 = scmp.ne.s32.totalorder %s16114_s17, %s13211_s18  ;;  %p13215_p13 = scmp.lt.u32.totalorder %s13211_s18, %s16114_s17 }
  0xfd   :  { %p13217_p0 = pnand %p13215_p13, %p13212_p12 }
  0xff   :  { %13220 = shalt.err (!%p13217_p0)
}
 0x100   :  { %s13221_s13 = scalar_lea.vmem %s175_s1, 3072  ;;  %p13226_p2 = scmp.lt.s32.totalorder %s175_s1, %s175_s1 }
 0x101   :  { %p13222_p1 = scmp.ne.s32.totalorder %s175_s1, %s13221_s13  ;;  %p13227_p3 = scmp.lt.s32.totalorder %s13221_s13, %s13221_s13 }
 0x103   :  { %p13228_p4 = por %p13227_p3, %p13226_p2 }
 0x105   :  { %p13229_p5 = pnand %p13228_p4, %p13222_p1 }
 0x107   :  { %13232 = shalt.err (!%p13229_p5)
}
 0x108   :  { %180 = dma.hbm_to_vmem [thread:$0]  %s16114_s17, 3072, %s175_s1, [#allocation18], %s13345_s26, %s13345_s26, %s13346_s6  }
 0x109   :  { %s13233_s5 = scalar_lea.hbm %s16116_s19, 48 }
 0x10a   :  { %p13234_p6 = scmp.ne.s32.totalorder %s16116_s19, %s13233_s5  ;;  %p13237_p7 = scmp.lt.u32.totalorder %s13233_s5, %s16116_s19 }
 0x10c   :  { %p13239_p8 = pnand %p13237_p7, %p13234_p6 }
 0x10e   :  { %13242 = shalt.err (!%p13239_p8)
}
 0x10f   :  { %s13243_s3 = scalar_lea.vmem %s200_s23, 48  ;;  %s13247_s29 = scalar_lea.vmem %s200_s23, 64 }
 0x110   :  { %p13244_p9 = scmp.ne.s32.totalorder %s200_s23, %s13243_s3  ;;  %p13248_p10 = scmp.lt.s32.totalorder %s200_s23, %s200_s23 }
 0x111   :  { %p13249_p11 = scmp.lt.s32.totalorder %s13247_s29, %s13243_s3 }
 0x113   :  { %p13250_p12 = por %p13249_p11, %p13248_p10 }
 0x115   :  { %p13251_p13 = pnand %p13250_p12, %p13244_p9 }
 0x117   :  { %13254 = shalt.err (!%p13251_p13)
}
 0x118   :  { %202 = dma.hbm_to_vmem [thread:$0]  %s16116_s19, 48, %s200_s23, [#allocation21]  }
 0x119   :  { %s13361_s6 = smov [#allocation25]   ;;  %s13255_s28 = scalar_lea.hbm %s16118_s21, 2048 }
 0x11a   :  { %s218_s1 = sshll.u32 %s13361_s6, 4  ;;  %p13256_p0 = scmp.ne.s32.totalorder %s16118_s21, %s13255_s28  ;;  %s219_s1 = int_to_ptr.vmem [resolvable:$true] %s218_s1 }
 0x11b   :  { %p13259_p1 = scmp.lt.u32.totalorder %s13255_s28, %s16118_s21 }
 0x11d   :  { %p13261_p2 = pnand %p13259_p1, %p13256_p0 }
 0x11f   :  { %13264 = shalt.err (!%p13261_p2)
}
 0x120   :  { %s13265_s4 = scalar_lea.vmem %s219_s1, 2048  ;;  %p13270_p4 = scmp.lt.s32.totalorder %s219_s1, %s219_s1 }
 0x121   :  { %p13266_p3 = scmp.ne.s32.totalorder %s219_s1, %s13265_s4  ;;  %p13271_p5 = scmp.lt.s32.totalorder %s13265_s4, %s13265_s4 }
 0x123   :  { %p13272_p6 = por %p13271_p5, %p13270_p4 }
 0x125   :  { %p13273_p7 = pnand %p13272_p6, %p13266_p3 }
 0x127   :  { %13276 = shalt.err (!%p13273_p7)
}
 0x128   :  { %s13362_s19 = smov 128   ;;  %s13363_s23 = smov 8  }
 0x129   :  { %224 = dma.hbm_to_vmem [thread:$0]  %s16118_s21, 2048, %s219_s1, [#allocation24], %s13362_s19, %s13362_s19, %s13363_s23  }
 0x12a   :  { %s13364_s27 = smov [#allocation26]   ;;  %s13277_s2 = scalar_lea.hbm %s16119_s22, 2048 }
 0x12b   :  { %s230_s8 = sshll.u32 %s13364_s27, 4  ;;  %p13278_p8 = scmp.ne.s32.totalorder %s16119_s22, %s13277_s2  ;;  %s231_s8 = int_to_ptr.vmem [resolvable:$true] %s230_s8 }
 0x12c   :  { %p13281_p9 = scmp.lt.u32.totalorder %s13277_s2, %s16119_s22 }
 0x12e   :  { %p13283_p10 = pnand %p13281_p9, %p13278_p8 }
 0x130   :  { %13286 = shalt.err (!%p13283_p10)
}
 0x131   :  { %s13287_s29 = scalar_lea.vmem %s231_s8, 2048  ;;  %p13292_p12 = scmp.lt.s32.totalorder %s231_s8, %s231_s8 }
 0x132   :  { %p13288_p11 = scmp.ne.s32.totalorder %s231_s8, %s13287_s29  ;;  %p13293_p13 = scmp.lt.s32.totalorder %s13287_s29, %s13287_s29 }
 0x134   :  { %p13294_p0 = por %p13293_p13, %p13292_p12 }
 0x136   :  { %p13295_p1 = pnand %p13294_p0, %p13288_p11 }
 0x138   :  { %13298 = shalt.err (!%p13295_p1)
}
 0x139   :  { %236 = dma.hbm_to_vmem [thread:$0]  %s16119_s22, 2048, %s231_s8, [#allocation27], %s13362_s19, %s13362_s19, %s13363_s23  }
 0x13a   :  { %13321 = dma.done.wait [#allocation3], 1024  }
 0x13b   :  { %13322 = vsyncadd [#allocation3], 4294966272 }
 0x13c   :  { %13323 = dma.done.wait [#allocation6], 6160  }
 0x13d   :  { %13324 = vsyncadd [#allocation6], 4294961136 }
 0x13e   :  { %13325 = dma.done.wait [#allocation9], 9216  }
 0x13f   :  { %13326 = vsyncadd [#allocation9], 4294958080 }
 0x140   :  { %13327 = dma.done.wait [#allocation12], 3088  }
 0x141   :  { %13328 = vsyncadd [#allocation12], 4294964208 }
 0x142   :  { %13329 = dma.done.wait [#allocation15], 9216  }
 0x143   :  { %13330 = vsyncadd [#allocation15], 4294958080 }
 0x144   :  { %13331 = dma.done.wait [#allocation18], 6144  }
 0x145   :  { %13332 = vsyncadd [#allocation18], 4294961152 }
 0x146   :  { %13333 = dma.done.wait [#allocation21], 6192  }
 0x147   :  { %13334 = vsyncadd [#allocation21], 4294961104 }
 0x148   :  { %13335 = dma.done.wait [#allocation24], 2064  }
 0x149   :  { %13336 = vsyncadd [#allocation24], 4294965232 }
 0x14a   :  { %13337 = dma.done.wait [#allocation27], 2048  }
 0x14b   :  { %13338 = vsyncadd [#allocation27], 4294965248  ;;  %v16135_v0 = vmov 0   ;;  %s16231_s6 = sld [smem:[#allocation97_spill]]  ;;  %v12408_v5 = vld [vmem:[#allocation2] sm:$0xff]   ;;  %v12409_v6 = vld [vmem:[#allocation2 + $0x8] sm:$0xff]   ;;  %v296_v32 = vlaneseq }
 0x14c   :  { %12407 = vset.pattern.permute.xlu1 %v16135_v0  ;;  %12406 = vset.pattern.permute.xlu0 %v16135_v0  ;;  %v12410_v10 = vld [vmem:[#allocation2 + $0x10] sm:$0xff]   ;;  %v12411_v12 = vld [vmem:[#allocation2 + $0x18] sm:$0xff]   ;;  %v12412_v13 = vld [vmem:[#allocation2 + $0x20] sm:$0xff]   ;;  %s16232_s5 = sld [smem:[#allocation100_spill]]  ;;  %v13366_v39 = vmov 1.0|1.0  }
 0x14d   :  { %677 = vmatprep.mubr.bf16.mxu1 %v16135_v0  ;;  %9082 = vmatprep.subr.bf16.mxu0 %v12408_v5  ;;  %v12413_v17 = vld [vmem:[#allocation2 + $0x28] sm:$0xff]   ;;  %v12414_v20 = vld [vmem:[#allocation2 + $0x30] sm:$0xff]   ;;  %v12415_v23 = vld [vmem:[#allocation2 + $0x38] sm:$0xff]   ;;  %v297_v35 = vand.u32 127, %v296_v32  ;;  %vm13368_vm12 = vmmov 0   ;;  %s16244_s19 = sld [smem:[#allocation102_spill]] }
 0x14e   :  { %9083 = vmatpush3.bf16.msra.mxu0 %v12408_v5  ;;  %v12450_v52 = vld [vmem:[#allocation8 + $0x4] ss:$12 sps:$4 sm:$0xff]   ;;  %v12451_v53 = vld [vmem:[#allocation8 + $0x8] ss:$12 sps:$4 sm:$0xff]   ;;  %v12448_v59 = vld [vmem:[#allocation8] ss:$12 sps:$4 sm:$0xff]  }
 0x14f   :  { %9084 = vmatprep.subr.bf16.mxu0 %v12409_v6  ;;  %v12454_v61 = vld [vmem:[#allocation8 + $0x1c] ss:$12 sps:$4 sm:$0xff]   ;;  %v12455_v62 = vld [vmem:[#allocation8 + $0x20] ss:$12 sps:$4 sm:$0xff]   ;;  %v12452_v63 = vld [vmem:[#allocation8 + $0x18] ss:$12 sps:$4 sm:$0xff]  }
 0x150   :  { %s16290_s27 = sld [smem:[#allocation98_spill]] }
 0x151   :  { %v290_v1 = vld [vmem:[%s16231_s6 + $0x10] sm:$0xff]  ;;  %v288_v2 = vld [vmem:[%s16231_s6] sm:$0xff]  ;;  %v291_v3 = vld [vmem:[%s16231_s6 + $0x18] sm:$0xff]  ;;  %s16580_s4 = sld [smem:[#allocation106_spill]] }
 0x152   :  { %305 = vperm.xlu1 %12407, %v290_v1   ;;  %299 = vperm.xlu0 %12406, %v288_v2   ;;  %v289_v4 = vld [vmem:[%s16231_s6 + $0x8] sm:$0xff]  ;;  %v292_v8 = vld [vmem:[%s16231_s6 + $0x20] sm:$0xff]  ;;  %v295_v9 = vld [vmem:[%s16231_s6 + $0x38] sm:$0xff] }
 0x153   :  { %v293_v7 = vld [vmem:[%s16231_s6 + $0x28] sm:$0xff]  ;;  %v294_v11 = vld [vmem:[%s16231_s6 + $0x30] sm:$0xff]  ;;  %9085 = vmatpush3.bf16.msra.mxu0 %v12409_v6  ;;  %v12422_v18 = vld [vmem:[%s16232_s5 + $0x18] ss:$12 sps:$4 sm:$0xff]  }
 0x154   :  { %9086 = vmatprep.subr.bf16.mxu0 %v12410_v10  ;;  %v12416_v14 = vld [vmem:[%s16232_s5 + $0x4] ss:$12 sps:$4 sm:$0xff]   ;;  %v12418_v15 = vld [vmem:[%s16232_s5] ss:$12 sps:$4 sm:$0xff]   ;;  %v12420_v16 = vld [vmem:[%s16232_s5 + $0x1c] ss:$12 sps:$4 sm:$0xff]  }
 0x155   :  { %645 = vmatprep.subr.bf16.mxu1 %v12416_v14  ;;  %v12424_v19 = vld [vmem:[%s16232_s5 + $0x34] ss:$12 sps:$4 sm:$0xff]   ;;  %v12426_v21 = vld [vmem:[%s16232_s5 + $0x30] ss:$12 sps:$4 sm:$0xff]   ;;  %v12428_v22 = vld [vmem:[%s16232_s5 + $0x4c] ss:$12 sps:$4 sm:$0xff]  }
 0x156   :  { %308 = vperm.xlu1 %12407, %v291_v3   ;;  %302 = vperm.xlu0 %12406, %v289_v4   ;;  %v12430_v24 = vld [vmem:[%s16232_s5 + $0x48] ss:$12 sps:$4 sm:$0xff]   ;;  %v12432_v25 = vld [vmem:[%s16232_s5 + $0x64] ss:$12 sps:$4 sm:$0xff]   ;;  %v12434_v27 = vld [vmem:[%s16232_s5 + $0x60] ss:$12 sps:$4 sm:$0xff]  }
 0x157   :  { %9087 = vmatpush3.bf16.msra.mxu0 %v12410_v10  ;;  %646 = vmatpush1.bf16.msra.mxu1 %v12418_v15  ;;  %v12419_v26 = vld [vmem:[%s16232_s5 + $0x8] ss:$12 sps:$4 sm:$0xff]   ;;  %v12438_v29 = vld [vmem:[%s16232_s5 + $0x78] ss:$12 sps:$4 sm:$0xff]   ;;  %v12442_v31 = vld [vmem:[%s16232_s5 + $0x90] ss:$12 sps:$4 sm:$0xff]  }
 0x158   :  { %9088 = vmatprep.subr.bf16.mxu0 %v12411_v12  ;;  %647 = vmatprep.subr.bf16.mxu1 %v12420_v16  ;;  %v12436_v28 = vld [vmem:[%s16232_s5 + $0x7c] ss:$12 sps:$4 sm:$0xff]   ;;  %v12440_v30 = vld [vmem:[%s16232_s5 + $0x94] ss:$12 sps:$4 sm:$0xff]   ;;  %v12427_v42 = vld [vmem:[%s16232_s5 + $0x38] ss:$12 sps:$4 sm:$0xff]  }
 0x159   :  { %v12423_v38 = vld [vmem:[%s16232_s5 + $0x20] ss:$12 sps:$4 sm:$0xff]   ;;  %v12431_v45 = vld [vmem:[%s16232_s5 + $0x50] ss:$12 sps:$4 sm:$0xff]   ;;  %v12435_v46 = vld [vmem:[%s16232_s5 + $0x68] ss:$12 sps:$4 sm:$0xff]  }
 0x15a   :  { %314 = vperm.xlu1 %12407, %v293_v7   ;;  %311 = vperm.xlu0 %12406, %v292_v8   ;;  %v12439_v47 = vld [vmem:[%s16232_s5 + $0x80] ss:$12 sps:$4 sm:$0xff]   ;;  %v12443_v48 = vld [vmem:[%s16232_s5 + $0x98] ss:$12 sps:$4 sm:$0xff]   ;;  %v12446_v50 = vld [vmem:[%s16232_s5 + $0xa8] ss:$12 sps:$4 sm:$0xff]  }
 0x15b   :  { %9089 = vmatpush3.bf16.msra.mxu0 %v12411_v12  ;;  %648 = vmatpush1.bf16.msra.mxu1 %v12422_v18  ;;  %v12444_v49 = vld [vmem:[%s16232_s5 + $0xac] ss:$12 sps:$4 sm:$0xff]   ;;  %v12447_v51 = vld [vmem:[%s16232_s5 + $0xb0] ss:$12 sps:$4 sm:$0xff]  }
 0x15c   :  { %9090 = vmatprep.subr.bf16.mxu0 %v12412_v13  ;;  %649 = vmatprep.subr.bf16.mxu1 %v12424_v19  ;;  %v12458_v2 = vld [vmem:[#allocation8 + $0x34] ss:$12 sps:$4 sm:$0xff]   ;;  %v12459_v4 = vld [vmem:[#allocation8 + $0x38] ss:$12 sps:$4 sm:$0xff]   ;;  %v12456_v8 = vld [vmem:[#allocation8 + $0x30] ss:$12 sps:$4 sm:$0xff]  }
 0x15d   :  { %v12462_v10 = vld [vmem:[#allocation8 + $0x4c] ss:$12 sps:$4 sm:$0xff]   ;;  %v12460_v12 = vld [vmem:[#allocation8 + $0x48] ss:$12 sps:$4 sm:$0xff]  }
 0x15e   :  { %320 = vperm.xlu1 %12407, %v295_v9   ;;  %317 = vperm.xlu0 %12406, %v294_v11   ;;  %v12463_v11 = vld [vmem:[#allocation8 + $0x50] ss:$12 sps:$4 sm:$0xff]   ;;  %v12467_v14 = vld [vmem:[#allocation8 + $0x68] ss:$12 sps:$4 sm:$0xff]   ;;  %v12464_v15 = vld [vmem:[#allocation8 + $0x60] ss:$12 sps:$4 sm:$0xff]  }
 0x15f   :  { %9091 = vmatpush3.bf16.msra.mxu0 %v12412_v13  ;;  %650 = vmatpush1.bf16.msra.mxu1 %v12426_v21  ;;  %v12466_v13 = vld [vmem:[#allocation8 + $0x64] ss:$12 sps:$4 sm:$0xff]   ;;  %v12470_v16 = vld [vmem:[#allocation8 + $0x7c] ss:$12 sps:$4 sm:$0xff]   ;;  %v12474_v19 = vld [vmem:[#allocation8 + $0x94] ss:$12 sps:$4 sm:$0xff]  }
 0x160   :  { %9092 = vmatprep.subr.bf16.mxu0 %v12413_v17  ;;  %651 = vmatprep.subr.bf16.mxu1 %v12428_v22  ;;  %v12468_v18 = vld [vmem:[#allocation8 + $0x78] ss:$12 sps:$4 sm:$0xff]   ;;  %v12472_v21 = vld [vmem:[#allocation8 + $0x90] ss:$12 sps:$4 sm:$0xff]  }
 0x161   :  { %v12478_v22 = vld [vmem:[#allocation8 + $0xac] ss:$12 sps:$4 sm:$0xff]  }
 0x163   :  { %9093 = vmatpush3.bf16.msra.mxu0 %v12413_v17  ;;  %652 = vmatpush1.bf16.msra.mxu1 %v12430_v24  ;;  %v12471_v17 = vld [vmem:[#allocation8 + $0x80] ss:$12 sps:$4 sm:$0xff]  }
 0x164   :  { %9094 = vmatprep.subr.bf16.mxu0 %v12414_v20  ;;  %653 = vmatprep.subr.bf16.mxu1 %v12432_v25  ;;  %v1162_v24 = vld [vmem:[#allocation5 + $0x8] sm:$0xff]  ;;  %v1165_v25 = vld [vmem:[#allocation5 + $0x20] sm:$0xff] }
 0x167   :  { %9095 = vmatpush3.bf16.msra.mxu0 %v12414_v20  ;;  %654 = vmatpush1.bf16.msra.mxu1 %v12434_v27  ;;  %v12475_v20 = vld [vmem:[#allocation8 + $0x98] ss:$12 sps:$4 sm:$0xff]   ;;  %v13871_v27 = vpack.c.bf16 %v1165_v25, %v1162_v24 }
 0x168   :  { %9096 = vmatprep.subr.bf16.mxu0 %v12415_v23  ;;  %655 = vmatprep.subr.bf16.mxu1 %v12436_v28  ;;  %v1161_v28 = vld [vmem:[#allocation5] sm:$0xff]  ;;  %v1200_v24 = vld [vmem:[#allocation5 + $0x138] sm:$0xff] }
 0x169   :  { %v1204_v25 = vld [vmem:[#allocation5 + $0x158] sm:$0xff] }
 0x16b   :  { %9097 = vmatpush3.bf16.msra.mxu0 %v12415_v23  ;;  %656 = vmatpush1.bf16.msra.mxu1 %v12438_v29  ;;  %v12479_v23 = vld [vmem:[#allocation8 + $0xb0] ss:$12 sps:$4 sm:$0xff]  }
 0x16c   :  { %9106 = vmatprep.subr.bf16.mxu0 %v12419_v26  ;;  %657 = vmatprep.subr.bf16.mxu1 %v12440_v30  ;;  %v1164_v29 = vld [vmem:[#allocation5 + $0x18] sm:$0xff] }
 0x16d   :  { %v1168_v30 = vld [vmem:[#allocation5 + $0x38] sm:$0xff] }
 0x16f   :  { %658 = vmatpush1.bf16.msra.mxu1 %v12442_v31  ;;  %v1171_v31 = vld [vmem:[#allocation5 + $0x50] sm:$0xff] }
 0x170   :  { %659 = vmatprep.subr.bf16.mxu1 %v12444_v49  ;;  %v1180_v49 = vld [vmem:[#allocation5 + $0x98] sm:$0xff] }
 0x173   :  { %660 = vmatpush1.bf16.msra.mxu1 %v12446_v50  ;;  %v1183_v50 = vld [vmem:[#allocation5 + $0xb0] sm:$0xff] }
 0x174   :  { %983 = vmatprep.subr.bf16.mxu1 %v12450_v52  ;;  %v1175_v52 = vld [vmem:[#allocation5 + $0x70] sm:$0xff] }
 0x1d1   :  { %v306_v33 = vpop.permute.xlu1 %305  ;;  %v300_v34 = vpop.permute.xlu0 %299 }
 0x1d2   :  { %vm324_vm0 = vcmp.eq.s32.totalorder %v297_v35, %v306_v33  ;;  %vm322_vm3 = vcmp.eq.s32.totalorder %v297_v35, %v300_v34  ;;  %v1163_v33 = vld [vmem:[#allocation5 + $0x10] sm:$0xff]  ;;  %v1166_v34 = vld [vmem:[#allocation5 + $0x28] sm:$0xff] }
 0x1d5   :  { %v309_v36 = vpop.permute.xlu1 %308  ;;  %v303_v37 = vpop.permute.xlu0 %302 }
 0x1d6   :  { %vm325_vm1 = vcmp.eq.s32.totalorder %v297_v35, %v309_v36  ;;  %vm323_vm2 = vcmp.eq.s32.totalorder %v297_v35, %v303_v37  ;;  %v13876_v36 = vpack.c.bf16 %v1171_v31, %v1168_v30  ;;  %v1167_v37 = vld [vmem:[#allocation5 + $0x30] sm:$0xff] }
 0x1d7   :  { %vm8201_vm4 = vmpackc.low %vm325_vm1, %vm324_vm0 }
 0x1d8   :  { %vm8199_vm5 = vmpackc.low %vm323_vm2, %vm322_vm3 }
 0x1d9   :  { %9098 = vmatprep.mubr.msk.bf16.mxu0 %vm8199_vm5, %v13366_v39  ;;  %v315_v40 = vpop.permute.xlu1 %314  ;;  %v312_v41 = vpop.permute.xlu0 %311 }
 0x1da   :  { %vm327_vm6 = vcmp.eq.s32.totalorder %v297_v35, %v315_v40  ;;  %9099 = vmatmul.mubr.msk.bf16.vlgmr.msra.gmra.mrb[0].mxu0 %vm8201_vm4, %v13366_v39  ;;  %vm326_vm7 = vcmp.eq.s32.totalorder %v297_v35, %v312_v41  ;;  %v1177_v40 = vld [vmem:[#allocation5 + $0x80] sm:$0xff]  ;;  %v16139_v41 = vmov 0.0|0.0  }
 0x1db   :  { %vm8203_vm8 = vmpackc.low %vm327_vm6, %vm326_vm7  ;;  %9107 = vmatpush3.bf16.msra.mxu0 %v12419_v26  ;;  %v12476_v26 = vld [vmem:[#allocation8 + $0xa8] ss:$12 sps:$4 sm:$0xff]  }
 0x1dc   :  { %9102 = vmatprep.mubr.msk.bf16.mxu0 %vm8203_vm8, %v13366_v39  ;;  %9108 = vmatprep.subr.bf16.mxu0 %v12423_v38 }
 0x1dd   :  { %v321_v43 = vpop.permute.xlu1 %320  ;;  %v318_v44 = vpop.permute.xlu0 %317 }
 0x1de   :  { %vm329_vm9 = vcmp.eq.s32.totalorder %v297_v35, %v321_v43  ;;  %vm328_vm10 = vcmp.eq.s32.totalorder %v297_v35, %v318_v44  ;;  %v13873_v35 = vpack.c.bf16 %v1164_v29, %v1161_v28  ;;  %v1169_v43 = vld [vmem:[#allocation5 + $0x40] sm:$0xff]  ;;  %v1172_v44 = vld [vmem:[#allocation5 + $0x58] sm:$0xff]  ;;  %v1199_v28 = vld [vmem:[#allocation5 + $0x130] sm:$0xff] }
 0x1df   :  { %vm8205_vm11 = vmpackc.low %vm329_vm9, %vm328_vm10  ;;  %9109 = vmatpush3.bf16.msra.mxu0 %v12423_v38  ;;  %v1170_v38 = vld [vmem:[#allocation5 + $0x48] sm:$0xff] }
 0x1e0   :  { %9110 = vmatprep.subr.bf16.mxu0 %v12427_v42  ;;  %v1202_v29 = vld [vmem:[#allocation5 + $0x148] sm:$0xff] }
 0x1e2   :  { %9103 = vmatmul.mubr.msk.bf16.gmra.mrb[4].mxu0 %vm8205_vm11, %v13366_v39  ;;  %v1174_v39 = vld [vmem:[#allocation5 + $0x68] sm:$0xff] }
 0x1e3   :  { %9111 = vmatpush3.bf16.msra.mxu0 %v12427_v42  ;;  %v13879_v42 = vpack.c.bf16 %v1166_v34, %v1163_v33  ;;  %v1203_v33 = vld [vmem:[#allocation5 + $0x150] sm:$0xff]  ;;  %v1206_v34 = vld [vmem:[#allocation5 + $0x168] sm:$0xff] }
 0x1e4   :  { %9112 = vmatprep.subr.bf16.mxu0 %v12431_v45 }
 0x1e7   :  { %9113 = vmatpush3.bf16.msra.mxu0 %v12431_v45  ;;  %v13884_v45 = vpack.c.bf16 %v1170_v38, %v1167_v37  ;;  %v1210_v37 = vld [vmem:[#allocation10 + $0x8] sm:$0xff]  ;;  %v1213_v38 = vld [vmem:[#allocation10 + $0x20] sm:$0xff] }
 0x1e8   :  { %9114 = vmatprep.subr.bf16.mxu0 %v12435_v46 }
 0x1eb   :  { %9115 = vmatpush3.bf16.msra.mxu0 %v12435_v46  ;;  %v13888_v46 = vpack.c.bf16 %v1177_v40, %v1174_v39  ;;  %v13949_v39 = vpack.c.bf16 %v1202_v29, %v1199_v28  ;;  %v1205_v40 = vld [vmem:[#allocation5 + $0x160] sm:$0xff]  ;;  %v1230_v28 = vld [vmem:[#allocation10 + $0xa8] sm:$0xff] }
 0x1ec   :  { %9116 = vmatprep.subr.bf16.mxu0 %v12439_v47  ;;  %v1234_v29 = vld [vmem:[#allocation10 + $0xc8] sm:$0xff] }
 0x1ed   :  { %16239 = vst [vmem:[#allocation45_spill] sm:$0xff] %v13949_v39 }
 0x1ef   :  { %9117 = vmatpush3.bf16.msra.mxu0 %v12439_v47  ;;  %v1173_v47 = vld [vmem:[#allocation5 + $0x60] sm:$0xff] }
 0x1f0   :  { %9118 = vmatprep.subr.bf16.mxu0 %v12443_v48 }
 0x1f3   :  { %9119 = vmatpush3.bf16.msra.mxu0 %v12443_v48  ;;  %v1176_v48 = vld [vmem:[#allocation5 + $0x78] sm:$0xff] }
 0x1f4   :  { %9120 = vmatprep.subr.bf16.mxu0 %v12447_v51 }
 0x1f7   :  { %9121 = vmatpush3.bf16.msra.mxu0 %v12447_v51  ;;  %v13892_v51 = vpack.c.bf16 %v1172_v44, %v1169_v43  ;;  %v1208_v43 = vld [vmem:[#allocation5 + $0x178] sm:$0xff]  ;;  %v13954_v44 = vpack.c.bf16 %v1206_v34, %v1203_v33  ;;  %v1237_v33 = vld [vmem:[#allocation10 + $0xe0] sm:$0xff] }
 0x1f8   :  { %9130 = vmatprep.subr.bf16.mxu0 %v12451_v53 }
 0x1f9   :  { %16240 = vst [vmem:[#allocation46_spill] sm:$0xff] %v13954_v44 }
 0x2ad   :  { %v9100_v54 = vpop.f32.mrb[0].mxu0 }
 0x2ae   :  { %v440_v55 = vpop.f32.mrb[1].mxu0 }
 0x2af   :  { %v9101_v56 = vpop.f32.mrb[2].mxu0 }
 0x2b0   :  { %v13850_v57 = vpack.c.bf16 %v9101_v56, %v9100_v54  ;;  %v443_v58 = vpop.f32.mrb[3].mxu0  ;;  %v13896_v54 = vpack.c.bf16 %v1176_v48, %v1173_v47  ;;  %v1179_v56 = vld [vmem:[#allocation5 + $0x90] sm:$0xff]  ;;  %v13958_v47 = vpack.c.bf16 %v1213_v38, %v1210_v37  ;;  %v1209_v48 = vld [vmem:[#allocation10] sm:$0xff]  ;;  %v1232_v38 = vld [vmem:[#allocation10 + $0xb8] sm:$0xff] }
 0x2b1   :  { %v13852_v60 = vpack.c.bf16 %v443_v58, %v440_v55  ;;  %v13899_v55 = vpack.c.bf16 %v1183_v50, %v1180_v49  ;;  %v1182_v58 = vld [vmem:[#allocation5 + $0xa8] sm:$0xff]  ;;  %v1212_v49 = vld [vmem:[#allocation10 + $0x18] sm:$0xff] }
 0x2b2   :  { %16241 = vst [vmem:[#allocation47_spill] sm:$0xff] %v13958_v47  ;;  %v1216_v50 = vld [vmem:[#allocation10 + $0x38] sm:$0xff]  ;;  %v1229_v37 = vld [vmem:[#allocation10 + $0xa0] sm:$0xff] }
 0x2b3   :  { %678 = vmatmul.mubr.bf16.vlgmr.msra.gmra.mrb[0].mxu1 %v13852_v60  ;;  %9122 = vmatprep.mubr.bf16.mxu0 %v13852_v60 }
 0x2b4   :  { %984 = vmatpush1.bf16.msra.mxu1 %v12448_v59  ;;  %9123 = vmatmul.mubr.bf16.vlgmr.msra.gmra.mrb[8].mxu0 %v13850_v57  ;;  %v1186_v59 = vld [vmem:[#allocation5 + $0xc8] sm:$0xff] }
 0x2b5   :  { %9131 = vmatpush3.bf16.msra.mxu0 %v12451_v53  ;;  %v9104_v1 = vpop.f32.mrb[4].mxu0  ;;  %985 = vmatprep.subr.bf16.mxu1 %v12454_v61  ;;  %v1178_v53 = vld [vmem:[#allocation5 + $0x88] sm:$0xff] }
 0x2b6   :  { %v456_v3 = vpop.f32.mrb[5].mxu0  ;;  %9132 = vmatprep.subr.bf16.mxu0 %v12455_v62  ;;  %687 = vmatprep.mubr.bf16.mxu1 %v16135_v0  ;;  %v13902_v61 = vpack.c.bf16 %v1178_v53, %v1175_v52  ;;  %v1219_v52 = vld [vmem:[#allocation10 + $0x50] sm:$0xff] }
 0x2b7   :  { %v9105_v5 = vpop.f32.mrb[6].mxu0  ;;  %v1211_v53 = vld [vmem:[#allocation10 + $0x10] sm:$0xff] }
 0x2b8   :  { %v13858_v6 = vpack.c.bf16 %v9105_v5, %v9104_v1  ;;  %986 = vmatpush1.bf16.msra.mxu1 %v12452_v63  ;;  %v459_v7 = vpop.f32.mrb[7].mxu0  ;;  %v1184_v63 = vld [vmem:[#allocation5 + $0xb8] sm:$0xff]  ;;  %v13908_v1 = vpack.c.bf16 %v1182_v58, %v1179_v56  ;;  %v1214_v56 = vld [vmem:[#allocation10 + $0x28] sm:$0xff]  ;;  %v13965_v58 = vpack.c.bf16 %v1212_v49, %v1209_v48  ;;  %v1233_v48 = vld [vmem:[#allocation10 + $0xc0] sm:$0xff] }
 0x2b9   :  { %v13860_v9 = vpack.c.bf16 %v459_v7, %v456_v3  ;;  %9133 = vmatpush3.bf16.msra.mxu0 %v12455_v62  ;;  %987 = vmatprep.subr.bf16.mxu1 %v12458_v2  ;;  %v1181_v62 = vld [vmem:[#allocation5 + $0xa0] sm:$0xff]  ;;  %v1192_v5 = vld [vmem:[#allocation5 + $0xf8] sm:$0xff] }
 0x2ba   :  { %9134 = vmatprep.subr.bf16.mxu0 %v12459_v4  ;;  %v1185_v3 = vld [vmem:[#allocation5 + $0xc0] sm:$0xff]  ;;  %v13915_v7 = vpack.c.bf16 %v1184_v63, %v1181_v62  ;;  %v1218_v62 = vld [vmem:[#allocation10 + $0x48] sm:$0xff] }
 0x2bb   :  { %688 = vmatmul.mubr.bf16.gmra.mrb[4].mxu1 %v13850_v57  ;;  %9126 = vmatprep.mubr.bf16.mxu0 %v13860_v9  ;;  %v1222_v63 = vld [vmem:[#allocation10 + $0x68] sm:$0xff]  ;;  %v1236_v49 = vld [vmem:[#allocation10 + $0xd8] sm:$0xff] }
 0x2bc   :  { %988 = vmatpush1.bf16.msra.mxu1 %v12456_v8  ;;  %9127 = vmatmul.mubr.bf16.gmra.mrb[12].mxu0 %v13858_v6  ;;  %v16137_v8 = vmov 0.0  }
 0x2bd   :  { %9135 = vmatpush3.bf16.msra.mxu0 %v12459_v4  ;;  %9146 = vmatprep.mubr.bf16.mxu0 %v13852_v60  ;;  %v1188_v4 = vld [vmem:[#allocation5 + $0xd8] sm:$0xff] }
 0x2be   :  { %989 = vmatprep.subr.bf16.mxu1 %v12462_v10  ;;  %9136 = vmatprep.subr.bf16.mxu0 %v12463_v11  ;;  %v1187_v10 = vld [vmem:[#allocation5 + $0xd0] sm:$0xff] }
 0x2bf   :  { %697 = vmatprep.mubr.bf16.mxu1 %v16135_v0 }
 0x2c0   :  { %990 = vmatpush1.bf16.msra.mxu1 %v12460_v12  ;;  %v13921_v12 = vpack.c.bf16 %v1188_v4, %v1185_v3  ;;  %v1225_v3 = vld [vmem:[#allocation10 + $0x80] sm:$0xff]  ;;  %v13971_v4 = vpack.c.bf16 %v1214_v56, %v1211_v53  ;;  %v14006_v53 = vpack.c.bf16 %v1232_v38, %v1229_v37  ;;  %v1235_v56 = vld [vmem:[#allocation10 + $0xd0] sm:$0xff] }
 0x2c1   :  { %9137 = vmatpush3.bf16.msra.mxu0 %v12463_v11  ;;  %991 = vmatprep.subr.bf16.mxu1 %v12466_v13  ;;  %v1190_v11 = vld [vmem:[#allocation5 + $0xe8] sm:$0xff]  ;;  %v1247_v38 = vld [vmem:[#allocation10 + $0x130] sm:$0xff] }
 0x2c2   :  { %9138 = vmatprep.subr.bf16.mxu0 %v12467_v14 }
 0x2c3   :  { %698 = vmatmul.mubr.bf16.gmra.mrb[8].mxu1 %v13860_v9 }
 0x2c4   :  { %992 = vmatpush1.bf16.msra.mxu1 %v12464_v15  ;;  %707 = vmatprep.mubr.bf16.mxu1 %v16135_v0  ;;  %v1194_v15 = vld [vmem:[#allocation5 + $0x108] sm:$0xff] }
 0x2c5   :  { %9139 = vmatpush3.bf16.msra.mxu0 %v12467_v14  ;;  %993 = vmatprep.subr.bf16.mxu1 %v12470_v16  ;;  %v1191_v14 = vld [vmem:[#allocation5 + $0xf0] sm:$0xff]  ;;  %v1198_v16 = vld [vmem:[#allocation5 + $0x128] sm:$0xff] }
 0x2c6   :  { %9140 = vmatprep.subr.bf16.mxu0 %v12471_v17 }
 0x2c8   :  { %994 = vmatpush1.bf16.msra.mxu1 %v12468_v18  ;;  %v13927_v18 = vpack.c.bf16 %v1190_v11, %v1187_v10  ;;  %v13980_v11 = vpack.c.bf16 %v1225_v3, %v1222_v63  ;;  %v1239_v3 = vld [vmem:[#allocation10 + $0xf0] sm:$0xff] }
 0x2c9   :  { %9141 = vmatpush3.bf16.msra.mxu0 %v12471_v17  ;;  %995 = vmatprep.subr.bf16.mxu1 %v12474_v19  ;;  %v1201_v17 = vld [vmem:[#allocation5 + $0x140] sm:$0xff] }
 0x2ca   :  { %9142 = vmatprep.subr.bf16.mxu0 %v12475_v20  ;;  %v1193_v19 = vld [vmem:[#allocation5 + $0x100] sm:$0xff] }
 0x2cb   :  { %708 = vmatmul.mubr.bf16.gmra.mrb[12].mxu1 %v13858_v6 }
 0x2cc   :  { %996 = vmatpush1.bf16.msra.mxu1 %v12472_v21  ;;  %1015 = vmatprep.mubr.bf16.mxu1 %v16135_v0  ;;  %v13932_v21 = vpack.c.bf16 %v1194_v15, %v1191_v14  ;;  %v1221_v14 = vld [vmem:[#allocation10 + $0x60] sm:$0xff]  ;;  %v1224_v15 = vld [vmem:[#allocation10 + $0x78] sm:$0xff] }
 0x2cd   :  { %9143 = vmatpush3.bf16.msra.mxu0 %v12475_v20  ;;  %997 = vmatprep.subr.bf16.mxu1 %v12478_v22  ;;  %v1196_v20 = vld [vmem:[#allocation5 + $0x118] sm:$0xff]  ;;  %v13936_v22 = vpack.c.bf16 %v1201_v17, %v1198_v16 }
 0x2ce   :  { %9144 = vmatprep.subr.bf16.mxu0 %v12479_v23  ;;  %16234 = vst [vmem:[#allocation40_spill] sm:$0xff] %v13932_v21  ;;  %v1228_v16 = vld [vmem:[#allocation10 + $0x98] sm:$0xff]  ;;  %v1231_v17 = vld [vmem:[#allocation10 + $0xb0] sm:$0xff] }
 0x2cf   :  { %16235 = vst [vmem:[#allocation41_spill] sm:$0xff] %v13936_v22 }
 0x2d0   :  { %998 = vmatpush1.bf16.msra.mxu1 %v12476_v26  ;;  %v1207_v26 = vld [vmem:[#allocation5 + $0x170] sm:$0xff] }
 0x2d1   :  { %9145 = vmatpush3.bf16.msra.mxu0 %v12479_v23  ;;  %10441 = vmatprep.subr.bf16.mxu1 %v13871_v27  ;;  %v1197_v23 = vld [vmem:[#allocation5 + $0x120] sm:$0xff]  ;;  %v13946_v31 = vpack.c.bf16 %v1207_v26, %v1204_v25  ;;  %v13993_v25 = vpack.c.bf16 %v1231_v17, %v1228_v16  ;;  %v1227_v26 = vld [vmem:[#allocation10 + $0x90] sm:$0xff] }
 0x2d2   :  { %10472 = vmatprep.subr.bf16.mxu0 %v16139_v41  ;;  %v13943_v30 = vpack.c.bf16 %v1200_v24, %v1197_v23  ;;  %v1226_v23 = vld [vmem:[#allocation10 + $0x88] sm:$0xff]  ;;  %v13990_v24 = vpack.c.bf16 %v1224_v15, %v1221_v14  ;;  %v1249_v14 = vld [vmem:[#allocation10 + $0x140] sm:$0xff]  ;;  %v1244_v17 = vld [vmem:[#allocation10 + $0x118] sm:$0xff] }
 0x2d3   :  { %1016 = vmatmul.mubr.bf16.vlgmr.msra.gmra.mrb[16].mxu1 %v13852_v60  ;;  %v1189_v60 = vld [vmem:[#allocation5 + $0xe0] sm:$0xff]  ;;  %16238 = vst [vmem:[#allocation44_spill] sm:$0xff] %v13946_v31 }
 0x2d4   :  { %9147 = vmatmul.mubr.bf16.vlgmr.msra.gmra.mrb[16].mxu0 %v13850_v57  ;;  %10443 = vmatpush1.bf16.msra.mxu1 %v13873_v35  ;;  %v13912_v2 = vpack.c.bf16 %v1189_v60, %v1186_v59  ;;  %16237 = vst [vmem:[#allocation43_spill] sm:$0xff] %v13943_v30  ;;  %v13968_v59 = vpack.c.bf16 %v1219_v52, %v1216_v50  ;;  %v1215_v60 = vld [vmem:[#allocation10 + $0x30] sm:$0xff]  ;;  %v1240_v50 = vld [vmem:[#allocation10 + $0xf8] sm:$0xff]  ;;  %v1241_v16 = vld [vmem:[#allocation10 + $0x100] sm:$0xff] }
 0x2d5   :  { %9150 = vmatprep.mubr.bf16.mxu0 %v13860_v9  ;;  %10445 = vmatprep.subr.bf16.mxu1 %v13876_v36  ;;  %v13976_v10 = vpack.c.bf16 %v1218_v62, %v1215_v60  ;;  %v1243_v52 = vld [vmem:[#allocation10 + $0x110] sm:$0xff]  ;;  %v1238_v60 = vld [vmem:[#allocation10 + $0xe8] sm:$0xff]  ;;  %v14010_v62 = vpack.c.bf16 %v1236_v49, %v1233_v48  ;;  %v14026_v37 = vpack.c.bf16 %v1244_v17, %v1241_v16  ;;  %v785_v16 = vshrl.u32 %v296_v32, 7 }
 0x2d6   :  { %1025 = vmatprep.mubr.bf16.mxu1 %v16135_v0  ;;  %10474 = vmatpush3.bf16.msra.mxu0 %v13879_v42  ;;  %v14013_v63 = vpack.c.bf16 %v1243_v52, %v1240_v50  ;;  %v14016_v15 = vpack.c.bf16 %v1238_v60, %v1235_v56  ;;  %v1250_v48 = vld [vmem:[#allocation10 + $0x148] sm:$0xff]  ;;  %v1251_v52 = vld [vmem:[#allocation10 + $0x150] sm:$0xff] }
 0x2d7   :  { %10475 = vmatprep.subr.bf16.mxu0 %v16139_v41  ;;  %v1254_v56 = vld [vmem:[#allocation10 + $0x168] sm:$0xff]  ;;  %v14036_v60 = vpack.c.bf16 %v1250_v48, %v1247_v38  ;;  %v14089_v17 = vsub.s32 2, %v785_v16 }
 0x2d8   :  { %10447 = vmatpush1.bf16.msra.mxu1 %v13884_v45 }
 0x2d9   :  { %10449 = vmatprep.subr.bf16.mxu1 %v13888_v46  ;;  %16243 = vst [vmem:[#allocation49_spill] sm:$0xff] %v14089_v17 }
 0x2da   :  { %10477 = vmatpush3.bf16.msra.mxu0 %v13892_v51 }
 0x2db   :  { %1026 = vmatmul.mubr.bf16.gmra.mrb[20].mxu1 %v13850_v57  ;;  %10478 = vmatprep.subr.bf16.mxu0 %v16139_v41  ;;  %v1195_v57 = vld [vmem:[#allocation5 + $0x110] sm:$0xff] }
 0x2dc   :  { %9151 = vmatmul.mubr.bf16.gmra.mrb[20].mxu0 %v13858_v6  ;;  %10451 = vmatpush1.bf16.msra.mxu1 %v13896_v54  ;;  %v13924_v13 = vpack.c.bf16 %v1195_v57, %v1192_v5  ;;  %v1217_v5 = vld [vmem:[#allocation10 + $0x40] sm:$0xff]  ;;  %v1220_v57 = vld [vmem:[#allocation10 + $0x58] sm:$0xff] }
 0x2dd   :  { %10453 = vmatprep.subr.bf16.mxu1 %v13899_v55  ;;  %1035 = vmatprep.mubr.bf16.mxu1 %v16135_v0 }
 0x2de   :  { %10480 = vmatpush3.bf16.msra.mxu0 %v13902_v61  ;;  %9186 = vmatprep.mubr.msk.f32.mxu0 %vm13368_vm12, %v16137_v8  ;;  %16233 = vst [vmem:[#allocation39_spill] sm:$0xff] %v13924_v13 }
 0x2df   :  { %10481 = vmatprep.subr.bf16.mxu0 %v16139_v41 }
 0x2e0   :  { %10455 = vmatpush1.bf16.msra.mxu1 %v13908_v1 }
 0x2e1   :  { %10457 = vmatprep.subr.bf16.mxu1 %v13912_v2 }
 0x2e2   :  { %10483 = vmatpush3.bf16.msra.mxu0 %v13915_v7 }
 0x2e3   :  { %1036 = vmatmul.mubr.bf16.gmra.mrb[24].mxu1 %v13860_v9  ;;  %10484 = vmatprep.subr.bf16.mxu0 %v16139_v41  ;;  %v13939_v9 = vpack.c.bf16 %v1196_v20, %v1193_v19  ;;  %v13984_v19 = vpack.c.bf16 %v1220_v57, %v1217_v5  ;;  %v1223_v20 = vld [vmem:[#allocation10 + $0x70] sm:$0xff]  ;;  %v1242_v5 = vld [vmem:[#allocation10 + $0x108] sm:$0xff] }
 0x2e4   :  { %10459 = vmatpush1.bf16.msra.mxu1 %v13921_v12  ;;  %1045 = vmatprep.mubr.bf16.mxu1 %v16135_v0  ;;  %v13996_v34 = vpack.c.bf16 %v1226_v23, %v1223_v20  ;;  %v1246_v57 = vld [vmem:[#allocation10 + $0x128] sm:$0xff]  ;;  %v14020_v20 = vpack.c.bf16 %v1242_v5, %v1239_v3  ;;  %v1253_v3 = vld [vmem:[#allocation10 + $0x160] sm:$0xff]  ;;  %v1256_v5 = vld [vmem:[#allocation10 + $0x178] sm:$0xff] }
 0x2e5   :  { %10461 = vmatprep.subr.bf16.mxu1 %v13924_v13  ;;  %16236 = vst [vmem:[#allocation42_spill] sm:$0xff] %v13939_v9  ;;  %v14023_v23 = vpack.c.bf16 %v1249_v14, %v1246_v57  ;;  %v14040_v57 = vpack.c.bf16 %v1254_v56, %v1251_v52  ;;  %v14044_v14 = vpack.c.bf16 %v1256_v5, %v1253_v3 }
 0x2e6   :  { %10486 = vmatpush3.bf16.msra.mxu0 %v13927_v18 }
 0x2e7   :  { %10487 = vmatprep.subr.bf16.mxu0 %v16139_v41 }
 0x2e8   :  { %10463 = vmatpush1.bf16.msra.mxu1 %v13932_v21 }
 0x2e9   :  { %10465 = vmatprep.subr.bf16.mxu1 %v13936_v22 }
 0x2ea   :  { %10489 = vmatpush3.bf16.msra.mxu0 %v13939_v9 }
 0x2eb   :  { %1046 = vmatmul.mubr.bf16.gmra.mrb[28].mxu1 %v13858_v6  ;;  %10490 = vmatprep.subr.bf16.mxu0 %v16139_v41  ;;  %v13961_v6 = vpack.c.bf16 %v1208_v43, %v1205_v40  ;;  %v14000_v40 = vpack.c.bf16 %v1230_v28, %v1227_v26  ;;  %v14003_v43 = vpack.c.bf16 %v1237_v33, %v1234_v29  ;;  %v1245_v26 = vld [vmem:[#allocation10 + $0x120] sm:$0xff]  ;;  %v1248_v28 = vld [vmem:[#allocation10 + $0x138] sm:$0xff]  ;;  %v1255_v33 = vld [vmem:[#allocation10 + $0x170] sm:$0xff] }
 0x2ec   :  { %10467 = vmatpush1.bf16.msra.mxu1 %v13943_v30  ;;  %1335 = vmatprep.mubr.f32.mxu1 %v16137_v8  ;;  %v1252_v29 = vld [vmem:[#allocation10 + $0x158] sm:$0xff]  ;;  %v14030_v49 = vpack.c.bf16 %v1248_v28, %v1245_v26  ;;  %v14094_v28 = vsub.s32 0, %v785_v16 }
 0x2ed   :  { %10469 = vmatprep.subr.bf16.mxu1 %v13946_v31  ;;  %16242 = vst [vmem:[#allocation48_spill] sm:$0xff] %v13961_v6  ;;  %v14033_v50 = vpack.c.bf16 %v1255_v33, %v1252_v29  ;;  %v483_v26 = vld [vmem:[%s16244_s19] sm:$0x7]  ;;  %v14096_v29 = vsub.s32 1, %v785_v16  ;;  %s13370_s19 = smov [#allocation28]  }
 0x2ee   :  { %10492 = vmatpush3.bf16.msra.mxu0 %v13949_v39  ;;  %16245 = vst [vmem:[#allocation50_spill] sm:$0xff] %v14094_v28  ;;  %v14099_v33 = vrot.slane %v483_v26, %v14089_v17  ;;  %v14104_v48 = vrot.slane %v483_v26, %v14094_v28 }
 0x2ef   :  { %10493 = vmatprep.subr.bf16.mxu0 %v16139_v41  ;;  %16246 = vst [vmem:[#allocation51_spill] sm:$0xff] %v14096_v29  ;;  %v14109_v56 = vrot.slane %v483_v26, %v14096_v29 }
 0x2f0   :  { %10471 = vmatpush1.bf16.msra.mxu1 %v13954_v44 }
 0x2f1   :  { %10497 = vmatprep.subr.bf16.mxu1 %v13958_v47 }
 0x2f2   :  { %10495 = vmatpush3.bf16.msra.mxu0 %v13961_v6 }
 0x2f3   :  { %1336 = vmatmul.mubr.f32.vlgmr.msra.gmra.mrb[32].mxu1 %v16137_v8  ;;  %10528 = vmatprep.subr.bf16.mxu0 %v16139_v41 }
 0x2f4   :  { %10499 = vmatpush1.bf16.msra.mxu1 %v13965_v58  ;;  %1499 = vmatprep.mubr.f32.mxu1 %v16137_v8 }
 0x2f5   :  { %10501 = vmatprep.subr.bf16.mxu1 %v13968_v59  ;;  %9187 = vmatmul.mubr.f32.vlgmr.msra.gmra.mrb[24].mxu0 %v16137_v8 }
 0x2f6   :  { %10530 = vmatpush3.bf16.msra.mxu0 %v13971_v4  ;;  %9221 = vmatprep.mubr.msk.f32.mxu0 %vm13368_vm12, %v16137_v8 }
 0x2f7   :  { %10531 = vmatprep.subr.bf16.mxu0 %v16139_v41 }
 0x2f8   :  { %10503 = vmatpush1.bf16.msra.mxu1 %v13976_v10 }
 0x2f9   :  { %10505 = vmatprep.subr.bf16.mxu1 %v13980_v11 }
 0x2fa   :  { %10533 = vmatpush3.bf16.msra.mxu0 %v13984_v19 }
 0x2fb   :  { %10534 = vmatprep.subr.bf16.mxu0 %v16139_v41 }
 0x2fc   :  { %10507 = vmatpush1.bf16.msra.mxu1 %v13990_v24 }
 0x2fd   :  { %10509 = vmatprep.subr.bf16.mxu1 %v13993_v25 }
 0x2fe   :  { %10536 = vmatpush3.bf16.msra.mxu0 %v13996_v34 }
 0x2ff   :  { %10537 = vmatprep.subr.bf16.mxu0 %v16139_v41 }
 0x300   :  { %10511 = vmatpush1.bf16.msra.mxu1 %v14000_v40 }
 0x301   :  { %10513 = vmatprep.subr.bf16.mxu1 %v14003_v43 }
 0x302   :  { %10539 = vmatpush3.bf16.msra.mxu0 %v14006_v53 }
 0x303   :  { %10540 = vmatprep.subr.bf16.mxu0 %v16139_v41 }
 0x304   :  { %10515 = vmatpush1.bf16.msra.mxu1 %v14010_v62 }
 0x305   :  { %10517 = vmatprep.subr.bf16.mxu1 %v14013_v63 }
 0x306   :  { %10542 = vmatpush3.bf16.msra.mxu0 %v14016_v15 }
 0x307   :  { %10543 = vmatprep.subr.bf16.mxu0 %v16139_v41 }
 0x308   :  { %10519 = vmatpush1.bf16.msra.mxu1 %v14020_v20 }
 0x309   :  { %10521 = vmatprep.subr.bf16.mxu1 %v14023_v23 }
 0x30a   :  { %10545 = vmatpush3.bf16.msra.mxu0 %v14026_v37 }
 0x30b   :  { %10546 = vmatprep.subr.bf16.mxu0 %v16139_v41 }
 0x30c   :  { %10523 = vmatpush1.bf16.msra.mxu1 %v14030_v49 }
 0x30d   :  { %10525 = vmatprep.subr.bf16.mxu1 %v14033_v50 }
 0x30e   :  { %10548 = vmatpush3.bf16.msra.mxu0 %v14036_v60 }
 0x30f   :  { %10549 = vmatprep.subr.bf16.mxu0 %v16139_v41 }
 0x310   :  { %10527 = vmatpush1.bf16.msra.mxu1 %v14040_v57 }
 0x311   :  { %10553 = vmatprep.subr.bf16.mxu1 %v13871_v27 }
 0x312   :  { %10551 = vmatpush3.bf16.msra.mxu0 %v14044_v14 }
 0x313   :  { %1500 = vmatmul.mubr.f32.vlgmr.msra.gmra.mrb[34].mxu1 %v16137_v8  ;;  %10584 = vmatprep.subr.bf16.mxu0 %v16139_v41 }
 0x314   :  { %10555 = vmatpush1.bf16.msra.mxu1 %v13873_v35  ;;  %1663 = vmatprep.mubr.f32.mxu1 %v16137_v8 }
 0x315   :  { %9222 = vmatmul.mubr.f32.vlgmr.msra.gmra.mrb[26].mxu0 %v16137_v8  ;;  %10557 = vmatprep.subr.bf16.mxu1 %v13876_v36 }
 0x316   :  { %10586 = vmatpush3.bf16.msra.mxu0 %v13879_v42  ;;  %9256 = vmatprep.mubr.msk.f32.mxu0 %vm13368_vm12, %v16137_v8 }
 0x317   :  { %10587 = vmatprep.subr.bf16.mxu0 %v16139_v41 }
 0x318   :  { %10559 = vmatpush1.bf16.msra.mxu1 %v13884_v45 }
 0x319   :  { %10561 = vmatprep.subr.bf16.mxu1 %v13888_v46 }
 0x31a   :  { %10589 = vmatpush3.bf16.msra.mxu0 %v13892_v51 }
 0x31b   :  { %10590 = vmatprep.subr.bf16.mxu0 %v16139_v41 }
 0x31c   :  { %10563 = vmatpush1.bf16.msra.mxu1 %v13896_v54 }
 0x31d   :  { %10565 = vmatprep.subr.bf16.mxu1 %v13899_v55 }
 0x31e   :  { %10592 = vmatpush3.bf16.msra.mxu0 %v13902_v61 }
 0x31f   :  { %10593 = vmatprep.subr.bf16.mxu0 %v16139_v41 }
 0x320   :  { %10567 = vmatpush1.bf16.msra.mxu1 %v13908_v1 }
 0x321   :  { %10569 = vmatprep.subr.bf16.mxu1 %v13912_v2 }
 0x322   :  { %10595 = vmatpush3.bf16.msra.mxu0 %v13915_v7 }
 0x323   :  { %10596 = vmatprep.subr.bf16.mxu0 %v16139_v41 }
 0x324   :  { %10571 = vmatpush1.bf16.msra.mxu1 %v13921_v12 }
 0x325   :  { %10573 = vmatprep.subr.bf16.mxu1 %v13924_v13 }
 0x326   :  { %10598 = vmatpush3.bf16.msra.mxu0 %v13927_v18 }
 0x327   :  { %10599 = vmatprep.subr.bf16.mxu0 %v16139_v41 }
 0x328   :  { %10575 = vmatpush1.bf16.msra.mxu1 %v13932_v21 }
 0x329   :  { %10577 = vmatprep.subr.bf16.mxu1 %v13936_v22 }
 0x32a   :  { %10601 = vmatpush3.bf16.msra.mxu0 %v13939_v9 }
 0x32b   :  { %10602 = vmatprep.subr.bf16.mxu0 %v16139_v41 }
 0x32c   :  { %10579 = vmatpush1.bf16.msra.mxu1 %v13943_v30 }
 0x32d   :  { %10581 = vmatprep.subr.bf16.mxu1 %v13946_v31 }
 0x32e   :  { %10604 = vmatpush3.bf16.msra.mxu0 %v13949_v39 }
 0x32f   :  { %10605 = vmatprep.subr.bf16.mxu0 %v16139_v41 }
 0x330   :  { %10583 = vmatpush1.bf16.msra.mxu1 %v13954_v44 }
 0x331   :  { %10609 = vmatprep.subr.bf16.mxu1 %v13958_v47 }
 0x332   :  { %10607 = vmatpush3.bf16.msra.mxu0 %v13961_v6 }
 0x333   :  { %10640 = vmatprep.subr.bf16.mxu0 %v16139_v41 }
 0x386   :  { %v14101_v38 = vpop.f32.mrb[0].mxu1 }
 0x387   :  { %v14106_v52 = vpop.f32.mrb[1].mxu1  ;;  %v9124_v32 = vpop.f32.mrb[8].mxu0 }
 0x388   :  { %v14112_v3 = vadd.f32 %v9124_v32, %v14099_v33  ;;  %v683_v5 = vpop.f32.mrb[2].mxu1  ;;  %v14114_v16 = vpop.f32.mrb[9].mxu0 }
 0x389   :  { %v14117_v0 = vadd.f32 %v14104_v48, %v683_v5  ;;  %v685_v8 = vpop.f32.mrb[3].mxu1  ;;  %v9125_v41 = vpop.f32.mrb[10].mxu0 }
 0x38a   :  { %16247 = vst [vmem:[#allocation52_spill] sm:$0xff] %v14112_v3  ;;  %v14120_v47 = vadd.f32 %v14109_v56, %v685_v8  ;;  %v14123_v6 = vadd.f32 %v9125_v41, %v14099_v33  ;;  %v755_v44 = vpop.f32.mrb[11].mxu0 }
 0x38b   :  { %16248 = vst [vmem:[#allocation53_spill] sm:$0xff] %v14117_v0  ;;  %v14126_v26 = vadd.f32 %v14099_v33, %v755_v44 }
 0x38c   :  { %16249 = vst [vmem:[#allocation54_spill] sm:$0xff] %v14120_v47  ;;  %16250 = vst [vmem:[#allocation55_spill] sm:$0xff] %v14123_v6 }
 0x38d   :  { %16251 = vst [vmem:[#allocation56_spill] sm:$0xff] %v14126_v26 }
 0x38e   :  { %v689_v32 = vpop.f32.mrb[4].mxu1 }
 0x38f   :  { %v14129_v3 = vadd.f32 %v14104_v48, %v689_v32  ;;  %v691_v31 = vpop.f32.mrb[5].mxu1  ;;  %v9128_v39 = vpop.f32.mrb[12].mxu0 }
 0x390   :  { %v14132_v5 = vadd.f32 %v14109_v56, %v691_v31  ;;  %v14135_v0 = vadd.f32 %v9128_v39, %v14099_v33  ;;  %v693_v8 = vpop.f32.mrb[6].mxu1  ;;  %v768_v47 = vpop.f32.mrb[13].mxu0 }
 0x391   :  { %16252 = vst [vmem:[#allocation57_spill] sm:$0xff] %v14129_v3  ;;  %v14138_v41 = vadd.f32 %v14104_v48, %v693_v8  ;;  %v14141_v44 = vadd.f32 %v14099_v33, %v768_v47  ;;  %v695_v6 = vpop.f32.mrb[7].mxu1  ;;  %v9129_v26 = vpop.f32.mrb[14].mxu0 }
 0x392   :  { %16253 = vst [vmem:[#allocation58_spill] sm:$0xff] %v14132_v5  ;;  %16254 = vst [vmem:[#allocation59_spill] sm:$0xff] %v14135_v0  ;;  %v14144_v32 = vadd.f32 %v14109_v56, %v695_v6  ;;  %v14147_v3 = vadd.f32 %v9129_v26, %v14099_v33  ;;  %v771_v31 = vpop.f32.mrb[15].mxu0 }
 0x393   :  { %16255 = vst [vmem:[#allocation60_spill] sm:$0xff] %v14138_v41  ;;  %16256 = vst [vmem:[#allocation61_spill] sm:$0xff] %v14141_v44  ;;  %v14150_v39 = vadd.f32 %v14099_v33, %v771_v31 }
 0x394   :  { %16257 = vst [vmem:[#allocation62_spill] sm:$0xff] %v14144_v32  ;;  %16258 = vst [vmem:[#allocation63_spill] sm:$0xff] %v14147_v3 }
 0x395   :  { %16259 = vst [vmem:[#allocation64_spill] sm:$0xff] %v14150_v39 }
 0x396   :  { %v699_v0 = vpop.f32.mrb[8].mxu1 }
 0x397   :  { %v14153_v5 = vadd.f32 %v14104_v48, %v699_v0  ;;  %v701_v8 = vpop.f32.mrb[9].mxu1 }
 0x398   :  { %v14156_v47 = vadd.f32 %v14109_v56, %v701_v8  ;;  %v703_v44 = vpop.f32.mrb[10].mxu1  ;;  %v484_v8 = vld [vmem:[%s16106_s9] sm:$0x7] }
 0x399   :  { %16260 = vst [vmem:[#allocation65_spill] sm:$0xff] %v14153_v5  ;;  %v14159_v41 = vadd.f32 %v14104_v48, %v703_v44  ;;  %v705_v6 = vpop.f32.mrb[11].mxu1 }
 0x39a   :  { %16261 = vst [vmem:[#allocation66_spill] sm:$0xff] %v14156_v47  ;;  %v14162_v26 = vadd.f32 %v14109_v56, %v705_v6 }
 0x39b   :  { %16262 = vst [vmem:[#allocation67_spill] sm:$0xff] %v14159_v41 }
 0x39c   :  { %16263 = vst [vmem:[#allocation68_spill] sm:$0xff] %v14162_v26  ;;  %v14180_v26 = vrot.slane %v484_v8, %v14094_v28 }
 0x39e   :  { %v709_v3 = vpop.f32.mrb[12].mxu1 }
 0x39f   :  { %v14165_v31 = vadd.f32 %v14104_v48, %v709_v3  ;;  %v711_v39 = vpop.f32.mrb[13].mxu1  ;;  %v14183_v3 = vrot.slane %v484_v8, %v14089_v17 }
 0x3a0   :  { %v14168_v0 = vadd.f32 %v14109_v56, %v711_v39  ;;  %v713_v5 = vpop.f32.mrb[14].mxu1  ;;  %v14186_v39 = vrot.slane %v484_v8, %v14096_v29 }
 0x3a1   :  { %16264 = vst [vmem:[#allocation69_spill] sm:$0xff] %v14165_v31  ;;  %v14174_v44 = vadd.f32 %v14104_v48, %v713_v5  ;;  %v715_v41 = vpop.f32.mrb[15].mxu1 }
 0x3a2   :  { %16265 = vst [vmem:[#allocation70_spill] sm:$0xff] %v14168_v0  ;;  %v14177_v6 = vadd.f32 %v14109_v56, %v715_v41 }
 0x3a3   :  { %16266 = vst [vmem:[#allocation71_spill] sm:$0xff] %v14174_v44 }
 0x3a4   :  { %16267 = vst [vmem:[#allocation72_spill] sm:$0xff] %v14177_v6 }
 0x3a6   :  { %v1017_v0 = vpop.f32.mrb[16].mxu1 }
 0x3a7   :  { %v14189_v31 = vadd.f32 %v14180_v26, %v1017_v0  ;;  %v9148_v47 = vpop.f32.mrb[16].mxu0  ;;  %v1019_v5 = vpop.f32.mrb[17].mxu1 }
 0x3a8   :  { %v14192_v44 = vadd.f32 %v9148_v47, %v14183_v3  ;;  %v14195_v41 = vadd.f32 %v14186_v39, %v1019_v5  ;;  %v1090_v28 = vpop.f32.mrb[17].mxu0  ;;  %v1021_v6 = vpop.f32.mrb[18].mxu1 }
 0x3a9   :  { %16268 = vst [vmem:[#allocation73_spill] sm:$0xff] %v14189_v31  ;;  %v14198_v17 = vadd.f32 %v14183_v3, %v1090_v28  ;;  %v14201_v8 = vadd.f32 %v14180_v26, %v1021_v6  ;;  %v9149_v29 = vpop.f32.mrb[18].mxu0  ;;  %v1023_v32 = vpop.f32.mrb[19].mxu1 }
 0x3aa   :  { %16269 = vst [vmem:[#allocation74_spill] sm:$0xff] %v14192_v44  ;;  %16270 = vst [vmem:[#allocation75_spill] sm:$0xff] %v14195_v41  ;;  %v14204_v0 = vadd.f32 %v9149_v29, %v14183_v3  ;;  %v14207_v31 = vadd.f32 %v14186_v39, %v1023_v32  ;;  %v1093_v47 = vpop.f32.mrb[19].mxu0 }
 0x3ab   :  { %16271 = vst [vmem:[#allocation76_spill] sm:$0xff] %v14198_v17  ;;  %16272 = vst [vmem:[#allocation77_spill] sm:$0xff] %v14201_v8  ;;  %v14210_v5 = vadd.f32 %v14183_v3, %v1093_v47 }
 0x3ac   :  { %16273 = vst [vmem:[#allocation78_spill] sm:$0xff] %v14204_v0  ;;  %16274 = vst [vmem:[#allocation79_spill] sm:$0xff] %v14207_v31 }
 0x3ad   :  { %16275 = vst [vmem:[#allocation80_spill] sm:$0xff] %v14210_v5 }
 0x3ae   :  { %v1027_v41 = vpop.f32.mrb[20].mxu1 }
 0x3af   :  { %v14213_v44 = vadd.f32 %v14180_v26, %v1027_v41  ;;  %v9152_v28 = vpop.f32.mrb[20].mxu0  ;;  %v1029_v17 = vpop.f32.mrb[21].mxu1 }
 0x3b0   :  { %v14216_v6 = vadd.f32 %v9152_v28, %v14183_v3  ;;  %v14219_v8 = vadd.f32 %v14186_v39, %v1029_v17  ;;  %v1106_v29 = vpop.f32.mrb[21].mxu0  ;;  %v1031_v0 = vpop.f32.mrb[22].mxu1 }
 0x3b1   :  { %16276 = vst [vmem:[#allocation81_spill] sm:$0xff] %v14213_v44  ;;  %v14222_v32 = vadd.f32 %v14183_v3, %v1106_v29  ;;  %v14225_v47 = vadd.f32 %v14180_v26, %v1031_v0  ;;  %v14227_v5 = vpop.f32.mrb[22].mxu0  ;;  %v1033_v41 = vpop.f32.mrb[23].mxu1 }
 0x3b2   :  { %16277 = vst [vmem:[#allocation82_spill] sm:$0xff] %v14216_v6  ;;  %16278 = vst [vmem:[#allocation83_spill] sm:$0xff] %v14219_v8  ;;  %v14230_v31 = vadd.f32 %v14186_v39, %v1033_v41  ;;  %v1109_v44 = vpop.f32.mrb[23].mxu0 }
 0x3b3   :  { %16279 = vst [vmem:[#allocation84_spill] sm:$0xff] %v14222_v32  ;;  %16280 = vst [vmem:[#allocation85_spill] sm:$0xff] %v14225_v47  ;;  %v14233_v28 = vadd.f32 %v14183_v3, %v1109_v44 }
 0x3b4   :  { %16281 = vst [vmem:[#allocation86_spill] sm:$0xff] %v14230_v31 }
 0x3b5   :  { %16282 = vst [vmem:[#allocation87_spill] sm:$0xff] %v14233_v28 }
 0x3b6   :  { %v1037_v17 = vpop.f32.mrb[24].mxu1 }
 0x3b7   :  { %v14236_v8 = vadd.f32 %v14180_v26, %v1037_v17  ;;  %v1039_v6 = vpop.f32.mrb[25].mxu1 }
 0x3b8   :  { %v14239_v29 = vadd.f32 %v14186_v39, %v1039_v6  ;;  %v1041_v0 = vpop.f32.mrb[26].mxu1  ;;  %v799_v6 = vadd.f32 %v14104_v48, %v14101_v38 }
 0x3b9   :  { %16283 = vst [vmem:[#allocation88_spill] sm:$0xff] %v14236_v8  ;;  %v14242_v47 = vadd.f32 %v14180_v26, %v1041_v0  ;;  %v1043_v32 = vpop.f32.mrb[27].mxu1  ;;  %v800_v0 = vadd.f32 %v14109_v56, %v14106_v52  ;;  %v801_v52 = vadd.f32 %v14099_v33, %v14114_v16 }
 0x3ba   :  { %16284 = vst [vmem:[#allocation89_spill] sm:$0xff] %v14239_v29  ;;  %v14245_v41 = vadd.f32 %v14186_v39, %v1043_v32 }
 0x3bb   :  { %16285 = vst [vmem:[#allocation90_spill] sm:$0xff] %v14242_v47 }
 0x3bc   :  { %16286 = vst [vmem:[#allocation91_spill] sm:$0xff] %v14245_v41 }
 0x3be   :  { %v1047_v31 = vpop.f32.mrb[28].mxu1 }
 0x3bf   :  { %v14248_v44 = vadd.f32 %v14180_v26, %v1047_v31  ;;  %v1049_v28 = vpop.f32.mrb[29].mxu1 }
 0x3c0   :  { %v14251_v17 = vadd.f32 %v14186_v39, %v1049_v28  ;;  %v1051_v8 = vpop.f32.mrb[30].mxu1 }
 0x3c1   :  { %16287 = vst [vmem:[#allocation92_spill] sm:$0xff] %v14248_v44  ;;  %v1053_v30 = vpop.f32.mrb[31].mxu1 }
 0x3c2   :  { %16288 = vst [vmem:[#allocation93_spill] sm:$0xff] %v14251_v17  ;;  %v14257_v17 = vld [vmem:[#allocation7] ss:$0 sm:$0xff] }
 0x3c3   :  { %16289 = vst [vmem:[#allocation94_spill] sm:$0xff] %v14257_v17 }
 0x3c6   :  { %v1337_v29 = vpop.f32.mrb[32].mxu1 }
 0x3c7   :  { %v1412_v47 = vadd.f32 %v1337_v29, %v799_v6  ;;  %v1339_v32 = vpop.f32.mrb[33].mxu1  ;;  %v1158_v29 = vadd.f32 %v14180_v26, %v1051_v8 }
 0x3c8   :  { %v1419_v41 = vadd.f32 %v1339_v32, %v800_v0  ;;  %v1408_v22 = vpop.f32.mrb[24].mxu0 }
 0x3c9   :  { %v8257_v9 = vmul.f32 -1.442695, %v1412_v47  ;;  %v9188_v31 = vpop.f32.mrb[25].mxu0  ;;  %v1426_v38 = vadd.f32 %v14257_v17, %v1408_v22 }
 0x3ca   :  { %v8258_v44 = vmul.f32 -1.442695, %v1419_v41 }
 0x3cb   :  { %12608 = vpow2.f32 %v8257_v9  ;;  %v1159_v9 = vadd.f32 %v14186_v39, %v1053_v30  ;;  %v475_v30 = vld [vmem:[%s16290_s27] sm:$0xff] }
 0x3cc   :  { %12610 = vpow2.f32 %v8258_v44 }
 0x3d5   :  { %v12609_v21 = vpop.eup %12608 }
 0x3d6   :  { %v1416_v28 = vadd.f32 1.0, %v12609_v21  ;;  %v12611_v48 = vpop.eup %12610 }
 0x3d7   :  { %v1423_v47 = vadd.f32 1.0, %v12611_v48  ;;  %v14275_v48 = vld [vmem:[#allocation11] ss:$0 sm:$0xff] }
 0x3d8   :  { %12612 = vrcp.f32 %v1416_v28 }
 0x3e2   :  { %v12613_v13 = vpop.eup %12612 }
 0x3e3   :  { %v1427_v56 = vmul.f32 %v12613_v13, %v1426_v38 }
 0x3e5   :  { %v1428_v6 = vadd.f32 %v1427_v56, %v801_v52  ;;  %v16293_v52 = vmov 0.0  }
 0x3e6   :  { %v1501_v41 = vpop.f32.mrb[34].mxu1 }
 0x3e7   :  { %12614 = vtanh.f32 %v1428_v6  ;;  %v1576_v21 = vadd.f32 %v1501_v41, %v1158_v29  ;;  %v1503_v44 = vpop.f32.mrb[35].mxu1  ;;  %v1160_v6 = vadd.f32 %v14227_v5, %v14183_v3 }
 0x3e8   :  { %v1583_v0 = vadd.f32 %v1503_v44, %v1159_v9  ;;  %v1572_v32 = vpop.f32.mrb[26].mxu0  ;;  %12616 = vrcp.f32 %v1423_v47 }
 0x3e9   :  { %v8259_v22 = vmul.f32 -1.442695, %v1576_v21  ;;  %v9223_v31 = vpop.f32.mrb[27].mxu0  ;;  %v1590_v56 = vadd.f32 %v14275_v48, %v1572_v32  ;;  %v482_v32 = vld [vmem:[%s16290_s27 + $0x38] sm:$0xff] }
 0x3ea   :  { %v8260_v13 = vmul.f32 -1.442695, %v1583_v0 }
 0x3eb   :  { %12618 = vpow2.f32 %v8259_v22 }
 0x3ec   :  { %12620 = vpow2.f32 %v8260_v13  ;;  %v16297_v13 = vld [vmem:[#allocation42_spill] sm:$0xff] }
 0x3f1   :  { %v12615_v28 = vpop.eup %12614 }
 0x3f2   :  { %v1430_v17 = vsub.f32 0.0, %v12615_v28  ;;  %v12617_v33 = vpop.eup %12616 }
 0x3f4   :  { %v1431_v16 = vmul.f32 %v12617_v33, %v1430_v17  ;;  %v16292_v17 = vmov 0.0|0.0   ;;  %v16296_v33 = vld [vmem:[#allocation40_spill] sm:$0xff] }
 0x3f5   :  { %v12619_v26 = vpop.eup %12618 }
 0x3f6   :  { %v1432_v39 = vadd.f32 %v12615_v28, %v1431_v16  ;;  %v1580_v8 = vadd.f32 1.0, %v12619_v26  ;;  %v12621_v29 = vpop.eup %12620  ;;  %v16295_v28 = vld [vmem:[#allocation39_spill] sm:$0xff]  ;;  %v16298_v16 = vld [vmem:[#allocation41_spill] sm:$0xff] }
 0x3f7   :  { %v1587_v41 = vadd.f32 1.0, %v12621_v29  ;;  %v16299_v26 = vld [vmem:[#allocation43_spill] sm:$0xff] }
 0x3f8   :  { %12622 = vrcp.f32 %v1580_v8  ;;  %v14267_v38 = vmul.f32 %v1432_v39, %v475_v30  ;;  %v16300_v30 = vld [vmem:[#allocation45_spill] sm:$0xff]  ;;  %v16301_v39 = vld [vmem:[#allocation44_spill] sm:$0xff]  ;;  %v16302_v8 = vld [vmem:[#allocation46_spill] sm:$0xff] }
 0x3f9   :  { %v16304_v29 = vld [vmem:[#allocation47_spill] sm:$0xff] }
 0x3fa   :  { %16291 = vst [vmem:[#allocation95_spill] sm:$0xff] %v14267_v38  ;;  %1664 = vmatmul.mubr.f32.vlgmr.msra.gmra.mrb[36].mxu1 %v14267_v38  ;;  %9257 = vmatmul.mubr.f32.vlgmr.msra.gmra.mrb[28].mxu0 %v14267_v38 }
 0x3fb   :  { %10611 = vmatpush1.bf16.msra.mxu1 %v13965_v58  ;;  %10642 = vmatpush3.bf16.msra.mxu0 %v13971_v4 }
 0x3fc   :  { %10613 = vmatprep.subr.bf16.mxu1 %v13968_v59  ;;  %10643 = vmatprep.subr.bf16.mxu0 %v16292_v17 }
 0x3fd   :  { %1828 = vmatprep.mubr.f32.mxu1 %v16293_v52  ;;  %9291 = vmatprep.mubr.msk.f32.mxu0 %vm13368_vm12, %v16293_v52 }
 0x3ff   :  { %10615 = vmatpush1.bf16.msra.mxu1 %v13976_v10  ;;  %10645 = vmatpush3.bf16.msra.mxu0 %v13984_v19 }
 0x400   :  { %10617 = vmatprep.subr.bf16.mxu1 %v13980_v11  ;;  %10646 = vmatprep.subr.bf16.mxu0 %v16292_v17 }
 0x402   :  { %v12623_v47 = vpop.eup %12622 }
 0x403   :  { %v1591_v9 = vmul.f32 %v12623_v47, %v1590_v56  ;;  %10619 = vmatpush1.bf16.msra.mxu1 %v13990_v24  ;;  %10648 = vmatpush3.bf16.msra.mxu0 %v13996_v34  ;;  %v16303_v56 = vld [vmem:[#allocation48_spill] sm:$0xff] }
 0x404   :  { %10621 = vmatprep.subr.bf16.mxu1 %v13993_v25  ;;  %10649 = vmatprep.subr.bf16.mxu0 %v16292_v17 }
 0x405   :  { %v1592_v21 = vadd.f32 %v1591_v9, %v1160_v6  ;;  %v16305_v9 = vld [vmem:[#allocation53_spill] sm:$0xff] }
 0x407   :  { %12624 = vtanh.f32 %v1592_v21  ;;  %10623 = vmatpush1.bf16.msra.mxu1 %v14000_v40  ;;  %10651 = vmatpush3.bf16.msra.mxu0 %v14006_v53 }
 0x408   :  { %10625 = vmatprep.subr.bf16.mxu1 %v14003_v43  ;;  %10652 = vmatprep.subr.bf16.mxu0 %v16292_v17  ;;  %12626 = vrcp.f32 %v1587_v41 }
 0x40b   :  { %10627 = vmatpush1.bf16.msra.mxu1 %v14010_v62  ;;  %10654 = vmatpush3.bf16.msra.mxu0 %v14016_v15 }
 0x40c   :  { %10629 = vmatprep.subr.bf16.mxu1 %v14013_v63  ;;  %10655 = vmatprep.subr.bf16.mxu0 %v16292_v17 }
 0x40f   :  { %10631 = vmatpush1.bf16.msra.mxu1 %v14020_v20  ;;  %10657 = vmatpush3.bf16.msra.mxu0 %v14026_v37 }
 0x410   :  { %10633 = vmatprep.subr.bf16.mxu1 %v14023_v23  ;;  %10658 = vmatprep.subr.bf16.mxu0 %v16292_v17 }
 0x411   :  { %v12625_v3 = vpop.eup %12624 }
 0x412   :  { %v1594_v5 = vsub.f32 0.0, %v12625_v3  ;;  %v12627_v44 = vpop.eup %12626 }
 0x413   :  { %10635 = vmatpush1.bf16.msra.mxu1 %v14030_v49  ;;  %10660 = vmatpush3.bf16.msra.mxu0 %v14036_v60 }
 0x414   :  { %v1595_v0 = vmul.f32 %v12627_v44, %v1594_v5  ;;  %10637 = vmatprep.subr.bf16.mxu1 %v14033_v50  ;;  %10661 = vmatprep.subr.bf16.mxu0 %v16292_v17  ;;  %v16306_v5 = vld [vmem:[#allocation54_spill] sm:$0xff] }
 0x416   :  { %v1596_v22 = vadd.f32 %v12625_v3, %v1595_v0 }
 0x417   :  { %10639 = vmatpush1.bf16.msra.mxu1 %v14040_v57  ;;  %10663 = vmatpush3.bf16.msra.mxu0 %v14044_v14 }
 0x418   :  { %v14312_v31 = vmul.f32 %v1596_v22, %v482_v32  ;;  %10665 = vmatprep.subr.bf16.mxu1 %v13871_v27  ;;  %10696 = vmatprep.subr.bf16.mxu0 %v16292_v17 }
 0x41a   :  { %16294 = vst [vmem:[#allocation96_spill] sm:$0xff] %v14312_v31  ;;  %1829 = vmatmul.mubr.f32.vlgmr.msra.gmra.mrb[38].mxu1 %v14312_v31  ;;  %9292 = vmatmul.mubr.f32.vlgmr.msra.gmra.mrb[30].mxu0 %v14312_v31 }
 0x41b   :  { %10667 = vmatpush1.bf16.msra.mxu1 %v13873_v35  ;;  %10698 = vmatpush3.bf16.msra.mxu0 %v13879_v42 }
 0x41c   :  { %10669 = vmatprep.subr.bf16.mxu1 %v13876_v36  ;;  %10699 = vmatprep.subr.bf16.mxu0 %v16292_v17 }
 0x41d   :  { %1993 = vmatprep.mubr.f32.mxu1 %v16293_v52  ;;  %9326 = vmatprep.mubr.msk.f32.mxu0 %vm13368_vm12, %v16293_v52 }
 0x41f   :  { %10671 = vmatpush1.bf16.msra.mxu1 %v13884_v45  ;;  %10701 = vmatpush3.bf16.msra.mxu0 %v13892_v51 }
 0x420   :  { %10673 = vmatprep.subr.bf16.mxu1 %v13888_v46  ;;  %10702 = vmatprep.subr.bf16.mxu0 %v16292_v17 }
 0x423   :  { %10675 = vmatpush1.bf16.msra.mxu1 %v13896_v54  ;;  %10704 = vmatpush3.bf16.msra.mxu0 %v13902_v61 }
 0x424   :  { %10677 = vmatprep.subr.bf16.mxu1 %v13899_v55  ;;  %10705 = vmatprep.subr.bf16.mxu0 %v16292_v17 }
 0x427   :  { %10679 = vmatpush1.bf16.msra.mxu1 %v13908_v1  ;;  %10707 = vmatpush3.bf16.msra.mxu0 %v13915_v7 }
 0x428   :  { %10681 = vmatprep.subr.bf16.mxu1 %v13912_v2  ;;  %10708 = vmatprep.subr.bf16.mxu0 %v16292_v17 }
 0x42b   :  { %10683 = vmatpush1.bf16.msra.mxu1 %v13921_v12  ;;  %10710 = vmatpush3.bf16.msra.mxu0 %v13927_v18 }
 0x42c   :  { %10685 = vmatprep.subr.bf16.mxu1 %v16295_v28  ;;  %10711 = vmatprep.subr.bf16.mxu0 %v16292_v17 }
 0x42f   :  { %10687 = vmatpush1.bf16.msra.mxu1 %v16296_v33  ;;  %10713 = vmatpush3.bf16.msra.mxu0 %v16297_v13 }
 0x430   :  { %10689 = vmatprep.subr.bf16.mxu1 %v16298_v16  ;;  %10714 = vmatprep.subr.bf16.mxu0 %v16292_v17  ;;  %v16308_v16 = vld [vmem:[#allocation56_spill] sm:$0xff] }
 0x433   :  { %10691 = vmatpush1.bf16.msra.mxu1 %v16299_v26  ;;  %10716 = vmatpush3.bf16.msra.mxu0 %v16300_v30 }
 0x434   :  { %10693 = vmatprep.subr.bf16.mxu1 %v16301_v39  ;;  %10717 = vmatprep.subr.bf16.mxu0 %v16292_v17 }
 0x437   :  { %10695 = vmatpush1.bf16.msra.mxu1 %v16302_v8  ;;  %10719 = vmatpush3.bf16.msra.mxu0 %v16303_v56  ;;  %v16307_v8 = vld [vmem:[#allocation94_spill] sm:$0xff] }
 0x438   :  { %10721 = vmatprep.subr.bf16.mxu1 %v16304_v29  ;;  %10752 = vmatprep.subr.bf16.mxu0 %v16292_v17 }
 0x4cd   :  { %v1665_v47 = vpop.f32.mrb[36].mxu1  ;;  %v1736_v6 = vpop.f32.mrb[28].mxu0 }
 0x4ce   :  { %v1740_v41 = vadd.f32 %v1665_v47, %v16305_v9  ;;  %v1667_v21 = vpop.f32.mrb[37].mxu1  ;;  %v9258_v3 = vpop.f32.mrb[29].mxu0  ;;  %v1754_v29 = vadd.f32 %v16307_v8, %v1736_v6 }
 0x4cf   :  { %v1747_v44 = vadd.f32 %v1667_v21, %v16306_v5  ;;  %v16309_v3 = vld [vmem:[#allocation92_spill] sm:$0xff] }
 0x4d0   :  { %v8261_v0 = vmul.f32 -1.442695, %v1740_v41 }
 0x4d1   :  { %v8262_v32 = vmul.f32 -1.442695, %v1747_v44  ;;  %v16310_v44 = vld [vmem:[#allocation93_spill] sm:$0xff] }
 0x4d2   :  { %12628 = vpow2.f32 %v8261_v0 }
 0x4d3   :  { %12630 = vpow2.f32 %v8262_v32 }
 0x4dc   :  { %v12629_v22 = vpop.eup %12628 }
 0x4dd   :  { %v1744_v39 = vadd.f32 1.0, %v12629_v22  ;;  %v12631_v56 = vpop.eup %12630 }
 0x4de   :  { %v1751_v33 = vadd.f32 1.0, %v12631_v56 }
 0x4df   :  { %12632 = vrcp.f32 %v1744_v39 }
 0x4e9   :  { %v12633_v30 = vpop.eup %12632 }
 0x4ea   :  { %v1755_v26 = vmul.f32 %v12633_v30, %v1754_v29 }
 0x4ec   :  { %v1756_v13 = vadd.f32 %v1755_v26, %v16308_v16 }
 0x4ed   :  { %v1830_v47 = vpop.f32.mrb[38].mxu1  ;;  %v1901_v9 = vpop.f32.mrb[30].mxu0 }
 0x4ee   :  { %12634 = vtanh.f32 %v1756_v13  ;;  %v1905_v21 = vadd.f32 %v1830_v47, %v16309_v3  ;;  %v1832_v41 = vpop.f32.mrb[39].mxu1  ;;  %v9293_v5 = vpop.f32.mrb[31].mxu0  ;;  %v476_v13 = vld [vmem:[%s16290_s27 + $0x8] sm:$0xff] }
 0x4ef   :  { %v1912_v0 = vadd.f32 %v1832_v41, %v16310_v44  ;;  %12636 = vrcp.f32 %v1751_v33  ;;  %v1919_v41 = vadd.f32 %v14275_v48, %v1901_v9 }
 0x4f0   :  { %v8263_v32 = vmul.f32 -1.442695, %v1905_v21 }
 0x4f1   :  { %v8264_v30 = vmul.f32 -1.442695, %v1912_v0  ;;  %v16312_v0 = vld [vmem:[#allocation82_spill] sm:$0xff] }
 0x4f2   :  { %12638 = vpow2.f32 %v8263_v32 }
 0x4f3   :  { %12640 = vpow2.f32 %v8264_v30 }
 0x4f8   :  { %v12635_v39 = vpop.eup %12634 }
 0x4f9   :  { %v1758_v6 = vsub.f32 %v14267_v38, %v12635_v39  ;;  %v12637_v22 = vpop.eup %12636 }
 0x4fb   :  { %v1759_v29 = vmul.f32 %v12637_v22, %v1758_v6 }
 0x4fc   :  { %v12639_v16 = vpop.eup %12638 }
 0x4fd   :  { %v1760_v26 = vadd.f32 %v12635_v39, %v1759_v29  ;;  %v1909_v56 = vadd.f32 1.0, %v12639_v16  ;;  %v12641_v21 = vpop.eup %12640  ;;  %v481_v16 = vld [vmem:[%s16290_s27 + $0x30] sm:$0xff] }
 0x4fe   :  { %v1916_v39 = vadd.f32 1.0, %v12641_v21  ;;  %v16316_v21 = vld [vmem:[#allocation41_spill] sm:$0xff] }
 0x4ff   :  { %v1761_v47 = vsub.f32 %v1760_v26, %v14267_v38  ;;  %12642 = vrcp.f32 %v1909_v56 }
 0x501   :  { %v1762_v33 = vmul.f32 %v1761_v47, %v476_v13  ;;  %v16314_v47 = vld [vmem:[#allocation40_spill] sm:$0xff] }
 0x503   :  { %v14365_v3 = vadd.f32 %v1762_v33, %v14267_v38  ;;  %v16315_v33 = vld [vmem:[#allocation42_spill] sm:$0xff] }
 0x505   :  { %16311 = vst [vmem:[#allocation39_spill] sm:$0xff] %v14365_v3  ;;  %1994 = vmatmul.mubr.f32.vlgmr.msra.gmra.mrb[40].mxu1 %v14365_v3  ;;  %9327 = vmatmul.mubr.f32.vlgmr.msra.gmra.mrb[32].mxu0 %v14365_v3 }
 0x506   :  { %10723 = vmatpush1.bf16.msra.mxu1 %v13965_v58  ;;  %10754 = vmatpush3.bf16.msra.mxu0 %v13971_v4 }
 0x507   :  { %10725 = vmatprep.subr.bf16.mxu1 %v13968_v59  ;;  %10755 = vmatprep.subr.bf16.mxu0 %v16292_v17 }
 0x508   :  { %2158 = vmatprep.mubr.f32.mxu1 %v16293_v52  ;;  %9361 = vmatprep.mubr.msk.f32.mxu0 %vm13368_vm12, %v16293_v52 }
 0x509   :  { %v12643_v5 = vpop.eup %12642 }
 0x50a   :  { %v1920_v44 = vmul.f32 %v12643_v5, %v1919_v41  ;;  %10727 = vmatpush1.bf16.msra.mxu1 %v13976_v10  ;;  %10757 = vmatpush3.bf16.msra.mxu0 %v13984_v19  ;;  %v16317_v41 = vld [vmem:[#allocation43_spill] sm:$0xff]  ;;  %v16318_v5 = vld [vmem:[#allocation45_spill] sm:$0xff] }
 0x50b   :  { %10729 = vmatprep.subr.bf16.mxu1 %v13980_v11  ;;  %10758 = vmatprep.subr.bf16.mxu0 %v16292_v17 }
 0x50c   :  { %v1921_v32 = vadd.f32 %v1920_v44, %v16312_v0  ;;  %v16319_v44 = vld [vmem:[#allocation44_spill] sm:$0xff]  ;;  %v16320_v0 = vld [vmem:[#allocation46_spill] sm:$0xff] }
 0x50e   :  { %12644 = vtanh.f32 %v1921_v32  ;;  %10731 = vmatpush1.bf16.msra.mxu1 %v13990_v24  ;;  %10760 = vmatpush3.bf16.msra.mxu0 %v13996_v34  ;;  %v16321_v32 = vld [vmem:[#allocation48_spill] sm:$0xff] }
 0x50f   :  { %10733 = vmatprep.subr.bf16.mxu1 %v13993_v25  ;;  %10761 = vmatprep.subr.bf16.mxu0 %v16292_v17  ;;  %12646 = vrcp.f32 %v1916_v39  ;;  %v16322_v39 = vld [vmem:[#allocation47_spill] sm:$0xff] }
 0x512   :  { %10735 = vmatpush1.bf16.msra.mxu1 %v14000_v40  ;;  %10763 = vmatpush3.bf16.msra.mxu0 %v14006_v53 }
 0x513   :  { %10737 = vmatprep.subr.bf16.mxu1 %v14003_v43  ;;  %10764 = vmatprep.subr.bf16.mxu0 %v16292_v17 }
 0x516   :  { %10739 = vmatpush1.bf16.msra.mxu1 %v14010_v62  ;;  %10766 = vmatpush3.bf16.msra.mxu0 %v14016_v15 }
 0x517   :  { %10741 = vmatprep.subr.bf16.mxu1 %v14013_v63  ;;  %10767 = vmatprep.subr.bf16.mxu0 %v16292_v17 }
 0x518   :  { %v12645_v9 = vpop.eup %12644 }
 0x519   :  { %v1923_v6 = vsub.f32 %v14312_v31, %v12645_v9  ;;  %v12647_v22 = vpop.eup %12646 }
 0x51a   :  { %10743 = vmatpush1.bf16.msra.mxu1 %v14020_v20  ;;  %10769 = vmatpush3.bf16.msra.mxu0 %v14026_v37 }
 0x51b   :  { %v1924_v30 = vmul.f32 %v12647_v22, %v1923_v6  ;;  %10745 = vmatprep.subr.bf16.mxu1 %v14023_v23  ;;  %10770 = vmatprep.subr.bf16.mxu0 %v16292_v17  ;;  %v16323_v22 = vld [vmem:[#allocation57_spill] sm:$0xff] }
 0x51d   :  { %v1925_v29 = vadd.f32 %v12645_v9, %v1924_v30 }
 0x51e   :  { %10747 = vmatpush1.bf16.msra.mxu1 %v14030_v49  ;;  %10772 = vmatpush3.bf16.msra.mxu0 %v14036_v60 }
 0x51f   :  { %v1926_v26 = vsub.f32 %v1925_v29, %v14312_v31  ;;  %10749 = vmatprep.subr.bf16.mxu1 %v14033_v50  ;;  %10773 = vmatprep.subr.bf16.mxu0 %v16292_v17 }
 0x521   :  { %v1927_v56 = vmul.f32 %v1926_v26, %v481_v16  ;;  %v16324_v26 = vld [vmem:[#allocation58_spill] sm:$0xff] }
 0x522   :  { %10751 = vmatpush1.bf16.msra.mxu1 %v14040_v57  ;;  %10775 = vmatpush3.bf16.msra.mxu0 %v14044_v14 }
 0x523   :  { %v14410_v13 = vadd.f32 %v1927_v56, %v14312_v31  ;;  %10777 = vmatprep.subr.bf16.mxu1 %v13871_v27  ;;  %10808 = vmatprep.subr.bf16.mxu0 %v16292_v17 }
 0x525   :  { %16313 = vst [vmem:[#allocation53_spill] sm:$0xff] %v14410_v13  ;;  %2159 = vmatmul.mubr.f32.vlgmr.msra.gmra.mrb[42].mxu1 %v14410_v13  ;;  %9362 = vmatmul.mubr.f32.vlgmr.msra.gmra.mrb[34].mxu0 %v14410_v13 }
 0x526   :  { %10779 = vmatpush1.bf16.msra.mxu1 %v13873_v35  ;;  %10810 = vmatpush3.bf16.msra.mxu0 %v13879_v42 }
 0x527   :  { %10781 = vmatprep.subr.bf16.mxu1 %v13876_v36  ;;  %10811 = vmatprep.subr.bf16.mxu0 %v16292_v17 }
 0x528   :  { %2323 = vmatprep.mubr.f32.mxu1 %v16293_v52  ;;  %9396 = vmatprep.mubr.msk.f32.mxu0 %vm13368_vm12, %v16293_v52 }
 0x52a   :  { %10783 = vmatpush1.bf16.msra.mxu1 %v13884_v45  ;;  %10813 = vmatpush3.bf16.msra.mxu0 %v13892_v51 }
 0x52b   :  { %10785 = vmatprep.subr.bf16.mxu1 %v13888_v46  ;;  %10814 = vmatprep.subr.bf16.mxu0 %v16292_v17 }
 0x52e   :  { %10787 = vmatpush1.bf16.msra.mxu1 %v13896_v54  ;;  %10816 = vmatpush3.bf16.msra.mxu0 %v13902_v61 }
 0x52f   :  { %10789 = vmatprep.subr.bf16.mxu1 %v13899_v55  ;;  %10817 = vmatprep.subr.bf16.mxu0 %v16292_v17 }
 0x532   :  { %10791 = vmatpush1.bf16.msra.mxu1 %v13908_v1  ;;  %10819 = vmatpush3.bf16.msra.mxu0 %v13915_v7 }
 0x533   :  { %10793 = vmatprep.subr.bf16.mxu1 %v13912_v2  ;;  %10820 = vmatprep.subr.bf16.mxu0 %v16292_v17 }
 0x536   :  { %10795 = vmatpush1.bf16.msra.mxu1 %v13921_v12  ;;  %10822 = vmatpush3.bf16.msra.mxu0 %v13927_v18 }
 0x537   :  { %10797 = vmatprep.subr.bf16.mxu1 %v16295_v28  ;;  %10823 = vmatprep.subr.bf16.mxu0 %v16292_v17 }
 0x53a   :  { %10799 = vmatpush1.bf16.msra.mxu1 %v16314_v47  ;;  %10825 = vmatpush3.bf16.msra.mxu0 %v16315_v33 }
 0x53b   :  { %10801 = vmatprep.subr.bf16.mxu1 %v16316_v21  ;;  %10826 = vmatprep.subr.bf16.mxu0 %v16292_v17  ;;  %v16325_v21 = vld [vmem:[#allocation52_spill] sm:$0xff] }
 0x53e   :  { %10803 = vmatpush1.bf16.msra.mxu1 %v16317_v41  ;;  %10828 = vmatpush3.bf16.msra.mxu0 %v16318_v5 }
 0x53f   :  { %10805 = vmatprep.subr.bf16.mxu1 %v16319_v44  ;;  %10829 = vmatprep.subr.bf16.mxu0 %v16292_v17 }
 0x542   :  { %10807 = vmatpush1.bf16.msra.mxu1 %v16320_v0  ;;  %10831 = vmatpush3.bf16.msra.mxu0 %v16321_v32 }
 0x543   :  { %10833 = vmatprep.subr.bf16.mxu1 %v16322_v39  ;;  %10864 = vmatprep.subr.bf16.mxu0 %v16292_v17 }
 0x5d8   :  { %v1995_v9 = vpop.f32.mrb[40].mxu1  ;;  %v2066_v6 = vpop.f32.mrb[32].mxu0 }
 0x5d9   :  { %v2070_v30 = vadd.f32 %v1995_v9, %v16323_v22  ;;  %v1997_v29 = vpop.f32.mrb[41].mxu1  ;;  %v9328_v16 = vpop.f32.mrb[33].mxu0  ;;  %v2084_v39 = vadd.f32 %v16307_v8, %v2066_v6 }
 0x5da   :  { %v2077_v56 = vadd.f32 %v1997_v29, %v16324_v26  ;;  %v16326_v16 = vld [vmem:[#allocation90_spill] sm:$0xff]  ;;  %v16327_v26 = vld [vmem:[#allocation91_spill] sm:$0xff] }
 0x5db   :  { %v8265_v31 = vmul.f32 -1.442695, %v2070_v30 }
 0x5dc   :  { %v8266_v38 = vmul.f32 -1.442695, %v2077_v56 }
 0x5dd   :  { %12648 = vpow2.f32 %v8265_v31 }
 0x5de   :  { %12650 = vpow2.f32 %v8266_v38 }
 0x5e7   :  { %v12649_v44 = vpop.eup %12648 }
 0x5e8   :  { %v2074_v5 = vadd.f32 1.0, %v12649_v44  ;;  %v12651_v32 = vpop.eup %12650 }
 0x5e9   :  { %v2081_v47 = vadd.f32 1.0, %v12651_v32 }
 0x5ea   :  { %12652 = vrcp.f32 %v2074_v5 }
 0x5f4   :  { %v12653_v0 = vpop.eup %12652 }
 0x5f5   :  { %v2085_v41 = vmul.f32 %v12653_v0, %v2084_v39 }
 0x5f7   :  { %v2086_v33 = vadd.f32 %v2085_v41, %v16325_v21 }
 0x5f8   :  { %v2160_v9 = vpop.f32.mrb[42].mxu1  ;;  %v2231_v22 = vpop.f32.mrb[34].mxu0 }
 0x5f9   :  { %12654 = vtanh.f32 %v2086_v33  ;;  %v2235_v29 = vadd.f32 %v2160_v9, %v16326_v16  ;;  %v2162_v30 = vpop.f32.mrb[43].mxu1  ;;  %v9363_v31 = vpop.f32.mrb[35].mxu0  ;;  %v14461_v33 = vld [vmem:[%s16290_s27 + $0x10] sm:$0xff] }
 0x5fa   :  { %v2242_v56 = vadd.f32 %v2162_v30, %v16327_v26  ;;  %12656 = vrcp.f32 %v2081_v47  ;;  %16328 = vst [vmem:[#allocation54_spill] sm:$0xff] %v14461_v33  ;;  %v2249_v30 = vadd.f32 %v14275_v48, %v2231_v22 }
 0x5fb   :  { %v8267_v38 = vmul.f32 -1.442695, %v2235_v29 }
 0x5fc   :  { %v8268_v0 = vmul.f32 -1.442695, %v2242_v56  ;;  %v16330_v56 = vld [vmem:[#allocation87_spill] sm:$0xff] }
 0x5fd   :  { %12658 = vpow2.f32 %v8267_v38 }
 0x5fe   :  { %12660 = vpow2.f32 %v8268_v0 }
 0x603   :  { %v12655_v5 = vpop.eup %12654 }
 0x604   :  { %v2088_v44 = vsub.f32 %v14365_v3, %v12655_v5  ;;  %v12657_v6 = vpop.eup %12656 }
 0x606   :  { %v2089_v39 = vmul.f32 %v12657_v6, %v2088_v44 }
 0x607   :  { %v12659_v21 = vpop.eup %12658 }
 0x608   :  { %v2090_v41 = vadd.f32 %v12655_v5, %v2089_v39  ;;  %v2239_v32 = vadd.f32 1.0, %v12659_v21  ;;  %v12661_v29 = vpop.eup %12660  ;;  %v14505_v21 = vld [vmem:[%s16290_s27 + $0x28] sm:$0xff] }
 0x609   :  { %v2246_v5 = vadd.f32 1.0, %v12661_v29  ;;  %16331 = vst [vmem:[#allocation56_spill] sm:$0xff] %v14505_v21  ;;  %v16334_v29 = vld [vmem:[#allocation42_spill] sm:$0xff] }
 0x60a   :  { %v2091_v9 = vsub.f32 %v2090_v41, %v14365_v3  ;;  %12662 = vrcp.f32 %v2239_v32 }
 0x60c   :  { %v2092_v47 = vmul.f32 %v2091_v9, %v14461_v33 }
 0x60e   :  { %v14466_v16 = vadd.f32 %v2092_v47, %v14365_v3  ;;  %v16333_v47 = vld [vmem:[#allocation40_spill] sm:$0xff] }
 0x610   :  { %16329 = vst [vmem:[#allocation94_spill] sm:$0xff] %v14466_v16  ;;  %2324 = vmatmul.mubr.f32.vlgmr.msra.gmra.mrb[44].mxu1 %v14466_v16  ;;  %9397 = vmatmul.mubr.f32.vlgmr.msra.gmra.mrb[36].mxu0 %v14466_v16 }
 0x611   :  { %10835 = vmatpush1.bf16.msra.mxu1 %v13965_v58  ;;  %10866 = vmatpush3.bf16.msra.mxu0 %v13971_v4 }
 0x612   :  { %10837 = vmatprep.subr.bf16.mxu1 %v13968_v59  ;;  %10867 = vmatprep.subr.bf16.mxu0 %v16292_v17 }
 0x613   :  { %2488 = vmatprep.mubr.f32.mxu1 %v16293_v52  ;;  %9431 = vmatprep.mubr.msk.f32.mxu0 %vm13368_vm12, %v16293_v52 }
 0x614   :  { %v12663_v31 = vpop.eup %12662 }
 0x615   :  { %v2250_v26 = vmul.f32 %v12663_v31, %v2249_v30  ;;  %10839 = vmatpush1.bf16.msra.mxu1 %v13976_v10  ;;  %10869 = vmatpush3.bf16.msra.mxu0 %v13984_v19  ;;  %v16335_v30 = vld [vmem:[#allocation41_spill] sm:$0xff]  ;;  %v16336_v31 = vld [vmem:[#allocation43_spill] sm:$0xff] }
 0x616   :  { %10841 = vmatprep.subr.bf16.mxu1 %v13980_v11  ;;  %10870 = vmatprep.subr.bf16.mxu0 %v16292_v17 }
 0x617   :  { %v2251_v38 = vadd.f32 %v2250_v26, %v16330_v56  ;;  %v16337_v26 = vld [vmem:[#allocation45_spill] sm:$0xff]  ;;  %v16338_v56 = vld [vmem:[#allocation44_spill] sm:$0xff] }
 0x619   :  { %12664 = vtanh.f32 %v2251_v38  ;;  %10843 = vmatpush1.bf16.msra.mxu1 %v13990_v24  ;;  %10872 = vmatpush3.bf16.msra.mxu0 %v13996_v34  ;;  %v16339_v38 = vld [vmem:[#allocation46_spill] sm:$0xff] }
 0x61a   :  { %10845 = vmatprep.subr.bf16.mxu1 %v13993_v25  ;;  %10873 = vmatprep.subr.bf16.mxu0 %v16292_v17  ;;  %12666 = vrcp.f32 %v2246_v5  ;;  %v16340_v5 = vld [vmem:[#allocation48_spill] sm:$0xff] }
 0x61d   :  { %10847 = vmatpush1.bf16.msra.mxu1 %v14000_v40  ;;  %10875 = vmatpush3.bf16.msra.mxu0 %v14006_v53 }
 0x61e   :  { %10849 = vmatprep.subr.bf16.mxu1 %v14003_v43  ;;  %10876 = vmatprep.subr.bf16.mxu0 %v16292_v17 }
 0x621   :  { %10851 = vmatpush1.bf16.msra.mxu1 %v14010_v62  ;;  %10878 = vmatpush3.bf16.msra.mxu0 %v14016_v15 }
 0x622   :  { %10853 = vmatprep.subr.bf16.mxu1 %v14013_v63  ;;  %10879 = vmatprep.subr.bf16.mxu0 %v16292_v17 }
 0x623   :  { %v12665_v22 = vpop.eup %12664 }
 0x624   :  { %v2253_v44 = vsub.f32 %v14410_v13, %v12665_v22  ;;  %v12667_v6 = vpop.eup %12666 }
 0x625   :  { %10855 = vmatpush1.bf16.msra.mxu1 %v14020_v20  ;;  %10881 = vmatpush3.bf16.msra.mxu0 %v14026_v37 }
 0x626   :  { %v2254_v0 = vmul.f32 %v12667_v6, %v2253_v44  ;;  %10857 = vmatprep.subr.bf16.mxu1 %v14023_v23  ;;  %10882 = vmatprep.subr.bf16.mxu0 %v16292_v17 }
 0x628   :  { %v2255_v39 = vadd.f32 %v12665_v22, %v2254_v0  ;;  %v16341_v22 = vld [vmem:[#allocation47_spill] sm:$0xff]  ;;  %v16342_v0 = vld [vmem:[#allocation60_spill] sm:$0xff] }
 0x629   :  { %10859 = vmatpush1.bf16.msra.mxu1 %v14030_v49  ;;  %10884 = vmatpush3.bf16.msra.mxu0 %v14036_v60 }
 0x62a   :  { %v2256_v41 = vsub.f32 %v2255_v39, %v14410_v13  ;;  %10861 = vmatprep.subr.bf16.mxu1 %v14033_v50  ;;  %10885 = vmatprep.subr.bf16.mxu0 %v16292_v17 }
 0x62c   :  { %v2257_v32 = vmul.f32 %v2256_v41, %v14505_v21 }
 0x62d   :  { %10863 = vmatpush1.bf16.msra.mxu1 %v14040_v57  ;;  %10887 = vmatpush3.bf16.msra.mxu0 %v14044_v14 }
 0x62e   :  { %v14514_v9 = vadd.f32 %v2257_v32, %v14410_v13  ;;  %10889 = vmatprep.subr.bf16.mxu1 %v13871_v27  ;;  %10920 = vmatprep.subr.bf16.mxu0 %v16292_v17  ;;  %v16343_v13 = vld [vmem:[#allocation62_spill] sm:$0xff] }
 0x630   :  { %16332 = vst [vmem:[#allocation92_spill] sm:$0xff] %v14514_v9  ;;  %2489 = vmatmul.mubr.f32.vlgmr.msra.gmra.mrb[46].mxu1 %v14514_v9  ;;  %9432 = vmatmul.mubr.f32.vlgmr.msra.gmra.mrb[38].mxu0 %v14514_v9 }
 0x631   :  { %10891 = vmatpush1.bf16.msra.mxu1 %v13873_v35  ;;  %10922 = vmatpush3.bf16.msra.mxu0 %v13879_v42 }
 0x632   :  { %10893 = vmatprep.subr.bf16.mxu1 %v13876_v36  ;;  %10923 = vmatprep.subr.bf16.mxu0 %v16292_v17 }
 0x633   :  { %2653 = vmatprep.mubr.f32.mxu1 %v16293_v52  ;;  %9466 = vmatprep.mubr.msk.f32.mxu0 %vm13368_vm12, %v16293_v52 }
 0x635   :  { %10895 = vmatpush1.bf16.msra.mxu1 %v13884_v45  ;;  %10925 = vmatpush3.bf16.msra.mxu0 %v13892_v51 }
 0x636   :  { %10897 = vmatprep.subr.bf16.mxu1 %v13888_v46  ;;  %10926 = vmatprep.subr.bf16.mxu0 %v16292_v17 }
 0x639   :  { %10899 = vmatpush1.bf16.msra.mxu1 %v13896_v54  ;;  %10928 = vmatpush3.bf16.msra.mxu0 %v13902_v61 }
 0x63a   :  { %10901 = vmatprep.subr.bf16.mxu1 %v13899_v55  ;;  %10929 = vmatprep.subr.bf16.mxu0 %v16292_v17 }
 0x63d   :  { %10903 = vmatpush1.bf16.msra.mxu1 %v13908_v1  ;;  %10931 = vmatpush3.bf16.msra.mxu0 %v13915_v7 }
 0x63e   :  { %10905 = vmatprep.subr.bf16.mxu1 %v13912_v2  ;;  %10932 = vmatprep.subr.bf16.mxu0 %v16292_v17 }
 0x641   :  { %10907 = vmatpush1.bf16.msra.mxu1 %v13921_v12  ;;  %10934 = vmatpush3.bf16.msra.mxu0 %v13927_v18 }
 0x642   :  { %10909 = vmatprep.subr.bf16.mxu1 %v16295_v28  ;;  %10935 = vmatprep.subr.bf16.mxu0 %v16292_v17 }
 0x645   :  { %10911 = vmatpush1.bf16.msra.mxu1 %v16333_v47  ;;  %10937 = vmatpush3.bf16.msra.mxu0 %v16334_v29 }
 0x646   :  { %10913 = vmatprep.subr.bf16.mxu1 %v16335_v30  ;;  %10938 = vmatprep.subr.bf16.mxu0 %v16292_v17  ;;  %v16344_v30 = vld [vmem:[#allocation55_spill] sm:$0xff] }
 0x649   :  { %10915 = vmatpush1.bf16.msra.mxu1 %v16336_v31  ;;  %10940 = vmatpush3.bf16.msra.mxu0 %v16337_v26 }
 0x64a   :  { %10917 = vmatprep.subr.bf16.mxu1 %v16338_v56  ;;  %10941 = vmatprep.subr.bf16.mxu0 %v16292_v17 }
 0x64d   :  { %10919 = vmatpush1.bf16.msra.mxu1 %v16339_v38  ;;  %10943 = vmatpush3.bf16.msra.mxu0 %v16340_v5 }
 0x64e   :  { %10945 = vmatprep.subr.bf16.mxu1 %v16341_v22  ;;  %10976 = vmatprep.subr.bf16.mxu0 %v16292_v17 }
 0x6e3   :  { %v2325_v44 = vpop.f32.mrb[44].mxu1  ;;  %v2396_v6 = vpop.f32.mrb[36].mxu0 }
 0x6e4   :  { %v2400_v39 = vadd.f32 %v2325_v44, %v16342_v0  ;;  %v2327_v41 = vpop.f32.mrb[45].mxu1  ;;  %v9398_v32 = vpop.f32.mrb[37].mxu0  ;;  %v2414_v22 = vadd.f32 %v16307_v8, %v2396_v6 }
 0x6e5   :  { %v2407_v3 = vadd.f32 %v2327_v41, %v16343_v13  ;;  %v16345_v32 = vld [vmem:[#allocation88_spill] sm:$0xff] }
 0x6e6   :  { %v8269_v33 = vmul.f32 -1.442695, %v2400_v39 }
 0x6e7   :  { %v8270_v21 = vmul.f32 -1.442695, %v2407_v3  ;;  %v16346_v3 = vld [vmem:[#allocation89_spill] sm:$0xff] }
 0x6e8   :  { %12668 = vpow2.f32 %v8269_v33 }
 0x6e9   :  { %12670 = vpow2.f32 %v8270_v21 }
 0x6f2   :  { %v12669_v56 = vpop.eup %12668 }
 0x6f3   :  { %v2404_v26 = vadd.f32 1.0, %v12669_v56  ;;  %v12671_v5 = vpop.eup %12670 }
 0x6f4   :  { %v2411_v47 = vadd.f32 1.0, %v12671_v5 }
 0x6f5   :  { %12672 = vrcp.f32 %v2404_v26 }
 0x6ff   :  { %v12673_v38 = vpop.eup %12672 }
 0x700   :  { %v2415_v31 = vmul.f32 %v12673_v38, %v2414_v22 }
 0x702   :  { %v2416_v29 = vadd.f32 %v2415_v31, %v16344_v30 }
 0x703   :  { %v2490_v44 = vpop.f32.mrb[46].mxu1  ;;  %v2561_v0 = vpop.f32.mrb[38].mxu0 }
 0x704   :  { %12674 = vtanh.f32 %v2416_v29  ;;  %v2565_v13 = vadd.f32 %v2490_v44, %v16345_v32  ;;  %v2492_v39 = vpop.f32.mrb[47].mxu1  ;;  %v9433_v33 = vpop.f32.mrb[39].mxu0  ;;  %v14565_v29 = vld [vmem:[%s16290_s27 + $0x18] sm:$0xff] }
 0x705   :  { %v2572_v41 = vadd.f32 %v2492_v39, %v16346_v3  ;;  %12676 = vrcp.f32 %v2411_v47  ;;  %v16348_v3 = vld [vmem:[#allocation84_spill] sm:$0xff] }
 0x706   :  { %v8271_v21 = vmul.f32 -1.442695, %v2565_v13  ;;  %v2579_v13 = vadd.f32 %v14275_v48, %v2561_v0 }
 0x707   :  { %v8272_v38 = vmul.f32 -1.442695, %v2572_v41 }
 0x708   :  { %12678 = vpow2.f32 %v8271_v21 }
 0x709   :  { %12680 = vpow2.f32 %v8272_v38  ;;  %v14609_v38 = vld [vmem:[%s16290_s27 + $0x20] sm:$0xff] }
 0x70e   :  { %v12675_v26 = vpop.eup %12674 }
 0x70f   :  { %v2418_v8 = vsub.f32 %v14466_v16, %v12675_v26  ;;  %v12677_v56 = vpop.eup %12676 }
 0x711   :  { %v2419_v22 = vmul.f32 %v12677_v56, %v2418_v8 }
 0x712   :  { %v12679_v30 = vpop.eup %12678 }
 0x713   :  { %v2420_v31 = vadd.f32 %v12675_v26, %v2419_v22  ;;  %v2569_v5 = vadd.f32 1.0, %v12679_v30  ;;  %v12681_v32 = vpop.eup %12680 }
 0x714   :  { %v2576_v21 = vadd.f32 1.0, %v12681_v32  ;;  %v16353_v32 = vld [vmem:[#allocation43_spill] sm:$0xff] }
 0x715   :  { %v2421_v6 = vsub.f32 %v2420_v31, %v14466_v16  ;;  %12682 = vrcp.f32 %v2569_v5  ;;  %v16350_v5 = vld [vmem:[#allocation40_spill] sm:$0xff] }
 0x717   :  { %v2422_v47 = vmul.f32 %v2421_v6, %v14565_v29  ;;  %v16351_v6 = vld [vmem:[#allocation42_spill] sm:$0xff] }
 0x719   :  { %v14570_v44 = vadd.f32 %v2422_v47, %v14466_v16  ;;  %v16352_v47 = vld [vmem:[#allocation41_spill] sm:$0xff] }
 0x71b   :  { %16347 = vst [vmem:[#allocation93_spill] sm:$0xff] %v14570_v44  ;;  %2654 = vmatmul.mubr.f32.vlgmr.msra.gmra.mrb[48].mxu1 %v14570_v44  ;;  %9467 = vmatmul.mubr.f32.vlgmr.msra.gmra.mrb[40].mxu0 %v14570_v44 }
 0x71c   :  { %10947 = vmatpush1.bf16.msra.mxu1 %v13965_v58  ;;  %10978 = vmatpush3.bf16.msra.mxu0 %v13971_v4 }
 0x71d   :  { %10949 = vmatprep.subr.bf16.mxu1 %v13968_v59  ;;  %10979 = vmatprep.subr.bf16.mxu0 %v16292_v17 }
 0x71e   :  { %2818 = vmatprep.mubr.f32.mxu1 %v16293_v52  ;;  %9501 = vmatprep.mubr.msk.f32.mxu0 %vm13368_vm12, %v16293_v52 }
 0x71f   :  { %v12683_v39 = vpop.eup %12682 }
 0x720   :  { %v2580_v33 = vmul.f32 %v12683_v39, %v2579_v13  ;;  %10951 = vmatpush1.bf16.msra.mxu1 %v13976_v10  ;;  %10981 = vmatpush3.bf16.msra.mxu0 %v13984_v19  ;;  %v16354_v13 = vld [vmem:[#allocation45_spill] sm:$0xff]  ;;  %v16355_v39 = vld [vmem:[#allocation44_spill] sm:$0xff] }
 0x721   :  { %10953 = vmatprep.subr.bf16.mxu1 %v13980_v11  ;;  %10982 = vmatprep.subr.bf16.mxu0 %v16292_v17 }
 0x722   :  { %v2581_v41 = vadd.f32 %v2580_v33, %v16348_v3  ;;  %v16356_v33 = vld [vmem:[#allocation46_spill] sm:$0xff]  ;;  %v16357_v3 = vld [vmem:[#allocation48_spill] sm:$0xff] }
 0x724   :  { %12684 = vtanh.f32 %v2581_v41  ;;  %10955 = vmatpush1.bf16.msra.mxu1 %v13990_v24  ;;  %10984 = vmatpush3.bf16.msra.mxu0 %v13996_v34  ;;  %v16358_v41 = vld [vmem:[#allocation47_spill] sm:$0xff] }
 0x725   :  { %10957 = vmatprep.subr.bf16.mxu1 %v13993_v25  ;;  %10985 = vmatprep.subr.bf16.mxu0 %v16292_v17  ;;  %12686 = vrcp.f32 %v2576_v21 }
 0x728   :  { %10959 = vmatpush1.bf16.msra.mxu1 %v14000_v40  ;;  %10987 = vmatpush3.bf16.msra.mxu0 %v14006_v53 }
 0x729   :  { %10961 = vmatprep.subr.bf16.mxu1 %v14003_v43  ;;  %10988 = vmatprep.subr.bf16.mxu0 %v16292_v17 }
 0x72c   :  { %10963 = vmatpush1.bf16.msra.mxu1 %v14010_v62  ;;  %10990 = vmatpush3.bf16.msra.mxu0 %v14016_v15 }
 0x72d   :  { %10965 = vmatprep.subr.bf16.mxu1 %v14013_v63  ;;  %10991 = vmatprep.subr.bf16.mxu0 %v16292_v17 }
 0x72e   :  { %v12685_v48 = vpop.eup %12684 }
 0x72f   :  { %v2583_v0 = vsub.f32 %v14514_v9, %v12685_v48  ;;  %v12687_v26 = vpop.eup %12686 }
 0x730   :  { %10967 = vmatpush1.bf16.msra.mxu1 %v14020_v20  ;;  %10993 = vmatpush3.bf16.msra.mxu0 %v14026_v37 }
 0x731   :  { %v2584_v8 = vmul.f32 %v12687_v26, %v2583_v0  ;;  %10969 = vmatprep.subr.bf16.mxu1 %v14023_v23  ;;  %10994 = vmatprep.subr.bf16.mxu0 %v16292_v17  ;;  %v16359_v0 = vld [vmem:[#allocation65_spill] sm:$0xff] }
 0x733   :  { %v2585_v56 = vadd.f32 %v12685_v48, %v2584_v8 }
 0x734   :  { %10971 = vmatpush1.bf16.msra.mxu1 %v14030_v49  ;;  %10996 = vmatpush3.bf16.msra.mxu0 %v14036_v60 }
 0x735   :  { %v2586_v22 = vsub.f32 %v2585_v56, %v14514_v9  ;;  %10973 = vmatprep.subr.bf16.mxu1 %v14033_v50  ;;  %10997 = vmatprep.subr.bf16.mxu0 %v16292_v17 }
 0x737   :  { %v2587_v30 = vmul.f32 %v2586_v22, %v14609_v38  ;;  %v16360_v22 = vld [vmem:[#allocation66_spill] sm:$0xff] }
 0x738   :  { %10975 = vmatpush1.bf16.msra.mxu1 %v14040_v57  ;;  %10999 = vmatpush3.bf16.msra.mxu0 %v14044_v14 }
 0x739   :  { %v14618_v31 = vadd.f32 %v2587_v30, %v14514_v9  ;;  %11001 = vmatprep.subr.bf16.mxu1 %v13871_v27  ;;  %11032 = vmatprep.subr.bf16.mxu0 %v16292_v17 }
 0x73b   :  { %16349 = vst [vmem:[#allocation82_spill] sm:$0xff] %v14618_v31  ;;  %2819 = vmatmul.mubr.f32.vlgmr.msra.gmra.mrb[50].mxu1 %v14618_v31  ;;  %9502 = vmatmul.mubr.f32.vlgmr.msra.gmra.mrb[42].mxu0 %v14618_v31 }
 0x73c   :  { %11003 = vmatpush1.bf16.msra.mxu1 %v13873_v35  ;;  %11034 = vmatpush3.bf16.msra.mxu0 %v13879_v42 }
 0x73d   :  { %11005 = vmatprep.subr.bf16.mxu1 %v13876_v36  ;;  %11035 = vmatprep.subr.bf16.mxu0 %v16292_v17 }
 0x73e   :  { %2983 = vmatprep.mubr.f32.mxu1 %v16293_v52  ;;  %9536 = vmatprep.mubr.msk.f32.mxu0 %vm13368_vm12, %v16293_v52 }
 0x740   :  { %11007 = vmatpush1.bf16.msra.mxu1 %v13884_v45  ;;  %11037 = vmatpush3.bf16.msra.mxu0 %v13892_v51 }
 0x741   :  { %11009 = vmatprep.subr.bf16.mxu1 %v13888_v46  ;;  %11038 = vmatprep.subr.bf16.mxu0 %v16292_v17 }
 0x744   :  { %11011 = vmatpush1.bf16.msra.mxu1 %v13896_v54  ;;  %11040 = vmatpush3.bf16.msra.mxu0 %v13902_v61 }
 0x745   :  { %11013 = vmatprep.subr.bf16.mxu1 %v13899_v55  ;;  %11041 = vmatprep.subr.bf16.mxu0 %v16292_v17 }
 0x748   :  { %11015 = vmatpush1.bf16.msra.mxu1 %v13908_v1  ;;  %11043 = vmatpush3.bf16.msra.mxu0 %v13915_v7 }
 0x749   :  { %11017 = vmatprep.subr.bf16.mxu1 %v13912_v2  ;;  %11044 = vmatprep.subr.bf16.mxu0 %v16292_v17 }
 0x74c   :  { %11019 = vmatpush1.bf16.msra.mxu1 %v13921_v12  ;;  %11046 = vmatpush3.bf16.msra.mxu0 %v13927_v18 }
 0x74d   :  { %11021 = vmatprep.subr.bf16.mxu1 %v16295_v28  ;;  %11047 = vmatprep.subr.bf16.mxu0 %v16292_v17 }
 0x750   :  { %11023 = vmatpush1.bf16.msra.mxu1 %v16350_v5  ;;  %11049 = vmatpush3.bf16.msra.mxu0 %v16351_v6  ;;  %v16362_v6 = vld [vmem:[#allocation61_spill] sm:$0xff] }
 0x751   :  { %11025 = vmatprep.subr.bf16.mxu1 %v16352_v47  ;;  %11050 = vmatprep.subr.bf16.mxu0 %v16292_v17 }
 0x754   :  { %11027 = vmatpush1.bf16.msra.mxu1 %v16353_v32  ;;  %11052 = vmatpush3.bf16.msra.mxu0 %v16354_v13 }
 0x755   :  { %11029 = vmatprep.subr.bf16.mxu1 %v16355_v39  ;;  %11053 = vmatprep.subr.bf16.mxu0 %v16292_v17 }
 0x758   :  { %11031 = vmatpush1.bf16.msra.mxu1 %v16356_v33  ;;  %11055 = vmatpush3.bf16.msra.mxu0 %v16357_v3  ;;  %v14661_v33 = vld [vmem:[#allocation7] ss:$0 sm:$0xff] }
 0x759   :  { %11057 = vmatprep.subr.bf16.mxu1 %v16358_v41  ;;  %11088 = vmatprep.subr.bf16.mxu0 %v16292_v17  ;;  %16361 = vst [vmem:[#allocation57_spill] sm:$0xff] %v14661_v33 }
 0x7ee   :  { %v2655_v21 = vpop.f32.mrb[48].mxu1  ;;  %v2726_v48 = vpop.f32.mrb[40].mxu0 }
 0x7ef   :  { %v2730_v26 = vadd.f32 %v2655_v21, %v16359_v0  ;;  %v2657_v8 = vpop.f32.mrb[49].mxu1  ;;  %v9468_v56 = vpop.f32.mrb[41].mxu0  ;;  %v2744_v41 = vadd.f32 %v14661_v33, %v2726_v48 }
 0x7f0   :  { %v2737_v30 = vadd.f32 %v2657_v8, %v16360_v22 }
 0x7f1   :  { %v8273_v9 = vmul.f32 -1.442695, %v2730_v26  ;;  %v16363_v26 = vld [vmem:[#allocation85_spill] sm:$0xff] }
 0x7f2   :  { %v8274_v16 = vmul.f32 -1.442695, %v2737_v30 }
 0x7f3   :  { %12688 = vpow2.f32 %v8273_v9 }
 0x7f4   :  { %12690 = vpow2.f32 %v8274_v16 }
 0x7fd   :  { %v12689_v39 = vpop.eup %12688 }
 0x7fe   :  { %v2734_v13 = vadd.f32 1.0, %v12689_v39  ;;  %v12691_v3 = vpop.eup %12690  ;;  %v16364_v39 = vld [vmem:[#allocation86_spill] sm:$0xff] }
 0x7ff   :  { %v2741_v0 = vadd.f32 1.0, %v12691_v3 }
 0x800   :  { %12692 = vrcp.f32 %v2734_v13 }
 0x80a   :  { %v12693_v32 = vpop.eup %12692 }
 0x80b   :  { %v2745_v47 = vmul.f32 %v12693_v32, %v2744_v41 }
 0x80d   :  { %v2746_v21 = vadd.f32 %v2745_v47, %v16362_v6 }
 0x80e   :  { %v2820_v56 = vpop.f32.mrb[50].mxu1  ;;  %v2891_v5 = vpop.f32.mrb[42].mxu0 }
 0x80f   :  { %12694 = vtanh.f32 %v2746_v21  ;;  %v2895_v9 = vadd.f32 %v2820_v56, %v16363_v26  ;;  %v2822_v8 = vpop.f32.mrb[51].mxu1  ;;  %v9503_v22 = vpop.f32.mrb[43].mxu0 }
 0x810   :  { %v2902_v16 = vadd.f32 %v2822_v8, %v16364_v39  ;;  %12696 = vrcp.f32 %v2741_v0  ;;  %v14679_v0 = vld [vmem:[#allocation11] ss:$0 sm:$0xff]  ;;  %v16365_v22 = vld [vmem:[#allocation78_spill] sm:$0xff] }
 0x811   :  { %v8275_v13 = vmul.f32 -1.442695, %v2895_v9 }
 0x812   :  { %v8276_v32 = vmul.f32 -1.442695, %v2902_v16 }
 0x813   :  { %12698 = vpow2.f32 %v8275_v13 }
 0x814   :  { %12700 = vpow2.f32 %v8276_v32 }
 0x819   :  { %v12695_v30 = vpop.eup %12694 }
 0x81a   :  { %v2748_v48 = vsub.f32 %v14570_v44, %v12695_v30  ;;  %v12697_v33 = vpop.eup %12696 }
 0x81c   :  { %v2749_v41 = vmul.f32 %v12697_v33, %v2748_v48 }
 0x81d   :  { %v12699_v6 = vpop.eup %12698 }
 0x81e   :  { %v2750_v47 = vadd.f32 %v12695_v30, %v2749_v41  ;;  %v2899_v3 = vadd.f32 1.0, %v12699_v6  ;;  %v12701_v33 = vpop.eup %12700 }
 0x81f   :  { %v2906_v16 = vadd.f32 1.0, %v12701_v33  ;;  %v16370_v33 = vld [vmem:[#allocation45_spill] sm:$0xff] }
 0x820   :  { %v2751_v21 = vsub.f32 %v2750_v47, %v14570_v44  ;;  %12702 = vrcp.f32 %v2899_v3  ;;  %v16367_v3 = vld [vmem:[#allocation42_spill] sm:$0xff] }
 0x822   :  { %v2752_v56 = vmul.f32 %v2751_v21, %v14609_v38  ;;  %v2909_v38 = vadd.f32 %v14679_v0, %v2891_v5  ;;  %v16368_v21 = vld [vmem:[#allocation41_spill] sm:$0xff] }
 0x824   :  { %v14671_v26 = vadd.f32 %v2752_v56, %v14570_v44  ;;  %v16369_v56 = vld [vmem:[#allocation43_spill] sm:$0xff] }
 0x826   :  { %2984 = vmatmul.mubr.f32.vlgmr.msra.gmra.mrb[52].mxu1 %v14671_v26  ;;  %9537 = vmatmul.mubr.f32.vlgmr.msra.gmra.mrb[44].mxu0 %v14671_v26 }
 0x827   :  { %11059 = vmatpush1.bf16.msra.mxu1 %v13965_v58  ;;  %11090 = vmatpush3.bf16.msra.mxu0 %v13971_v4 }
 0x828   :  { %11061 = vmatprep.subr.bf16.mxu1 %v13968_v59  ;;  %11091 = vmatprep.subr.bf16.mxu0 %v16292_v17 }
 0x829   :  { %3148 = vmatprep.mubr.f32.mxu1 %v16293_v52  ;;  %9571 = vmatprep.mubr.msk.f32.mxu0 %vm13368_vm12, %v16293_v52 }
 0x82a   :  { %v12703_v9 = vpop.eup %12702 }
 0x82b   :  { %v2910_v8 = vmul.f32 %v12703_v9, %v2909_v38  ;;  %11063 = vmatpush1.bf16.msra.mxu1 %v13976_v10  ;;  %11093 = vmatpush3.bf16.msra.mxu0 %v13984_v19  ;;  %v16371_v38 = vld [vmem:[#allocation44_spill] sm:$0xff]  ;;  %v16372_v9 = vld [vmem:[#allocation46_spill] sm:$0xff] }
 0x82c   :  { %11065 = vmatprep.subr.bf16.mxu1 %v13980_v11  ;;  %11094 = vmatprep.subr.bf16.mxu0 %v16292_v17 }
 0x82d   :  { %v2911_v39 = vadd.f32 %v2910_v8, %v16365_v22  ;;  %v16373_v8 = vld [vmem:[#allocation48_spill] sm:$0xff]  ;;  %v16374_v22 = vld [vmem:[#allocation47_spill] sm:$0xff] }
 0x82f   :  { %12704 = vtanh.f32 %v2911_v39  ;;  %11067 = vmatpush1.bf16.msra.mxu1 %v13990_v24  ;;  %11096 = vmatpush3.bf16.msra.mxu0 %v13996_v34 }
 0x830   :  { %11069 = vmatprep.subr.bf16.mxu1 %v13993_v25  ;;  %11097 = vmatprep.subr.bf16.mxu0 %v16292_v17  ;;  %12706 = vrcp.f32 %v2906_v16 }
 0x833   :  { %11071 = vmatpush1.bf16.msra.mxu1 %v14000_v40  ;;  %11099 = vmatpush3.bf16.msra.mxu0 %v14006_v53 }
 0x834   :  { %11073 = vmatprep.subr.bf16.mxu1 %v14003_v43  ;;  %11100 = vmatprep.subr.bf16.mxu0 %v16292_v17 }
 0x837   :  { %11075 = vmatpush1.bf16.msra.mxu1 %v14010_v62  ;;  %11102 = vmatpush3.bf16.msra.mxu0 %v14016_v15 }
 0x838   :  { %11077 = vmatprep.subr.bf16.mxu1 %v14013_v63  ;;  %11103 = vmatprep.subr.bf16.mxu0 %v16292_v17 }
 0x839   :  { %v12705_v5 = vpop.eup %12704 }
 0x83a   :  { %v2913_v13 = vsub.f32 %v14618_v31, %v12705_v5  ;;  %v12707_v30 = vpop.eup %12706 }
 0x83b   :  { %11079 = vmatpush1.bf16.msra.mxu1 %v14020_v20  ;;  %11105 = vmatpush3.bf16.msra.mxu0 %v14026_v37 }
 0x83c   :  { %v2914_v48 = vmul.f32 %v12707_v30, %v2913_v13  ;;  %11081 = vmatprep.subr.bf16.mxu1 %v14023_v23  ;;  %11106 = vmatprep.subr.bf16.mxu0 %v16292_v17 }
 0x83e   :  { %v2915_v32 = vadd.f32 %v12705_v5, %v2914_v48  ;;  %v16375_v5 = vld [vmem:[#allocation67_spill] sm:$0xff] }
 0x83f   :  { %11083 = vmatpush1.bf16.msra.mxu1 %v14030_v49  ;;  %11108 = vmatpush3.bf16.msra.mxu0 %v14036_v60 }
 0x840   :  { %v2916_v41 = vsub.f32 %v2915_v32, %v14618_v31  ;;  %11085 = vmatprep.subr.bf16.mxu1 %v14033_v50  ;;  %11109 = vmatprep.subr.bf16.mxu0 %v16292_v17  ;;  %v16376_v32 = vld [vmem:[#allocation68_spill] sm:$0xff] }
 0x842   :  { %v2917_v6 = vmul.f32 %v2916_v41, %v14565_v29  ;;  %v16366_v29 = vld [vmem:[#allocation40_spill] sm:$0xff] }
 0x843   :  { %11087 = vmatpush1.bf16.msra.mxu1 %v14040_v57  ;;  %11111 = vmatpush3.bf16.msra.mxu0 %v14044_v14 }
 0x844   :  { %v14716_v47 = vadd.f32 %v2917_v6, %v14618_v31  ;;  %11113 = vmatprep.subr.bf16.mxu1 %v13871_v27  ;;  %11144 = vmatprep.subr.bf16.mxu0 %v16292_v17 }
 0x846   :  { %3149 = vmatmul.mubr.f32.vlgmr.msra.gmra.mrb[54].mxu1 %v14716_v47  ;;  %9572 = vmatmul.mubr.f32.vlgmr.msra.gmra.mrb[46].mxu0 %v14716_v47 }
 0x847   :  { %11115 = vmatpush1.bf16.msra.mxu1 %v13873_v35  ;;  %11146 = vmatpush3.bf16.msra.mxu0 %v13879_v42 }
 0x848   :  { %11117 = vmatprep.subr.bf16.mxu1 %v13876_v36  ;;  %11147 = vmatprep.subr.bf16.mxu0 %v16292_v17 }
 0x849   :  { %3313 = vmatprep.mubr.f32.mxu1 %v16293_v52  ;;  %9606 = vmatprep.mubr.msk.f32.mxu0 %vm13368_vm12, %v16293_v52 }
 0x84b   :  { %11119 = vmatpush1.bf16.msra.mxu1 %v13884_v45  ;;  %11149 = vmatpush3.bf16.msra.mxu0 %v13892_v51 }
 0x84c   :  { %11121 = vmatprep.subr.bf16.mxu1 %v13888_v46  ;;  %11150 = vmatprep.subr.bf16.mxu0 %v16292_v17 }
 0x84f   :  { %11123 = vmatpush1.bf16.msra.mxu1 %v13896_v54  ;;  %11152 = vmatpush3.bf16.msra.mxu0 %v13902_v61 }
 0x850   :  { %11125 = vmatprep.subr.bf16.mxu1 %v13899_v55  ;;  %11153 = vmatprep.subr.bf16.mxu0 %v16292_v17 }
 0x853   :  { %11127 = vmatpush1.bf16.msra.mxu1 %v13908_v1  ;;  %11155 = vmatpush3.bf16.msra.mxu0 %v13915_v7 }
 0x854   :  { %11129 = vmatprep.subr.bf16.mxu1 %v13912_v2  ;;  %11156 = vmatprep.subr.bf16.mxu0 %v16292_v17 }
 0x857   :  { %11131 = vmatpush1.bf16.msra.mxu1 %v13921_v12  ;;  %11158 = vmatpush3.bf16.msra.mxu0 %v13927_v18 }
 0x858   :  { %11133 = vmatprep.subr.bf16.mxu1 %v16295_v28  ;;  %11159 = vmatprep.subr.bf16.mxu0 %v16292_v17 }
 0x85b   :  { %11135 = vmatpush1.bf16.msra.mxu1 %v16366_v29  ;;  %11161 = vmatpush3.bf16.msra.mxu0 %v16367_v3 }
 0x85c   :  { %11137 = vmatprep.subr.bf16.mxu1 %v16368_v21  ;;  %11162 = vmatprep.subr.bf16.mxu0 %v16292_v17  ;;  %v16378_v21 = vld [vmem:[#allocation64_spill] sm:$0xff] }
 0x85f   :  { %11139 = vmatpush1.bf16.msra.mxu1 %v16369_v56  ;;  %11164 = vmatpush3.bf16.msra.mxu0 %v16370_v33 }
 0x860   :  { %11141 = vmatprep.subr.bf16.mxu1 %v16371_v38  ;;  %11165 = vmatprep.subr.bf16.mxu0 %v16292_v17 }
 0x863   :  { %11143 = vmatpush1.bf16.msra.mxu1 %v16372_v9  ;;  %11167 = vmatpush3.bf16.msra.mxu0 %v16373_v8  ;;  %v16377_v9 = vld [vmem:[#allocation57_spill] sm:$0xff] }
 0x864   :  { %11169 = vmatprep.subr.bf16.mxu1 %v16374_v22  ;;  %11200 = vmatprep.subr.bf16.mxu0 %v16292_v17 }
 0x8f9   :  { %v2985_v39 = vpop.f32.mrb[52].mxu1  ;;  %v3056_v16 = vpop.f32.mrb[44].mxu0 }
 0x8fa   :  { %v3060_v13 = vadd.f32 %v2985_v39, %v16375_v5  ;;  %v2987_v30 = vpop.f32.mrb[53].mxu1  ;;  %v9538_v48 = vpop.f32.mrb[45].mxu0  ;;  %v3074_v22 = vadd.f32 %v16377_v9, %v3056_v16 }
 0x8fb   :  { %v3067_v41 = vadd.f32 %v2987_v30, %v16376_v32  ;;  %v16379_v48 = vld [vmem:[#allocation81_spill] sm:$0xff] }
 0x8fc   :  { %v8277_v6 = vmul.f32 -1.442695, %v3060_v13 }
 0x8fd   :  { %v8278_v31 = vmul.f32 -1.442695, %v3067_v41  ;;  %v16380_v41 = vld [vmem:[#allocation83_spill] sm:$0xff] }
 0x8fe   :  { %12708 = vpow2.f32 %v8277_v6 }
 0x8ff   :  { %12710 = vpow2.f32 %v8278_v31 }
 0x908   :  { %v12709_v44 = vpop.eup %12708 }
 0x909   :  { %v3064_v38 = vadd.f32 1.0, %v12709_v44  ;;  %v12711_v8 = vpop.eup %12710 }
 0x90a   :  { %v3071_v29 = vadd.f32 1.0, %v12711_v8 }
 0x90b   :  { %12712 = vrcp.f32 %v3064_v38 }
 0x915   :  { %v12713_v33 = vpop.eup %12712 }
 0x916   :  { %v3075_v56 = vmul.f32 %v12713_v33, %v3074_v22 }
 0x918   :  { %v3076_v3 = vadd.f32 %v3075_v56, %v16378_v21 }
 0x919   :  { %v3150_v39 = vpop.f32.mrb[54].mxu1  ;;  %v3221_v5 = vpop.f32.mrb[46].mxu0 }
 0x91a   :  { %12714 = vtanh.f32 %v3076_v3  ;;  %v3225_v30 = vadd.f32 %v3150_v39, %v16379_v48  ;;  %v3152_v13 = vpop.f32.mrb[55].mxu1  ;;  %v9573_v32 = vpop.f32.mrb[47].mxu0  ;;  %v16381_v39 = vld [vmem:[#allocation56_spill] sm:$0xff] }
 0x91b   :  { %v3232_v6 = vadd.f32 %v3152_v13, %v16380_v41  ;;  %12716 = vrcp.f32 %v3071_v29 }
 0x91c   :  { %v8279_v44 = vmul.f32 -1.442695, %v3225_v30  ;;  %v3239_v30 = vadd.f32 %v14679_v0, %v3221_v5 }
 0x91d   :  { %v8280_v33 = vmul.f32 -1.442695, %v3232_v6  ;;  %v16382_v6 = vld [vmem:[#allocation74_spill] sm:$0xff] }
 0x91e   :  { %12718 = vpow2.f32 %v8279_v44 }
 0x91f   :  { %12720 = vpow2.f32 %v8280_v33 }
 0x924   :  { %v12715_v31 = vpop.eup %12714 }
 0x925   :  { %v3078_v38 = vsub.f32 %v14671_v26, %v12715_v31  ;;  %v12717_v16 = vpop.eup %12716 }
 0x927   :  { %v3079_v22 = vmul.f32 %v12717_v16, %v3078_v38 }
 0x928   :  { %v12719_v21 = vpop.eup %12718 }
 0x929   :  { %v3080_v56 = vadd.f32 %v12715_v31, %v3079_v22  ;;  %v3229_v8 = vadd.f32 1.0, %v12719_v21  ;;  %v12721_v29 = vpop.eup %12720 }
 0x92a   :  { %v3236_v31 = vadd.f32 1.0, %v12721_v29 }
 0x92b   :  { %v3081_v3 = vsub.f32 %v3080_v56, %v14671_v26  ;;  %12722 = vrcp.f32 %v3229_v8  ;;  %v16383_v56 = vld [vmem:[#allocation54_spill] sm:$0xff] }
 0x92d   :  { %v3082_v48 = vmul.f32 %v3081_v3, %v16381_v39 }
 0x92f   :  { %v14767_v13 = vadd.f32 %v3082_v48, %v14671_v26 }
 0x931   :  { %3314 = vmatmul.mubr.f32.vlgmr.msra.gmra.mrb[56].mxu1 %v14767_v13  ;;  %9607 = vmatmul.mubr.f32.vlgmr.msra.gmra.mrb[48].mxu0 %v14767_v13 }
 0x932   :  { %11171 = vmatpush1.bf16.msra.mxu1 %v13965_v58  ;;  %11202 = vmatpush3.bf16.msra.mxu0 %v13971_v4 }
 0x933   :  { %11173 = vmatprep.subr.bf16.mxu1 %v13968_v59  ;;  %11203 = vmatprep.subr.bf16.mxu0 %v16292_v17 }
 0x934   :  { %3478 = vmatprep.mubr.f32.mxu1 %v16293_v52  ;;  %9641 = vmatprep.mubr.msk.f32.mxu0 %vm13368_vm12, %v16293_v52 }
 0x935   :  { %v12723_v32 = vpop.eup %12722 }
 0x936   :  { %v3240_v41 = vmul.f32 %v12723_v32, %v3239_v30  ;;  %11175 = vmatpush1.bf16.msra.mxu1 %v13976_v10  ;;  %11205 = vmatpush3.bf16.msra.mxu0 %v13984_v19 }
 0x937   :  { %11177 = vmatprep.subr.bf16.mxu1 %v13980_v11  ;;  %11206 = vmatprep.subr.bf16.mxu0 %v16292_v17 }
 0x938   :  { %v3241_v44 = vadd.f32 %v3240_v41, %v16382_v6 }
 0x93a   :  { %12724 = vtanh.f32 %v3241_v44  ;;  %11179 = vmatpush1.bf16.msra.mxu1 %v13990_v24  ;;  %11208 = vmatpush3.bf16.msra.mxu0 %v13996_v34 }
 0x93b   :  { %11181 = vmatprep.subr.bf16.mxu1 %v13993_v25  ;;  %11209 = vmatprep.subr.bf16.mxu0 %v16292_v17  ;;  %12726 = vrcp.f32 %v3236_v31 }
 0x93e   :  { %11183 = vmatpush1.bf16.msra.mxu1 %v14000_v40  ;;  %11211 = vmatpush3.bf16.msra.mxu0 %v14006_v53 }
 0x93f   :  { %11185 = vmatprep.subr.bf16.mxu1 %v14003_v43  ;;  %11212 = vmatprep.subr.bf16.mxu0 %v16292_v17 }
 0x942   :  { %11187 = vmatpush1.bf16.msra.mxu1 %v14010_v62  ;;  %11214 = vmatpush3.bf16.msra.mxu0 %v14016_v15 }
 0x943   :  { %11189 = vmatprep.subr.bf16.mxu1 %v14013_v63  ;;  %11215 = vmatprep.subr.bf16.mxu0 %v16292_v17 }
 0x944   :  { %v12725_v5 = vpop.eup %12724 }
 0x945   :  { %v3243_v38 = vsub.f32 %v14716_v47, %v12725_v5  ;;  %v12727_v16 = vpop.eup %12726 }
 0x946   :  { %11191 = vmatpush1.bf16.msra.mxu1 %v14020_v20  ;;  %11217 = vmatpush3.bf16.msra.mxu0 %v14026_v37 }
 0x947   :  { %v3244_v33 = vmul.f32 %v12727_v16, %v3243_v38  ;;  %11193 = vmatprep.subr.bf16.mxu1 %v14023_v23  ;;  %11218 = vmatprep.subr.bf16.mxu0 %v16292_v17 }
 0x949   :  { %v3245_v22 = vadd.f32 %v12725_v5, %v3244_v33  ;;  %v16395_v5 = vld [vmem:[#allocation59_spill] sm:$0xff] }
 0x94a   :  { %11195 = vmatpush1.bf16.msra.mxu1 %v14030_v49  ;;  %11220 = vmatpush3.bf16.msra.mxu0 %v14036_v60 }
 0x94b   :  { %v3246_v21 = vsub.f32 %v3245_v22, %v14716_v47  ;;  %11197 = vmatprep.subr.bf16.mxu1 %v14033_v50  ;;  %11221 = vmatprep.subr.bf16.mxu0 %v16292_v17 }
 0x94d   :  { %v3247_v8 = vmul.f32 %v3246_v21, %v16383_v56  ;;  %v16396_v21 = vld [vmem:[#allocation77_spill] sm:$0xff] }
 0x94e   :  { %11199 = vmatpush1.bf16.msra.mxu1 %v14040_v57  ;;  %11223 = vmatpush3.bf16.msra.mxu0 %v14044_v14 }
 0x94f   :  { %v14810_v3 = vadd.f32 %v3247_v8, %v14716_v47  ;;  %11225 = vmatprep.subr.bf16.mxu1 %v13871_v27  ;;  %11256 = vmatprep.subr.bf16.mxu0 %v16292_v17  ;;  %v16384_v27 = vld [vmem:[#allocation40_spill] sm:$0xff] }
 0x951   :  { %3479 = vmatmul.mubr.f32.vlgmr.msra.gmra.mrb[58].mxu1 %v14810_v3  ;;  %9642 = vmatmul.mubr.f32.vlgmr.msra.gmra.mrb[50].mxu0 %v14810_v3 }
 0x952   :  { %11227 = vmatpush1.bf16.msra.mxu1 %v13873_v35  ;;  %11258 = vmatpush3.bf16.msra.mxu0 %v13879_v42  ;;  %v16385_v35 = vld [vmem:[#allocation42_spill] sm:$0xff]  ;;  %v16387_v42 = vld [vmem:[#allocation43_spill] sm:$0xff] }
 0x953   :  { %11229 = vmatprep.subr.bf16.mxu1 %v13876_v36  ;;  %11259 = vmatprep.subr.bf16.mxu0 %v16292_v17  ;;  %v16386_v36 = vld [vmem:[#allocation41_spill] sm:$0xff] }
 0x954   :  { %3643 = vmatprep.mubr.f32.mxu1 %v16293_v52  ;;  %9676 = vmatprep.mubr.msk.f32.mxu0 %vm13368_vm12, %v16293_v52 }
 0x956   :  { %11231 = vmatpush1.bf16.msra.mxu1 %v13884_v45  ;;  %11261 = vmatpush3.bf16.msra.mxu0 %v13892_v51  ;;  %v16388_v45 = vld [vmem:[#allocation45_spill] sm:$0xff]  ;;  %v16390_v51 = vld [vmem:[#allocation46_spill] sm:$0xff] }
 0x957   :  { %11233 = vmatprep.subr.bf16.mxu1 %v13888_v46  ;;  %11262 = vmatprep.subr.bf16.mxu0 %v16292_v17  ;;  %v16389_v46 = vld [vmem:[#allocation44_spill] sm:$0xff] }
 0x95a   :  { %11235 = vmatpush1.bf16.msra.mxu1 %v13896_v54  ;;  %11264 = vmatpush3.bf16.msra.mxu0 %v13902_v61  ;;  %v16391_v54 = vld [vmem:[#allocation48_spill] sm:$0xff] }
 0x95b   :  { %11237 = vmatprep.subr.bf16.mxu1 %v13899_v55  ;;  %11265 = vmatprep.subr.bf16.mxu0 %v16292_v17  ;;  %v16392_v55 = vld [vmem:[#allocation47_spill] sm:$0xff] }
 0x95e   :  { %11239 = vmatpush1.bf16.msra.mxu1 %v13908_v1  ;;  %11267 = vmatpush3.bf16.msra.mxu0 %v13915_v7 }
 0x95f   :  { %11241 = vmatprep.subr.bf16.mxu1 %v13912_v2  ;;  %11268 = vmatprep.subr.bf16.mxu0 %v16292_v17  ;;  %v16393_v2 = vld [vmem:[#allocation69_spill] sm:$0xff] }
 0x962   :  { %11243 = vmatpush1.bf16.msra.mxu1 %v13921_v12  ;;  %11270 = vmatpush3.bf16.msra.mxu0 %v13927_v18 }
 0x963   :  { %11245 = vmatprep.subr.bf16.mxu1 %v16295_v28  ;;  %11271 = vmatprep.subr.bf16.mxu0 %v16292_v17  ;;  %v16394_v28 = vld [vmem:[#allocation70_spill] sm:$0xff] }
 0x966   :  { %11247 = vmatpush1.bf16.msra.mxu1 %v16384_v27  ;;  %11273 = vmatpush3.bf16.msra.mxu0 %v16385_v35  ;;  %v16397_v35 = vld [vmem:[#allocation79_spill] sm:$0xff] }
 0x967   :  { %11249 = vmatprep.subr.bf16.mxu1 %v16386_v36  ;;  %11274 = vmatprep.subr.bf16.mxu0 %v16292_v17 }
 0x96a   :  { %11251 = vmatpush1.bf16.msra.mxu1 %v16387_v42  ;;  %11276 = vmatpush3.bf16.msra.mxu0 %v16388_v45 }
 0x96b   :  { %11253 = vmatprep.subr.bf16.mxu1 %v16389_v46  ;;  %11277 = vmatprep.subr.bf16.mxu0 %v16292_v17 }
 0x96e   :  { %11255 = vmatpush1.bf16.msra.mxu1 %v16390_v51  ;;  %11279 = vmatpush3.bf16.msra.mxu0 %v16391_v54 }
 0x96f   :  { %11281 = vmatprep.subr.bf16.mxu1 %v16392_v55  ;;  %11312 = vmatprep.subr.bf16.mxu0 %v16292_v17 }
 0xa04   :  { %v3315_v61 = vpop.f32.mrb[56].mxu1  ;;  %v3386_v1 = vpop.f32.mrb[48].mxu0 }
 0xa05   :  { %v3390_v7 = vadd.f32 %v3315_v61, %v16393_v2  ;;  %v3317_v12 = vpop.f32.mrb[57].mxu1  ;;  %v9608_v18 = vpop.f32.mrb[49].mxu0  ;;  %v3404_v6 = vadd.f32 %v16377_v9, %v3386_v1 }
 0xa06   :  { %v3397_v39 = vadd.f32 %v3317_v12, %v16394_v28  ;;  %v12930_v12 = vld [vmem:[%s16290_s27 + $0x30] sm:$0xff] }
 0xa07   :  { %v8281_v48 = vmul.f32 -1.442695, %v3390_v7 }
 0xa08   :  { %v8282_v29 = vmul.f32 -1.442695, %v3397_v39 }
 0xa09   :  { %12728 = vpow2.f32 %v8281_v48 }
 0xa0a   :  { %12730 = vpow2.f32 %v8282_v29 }
 0xa13   :  { %v12729_v30 = vpop.eup %12728 }
 0xa14   :  { %v3394_v32 = vadd.f32 1.0, %v12729_v30  ;;  %v12731_v41 = vpop.eup %12730 }
 0xa15   :  { %v3401_v16 = vadd.f32 1.0, %v12731_v41  ;;  %v12488_v41 = vld [vmem:[#allocation13 + $0x30] ss:$12 sps:$4 sm:$0xff]  }
 0xa16   :  { %12732 = vrcp.f32 %v3394_v32  ;;  %v16401_v32 = vmov 0  }
 0xa20   :  { %v12733_v44 = vpop.eup %12732 }
 0xa21   :  { %v3405_v31 = vmul.f32 %v12733_v44, %v3404_v6  ;;  %v12494_v6 = vld [vmem:[#allocation13 + $0x4c] ss:$12 sps:$4 sm:$0xff]   ;;  %v12495_v44 = vld [vmem:[#allocation13 + $0x50] ss:$12 sps:$4 sm:$0xff]  }
 0xa23   :  { %v3406_v38 = vadd.f32 %v3405_v31, %v16395_v5  ;;  %v12492_v31 = vld [vmem:[#allocation13 + $0x48] ss:$12 sps:$4 sm:$0xff]   ;;  %v12498_v5 = vld [vmem:[#allocation13 + $0x64] ss:$12 sps:$4 sm:$0xff]  }
 0xa24   :  { %v3480_v33 = vpop.f32.mrb[58].mxu1  ;;  %v3551_v22 = vpop.f32.mrb[50].mxu0 }
 0xa25   :  { %12734 = vtanh.f32 %v3406_v38  ;;  %v3555_v56 = vadd.f32 %v3480_v33, %v16396_v21  ;;  %v3482_v8 = vpop.f32.mrb[59].mxu1  ;;  %v9643_v27 = vpop.f32.mrb[51].mxu0  ;;  %v3569_v48 = vadd.f32 %v14679_v0, %v3551_v22  ;;  %v12499_v38 = vld [vmem:[#allocation13 + $0x68] ss:$12 sps:$4 sm:$0xff]   ;;  %v12503_v22 = vld [vmem:[#allocation13 + $0x80] ss:$12 sps:$4 sm:$0xff]  }
 0xa26   :  { %v3562_v36 = vadd.f32 %v3482_v8, %v16397_v35  ;;  %12736 = vrcp.f32 %v3401_v16  ;;  %v12496_v16 = vld [vmem:[#allocation13 + $0x60] ss:$12 sps:$4 sm:$0xff]   ;;  %v12502_v33 = vld [vmem:[#allocation13 + $0x7c] ss:$12 sps:$4 sm:$0xff]   ;;  %v12500_v21 = vld [vmem:[#allocation13 + $0x78] ss:$12 sps:$4 sm:$0xff]  }
 0xa27   :  { %v8283_v42 = vmul.f32 -1.442695, %v3555_v56  ;;  %v12506_v56 = vld [vmem:[#allocation13 + $0x94] ss:$12 sps:$4 sm:$0xff]   ;;  %v12507_v8 = vld [vmem:[#allocation13 + $0x98] ss:$12 sps:$4 sm:$0xff]  }
 0xa28   :  { %v8284_v54 = vmul.f32 -1.442695, %v3562_v36  ;;  %v12504_v27 = vld [vmem:[#allocation13 + $0x90] ss:$12 sps:$4 sm:$0xff]   ;;  %v12510_v35 = vld [vmem:[#allocation13 + $0xac] ss:$12 sps:$4 sm:$0xff]  }
 0xa29   :  { %12738 = vpow2.f32 %v8283_v42  ;;  %v12511_v36 = vld [vmem:[#allocation13 + $0xb0] ss:$12 sps:$4 sm:$0xff]   ;;  %v12508_v42 = vld [vmem:[#allocation13 + $0xa8] ss:$12 sps:$4 sm:$0xff]  }
 0xa2a   :  { %12740 = vpow2.f32 %v8284_v54  ;;  %v14924_v54 = vpack.c.bf16 %v14767_v13, %v14671_v26  ;;  %v12512_v26 = vld [vmem:[#allocation17] ss:$12 sps:$4 sm:$0xff]  }
 0xa2f   :  { %v12735_v45 = vpop.eup %12734 }
 0xa30   :  { %v3408_v46 = vsub.f32 %v14767_v13, %v12735_v45  ;;  %v12737_v51 = vpop.eup %12736 }
 0xa32   :  { %v3409_v55 = vmul.f32 %v12737_v51, %v3408_v46  ;;  %v16403_v46 = vld [vmem:[#allocation93_spill] sm:$0xff] }
 0xa33   :  { %v12739_v61 = vpop.eup %12738 }
 0xa34   :  { %v3410_v1 = vadd.f32 %v12735_v45, %v3409_v55  ;;  %v3559_v2 = vadd.f32 1.0, %v12739_v61  ;;  %v12741_v39 = vpop.eup %12740  ;;  %v16402_v45 = vld [vmem:[#allocation94_spill] sm:$0xff] }
 0xa35   :  { %v14920_v51 = vpack.c.bf16 %v16403_v46, %v16402_v45  ;;  %v12514_v55 = vld [vmem:[#allocation17 + $0x4] ss:$12 sps:$4 sm:$0xff]   ;;  %v12515_v61 = vld [vmem:[#allocation17 + $0x8] ss:$12 sps:$4 sm:$0xff]  }
 0xa36   :  { %v3411_v7 = vsub.f32 %v3410_v1, %v14767_v13  ;;  %12742 = vrcp.f32 %v3559_v2  ;;  %v12519_v1 = vld [vmem:[#allocation17 + $0x20] ss:$12 sps:$4 sm:$0xff]   ;;  %v12516_v2 = vld [vmem:[#allocation17 + $0x18] ss:$12 sps:$4 sm:$0xff]  }
 0xa37   :  { %v16408_v46 = vld [vmem:[#allocation75_spill] sm:$0xff] }
 0xa38   :  { %v3412_v18 = vmul.f32 %v12930_v12, %v3411_v7  ;;  %v12522_v7 = vld [vmem:[#allocation17 + $0x34] ss:$12 sps:$4 sm:$0xff]   ;;  %v12523_v12 = vld [vmem:[#allocation17 + $0x38] ss:$12 sps:$4 sm:$0xff]  }
 0xa3a   :  { %v14863_v28 = vadd.f32 %v3412_v18, %v14767_v13  ;;  %v12518_v13 = vld [vmem:[#allocation17 + $0x1c] ss:$12 sps:$4 sm:$0xff]  }
 0xa3b   :  { %v12520_v18 = vld [vmem:[#allocation17 + $0x30] ss:$12 sps:$4 sm:$0xff]  }
 0xa3c   :  { %3644 = vmatmul.mubr.f32.vlgmr.msra.gmra.mrb[60].mxu1 %v14863_v28  ;;  %9677 = vmatmul.mubr.f32.vlgmr.msra.gmra.mrb[52].mxu0 %v14863_v28 }
 0xa3d   :  { %11283 = vmatpush1.bf16.msra.mxu1 %v13965_v58  ;;  %11314 = vmatpush3.bf16.msra.mxu0 %v13971_v4  ;;  %v16398_v58 = vld [vmem:[#allocation80_spill] sm:$0xff]  ;;  %v3566_v4 = vadd.f32 1.0, %v12741_v39 }
 0xa3e   :  { %11285 = vmatprep.subr.bf16.mxu1 %v13968_v59  ;;  %11315 = vmatprep.subr.bf16.mxu0 %v16292_v17  ;;  %v12526_v39 = vld [vmem:[#allocation17 + $0x4c] ss:$12 sps:$4 sm:$0xff]  }
 0xa3f   :  { %3808 = vmatprep.mubr.f32.mxu1 %v16293_v52  ;;  %9711 = vmatprep.mubr.msk.f32.mxu0 %vm13368_vm12, %v16293_v52 }
 0xa40   :  { %v12743_v29 = vpop.eup %12742 }
 0xa41   :  { %v3570_v30 = vmul.f32 %v12743_v29, %v3569_v48  ;;  %11287 = vmatpush1.bf16.msra.mxu1 %v13976_v10  ;;  %11317 = vmatpush3.bf16.msra.mxu0 %v13984_v19  ;;  %v12527_v48 = vld [vmem:[#allocation17 + $0x50] ss:$12 sps:$4 sm:$0xff]   ;;  %v12524_v29 = vld [vmem:[#allocation17 + $0x48] ss:$12 sps:$4 sm:$0xff]  }
 0xa42   :  { %11289 = vmatprep.subr.bf16.mxu1 %v13980_v11  ;;  %11318 = vmatprep.subr.bf16.mxu0 %v16292_v17 }
 0xa43   :  { %v3571_v59 = vadd.f32 %v3570_v30, %v16398_v58  ;;  %v12530_v30 = vld [vmem:[#allocation17 + $0x64] ss:$12 sps:$4 sm:$0xff]   ;;  %v12531_v58 = vld [vmem:[#allocation17 + $0x68] ss:$12 sps:$4 sm:$0xff]  }
 0xa45   :  { %12744 = vtanh.f32 %v3571_v59  ;;  %11291 = vmatpush1.bf16.msra.mxu1 %v13990_v24  ;;  %11320 = vmatpush3.bf16.msra.mxu0 %v13996_v34  ;;  %v12528_v59 = vld [vmem:[#allocation17 + $0x60] ss:$12 sps:$4 sm:$0xff]  }
 0xa46   :  { %11293 = vmatprep.subr.bf16.mxu1 %v13993_v25  ;;  %11321 = vmatprep.subr.bf16.mxu0 %v16292_v17  ;;  %12746 = vrcp.f32 %v3566_v4  ;;  %v12534_v4 = vld [vmem:[#allocation17 + $0x7c] ss:$12 sps:$4 sm:$0xff]  }
 0xa49   :  { %11295 = vmatpush1.bf16.msra.mxu1 %v14000_v40  ;;  %11323 = vmatpush3.bf16.msra.mxu0 %v14006_v53  ;;  %v12482_v40 = vld [vmem:[#allocation13 + $0x4] ss:$12 sps:$4 sm:$0xff]  }
 0xa4a   :  { %11297 = vmatprep.subr.bf16.mxu1 %v14003_v43  ;;  %11324 = vmatprep.subr.bf16.mxu0 %v16292_v17  ;;  %v12483_v43 = vld [vmem:[#allocation13 + $0x8] ss:$12 sps:$4 sm:$0xff]  }
 0xa4b   :  { %v12931_v53 = vld [vmem:[%s16290_s27 + $0x8] sm:$0xff] }
 0xa4d   :  { %11299 = vmatpush1.bf16.msra.mxu1 %v14010_v62  ;;  %11326 = vmatpush3.bf16.msra.mxu0 %v14016_v15 }
 0xa4e   :  { %11301 = vmatprep.subr.bf16.mxu1 %v14013_v63  ;;  %11327 = vmatprep.subr.bf16.mxu0 %v16292_v17  ;;  %v12480_v63 = vld [vmem:[#allocation13] ss:$12 sps:$4 sm:$0xff]  }
 0xa4f   :  { %v12745_v10 = vpop.eup %12744 }
 0xa50   :  { %v3573_v11 = vsub.f32 %v14810_v3, %v12745_v10  ;;  %v12747_v19 = vpop.eup %12746 }
 0xa51   :  { %11303 = vmatpush1.bf16.msra.mxu1 %v14020_v20  ;;  %11329 = vmatpush3.bf16.msra.mxu0 %v14026_v37  ;;  %v12486_v20 = vld [vmem:[#allocation13 + $0x1c] ss:$12 sps:$4 sm:$0xff]   ;;  %v16399_v37 = vld [vmem:[#allocation95_spill] sm:$0xff] }
 0xa52   :  { %v3574_v24 = vmul.f32 %v12747_v19, %v3573_v11  ;;  %11305 = vmatprep.subr.bf16.mxu1 %v14023_v23  ;;  %11330 = vmatprep.subr.bf16.mxu0 %v16292_v17  ;;  %v12487_v23 = vld [vmem:[#allocation13 + $0x20] ss:$12 sps:$4 sm:$0xff]   ;;  %v12532_v11 = vld [vmem:[#allocation17 + $0x78] ss:$12 sps:$4 sm:$0xff]  }
 0xa53   :  { %v12538_v19 = vld [vmem:[#allocation17 + $0x94] ss:$12 sps:$4 sm:$0xff]  }
 0xa54   :  { %v3575_v25 = vadd.f32 %v12745_v10, %v3574_v24  ;;  %v12535_v10 = vld [vmem:[#allocation17 + $0x80] ss:$12 sps:$4 sm:$0xff]   ;;  %v12539_v24 = vld [vmem:[#allocation17 + $0x98] ss:$12 sps:$4 sm:$0xff]  }
 0xa55   :  { %11307 = vmatpush1.bf16.msra.mxu1 %v14030_v49  ;;  %11332 = vmatpush3.bf16.msra.mxu0 %v14036_v60  ;;  %v16400_v49 = vld [vmem:[#allocation39_spill] sm:$0xff]  ;;  %v12484_v60 = vld [vmem:[#allocation13 + $0x18] ss:$12 sps:$4 sm:$0xff]  }
 0xa56   :  { %v3576_v34 = vsub.f32 %v3575_v25, %v14810_v3  ;;  %11309 = vmatprep.subr.bf16.mxu1 %v14033_v50  ;;  %11333 = vmatprep.subr.bf16.mxu0 %v16292_v17  ;;  %v14914_v50 = vpack.c.bf16 %v16400_v49, %v16399_v37  ;;  %v12536_v25 = vld [vmem:[#allocation17 + $0x90] ss:$12 sps:$4 sm:$0xff]  }
 0xa58   :  { %v3577_v62 = vmul.f32 %v12931_v53, %v3576_v34  ;;  %v12542_v34 = vld [vmem:[#allocation17 + $0xac] ss:$12 sps:$4 sm:$0xff]   ;;  %v12546_v53 = vld [vmem:[#allocation14 + $0x4] ss:$12 sps:$4 sm:$0xff]  }
 0xa59   :  { %11311 = vmatpush1.bf16.msra.mxu1 %v14040_v57  ;;  %11335 = vmatpush3.bf16.msra.mxu0 %v14044_v14  ;;  %v12490_v57 = vld [vmem:[#allocation13 + $0x34] ss:$12 sps:$4 sm:$0xff]   ;;  %v12491_v14 = vld [vmem:[#allocation13 + $0x38] ss:$12 sps:$4 sm:$0xff]  }
 0xa5a   :  { %v14908_v15 = vadd.f32 %v3577_v62, %v14810_v3  ;;  %4079 = vmatprep.subr.bf16.mxu1 %v12482_v40  ;;  %9714 = vmatprep.subr.bf16.mxu0 %v12483_v43  ;;  %v12543_v40 = vld [vmem:[#allocation17 + $0xb0] ss:$12 sps:$4 sm:$0xff]   ;;  %v14934_v62 = vld [vmem:[#allocation14 + $0x8] ss:$12 sps:$4 sm:$0xff]  }
 0xa5c   :  { %3809 = vmatmul.mubr.f32.vlgmr.msra.gmra.mrb[62].mxu1 %v14908_v15  ;;  %9712 = vmatmul.mubr.f32.vlgmr.msra.gmra.mrb[54].mxu0 %v14908_v15 }
 0xa5d   :  { %4080 = vmatpush1.bf16.msra.mxu1 %v12480_v63  ;;  %9715 = vmatpush3.bf16.msra.mxu0 %v12483_v43  ;;  %v12540_v43 = vld [vmem:[#allocation17 + $0xa8] ss:$12 sps:$4 sm:$0xff]  }
 0xa5e   :  { %9730 = vmatprep.mubr.bf16.mxu0 %v14914_v50  ;;  %4081 = vmatprep.subr.bf16.mxu1 %v12486_v20 }
 0xa5f   :  { %9716 = vmatprep.subr.bf16.mxu0 %v12487_v23  ;;  %4111 = vmatprep.mubr.bf16.mxu1 %v16401_v32 }
 0xa61   :  { %4082 = vmatpush1.bf16.msra.mxu1 %v12484_v60  ;;  %9717 = vmatpush3.bf16.msra.mxu0 %v12487_v23  ;;  %v16404_v23 = vld [vmem:[#allocation71_spill] sm:$0xff] }
 0xa62   :  { %4083 = vmatprep.subr.bf16.mxu1 %v12490_v57  ;;  %9718 = vmatprep.subr.bf16.mxu0 %v12491_v14  ;;  %v16405_v57 = vld [vmem:[#allocation72_spill] sm:$0xff] }
 0xa65   :  { %4084 = vmatpush1.bf16.msra.mxu1 %v12488_v41  ;;  %9719 = vmatpush3.bf16.msra.mxu0 %v12491_v14 }
 0xa66   :  { %4085 = vmatprep.subr.bf16.mxu1 %v12494_v6  ;;  %9720 = vmatprep.subr.bf16.mxu0 %v12495_v44 }
 0xa69   :  { %4086 = vmatpush1.bf16.msra.mxu1 %v12492_v31  ;;  %9721 = vmatpush3.bf16.msra.mxu0 %v12495_v44 }
 0xa6a   :  { %4087 = vmatprep.subr.bf16.mxu1 %v12498_v5  ;;  %9722 = vmatprep.subr.bf16.mxu0 %v12499_v38 }
 0xa6d   :  { %4088 = vmatpush1.bf16.msra.mxu1 %v12496_v16  ;;  %9723 = vmatpush3.bf16.msra.mxu0 %v12499_v38 }
 0xa6e   :  { %4089 = vmatprep.subr.bf16.mxu1 %v12502_v33  ;;  %9724 = vmatprep.subr.bf16.mxu0 %v12503_v22 }
 0xa71   :  { %4090 = vmatpush1.bf16.msra.mxu1 %v12500_v21  ;;  %9725 = vmatpush3.bf16.msra.mxu0 %v12503_v22  ;;  %v16406_v22 = vld [vmem:[#allocation63_spill] sm:$0xff] }
 0xa72   :  { %4091 = vmatprep.subr.bf16.mxu1 %v12506_v56  ;;  %9726 = vmatprep.subr.bf16.mxu0 %v12507_v8 }
 0xa75   :  { %4092 = vmatpush1.bf16.msra.mxu1 %v12504_v27  ;;  %9727 = vmatpush3.bf16.msra.mxu0 %v12507_v8 }
 0xa76   :  { %4093 = vmatprep.subr.bf16.mxu1 %v12510_v35  ;;  %9728 = vmatprep.subr.bf16.mxu0 %v12511_v36  ;;  %v16407_v35 = vld [vmem:[#allocation73_spill] sm:$0xff] }
 0xa79   :  { %4094 = vmatpush1.bf16.msra.mxu1 %v12508_v42  ;;  %9729 = vmatpush3.bf16.msra.mxu0 %v12511_v36 }
 0xa7a   :  { %4417 = vmatprep.subr.bf16.mxu1 %v12514_v55  ;;  %9738 = vmatprep.subr.bf16.mxu0 %v12515_v61 }
 0xa7c   :  { %4112 = vmatmul.mubr.bf16.vlgmr.msra.gmra.mrb[64].mxu1 %v14914_v50  ;;  %9731 = vmatmul.mubr.bf16.vlgmr.msra.gmra.mrb[56].mxu0 %v14920_v51 }
 0xa7d   :  { %9734 = vmatprep.mubr.bf16.mxu0 %v14924_v54  ;;  %4121 = vmatprep.mubr.bf16.mxu1 %v16401_v32 }
 0xa7e   :  { %4418 = vmatpush1.bf16.msra.mxu1 %v12512_v26  ;;  %9739 = vmatpush3.bf16.msra.mxu0 %v12515_v61 }
 0xa7f   :  { %4419 = vmatprep.subr.bf16.mxu1 %v12518_v13  ;;  %9740 = vmatprep.subr.bf16.mxu0 %v12519_v1 }
 0xa82   :  { %4420 = vmatpush1.bf16.msra.mxu1 %v12516_v2  ;;  %9741 = vmatpush3.bf16.msra.mxu0 %v12519_v1 }
 0xa83   :  { %4421 = vmatprep.subr.bf16.mxu1 %v12522_v7  ;;  %9742 = vmatprep.subr.bf16.mxu0 %v12523_v12 }
 0xa84   :  { %4122 = vmatmul.mubr.bf16.gmra.mrb[68].mxu1 %v14920_v51 }
 0xa85   :  { %4131 = vmatprep.mubr.bf16.mxu1 %v16401_v32 }
 0xa86   :  { %4422 = vmatpush1.bf16.msra.mxu1 %v12520_v18  ;;  %9743 = vmatpush3.bf16.msra.mxu0 %v12523_v12 }
 0xa87   :  { %4423 = vmatprep.subr.bf16.mxu1 %v12526_v39  ;;  %9744 = vmatprep.subr.bf16.mxu0 %v12527_v48 }
 0xa8a   :  { %4424 = vmatpush1.bf16.msra.mxu1 %v12524_v29  ;;  %9745 = vmatpush3.bf16.msra.mxu0 %v12527_v48  ;;  %v12932_v48 = vld [vmem:[%s16290_s27 + $0x38] sm:$0xff] }
 0xa8b   :  { %4425 = vmatprep.subr.bf16.mxu1 %v12530_v30  ;;  %9746 = vmatprep.subr.bf16.mxu0 %v12531_v58 }
 0xa8c   :  { %4132 = vmatmul.mubr.bf16.gmra.mrb[72].mxu1 %v14924_v54 }
 0xa8d   :  { %4141 = vmatprep.mubr.bf16.mxu1 %v16401_v32 }
 0xa8e   :  { %4426 = vmatpush1.bf16.msra.mxu1 %v12528_v59  ;;  %9747 = vmatpush3.bf16.msra.mxu0 %v12531_v58 }
 0xa8f   :  { %4427 = vmatprep.subr.bf16.mxu1 %v12534_v4  ;;  %9748 = vmatprep.subr.bf16.mxu0 %v12535_v10 }
 0xa92   :  { %4428 = vmatpush1.bf16.msra.mxu1 %v12532_v11  ;;  %9749 = vmatpush3.bf16.msra.mxu0 %v12535_v10 }
 0xa93   :  { %4429 = vmatprep.subr.bf16.mxu1 %v12538_v19  ;;  %9750 = vmatprep.subr.bf16.mxu0 %v12539_v24  ;;  %v16409_v19 = vld [vmem:[#allocation76_spill] sm:$0xff] }
 0xa96   :  { %4430 = vmatpush1.bf16.msra.mxu1 %v12536_v25  ;;  %9751 = vmatpush3.bf16.msra.mxu0 %v12539_v24 }
 0xa97   :  { %4431 = vmatprep.subr.bf16.mxu1 %v12542_v34  ;;  %9752 = vmatprep.subr.bf16.mxu0 %v12543_v40  ;;  %v12544_v34 = vld [vmem:[#allocation14] ss:$12 sps:$4 sm:$0xff]  }
 0xa9a   :  { %4432 = vmatpush1.bf16.msra.mxu1 %v12540_v43  ;;  %9753 = vmatpush3.bf16.msra.mxu0 %v12543_v40  ;;  %v12550_v40 = vld [vmem:[#allocation14 + $0x1c] ss:$12 sps:$4 sm:$0xff]   ;;  %v12554_v43 = vld [vmem:[#allocation14 + $0x34] ss:$12 sps:$4 sm:$0xff]  }
 0xa9b   :  { %4755 = vmatprep.subr.bf16.mxu1 %v12546_v53  ;;  %9762 = vmatprep.subr.bf16.mxu0 %v14934_v62  ;;  %v12555_v53 = vld [vmem:[#allocation14 + $0x38] ss:$12 sps:$4 sm:$0xff]  }
 0xb0f   :  { %v3645_v63 = vpop.f32.mrb[60].mxu1  ;;  %v3716_v20 = vpop.f32.mrb[52].mxu0 }
 0xb10   :  { %v3720_v37 = vadd.f32 %v3645_v63, %v16404_v23  ;;  %v3647_v49 = vpop.f32.mrb[61].mxu1  ;;  %v9678_v60 = vpop.f32.mrb[53].mxu0  ;;  %v3734_v38 = vadd.f32 %v16377_v9, %v3716_v20  ;;  %v12552_v63 = vld [vmem:[#allocation14 + $0x30] ss:$12 sps:$4 sm:$0xff]   ;;  %v12556_v23 = vld [vmem:[#allocation14 + $0x48] ss:$12 sps:$4 sm:$0xff]  }
 0xb11   :  { %v3727_v14 = vadd.f32 %v3647_v49, %v16405_v57  ;;  %v12559_v20 = vld [vmem:[#allocation14 + $0x50] ss:$12 sps:$4 sm:$0xff]   ;;  %v12563_v60 = vld [vmem:[#allocation14 + $0x68] ss:$12 sps:$4 sm:$0xff]  }
 0xb12   :  { %v8285_v41 = vmul.f32 -1.442695, %v3720_v37  ;;  %v12562_v49 = vld [vmem:[#allocation14 + $0x64] ss:$12 sps:$4 sm:$0xff]  }
 0xb13   :  { %v8286_v6 = vmul.f32 -1.442695, %v3727_v14 }
 0xb14   :  { %12748 = vpow2.f32 %v8285_v41  ;;  %v12560_v41 = vld [vmem:[#allocation14 + $0x60] ss:$12 sps:$4 sm:$0xff]  }
 0xb15   :  { %12750 = vpow2.f32 %v8286_v6  ;;  %v12567_v6 = vld [vmem:[#allocation14 + $0x80] ss:$12 sps:$4 sm:$0xff]  }
 0xb1e   :  { %v12749_v44 = vpop.eup %12748 }
 0xb1f   :  { %v3724_v31 = vadd.f32 1.0, %v12749_v44  ;;  %v12751_v5 = vpop.eup %12750 }
 0xb20   :  { %v3731_v56 = vadd.f32 1.0, %v12751_v5  ;;  %v12564_v5 = vld [vmem:[#allocation14 + $0x78] ss:$12 sps:$4 sm:$0xff]  }
 0xb21   :  { %12752 = vrcp.f32 %v3724_v31 }
 0xb2b   :  { %v12753_v16 = vpop.eup %12752 }
 0xb2c   :  { %v3735_v33 = vmul.f32 %v12753_v16, %v3734_v38  ;;  %v12570_v38 = vld [vmem:[#allocation14 + $0x94] ss:$12 sps:$4 sm:$0xff]   ;;  %v12571_v16 = vld [vmem:[#allocation14 + $0x98] ss:$12 sps:$4 sm:$0xff]  }
 0xb2e   :  { %v3736_v21 = vadd.f32 %v3735_v33, %v16406_v22  ;;  %v14972_v33 = vld [vmem:[%s16290_s27] sm:$0xff] }
 0xb2f   :  { %v3810_v8 = vpop.f32.mrb[62].mxu1  ;;  %v3881_v27 = vpop.f32.mrb[54].mxu0 }
 0xb30   :  { %12754 = vtanh.f32 %v3736_v21  ;;  %v3885_v36 = vadd.f32 %v3810_v8, %v16407_v35  ;;  %v3812_v42 = vpop.f32.mrb[63].mxu1  ;;  %v9713_v45 = vpop.f32.mrb[55].mxu0  ;;  %v3899_v4 = vadd.f32 %v14679_v0, %v3881_v27  ;;  %v12548_v0 = vld [vmem:[#allocation14 + $0x18] ss:$12 sps:$4 sm:$0xff]   ;;  %v12568_v21 = vld [vmem:[#allocation14 + $0x90] ss:$12 sps:$4 sm:$0xff]  }
 0xb31   :  { %v3892_v55 = vadd.f32 %v3812_v42, %v16408_v46  ;;  %12756 = vrcp.f32 %v3731_v56  ;;  %v12574_v8 = vld [vmem:[#allocation14 + $0xac] ss:$12 sps:$4 sm:$0xff]   ;;  %v12575_v27 = vld [vmem:[#allocation14 + $0xb0] ss:$12 sps:$4 sm:$0xff]   ;;  %v12572_v35 = vld [vmem:[#allocation14 + $0xa8] ss:$12 sps:$4 sm:$0xff]  }
 0xb32   :  { %v8287_v61 = vmul.f32 -1.442695, %v3885_v36  ;;  %v12578_v36 = vld [vmem:[#allocation19 + $0x4] ss:$12 sps:$4 sm:$0xff]   ;;  %v12579_v42 = vld [vmem:[#allocation19 + $0x8] ss:$12 sps:$4 sm:$0xff]  }
 0xb33   :  { %v8288_v1 = vmul.f32 -1.442695, %v3892_v55  ;;  %v12576_v45 = vld [vmem:[#allocation19] ss:$12 sps:$4 sm:$0xff]   ;;  %v12582_v46 = vld [vmem:[#allocation19 + $0x1c] ss:$12 sps:$4 sm:$0xff]  }
 0xb34   :  { %12758 = vpow2.f32 %v8287_v61  ;;  %v16410_v55 = vld [vmem:[#allocation82_spill] sm:$0xff]  ;;  %v16411_v61 = vld [vmem:[#allocation92_spill] sm:$0xff] }
 0xb35   :  { %12760 = vpow2.f32 %v8288_v1  ;;  %v12584_v1 = vld [vmem:[#allocation19 + $0x30] ss:$12 sps:$4 sm:$0xff]  }
 0xb3a   :  { %v12755_v26 = vpop.eup %12754 }
 0xb3b   :  { %v3738_v9 = vsub.f32 %v14863_v28, %v12755_v26  ;;  %v12757_v13 = vpop.eup %12756 }
 0xb3d   :  { %v3739_v2 = vmul.f32 %v12757_v13, %v3738_v9  ;;  %v12583_v9 = vld [vmem:[#allocation19 + $0x20] ss:$12 sps:$4 sm:$0xff]   ;;  %v12580_v13 = vld [vmem:[#allocation19 + $0x18] ss:$12 sps:$4 sm:$0xff]  }
 0xb3e   :  { %v12759_v7 = vpop.eup %12758 }
 0xb3f   :  { %v3889_v12 = vadd.f32 1.0, %v12759_v7  ;;  %v3740_v18 = vadd.f32 %v12755_v26, %v3739_v2  ;;  %v12761_v59 = vpop.eup %12760  ;;  %v14989_v26 = vpack.c.bf16 %v16411_v61, %v16410_v55  ;;  %v16412_v2 = vld [vmem:[#allocation53_spill] sm:$0xff]  ;;  %v16413_v7 = vld [vmem:[#allocation96_spill] sm:$0xff] }
 0xb40   :  { %v3896_v25 = vadd.f32 1.0, %v12761_v59  ;;  %v12598_v59 = vld [vmem:[#allocation19 + $0x7c] ss:$12 sps:$4 sm:$0xff]   ;;  %v5259_v61 = vld [vmem:[#allocation16 + $0xa0] sm:$0xff] }
 0xb41   :  { %12762 = vrcp.f32 %v3889_v12  ;;  %v3741_v39 = vsub.f32 %v3740_v18, %v14863_v28  ;;  %v14997_v12 = vpack.c.bf16 %v16413_v7, %v16412_v2  ;;  %v12590_v18 = vld [vmem:[#allocation19 + $0x4c] ss:$12 sps:$4 sm:$0xff]  }
 0xb42   :  { %v5270_v2 = vld [vmem:[#allocation16 + $0xf8] sm:$0xff] }
 0xb43   :  { %v3742_v29 = vmul.f32 %v12932_v48, %v3741_v39  ;;  %v12591_v39 = vld [vmem:[#allocation19 + $0x50] ss:$12 sps:$4 sm:$0xff]   ;;  %v12588_v48 = vld [vmem:[#allocation19 + $0x48] ss:$12 sps:$4 sm:$0xff]  }
 0xb45   :  { %v3743_v30 = vadd.f32 %v3742_v29, %v14863_v28  ;;  %v12594_v29 = vld [vmem:[#allocation19 + $0x64] ss:$12 sps:$4 sm:$0xff]  }
 0xb47   :  { %v14950_v58 = vpack.c.bf16 %v3743_v30, %v14863_v28  ;;  %v12551_v28 = vld [vmem:[#allocation14 + $0x20] ss:$12 sps:$4 sm:$0xff]   ;;  %v12595_v30 = vld [vmem:[#allocation19 + $0x68] ss:$12 sps:$4 sm:$0xff]  }
 0xb49   :  { %4142 = vmatmul.mubr.bf16.gmra.mrb[76].mxu1 %v14950_v58  ;;  %9735 = vmatmul.mubr.bf16.gmra.mrb[60].mxu0 %v14950_v58 }
 0xb4a   :  { %9754 = vmatprep.mubr.bf16.mxu0 %v14914_v50  ;;  %4449 = vmatprep.mubr.bf16.mxu1 %v16401_v32 }
 0xb4b   :  { %v12763_v10 = vpop.eup %12762 }
 0xb4c   :  { %v3900_v11 = vmul.f32 %v12763_v10, %v3899_v4  ;;  %v12599_v4 = vld [vmem:[#allocation19 + $0x80] ss:$12 sps:$4 sm:$0xff]   ;;  %v12596_v10 = vld [vmem:[#allocation19 + $0x78] ss:$12 sps:$4 sm:$0xff]  }
 0xb4e   :  { %v3901_v24 = vadd.f32 %v3900_v11, %v16409_v19  ;;  %v12602_v11 = vld [vmem:[#allocation19 + $0x94] ss:$12 sps:$4 sm:$0xff]   ;;  %v12603_v19 = vld [vmem:[#allocation19 + $0x98] ss:$12 sps:$4 sm:$0xff]  }
 0xb50   :  { %12764 = vtanh.f32 %v3901_v24  ;;  %v12600_v24 = vld [vmem:[#allocation19 + $0x90] ss:$12 sps:$4 sm:$0xff]  }
 0xb51   :  { %4450 = vmatmul.mubr.bf16.vlgmr.msra.gmra.mrb[80].mxu1 %v14914_v50  ;;  %9755 = vmatmul.mubr.bf16.vlgmr.msra.gmra.mrb[64].mxu0 %v14920_v51  ;;  %12766 = vrcp.f32 %v3896_v25  ;;  %v12558_v50 = vld [vmem:[#allocation14 + $0x4c] ss:$12 sps:$4 sm:$0xff]  }
 0xb52   :  { %4756 = vmatpush1.bf16.msra.mxu1 %v12544_v34  ;;  %9763 = vmatpush3.bf16.msra.mxu0 %v14934_v62  ;;  %v12606_v25 = vld [vmem:[#allocation19 + $0xac] ss:$12 sps:$4 sm:$0xff]   ;;  %v12607_v34 = vld [vmem:[#allocation19 + $0xb0] ss:$12 sps:$4 sm:$0xff]  }
 0xb53   :  { %9758 = vmatprep.mubr.bf16.mxu0 %v14924_v54  ;;  %4757 = vmatprep.subr.bf16.mxu1 %v12550_v40  ;;  %v5240_v40 = vld [vmem:[#allocation16 + $0x8] sm:$0xff] }
 0xb54   :  { %9764 = vmatprep.subr.bf16.mxu0 %v12551_v28  ;;  %4459 = vmatprep.mubr.bf16.mxu1 %v16401_v32 }
 0xb56   :  { %4758 = vmatpush1.bf16.msra.mxu1 %v12548_v0  ;;  %9765 = vmatpush3.bf16.msra.mxu0 %v12551_v28  ;;  %v5243_v28 = vld [vmem:[#allocation16 + $0x20] sm:$0xff]  ;;  %v12604_v0 = vld [vmem:[#allocation19 + $0xa8] ss:$12 sps:$4 sm:$0xff]  }
 0xb57   :  { %4759 = vmatprep.subr.bf16.mxu1 %v12554_v43  ;;  %9766 = vmatprep.subr.bf16.mxu0 %v12555_v53  ;;  %v15007_v43 = vpack.c.bf16 %v5243_v28, %v5240_v40  ;;  %v5278_v40 = vld [vmem:[#allocation16 + $0x138] sm:$0xff] }
 0xb58   :  { %v5282_v28 = vld [vmem:[#allocation16 + $0x158] sm:$0xff] }
 0xb59   :  { %4460 = vmatmul.mubr.bf16.gmra.mrb[84].mxu1 %v14920_v51  ;;  %9759 = vmatmul.mubr.bf16.gmra.mrb[68].mxu0 %v14950_v58  ;;  %v12566_v51 = vld [vmem:[#allocation14 + $0x7c] ss:$12 sps:$4 sm:$0xff]  }
 0xb5a   :  { %v12765_v62 = vpop.eup %12764  ;;  %4760 = vmatpush1.bf16.msra.mxu1 %v12552_v63  ;;  %9767 = vmatpush3.bf16.msra.mxu0 %v12555_v53  ;;  %v5239_v53 = vld [vmem:[#allocation16] sm:$0xff]  ;;  %v5242_v63 = vld [vmem:[#allocation16 + $0x18] sm:$0xff] }
 0xb5b   :  { %v3903_v37 = vsub.f32 %v14908_v15, %v12765_v62  ;;  %4761 = vmatprep.subr.bf16.mxu1 %v12558_v50  ;;  %9768 = vmatprep.subr.bf16.mxu0 %v12559_v20  ;;  %v12767_v57 = vpop.eup %12766  ;;  %v5246_v50 = vld [vmem:[#allocation16 + $0x38] sm:$0xff] }
 0xb5c   :  { %4469 = vmatprep.mubr.bf16.mxu1 %v16401_v32 }
 0xb5d   :  { %v3904_v14 = vmul.f32 %v12767_v57, %v3903_v37  ;;  %v15009_v37 = vpack.c.bf16 %v5242_v63, %v5239_v53  ;;  %v5248_v57 = vld [vmem:[#allocation16 + $0x48] sm:$0xff]  ;;  %v5277_v53 = vld [vmem:[#allocation16 + $0x130] sm:$0xff] }
 0xb5e   :  { %4762 = vmatpush1.bf16.msra.mxu1 %v12556_v23  ;;  %9769 = vmatpush3.bf16.msra.mxu0 %v12559_v20  ;;  %v5249_v20 = vld [vmem:[#allocation16 + $0x50] sm:$0xff]  ;;  %v5244_v23 = vld [vmem:[#allocation16 + $0x28] sm:$0xff] }
 0xb5f   :  { %4763 = vmatprep.subr.bf16.mxu1 %v12562_v49  ;;  %9770 = vmatprep.subr.bf16.mxu0 %v12563_v60  ;;  %v3905_v44 = vadd.f32 %v12765_v62, %v3904_v14  ;;  %v5241_v62 = vld [vmem:[#allocation16 + $0x10] sm:$0xff]  ;;  %v15012_v49 = vpack.c.bf16 %v5249_v20, %v5246_v50  ;;  %v5252_v14 = vld [vmem:[#allocation16 + $0x68] sm:$0xff] }
 0xb60   :  { %v5280_v63 = vld [vmem:[#allocation16 + $0x148] sm:$0xff]  ;;  %v5281_v20 = vld [vmem:[#allocation16 + $0x150] sm:$0xff] }
 0xb61   :  { %4470 = vmatmul.mubr.bf16.gmra.mrb[88].mxu1 %v14924_v54  ;;  %v3906_v31 = vsub.f32 %v3905_v44, %v14908_v15  ;;  %v5250_v44 = vld [vmem:[#allocation16 + $0x58] sm:$0xff] }
 0xb62   :  { %4764 = vmatpush1.bf16.msra.mxu1 %v12560_v41  ;;  %9771 = vmatpush3.bf16.msra.mxu0 %v12563_v60  ;;  %v5245_v60 = vld [vmem:[#allocation16 + $0x30] sm:$0xff]  ;;  %v5255_v41 = vld [vmem:[#allocation16 + $0x80] sm:$0xff] }
 0xb63   :  { %4765 = vmatprep.subr.bf16.mxu1 %v12566_v51  ;;  %9772 = vmatprep.subr.bf16.mxu0 %v12567_v6  ;;  %v3907_v22 = vmul.f32 %v14972_v33, %v3906_v31  ;;  %v15015_v51 = vpack.c.bf16 %v5244_v23, %v5241_v62  ;;  %v15020_v31 = vpack.c.bf16 %v5248_v57, %v5245_v60  ;;  %v5284_v62 = vld [vmem:[#allocation16 + $0x168] sm:$0xff]  ;;  %v5291_v60 = vld [vmem:[#allocation20 + $0x20] sm:$0xff] }
 0xb64   :  { %4479 = vmatprep.mubr.bf16.mxu1 %v16401_v32  ;;  %v5288_v23 = vld [vmem:[#allocation20 + $0x8] sm:$0xff]  ;;  %v15085_v57 = vpack.c.bf16 %v5280_v63, %v5277_v53  ;;  %v5315_v63 = vld [vmem:[#allocation20 + $0xe0] sm:$0xff] }
 0xb65   :  { %v3908_v54 = vadd.f32 %v3907_v22, %v14908_v15  ;;  %v5258_v22 = vld [vmem:[#allocation16 + $0x98] sm:$0xff]  ;;  %v5312_v53 = vld [vmem:[#allocation20 + $0xc8] sm:$0xff] }
 0xb66   :  { %4766 = vmatpush1.bf16.msra.mxu1 %v12564_v5  ;;  %9773 = vmatpush3.bf16.msra.mxu0 %v12567_v6  ;;  %v5247_v6 = vld [vmem:[#allocation16 + $0x40] sm:$0xff]  ;;  %v15024_v5 = vpack.c.bf16 %v5255_v41, %v5252_v14  ;;  %16423 = vst [vmem:[#allocation89_spill] sm:$0xff] %v15085_v57  ;;  %v5286_v41 = vld [vmem:[#allocation16 + $0x178] sm:$0xff] }
 0xb67   :  { %4767 = vmatprep.subr.bf16.mxu1 %v12570_v38  ;;  %9774 = vmatprep.subr.bf16.mxu0 %v12571_v16  ;;  %v14978_v56 = vpack.c.bf16 %v14908_v15, %v3908_v54  ;;  %v14985_v15 = vpack.c.bf16 %v14716_v47, %v14810_v3  ;;  %v12586_v47 = vld [vmem:[#allocation19 + $0x34] ss:$12 sps:$4 sm:$0xff]   ;;  %v12587_v3 = vld [vmem:[#allocation19 + $0x38] ss:$12 sps:$4 sm:$0xff]  }
 0xb68   :  { %v5251_v38 = vld [vmem:[#allocation16 + $0x60] sm:$0xff]  ;;  %v5261_v54 = vld [vmem:[#allocation16 + $0xb0] sm:$0xff] }
 0xb69   :  { %9778 = vmatprep.mubr.bf16.mxu0 %v14978_v56  ;;  %4480 = vmatmul.mubr.bf16.gmra.mrb[92].mxu1 %v14950_v58  ;;  %v12592_v58 = vld [vmem:[#allocation19 + $0x60] ss:$12 sps:$4 sm:$0xff]  }
 0xb6a   :  { %4768 = vmatpush1.bf16.msra.mxu1 %v12568_v21  ;;  %9775 = vmatpush3.bf16.msra.mxu0 %v12571_v16  ;;  %v5254_v16 = vld [vmem:[#allocation16 + $0x78] sm:$0xff]  ;;  %v15028_v21 = vpack.c.bf16 %v5250_v44, %v5247_v6  ;;  %v5283_v14 = vld [vmem:[#allocation16 + $0x160] sm:$0xff]  ;;  %v15090_v6 = vpack.c.bf16 %v5284_v62, %v5281_v20  ;;  %v15094_v44 = vpack.c.bf16 %v5291_v60, %v5288_v23 }
 0xb6b   :  { %4769 = vmatprep.subr.bf16.mxu1 %v12574_v8  ;;  %9776 = vmatprep.subr.bf16.mxu0 %v12575_v27  ;;  %v5256_v8 = vld [vmem:[#allocation16 + $0x88] sm:$0xff]  ;;  %v5307_v62 = vld [vmem:[#allocation20 + $0xa0] sm:$0xff]  ;;  %v5310_v23 = vld [vmem:[#allocation20 + $0xb8] sm:$0xff] }
 0xb6c   :  { %4787 = vmatprep.mubr.bf16.mxu1 %v16401_v32  ;;  %16424 = vst [vmem:[#allocation84_spill] sm:$0xff] %v15090_v6  ;;  %16425 = vst [vmem:[#allocation65_spill] sm:$0xff] %v15094_v44 }
 0xb6e   :  { %4770 = vmatpush1.bf16.msra.mxu1 %v12572_v35  ;;  %9777 = vmatpush3.bf16.msra.mxu0 %v12575_v27  ;;  %v15032_v27 = vpack.c.bf16 %v5254_v16, %v5251_v38  ;;  %v15035_v35 = vpack.c.bf16 %v5261_v54, %v5258_v22  ;;  %v5287_v38 = vld [vmem:[#allocation20] sm:$0xff]  ;;  %v5290_v16 = vld [vmem:[#allocation20 + $0x18] sm:$0xff]  ;;  %v5297_v54 = vld [vmem:[#allocation20 + $0x50] sm:$0xff] }
 0xb6f   :  { %5077 = vmatprep.subr.bf16.mxu1 %v12578_v36  ;;  %9786 = vmatprep.subr.bf16.mxu0 %v12579_v42  ;;  %v5257_v36 = vld [vmem:[#allocation16 + $0x90] sm:$0xff]  ;;  %v5294_v22 = vld [vmem:[#allocation20 + $0x38] sm:$0xff] }
 0xb71   :  { %9779 = vmatmul.mubr.bf16.vlgmr.msra.gmra.mrb[56].mxu0 %v14985_v15  ;;  %4788 = vmatmul.mubr.bf16.vlgmr.msra.gmra.mrb[64].mxu1 %v14978_v56 }
 0xb72   :  { %9782 = vmatprep.mubr.bf16.mxu0 %v14989_v26  ;;  %5078 = vmatpush1.bf16.msra.mxu1 %v12576_v45  ;;  %v5264_v45 = vld [vmem:[#allocation16 + $0xc8] sm:$0xff] }
 0xb73   :  { %9787 = vmatpush3.bf16.msra.mxu0 %v12579_v42  ;;  %5079 = vmatprep.subr.bf16.mxu1 %v12582_v46  ;;  %v5260_v42 = vld [vmem:[#allocation16 + $0xa8] sm:$0xff]  ;;  %v5267_v46 = vld [vmem:[#allocation16 + $0xe0] sm:$0xff] }
 0xb74   :  { %9788 = vmatprep.subr.bf16.mxu0 %v12583_v9  ;;  %4797 = vmatprep.mubr.bf16.mxu1 %v16401_v32 }
 0xb76   :  { %5080 = vmatpush1.bf16.msra.mxu1 %v12580_v13  ;;  %v15044_v13 = vpack.c.bf16 %v5260_v42, %v5257_v36  ;;  %v15101_v36 = vpack.c.bf16 %v5290_v16, %v5287_v38  ;;  %v15104_v42 = vpack.c.bf16 %v5297_v54, %v5294_v22  ;;  %v5314_v38 = vld [vmem:[#allocation20 + $0xd8] sm:$0xff]  ;;  %v5321_v22 = vld [vmem:[#allocation20 + $0x110] sm:$0xff]  ;;  %v15142_v54 = vpack.c.bf16 %v5310_v23, %v5307_v62  ;;  %v5328_v23 = vld [vmem:[#allocation20 + $0x148] sm:$0xff] }
 0xb77   :  { %9789 = vmatpush3.bf16.msra.mxu0 %v12583_v9  ;;  %5081 = vmatprep.subr.bf16.mxu1 %v12586_v47  ;;  %v5262_v9 = vld [vmem:[#allocation16 + $0xb8] sm:$0xff]  ;;  %v15048_v47 = vpack.c.bf16 %v5267_v46, %v5264_v45  ;;  %v5293_v45 = vld [vmem:[#allocation20 + $0x30] sm:$0xff]  ;;  %v5296_v46 = vld [vmem:[#allocation20 + $0x48] sm:$0xff] }
 0xb78   :  { %9790 = vmatprep.subr.bf16.mxu0 %v12587_v3  ;;  %v15051_v7 = vpack.c.bf16 %v5262_v9, %v5259_v61  ;;  %v5300_v61 = vld [vmem:[#allocation20 + $0x68] sm:$0xff]  ;;  %v5303_v9 = vld [vmem:[#allocation20 + $0x80] sm:$0xff]  ;;  %v5318_v16 = vld [vmem:[#allocation20 + $0xf8] sm:$0xff] }
 0xb79   :  { %9783 = vmatmul.mubr.bf16.gmra.mrb[60].mxu0 %v14997_v12  ;;  %4798 = vmatmul.mubr.bf16.gmra.mrb[68].mxu1 %v14985_v15  ;;  %16414 = vst [vmem:[#allocation58_spill] sm:$0xff] %v15048_v47  ;;  %v5325_v62 = vld [vmem:[#allocation20 + $0x130] sm:$0xff] }
 0xb7a   :  { %5082 = vmatpush1.bf16.msra.mxu1 %v12584_v1  ;;  %9802 = vmatprep.mubr.bf16.mxu0 %v14978_v56  ;;  %v5266_v1 = vld [vmem:[#allocation16 + $0xd8] sm:$0xff] }
 0xb7b   :  { %9791 = vmatpush3.bf16.msra.mxu0 %v12587_v3  ;;  %5083 = vmatprep.subr.bf16.mxu1 %v12590_v18  ;;  %v5263_v3 = vld [vmem:[#allocation16 + $0xc0] sm:$0xff]  ;;  %v5265_v18 = vld [vmem:[#allocation16 + $0xd0] sm:$0xff] }
 0xb7c   :  { %9792 = vmatprep.subr.bf16.mxu0 %v12591_v39  ;;  %4807 = vmatprep.mubr.bf16.mxu1 %v16401_v32 }
 0xb7e   :  { %5084 = vmatpush1.bf16.msra.mxu1 %v12588_v48  ;;  %v15057_v48 = vpack.c.bf16 %v5266_v1, %v5263_v3  ;;  %v5295_v1 = vld [vmem:[#allocation20 + $0x40] sm:$0xff] }
 0xb7f   :  { %9793 = vmatpush3.bf16.msra.mxu0 %v12591_v39  ;;  %5085 = vmatprep.subr.bf16.mxu1 %v12594_v29  ;;  %v5268_v39 = vld [vmem:[#allocation16 + $0xe8] sm:$0xff] }
 0xb80   :  { %9794 = vmatprep.subr.bf16.mxu0 %v12595_v30  ;;  %16415 = vst [vmem:[#allocation52_spill] sm:$0xff] %v15057_v48 }
 0xb81   :  { %4808 = vmatmul.mubr.bf16.gmra.mrb[72].mxu1 %v14989_v26 }
 0xb82   :  { %5086 = vmatpush1.bf16.msra.mxu1 %v12592_v58  ;;  %4817 = vmatprep.mubr.bf16.mxu1 %v16401_v32  ;;  %v5272_v58 = vld [vmem:[#allocation16 + $0x108] sm:$0xff] }
 0xb83   :  { %9795 = vmatpush3.bf16.msra.mxu0 %v12595_v30  ;;  %5087 = vmatprep.subr.bf16.mxu1 %v12598_v59  ;;  %v5269_v30 = vld [vmem:[#allocation16 + $0xf0] sm:$0xff]  ;;  %v5276_v59 = vld [vmem:[#allocation16 + $0x128] sm:$0xff] }
 0xb84   :  { %9796 = vmatprep.subr.bf16.mxu0 %v12599_v4 }
 0xb86   :  { %5088 = vmatpush1.bf16.msra.mxu1 %v12596_v10  ;;  %v15063_v10 = vpack.c.bf16 %v5268_v39, %v5265_v18  ;;  %v15116_v18 = vpack.c.bf16 %v5303_v9, %v5300_v61  ;;  %v5299_v39 = vld [vmem:[#allocation20 + $0x60] sm:$0xff]  ;;  %v5317_v61 = vld [vmem:[#allocation20 + $0xf0] sm:$0xff]  ;;  %v5320_v9 = vld [vmem:[#allocation20 + $0x108] sm:$0xff] }
 0xb87   :  { %9797 = vmatpush3.bf16.msra.mxu0 %v12599_v4  ;;  %5089 = vmatprep.subr.bf16.mxu1 %v12602_v11  ;;  %v5279_v4 = vld [vmem:[#allocation16 + $0x140] sm:$0xff] }
 0xb88   :  { %9798 = vmatprep.subr.bf16.mxu0 %v12603_v19  ;;  %16417 = vst [vmem:[#allocation91_spill] sm:$0xff] %v15063_v10  ;;  %v5271_v11 = vld [vmem:[#allocation16 + $0x100] sm:$0xff] }
 0xb89   :  { %4818 = vmatmul.mubr.bf16.gmra.mrb[76].mxu1 %v14997_v12 }
 0xb8a   :  { %5090 = vmatpush1.bf16.msra.mxu1 %v12600_v24  ;;  %5109 = vmatprep.mubr.bf16.mxu1 %v16401_v32  ;;  %v15068_v24 = vpack.c.bf16 %v5272_v58, %v5269_v30  ;;  %v5302_v30 = vld [vmem:[#allocation20 + $0x78] sm:$0xff] }
 0xb8b   :  { %9799 = vmatpush3.bf16.msra.mxu0 %v12603_v19  ;;  %5091 = vmatprep.subr.bf16.mxu1 %v12606_v25  ;;  %v5274_v19 = vld [vmem:[#allocation16 + $0x118] sm:$0xff]  ;;  %v15072_v25 = vpack.c.bf16 %v5279_v4, %v5276_v59  ;;  %v5309_v59 = vld [vmem:[#allocation20 + $0xb0] sm:$0xff] }
 0xb8c   :  { %9800 = vmatprep.subr.bf16.mxu0 %v12607_v34  ;;  %16418 = vst [vmem:[#allocation87_spill] sm:$0xff] %v15068_v24  ;;  %v5306_v58 = vld [vmem:[#allocation20 + $0x98] sm:$0xff] }
 0xb8d   :  { %16419 = vst [vmem:[#allocation60_spill] sm:$0xff] %v15072_v25 }
 0xb8e   :  { %5092 = vmatpush1.bf16.msra.mxu1 %v12604_v0  ;;  %v5285_v0 = vld [vmem:[#allocation16 + $0x170] sm:$0xff] }
 0xb8f   :  { %9801 = vmatpush3.bf16.msra.mxu0 %v12607_v34  ;;  %11337 = vmatprep.subr.bf16.mxu1 %v15007_v43  ;;  %v5275_v34 = vld [vmem:[#allocation16 + $0x120] sm:$0xff] }
 0xb90   :  { %11368 = vmatprep.subr.bf16.mxu0 %v16292_v17  ;;  %v15079_v50 = vpack.c.bf16 %v5278_v40, %v5275_v34  ;;  %v15126_v34 = vpack.c.bf16 %v5302_v30, %v5299_v39  ;;  %v15129_v40 = vpack.c.bf16 %v5309_v59, %v5306_v58  ;;  %v5319_v30 = vld [vmem:[#allocation20 + $0x100] sm:$0xff]  ;;  %v5322_v58 = vld [vmem:[#allocation20 + $0x118] sm:$0xff]  ;;  %v15156_v59 = vpack.c.bf16 %v5320_v9, %v5317_v61 }
 0xb91   :  { %5110 = vmatmul.mubr.bf16.vlgmr.msra.gmra.mrb[80].mxu1 %v14978_v56  ;;  %v5253_v56 = vld [vmem:[#allocation16 + $0x70] sm:$0xff]  ;;  %v5334_v61 = vld [vmem:[#allocation20 + $0x178] sm:$0xff] }
 0xb92   :  { %9803 = vmatmul.mubr.bf16.vlgmr.msra.gmra.mrb[64].mxu0 %v14985_v15  ;;  %11339 = vmatpush1.bf16.msra.mxu1 %v15009_v37  ;;  %v15038_v55 = vpack.c.bf16 %v5256_v8, %v5253_v56  ;;  %16421 = vst [vmem:[#allocation55_spill] sm:$0xff] %v15079_v50  ;;  %v5289_v56 = vld [vmem:[#allocation20 + $0x10] sm:$0xff]  ;;  %v5292_v8 = vld [vmem:[#allocation20 + $0x28] sm:$0xff] }
 0xb93   :  { %9806 = vmatprep.mubr.bf16.mxu0 %v14989_v26  ;;  %11341 = vmatprep.subr.bf16.mxu1 %v15012_v49  ;;  %v15107_v3 = vpack.c.bf16 %v5292_v8, %v5289_v56  ;;  %v5313_v56 = vld [vmem:[#allocation20 + $0xd0] sm:$0xff]  ;;  %v5316_v8 = vld [vmem:[#allocation20 + $0xe8] sm:$0xff] }
 0xb94   :  { %5119 = vmatprep.mubr.bf16.mxu1 %v16401_v32  ;;  %11370 = vmatpush3.bf16.msra.mxu0 %v15015_v51  ;;  %v15152_v39 = vpack.c.bf16 %v5316_v8, %v5313_v56  ;;  %v15172_v56 = vpack.c.bf16 %v5328_v23, %v5325_v62  ;;  %v5331_v8 = vld [vmem:[#allocation20 + $0x160] sm:$0xff] }
 0xb95   :  { %11371 = vmatprep.subr.bf16.mxu0 %v16292_v17 }
 0xb96   :  { %11343 = vmatpush1.bf16.msra.mxu1 %v15020_v31 }
 0xb97   :  { %11345 = vmatprep.subr.bf16.mxu1 %v15024_v5 }
 0xb98   :  { %11373 = vmatpush3.bf16.msra.mxu0 %v15028_v21 }
 0xb99   :  { %5120 = vmatmul.mubr.bf16.gmra.mrb[84].mxu1 %v14985_v15  ;;  %11374 = vmatprep.subr.bf16.mxu0 %v16292_v17  ;;  %v5273_v15 = vld [vmem:[#allocation16 + $0x110] sm:$0xff] }
 0xb9a   :  { %9807 = vmatmul.mubr.bf16.gmra.mrb[68].mxu0 %v14997_v12  ;;  %11347 = vmatpush1.bf16.msra.mxu1 %v15032_v27  ;;  %v15060_v29 = vpack.c.bf16 %v5273_v15, %v5270_v2  ;;  %v5298_v2 = vld [vmem:[#allocation20 + $0x58] sm:$0xff]  ;;  %v15112_v15 = vpack.c.bf16 %v5296_v46, %v5293_v45  ;;  %v15149_v46 = vpack.c.bf16 %v5321_v22, %v5318_v16  ;;  %v5329_v16 = vld [vmem:[#allocation20 + $0x150] sm:$0xff]  ;;  %v5332_v22 = vld [vmem:[#allocation20 + $0x168] sm:$0xff] }
 0xb9b   :  { %11349 = vmatprep.subr.bf16.mxu1 %v15035_v35  ;;  %5129 = vmatprep.mubr.bf16.mxu1 %v16401_v32  ;;  %v15120_v4 = vpack.c.bf16 %v5298_v2, %v5295_v1  ;;  %v5324_v1 = vld [vmem:[#allocation20 + $0x128] sm:$0xff]  ;;  %v5327_v2 = vld [vmem:[#allocation20 + $0x140] sm:$0xff]  ;;  %v15176_v9 = vpack.c.bf16 %v5332_v22, %v5329_v16 }
 0xb9c   :  { %11376 = vmatpush3.bf16.msra.mxu0 %v15038_v55  ;;  %9842 = vmatprep.mubr.msk.f32.mxu0 %vm13368_vm12, %v16293_v52  ;;  %16416 = vst [vmem:[#allocation90_spill] sm:$0xff] %v15060_v29  ;;  %v16430_v22 = vld [vmem:[#allocation51_spill] sm:$0xff] }
 0xb9d   :  { %11377 = vmatprep.subr.bf16.mxu0 %v16292_v17 }
 0xb9e   :  { %11351 = vmatpush1.bf16.msra.mxu1 %v15044_v13 }
 0xb9f   :  { %11353 = vmatprep.subr.bf16.mxu1 %v15048_v47 }
 0xba0   :  { %11379 = vmatpush3.bf16.msra.mxu0 %v15051_v7 }
 0xba1   :  { %5130 = vmatmul.mubr.bf16.gmra.mrb[88].mxu1 %v14989_v26  ;;  %11380 = vmatprep.subr.bf16.mxu0 %v16292_v17  ;;  %v15075_v26 = vpack.c.bf16 %v5274_v19, %v5271_v11  ;;  %v5301_v11 = vld [vmem:[#allocation20 + $0x70] sm:$0xff]  ;;  %v5304_v19 = vld [vmem:[#allocation20 + $0x88] sm:$0xff] }
 0xba2   :  { %11355 = vmatpush1.bf16.msra.mxu1 %v15057_v48  ;;  %5139 = vmatprep.mubr.bf16.mxu1 %v16401_v32  ;;  %v15082_v32 = vpack.c.bf16 %v5285_v0, %v5282_v28  ;;  %v5305_v28 = vld [vmem:[#allocation20 + $0x90] sm:$0xff]  ;;  %v5308_v0 = vld [vmem:[#allocation20 + $0xa8] sm:$0xff]  ;;  %v15132_v20 = vpack.c.bf16 %v5304_v19, %v5301_v11  ;;  %v15159_v11 = vpack.c.bf16 %v5327_v2, %v5324_v1  ;;  %v5323_v19 = vld [vmem:[#allocation20 + $0x120] sm:$0xff] }
 0xba3   :  { %11357 = vmatprep.subr.bf16.mxu1 %v15060_v29  ;;  %16420 = vst [vmem:[#allocation62_spill] sm:$0xff] %v15075_v26  ;;  %v15136_v60 = vpack.c.bf16 %v5308_v0, %v5305_v28  ;;  %v5326_v28 = vld [vmem:[#allocation20 + $0x138] sm:$0xff]  ;;  %v15180_v1 = vpack.c.bf16 %v5334_v61, %v5331_v8 }
 0xba4   :  { %11382 = vmatpush3.bf16.msra.mxu0 %v15063_v10  ;;  %16422 = vst [vmem:[#allocation88_spill] sm:$0xff] %v15082_v32  ;;  %v5330_v0 = vld [vmem:[#allocation20 + $0x158] sm:$0xff] }
 0xba5   :  { %11383 = vmatprep.subr.bf16.mxu0 %v16292_v17  ;;  %v3917_v2 = vld [vmem:[%s16111_s14] sm:$0x7]  ;;  %s8174_s14 = sshll.u32 %s13370_s19, 4  ;;  %s8175_s14 = int_to_ptr.vmem [resolvable:$true] %s8174_s14 }
 0xba6   :  { %11359 = vmatpush1.bf16.msra.mxu1 %v15068_v24  ;;  %v15243_v8 = vrot.slane %v3917_v2, %v16430_v22  ;;  %s13299_s23 = scalar_lea.vmem %s8175_s14, 128  ;;  %p13304_p3 = scmp.lt.s32.totalorder %s8175_s14, %s8175_s14 }
 0xba7   :  { %11361 = vmatprep.subr.bf16.mxu1 %v15072_v25  ;;  %p13300_p2 = scmp.ne.s32.totalorder %s8175_s14, %s13299_s23  ;;  %p13305_p4 = scmp.lt.s32.totalorder %s13299_s23, %s13299_s23 }
 0xba8   :  { %11385 = vmatpush3.bf16.msra.mxu0 %v15075_v26 }
 0xba9   :  { %5140 = vmatmul.mubr.bf16.gmra.mrb[92].mxu1 %v14997_v12  ;;  %11386 = vmatprep.subr.bf16.mxu0 %v16292_v17  ;;  %v15097_v12 = vpack.c.bf16 %v5286_v41, %v5283_v14  ;;  %v15139_v14 = vpack.c.bf16 %v5315_v63, %v5312_v53  ;;  %v5311_v41 = vld [vmem:[#allocation20 + $0xc0] sm:$0xff]  ;;  %v5333_v53 = vld [vmem:[#allocation20 + $0x170] sm:$0xff]  ;;  %v15162_v63 = vpack.c.bf16 %v5322_v58, %v5319_v30  ;;  %p13306_p5 = por %p13305_p4, %p13304_p3 }
 0xbaa   :  { %11363 = vmatpush1.bf16.msra.mxu1 %v15079_v50  ;;  %5413 = vmatprep.mubr.f32.mxu1 %v16293_v52  ;;  %v15146_v45 = vpack.c.bf16 %v5314_v38, %v5311_v41  ;;  %v15166_v41 = vpack.c.bf16 %v5326_v28, %v5323_v19  ;;  %v15169_v38 = vpack.c.bf16 %v5333_v53, %v5330_v0  ;;  %v16427_v30 = vld [vmem:[#allocation49_spill] sm:$0xff]  ;;  %v16429_v53 = vld [vmem:[#allocation50_spill] sm:$0xff] }
 0xbab   :  { %11365 = vmatprep.subr.bf16.mxu1 %v15082_v32  ;;  %16426 = vst [vmem:[#allocation66_spill] sm:$0xff] %v15097_v12  ;;  %v15228_v58 = vrot.slane %v3917_v2, %v16427_v30  ;;  %v15236_v62 = vrot.slane %v3917_v2, %v16429_v53  ;;  %p13307_p6 = pnand %p13306_p5, %p13300_p2 }
 0xbac   :  { %11388 = vmatpush3.bf16.msra.mxu0 %v15085_v57 }
 0xbad   :  { %11389 = vmatprep.subr.bf16.mxu0 %v16292_v17 }
 0xbae   :  { %11367 = vmatpush1.bf16.msra.mxu1 %v15090_v6 }
 0xbaf   :  { %11393 = vmatprep.subr.bf16.mxu1 %v15094_v44 }
 0xbb0   :  { %11391 = vmatpush3.bf16.msra.mxu0 %v15097_v12 }
 0xbb1   :  { %5414 = vmatmul.mubr.f32.vlgmr.msra.gmra.mrb[96].mxu1 %v16293_v52  ;;  %11424 = vmatprep.subr.bf16.mxu0 %v16292_v17 }
 0xbb2   :  { %11395 = vmatpush1.bf16.msra.mxu1 %v15101_v36  ;;  %5577 = vmatprep.mubr.f32.mxu1 %v16293_v52 }
 0xbb3   :  { %11397 = vmatprep.subr.bf16.mxu1 %v15104_v42  ;;  %9843 = vmatmul.mubr.f32.vlgmr.msra.gmra.mrb[72].mxu0 %v16293_v52 }
 0xbb4   :  { %11426 = vmatpush3.bf16.msra.mxu0 %v15107_v3  ;;  %9877 = vmatprep.mubr.msk.f32.mxu0 %vm13368_vm12, %v16293_v52 }
 0xbb5   :  { %11427 = vmatprep.subr.bf16.mxu0 %v16292_v17 }
 0xbb6   :  { %11399 = vmatpush1.bf16.msra.mxu1 %v15112_v15 }
 0xbb7   :  { %11401 = vmatprep.subr.bf16.mxu1 %v15116_v18 }
 0xbb8   :  { %11429 = vmatpush3.bf16.msra.mxu0 %v15120_v4 }
 0xbb9   :  { %11430 = vmatprep.subr.bf16.mxu0 %v16292_v17 }
 0xbba   :  { %11403 = vmatpush1.bf16.msra.mxu1 %v15126_v34 }
 0xbbb   :  { %11405 = vmatprep.subr.bf16.mxu1 %v15129_v40 }
 0xbbc   :  { %11432 = vmatpush3.bf16.msra.mxu0 %v15132_v20 }
 0xbbd   :  { %11433 = vmatprep.subr.bf16.mxu0 %v16292_v17 }
 0xbbe   :  { %11407 = vmatpush1.bf16.msra.mxu1 %v15136_v60 }
 0xbbf   :  { %11409 = vmatprep.subr.bf16.mxu1 %v15139_v14 }
 0xbc0   :  { %11435 = vmatpush3.bf16.msra.mxu0 %v15142_v54 }
 0xbc1   :  { %11436 = vmatprep.subr.bf16.mxu0 %v16292_v17 }
 0xbc2   :  { %11411 = vmatpush1.bf16.msra.mxu1 %v15146_v45 }
 0xbc3   :  { %11413 = vmatprep.subr.bf16.mxu1 %v15149_v46 }
 0xbc4   :  { %11438 = vmatpush3.bf16.msra.mxu0 %v15152_v39 }
 0xbc5   :  { %11439 = vmatprep.subr.bf16.mxu0 %v16292_v17 }
 0xbc6   :  { %11415 = vmatpush1.bf16.msra.mxu1 %v15156_v59 }
 0xbc7   :  { %11417 = vmatprep.subr.bf16.mxu1 %v15159_v11 }
 0xbc8   :  { %11441 = vmatpush3.bf16.msra.mxu0 %v15162_v63 }
 0xbc9   :  { %11442 = vmatprep.subr.bf16.mxu0 %v16292_v17 }
 0xbca   :  { %11419 = vmatpush1.bf16.msra.mxu1 %v15166_v41 }
 0xbcb   :  { %11421 = vmatprep.subr.bf16.mxu1 %v15169_v38 }
 0xbcc   :  { %11444 = vmatpush3.bf16.msra.mxu0 %v15172_v56 }
 0xbcd   :  { %11445 = vmatprep.subr.bf16.mxu0 %v16292_v17 }
 0xbce   :  { %11423 = vmatpush1.bf16.msra.mxu1 %v15176_v9 }
 0xbcf   :  { %11449 = vmatprep.subr.bf16.mxu1 %v15007_v43 }
 0xbd0   :  { %11447 = vmatpush3.bf16.msra.mxu0 %v15180_v1 }
 0xbd1   :  { %5578 = vmatmul.mubr.f32.vlgmr.msra.gmra.mrb[98].mxu1 %v16293_v52  ;;  %11480 = vmatprep.subr.bf16.mxu0 %v16292_v17 }
 0xbd2   :  { %11451 = vmatpush1.bf16.msra.mxu1 %v15009_v37  ;;  %5741 = vmatprep.mubr.f32.mxu1 %v16293_v52 }
 0xbd3   :  { %9878 = vmatmul.mubr.f32.vlgmr.msra.gmra.mrb[74].mxu0 %v16293_v52  ;;  %11453 = vmatprep.subr.bf16.mxu1 %v15012_v49 }
 0xbd4   :  { %11482 = vmatpush3.bf16.msra.mxu0 %v15015_v51  ;;  %9912 = vmatprep.mubr.msk.f32.mxu0 %vm13368_vm12, %v16293_v52 }
 0xbd5   :  { %11483 = vmatprep.subr.bf16.mxu0 %v16292_v17 }
 0xbd6   :  { %11455 = vmatpush1.bf16.msra.mxu1 %v15020_v31 }
 0xbd7   :  { %11457 = vmatprep.subr.bf16.mxu1 %v15024_v5 }
 0xbd8   :  { %11485 = vmatpush3.bf16.msra.mxu0 %v15028_v21 }
 0xbd9   :  { %11486 = vmatprep.subr.bf16.mxu0 %v16292_v17 }
 0xbda   :  { %11459 = vmatpush1.bf16.msra.mxu1 %v15032_v27 }
 0xbdb   :  { %11461 = vmatprep.subr.bf16.mxu1 %v15035_v35 }
 0xbdc   :  { %11488 = vmatpush3.bf16.msra.mxu0 %v15038_v55 }
 0xbdd   :  { %11489 = vmatprep.subr.bf16.mxu0 %v16292_v17 }
 0xbde   :  { %11463 = vmatpush1.bf16.msra.mxu1 %v15044_v13 }
 0xbdf   :  { %11465 = vmatprep.subr.bf16.mxu1 %v15048_v47 }
 0xbe0   :  { %11491 = vmatpush3.bf16.msra.mxu0 %v15051_v7 }
 0xbe1   :  { %11492 = vmatprep.subr.bf16.mxu0 %v16292_v17 }
 0xbe2   :  { %11467 = vmatpush1.bf16.msra.mxu1 %v15057_v48 }
 0xbe3   :  { %11469 = vmatprep.subr.bf16.mxu1 %v15060_v29 }
 0xbe4   :  { %11494 = vmatpush3.bf16.msra.mxu0 %v15063_v10 }
 0xbe5   :  { %11495 = vmatprep.subr.bf16.mxu0 %v16292_v17 }
 0xbe6   :  { %11471 = vmatpush1.bf16.msra.mxu1 %v15068_v24 }
 0xbe7   :  { %11473 = vmatprep.subr.bf16.mxu1 %v15072_v25 }
 0xbe8   :  { %11497 = vmatpush3.bf16.msra.mxu0 %v15075_v26 }
 0xbe9   :  { %11498 = vmatprep.subr.bf16.mxu0 %v16292_v17 }
 0xbea   :  { %11475 = vmatpush1.bf16.msra.mxu1 %v15079_v50 }
 0xbeb   :  { %11477 = vmatprep.subr.bf16.mxu1 %v15082_v32 }
 0xbec   :  { %11500 = vmatpush3.bf16.msra.mxu0 %v15085_v57 }
 0xbed   :  { %11501 = vmatprep.subr.bf16.mxu0 %v16292_v17 }
 0xbee   :  { %11479 = vmatpush1.bf16.msra.mxu1 %v15090_v6 }
 0xbef   :  { %11505 = vmatprep.subr.bf16.mxu1 %v15094_v44 }
 0xbf0   :  { %11503 = vmatpush3.bf16.msra.mxu0 %v15097_v12 }
 0xbf1   :  { %11536 = vmatprep.subr.bf16.mxu0 %v16292_v17 }
 0xc44   :  { %v9780_v19 = vpop.f32.mrb[56].mxu0  ;;  %v15230_v28 = vpop.f32.mrb[64].mxu1 }
 0xc45   :  { %v15233_v0 = vadd.f32 %v9780_v19, %v15228_v58  ;;  %v15238_v23 = vpop.f32.mrb[57].mxu0  ;;  %v15240_v16 = vpop.f32.mrb[65].mxu1 }
 0xc46   :  { %v9781_v61 = vpop.f32.mrb[58].mxu0  ;;  %v4793_v44 = vpop.f32.mrb[66].mxu1 }
 0xc47   :  { %16428 = vst [vmem:[#allocation61_spill] sm:$0xff] %v15233_v0  ;;  %v15246_v12 = vadd.f32 %v9781_v61, %v15228_v58  ;;  %v15249_v6 = vadd.f32 %v4793_v44, %v15236_v62  ;;  %v4865_v19 = vpop.f32.mrb[59].mxu0  ;;  %v4795_v0 = vpop.f32.mrb[67].mxu1 }
 0xc48   :  { %v15252_v32 = vadd.f32 %v4865_v19, %v15228_v58  ;;  %v15255_v57 = vadd.f32 %v4795_v0, %v15243_v8 }
 0xc49   :  { %16431 = vst [vmem:[#allocation85_spill] sm:$0xff] %v15246_v12  ;;  %16432 = vst [vmem:[#allocation86_spill] sm:$0xff] %v15249_v6 }
 0xc4a   :  { %16433 = vst [vmem:[#allocation78_spill] sm:$0xff] %v15252_v32  ;;  %16434 = vst [vmem:[#allocation67_spill] sm:$0xff] %v15255_v57 }
 0xc4c   :  { %v9784_v50 = vpop.f32.mrb[60].mxu0  ;;  %v4799_v25 = vpop.f32.mrb[68].mxu1 }
 0xc4d   :  { %v15258_v2 = vadd.f32 %v9784_v50, %v15228_v58  ;;  %v15261_v26 = vadd.f32 %v4799_v25, %v15236_v62  ;;  %v4878_v61 = vpop.f32.mrb[61].mxu0  ;;  %v4801_v12 = vpop.f32.mrb[69].mxu1 }
 0xc4e   :  { %v15264_v44 = vadd.f32 %v4878_v61, %v15228_v58  ;;  %v15267_v6 = vadd.f32 %v4801_v12, %v15243_v8  ;;  %v9785_v19 = vpop.f32.mrb[62].mxu0  ;;  %v4803_v32 = vpop.f32.mrb[70].mxu1 }
 0xc4f   :  { %16435 = vst [vmem:[#allocation68_spill] sm:$0xff] %v15258_v2  ;;  %16436 = vst [vmem:[#allocation57_spill] sm:$0xff] %v15261_v26  ;;  %v15270_v0 = vadd.f32 %v9785_v19, %v15228_v58  ;;  %v15273_v57 = vadd.f32 %v4803_v32, %v15236_v62  ;;  %v4881_v50 = vpop.f32.mrb[63].mxu0  ;;  %v4805_v2 = vpop.f32.mrb[71].mxu1 }
 0xc50   :  { %16437 = vst [vmem:[#allocation64_spill] sm:$0xff] %v15264_v44  ;;  %16438 = vst [vmem:[#allocation81_spill] sm:$0xff] %v15267_v6  ;;  %v15276_v25 = vadd.f32 %v4881_v50, %v15228_v58  ;;  %v15279_v26 = vadd.f32 %v4805_v2, %v15243_v8 }
 0xc51   :  { %16439 = vst [vmem:[#allocation83_spill] sm:$0xff] %v15270_v0  ;;  %16440 = vst [vmem:[#allocation56_spill] sm:$0xff] %v15273_v57 }
 0xc52   :  { %16441 = vst [vmem:[#allocation74_spill] sm:$0xff] %v15276_v25  ;;  %16442 = vst [vmem:[#allocation54_spill] sm:$0xff] %v15279_v26  ;;  %v3918_v26 = vld [vmem:[#allocation22] sm:$0x7] }
 0xc54   :  { %v4809_v61 = vpop.f32.mrb[72].mxu1 }
 0xc55   :  { %v15282_v12 = vadd.f32 %v4809_v61, %v15236_v62  ;;  %v4811_v44 = vpop.f32.mrb[73].mxu1 }
 0xc56   :  { %v15285_v6 = vadd.f32 %v4811_v44, %v15243_v8  ;;  %v4813_v19 = vpop.f32.mrb[74].mxu1 }
 0xc57   :  { %16443 = vst [vmem:[#allocation40_spill] sm:$0xff] %v15282_v12  ;;  %v15288_v32 = vadd.f32 %v4813_v19, %v15236_v62  ;;  %v4815_v0 = vpop.f32.mrb[75].mxu1 }
 0xc58   :  { %16444 = vst [vmem:[#allocation42_spill] sm:$0xff] %v15285_v6  ;;  %v15291_v57 = vadd.f32 %v4815_v0, %v15243_v8  ;;  %v15306_v0 = vrot.slane %v3918_v26, %v16429_v53 }
 0xc59   :  { %16445 = vst [vmem:[#allocation41_spill] sm:$0xff] %v15288_v32 }
 0xc5a   :  { %16446 = vst [vmem:[#allocation43_spill] sm:$0xff] %v15291_v57  ;;  %v15309_v57 = vrot.slane %v3918_v26, %v16427_v30 }
 0xc5c   :  { %v4819_v50 = vpop.f32.mrb[76].mxu1 }
 0xc5d   :  { %v15294_v2 = vadd.f32 %v4819_v50, %v15236_v62  ;;  %v4821_v25 = vpop.f32.mrb[77].mxu1  ;;  %v15312_v50 = vrot.slane %v3918_v26, %v16430_v22 }
 0xc5e   :  { %v15297_v61 = vadd.f32 %v4821_v25, %v15243_v8  ;;  %v4823_v12 = vpop.f32.mrb[78].mxu1 }
 0xc5f   :  { %16447 = vst [vmem:[#allocation45_spill] sm:$0xff] %v15294_v2  ;;  %v15300_v44 = vadd.f32 %v4823_v12, %v15236_v62  ;;  %v4825_v6 = vpop.f32.mrb[79].mxu1 }
 0xc60   :  { %16448 = vst [vmem:[#allocation44_spill] sm:$0xff] %v15297_v61  ;;  %v15303_v19 = vadd.f32 %v4825_v6, %v15243_v8 }
 0xc61   :  { %16449 = vst [vmem:[#allocation46_spill] sm:$0xff] %v15300_v44 }
 0xc62   :  { %16450 = vst [vmem:[#allocation48_spill] sm:$0xff] %v15303_v19 }
 0xc64   :  { %v5111_v25 = vpop.f32.mrb[80].mxu1 }
 0xc65   :  { %v9804_v61 = vpop.f32.mrb[64].mxu0  ;;  %v15315_v2 = vadd.f32 %v5111_v25, %v15306_v0  ;;  %v5113_v12 = vpop.f32.mrb[81].mxu1 }
 0xc66   :  { %v15318_v44 = vadd.f32 %v9804_v61, %v15309_v57  ;;  %v5184_v6 = vpop.f32.mrb[65].mxu0  ;;  %v15321_v19 = vadd.f32 %v5113_v12, %v15312_v50  ;;  %v5115_v53 = vpop.f32.mrb[82].mxu1 }
 0xc67   :  { %16451 = vst [vmem:[#allocation47_spill] sm:$0xff] %v15315_v2  ;;  %v15324_v30 = vadd.f32 %v5184_v6, %v15309_v57  ;;  %v9805_v32 = vpop.f32.mrb[66].mxu0  ;;  %v15327_v26 = vadd.f32 %v5115_v53, %v15306_v0  ;;  %v5117_v22 = vpop.f32.mrb[83].mxu1 }
 0xc68   :  { %16452 = vst [vmem:[#allocation69_spill] sm:$0xff] %v15318_v44  ;;  %16453 = vst [vmem:[#allocation70_spill] sm:$0xff] %v15321_v19  ;;  %v15330_v25 = vadd.f32 %v9805_v32, %v15309_v57  ;;  %v5187_v2 = vpop.f32.mrb[67].mxu0  ;;  %v15333_v61 = vadd.f32 %v5117_v22, %v15312_v50 }
 0xc69   :  { %16454 = vst [vmem:[#allocation59_spill] sm:$0xff] %v15324_v30  ;;  %16455 = vst [vmem:[#allocation77_spill] sm:$0xff] %v15327_v26  ;;  %v15336_v44 = vadd.f32 %v5187_v2, %v15309_v57 }
 0xc6a   :  { %16456 = vst [vmem:[#allocation79_spill] sm:$0xff] %v15330_v25  ;;  %16457 = vst [vmem:[#allocation80_spill] sm:$0xff] %v15333_v61 }
 0xc6b   :  { %16458 = vst [vmem:[#allocation95_spill] sm:$0xff] %v15336_v44 }
 0xc6c   :  { %v5121_v12 = vpop.f32.mrb[84].mxu1 }
 0xc6d   :  { %v9808_v19 = vpop.f32.mrb[68].mxu0  ;;  %v15339_v6 = vadd.f32 %v5121_v12, %v15306_v0  ;;  %v5123_v30 = vpop.f32.mrb[85].mxu1 }
 0xc6e   :  { %v15342_v53 = vadd.f32 %v9808_v19, %v15309_v57  ;;  %v5200_v26 = vpop.f32.mrb[69].mxu0  ;;  %v15345_v32 = vadd.f32 %v5123_v30, %v15312_v50  ;;  %v5125_v25 = vpop.f32.mrb[86].mxu1 }
 0xc6f   :  { %16459 = vst [vmem:[#allocation39_spill] sm:$0xff] %v15339_v6  ;;  %v15348_v22 = vadd.f32 %v5200_v26, %v15309_v57  ;;  %v15350_v61 = vpop.f32.mrb[70].mxu0  ;;  %v15353_v2 = vadd.f32 %v5125_v25, %v15306_v0  ;;  %v5127_v44 = vpop.f32.mrb[87].mxu1 }
 0xc70   :  { %16460 = vst [vmem:[#allocation94_spill] sm:$0xff] %v15342_v53  ;;  %16461 = vst [vmem:[#allocation93_spill] sm:$0xff] %v15345_v32  ;;  %v5203_v12 = vpop.f32.mrb[71].mxu0  ;;  %v15356_v6 = vadd.f32 %v5127_v44, %v15312_v50 }
 0xc71   :  { %16462 = vst [vmem:[#allocation71_spill] sm:$0xff] %v15348_v22  ;;  %16463 = vst [vmem:[#allocation72_spill] sm:$0xff] %v15353_v2  ;;  %v15359_v19 = vadd.f32 %v5203_v12, %v15309_v57 }
 0xc72   :  { %16464 = vst [vmem:[#allocation63_spill] sm:$0xff] %v15356_v6 }
 0xc73   :  { %16465 = vst [vmem:[#allocation73_spill] sm:$0xff] %v15359_v19 }
 0xc74   :  { %v5131_v53 = vpop.f32.mrb[88].mxu1 }
 0xc75   :  { %v15362_v30 = vadd.f32 %v5131_v53, %v15306_v0  ;;  %v5133_v32 = vpop.f32.mrb[89].mxu1 }
 0xc76   :  { %v15365_v26 = vadd.f32 %v5133_v32, %v15312_v50  ;;  %v5135_v22 = vpop.f32.mrb[90].mxu1  ;;  %v12280_v32 = vadd.f32 %v15230_v28, %v15236_v62  ;;  %v15386_v28 = vld [vmem:[%s16112_s15] ss:$0 sm:$0xff] }
 0xc77   :  { %16466 = vst [vmem:[#allocation75_spill] sm:$0xff] %v15362_v30  ;;  %v15368_v25 = vadd.f32 %v5135_v22, %v15306_v0  ;;  %v5137_v2 = vpop.f32.mrb[91].mxu1  ;;  %v12281_v22 = vadd.f32 %v15240_v16, %v15243_v8  ;;  %16472 = vst [vmem:[#allocation49_spill] sm:$0xff] %v15386_v28 }
 0xc78   :  { %16467 = vst [vmem:[#allocation76_spill] sm:$0xff] %v15365_v26  ;;  %v15371_v24 = vadd.f32 %v5137_v2, %v15312_v50 }
 0xc79   :  { %16468 = vst [vmem:[#allocation82_spill] sm:$0xff] %v15368_v25 }
 0xc7a   :  { %16469 = vst [vmem:[#allocation92_spill] sm:$0xff] %v15371_v24 }
 0xc7c   :  { %v5141_v44 = vpop.f32.mrb[92].mxu1 }
 0xc7d   :  { %v15374_v12 = vadd.f32 %v5141_v44, %v15306_v0  ;;  %v5143_v6 = vpop.f32.mrb[93].mxu1 }
 0xc7e   :  { %v15377_v53 = vadd.f32 %v5143_v6, %v15312_v50  ;;  %v5145_v30 = vpop.f32.mrb[94].mxu1 }
 0xc7f   :  { %16470 = vst [vmem:[#allocation53_spill] sm:$0xff] %v15374_v12  ;;  %v5147_v19 = vpop.f32.mrb[95].mxu1 }
 0xc80   :  { %16471 = vst [vmem:[#allocation96_spill] sm:$0xff] %v15377_v53 }
 0xc84   :  { %v5415_v26 = vpop.f32.mrb[96].mxu1 }
 0xc85   :  { %v5490_v25 = vadd.f32 %v12280_v32, %v5415_v26  ;;  %v5417_v2 = vpop.f32.mrb[97].mxu1  ;;  %v12297_v26 = vadd.f32 %v15238_v23, %v15228_v58 }
 0xc86   :  { %v5497_v24 = vadd.f32 %v12281_v22, %v5417_v2  ;;  %v5486_v29 = vpop.f32.mrb[72].mxu0 }
 0xc87   :  { %v8387_v10 = vmul.f32 -1.442695, %v5490_v25  ;;  %v9844_v44 = vpop.f32.mrb[73].mxu0  ;;  %v5504_v62 = vadd.f32 %v15386_v28, %v5486_v29 }
 0xc88   :  { %v8388_v12 = vmul.f32 -1.442695, %v5497_v24 }
 0xc89   :  { %12768 = vpow2.f32 %v8387_v10  ;;  %v12318_v10 = vadd.f32 %v5145_v30, %v15306_v0 }
 0xc8a   :  { %12770 = vpow2.f32 %v8388_v12 }
 0xc93   :  { %v12769_v48 = vpop.eup %12768 }
 0xc94   :  { %v5494_v6 = vadd.f32 1.0, %v12769_v48  ;;  %v12771_v16 = vpop.eup %12770  ;;  %v12319_v48 = vadd.f32 %v5147_v19, %v15312_v50 }
 0xc95   :  { %v5501_v24 = vadd.f32 1.0, %v12771_v16 }
 0xc96   :  { %12772 = vrcp.f32 %v5494_v6 }
 0xca0   :  { %v12773_v8 = vpop.eup %12772 }
 0xca1   :  { %v5505_v25 = vmul.f32 %v12773_v8, %v5504_v62 }
 0xca3   :  { %v5506_v32 = vadd.f32 %v12297_v26, %v5505_v25 }
 0xca4   :  { %v5579_v12 = vpop.f32.mrb[98].mxu1 }
 0xca5   :  { %12774 = vtanh.f32 %v5506_v32  ;;  %v5654_v22 = vadd.f32 %v12318_v10, %v5579_v12  ;;  %v5581_v2 = vpop.f32.mrb[99].mxu1 }
 0xca6   :  { %v5661_v44 = vadd.f32 %v12319_v48, %v5581_v2  ;;  %v5650_v6 = vpop.f32.mrb[74].mxu0  ;;  %12776 = vrcp.f32 %v5501_v24  ;;  %v12934_v48 = vld [vmem:[%s16290_s27 + $0x38] sm:$0xff] }
 0xca7   :  { %v8389_v29 = vmul.f32 -1.442695, %v5654_v22  ;;  %v9879_v53 = vpop.f32.mrb[75].mxu0  ;;  %v16473_v22 = vld [vmem:[#allocation58_spill] sm:$0xff]  ;;  %v16474_v2 = vld [vmem:[#allocation52_spill] sm:$0xff] }
 0xca8   :  { %v8390_v23 = vmul.f32 -1.442695, %v5661_v44  ;;  %v16475_v44 = vld [vmem:[#allocation91_spill] sm:$0xff] }
 0xca9   :  { %12778 = vpow2.f32 %v8389_v29  ;;  %v16477_v29 = vld [vmem:[#allocation87_spill] sm:$0xff] }
 0xcaa   :  { %12780 = vpow2.f32 %v8390_v23  ;;  %v16479_v23 = vld [vmem:[#allocation60_spill] sm:$0xff] }
 0xcaf   :  { %v12775_v28 = vpop.eup %12774 }
 0xcb0   :  { %v5508_v47 = vsub.f32 0.0, %v12775_v28  ;;  %v12777_v58 = vpop.eup %12776 }
 0xcb2   :  { %v5509_v62 = vmul.f32 %v12777_v58, %v5508_v47  ;;  %v15402_v47 = vld [vmem:[#allocation23] ss:$0 sm:$0xff]  ;;  %v16478_v58 = vld [vmem:[#allocation62_spill] sm:$0xff] }
 0xcb3   :  { %v12779_v0 = vpop.eup %12778 }
 0xcb4   :  { %v5658_v30 = vadd.f32 1.0, %v12779_v0  ;;  %v5510_v16 = vadd.f32 %v12775_v28, %v5509_v62  ;;  %v12781_v19 = vpop.eup %12780  ;;  %v12326_v28 = vadd.f32 %v15350_v61, %v15309_v57  ;;  %v16480_v62 = vld [vmem:[#allocation55_spill] sm:$0xff]  ;;  %v16481_v0 = vld [vmem:[#allocation89_spill] sm:$0xff] }
 0xcb5   :  { %v5665_v26 = vadd.f32 1.0, %v12781_v19  ;;  %v16485_v19 = vld [vmem:[#allocation65_spill] sm:$0xff] }
 0xcb6   :  { %12782 = vrcp.f32 %v5658_v30  ;;  %v15394_v50 = vmul.f32 %v14972_v33, %v5510_v16  ;;  %v5668_v33 = vadd.f32 %v15402_v47, %v5650_v6  ;;  %v16476_v6 = vld [vmem:[#allocation90_spill] sm:$0xff]  ;;  %v16482_v30 = vld [vmem:[#allocation88_spill] sm:$0xff] }
 0xcb7   :  { %v16483_v16 = vld [vmem:[#allocation84_spill] sm:$0xff] }
 0xcb8   :  { %5742 = vmatmul.mubr.f32.vlgmr.msra.gmra.mrb[100].mxu1 %v15394_v50  ;;  %9913 = vmatmul.mubr.f32.vlgmr.msra.gmra.mrb[76].mxu0 %v15394_v50 }
 0xcb9   :  { %11507 = vmatpush1.bf16.msra.mxu1 %v15101_v36  ;;  %11538 = vmatpush3.bf16.msra.mxu0 %v15107_v3 }
 0xcba   :  { %11509 = vmatprep.subr.bf16.mxu1 %v15104_v42  ;;  %11539 = vmatprep.subr.bf16.mxu0 %v16292_v17 }
 0xcbb   :  { %5906 = vmatprep.mubr.f32.mxu1 %v16293_v52  ;;  %9947 = vmatprep.mubr.msk.f32.mxu0 %vm13368_vm12, %v16293_v52 }
 0xcbd   :  { %11511 = vmatpush1.bf16.msra.mxu1 %v15112_v15  ;;  %11541 = vmatpush3.bf16.msra.mxu0 %v15120_v4 }
 0xcbe   :  { %11513 = vmatprep.subr.bf16.mxu1 %v15116_v18  ;;  %11542 = vmatprep.subr.bf16.mxu0 %v16292_v17 }
 0xcc0   :  { %v12783_v53 = vpop.eup %12782 }
 0xcc1   :  { %v5669_v8 = vmul.f32 %v12783_v53, %v5668_v33  ;;  %11515 = vmatpush1.bf16.msra.mxu1 %v15126_v34  ;;  %11544 = vmatpush3.bf16.msra.mxu0 %v15132_v20  ;;  %v16484_v33 = vld [vmem:[#allocation66_spill] sm:$0xff] }
 0xcc2   :  { %11517 = vmatprep.subr.bf16.mxu1 %v15129_v40  ;;  %11545 = vmatprep.subr.bf16.mxu0 %v16292_v17 }
 0xcc3   :  { %v5670_v25 = vadd.f32 %v12326_v28, %v5669_v8  ;;  %v16486_v8 = vld [vmem:[#allocation86_spill] sm:$0xff] }
 0xcc5   :  { %12784 = vtanh.f32 %v5670_v25  ;;  %11519 = vmatpush1.bf16.msra.mxu1 %v15136_v60  ;;  %11547 = vmatpush3.bf16.msra.mxu0 %v15142_v54 }
 0xcc6   :  { %11521 = vmatprep.subr.bf16.mxu1 %v15139_v14  ;;  %11548 = vmatprep.subr.bf16.mxu0 %v16292_v17  ;;  %12786 = vrcp.f32 %v5665_v26 }
 0xcc9   :  { %11523 = vmatpush1.bf16.msra.mxu1 %v15146_v45  ;;  %11550 = vmatpush3.bf16.msra.mxu0 %v15152_v39 }
 0xcca   :  { %11525 = vmatprep.subr.bf16.mxu1 %v15149_v46  ;;  %11551 = vmatprep.subr.bf16.mxu0 %v16292_v17 }
 0xccd   :  { %11527 = vmatpush1.bf16.msra.mxu1 %v15156_v59  ;;  %11553 = vmatpush3.bf16.msra.mxu0 %v15162_v63 }
 0xcce   :  { %11529 = vmatprep.subr.bf16.mxu1 %v15159_v11  ;;  %11554 = vmatprep.subr.bf16.mxu0 %v16292_v17 }
 0xccf   :  { %v12785_v57 = vpop.eup %12784 }
 0xcd0   :  { %v5672_v61 = vsub.f32 0.0, %v12785_v57  ;;  %v12787_v10 = vpop.eup %12786 }
 0xcd1   :  { %11531 = vmatpush1.bf16.msra.mxu1 %v15166_v41  ;;  %11556 = vmatpush3.bf16.msra.mxu0 %v15172_v56 }
 0xcd2   :  { %11533 = vmatprep.subr.bf16.mxu1 %v15169_v38  ;;  %11557 = vmatprep.subr.bf16.mxu0 %v16292_v17  ;;  %v5673_v24 = vmul.f32 %v12787_v10, %v5672_v61  ;;  %v16487_v61 = vld [vmem:[#allocation67_spill] sm:$0xff] }
 0xcd4   :  { %v5674_v32 = vadd.f32 %v12785_v57, %v5673_v24 }
 0xcd5   :  { %11535 = vmatpush1.bf16.msra.mxu1 %v15176_v9  ;;  %11559 = vmatpush3.bf16.msra.mxu0 %v15180_v1 }
 0xcd6   :  { %v15439_v12 = vmul.f32 %v12934_v48, %v5674_v32  ;;  %11561 = vmatprep.subr.bf16.mxu1 %v15007_v43  ;;  %11592 = vmatprep.subr.bf16.mxu0 %v16292_v17 }
 0xcd8   :  { %5907 = vmatmul.mubr.f32.vlgmr.msra.gmra.mrb[102].mxu1 %v15439_v12  ;;  %9948 = vmatmul.mubr.f32.vlgmr.msra.gmra.mrb[78].mxu0 %v15439_v12 }
 0xcd9   :  { %11563 = vmatpush1.bf16.msra.mxu1 %v15009_v37  ;;  %11594 = vmatpush3.bf16.msra.mxu0 %v15015_v51 }
 0xcda   :  { %11565 = vmatprep.subr.bf16.mxu1 %v15012_v49  ;;  %11595 = vmatprep.subr.bf16.mxu0 %v16292_v17 }
 0xcdb   :  { %6071 = vmatprep.mubr.f32.mxu1 %v16293_v52  ;;  %9982 = vmatprep.mubr.msk.f32.mxu0 %vm13368_vm12, %v16293_v52 }
 0xcdd   :  { %11567 = vmatpush1.bf16.msra.mxu1 %v15020_v31  ;;  %11597 = vmatpush3.bf16.msra.mxu0 %v15028_v21 }
 0xcde   :  { %11569 = vmatprep.subr.bf16.mxu1 %v15024_v5  ;;  %11598 = vmatprep.subr.bf16.mxu0 %v16292_v17 }
 0xce1   :  { %11571 = vmatpush1.bf16.msra.mxu1 %v15032_v27  ;;  %11600 = vmatpush3.bf16.msra.mxu0 %v15038_v55 }
 0xce2   :  { %11573 = vmatprep.subr.bf16.mxu1 %v15035_v35  ;;  %11601 = vmatprep.subr.bf16.mxu0 %v16292_v17 }
 0xce5   :  { %11575 = vmatpush1.bf16.msra.mxu1 %v15044_v13  ;;  %11603 = vmatpush3.bf16.msra.mxu0 %v15051_v7 }
 0xce6   :  { %11577 = vmatprep.subr.bf16.mxu1 %v16473_v22  ;;  %11604 = vmatprep.subr.bf16.mxu0 %v16292_v17 }
 0xce9   :  { %11579 = vmatpush1.bf16.msra.mxu1 %v16474_v2  ;;  %11606 = vmatpush3.bf16.msra.mxu0 %v16475_v44 }
 0xcea   :  { %11581 = vmatprep.subr.bf16.mxu1 %v16476_v6  ;;  %11607 = vmatprep.subr.bf16.mxu0 %v16292_v17 }
 0xced   :  { %11583 = vmatpush1.bf16.msra.mxu1 %v16477_v29  ;;  %11609 = vmatpush3.bf16.msra.mxu0 %v16478_v58 }
 0xcee   :  { %11585 = vmatprep.subr.bf16.mxu1 %v16479_v23  ;;  %11610 = vmatprep.subr.bf16.mxu0 %v16292_v17  ;;  %v16489_v23 = vld [vmem:[#allocation78_spill] sm:$0xff] }
 0xcf1   :  { %11587 = vmatpush1.bf16.msra.mxu1 %v16480_v62  ;;  %11612 = vmatpush3.bf16.msra.mxu0 %v16481_v0 }
 0xcf2   :  { %11589 = vmatprep.subr.bf16.mxu1 %v16482_v30  ;;  %11613 = vmatprep.subr.bf16.mxu0 %v16292_v17 }
 0xcf5   :  { %11591 = vmatpush1.bf16.msra.mxu1 %v16483_v16  ;;  %11615 = vmatpush3.bf16.msra.mxu0 %v16484_v33  ;;  %v16488_v16 = vld [vmem:[#allocation49_spill] sm:$0xff] }
 0xcf6   :  { %11617 = vmatprep.subr.bf16.mxu1 %v16485_v19  ;;  %11648 = vmatprep.subr.bf16.mxu0 %v16292_v17 }
 0xd8b   :  { %v5743_v53 = vpop.f32.mrb[100].mxu1  ;;  %v5814_v28 = vpop.f32.mrb[76].mxu0 }
 0xd8c   :  { %v5818_v26 = vadd.f32 %v16486_v8, %v5743_v53  ;;  %v5745_v25 = vpop.f32.mrb[101].mxu1  ;;  %v9914_v57 = vpop.f32.mrb[77].mxu0  ;;  %v5832_v19 = vadd.f32 %v16488_v16, %v5814_v28 }
 0xd8d   :  { %v5825_v10 = vadd.f32 %v16487_v61, %v5745_v25  ;;  %v16490_v57 = vld [vmem:[#allocation53_spill] sm:$0xff] }
 0xd8e   :  { %v8391_v24 = vmul.f32 -1.442695, %v5818_v26 }
 0xd8f   :  { %v8392_v32 = vmul.f32 -1.442695, %v5825_v10  ;;  %v16491_v10 = vld [vmem:[#allocation96_spill] sm:$0xff] }
 0xd90   :  { %12788 = vpow2.f32 %v8391_v24 }
 0xd91   :  { %12790 = vpow2.f32 %v8392_v32 }
 0xd9a   :  { %v12789_v48 = vpop.eup %12788 }
 0xd9b   :  { %v5822_v30 = vadd.f32 1.0, %v12789_v48  ;;  %v12791_v33 = vpop.eup %12790 }
 0xd9c   :  { %v5829_v29 = vadd.f32 1.0, %v12791_v33 }
 0xd9d   :  { %12792 = vrcp.f32 %v5822_v30 }
 0xda7   :  { %v12793_v0 = vpop.eup %12792 }
 0xda8   :  { %v5833_v62 = vmul.f32 %v12793_v0, %v5832_v19 }
 0xdaa   :  { %v5834_v58 = vadd.f32 %v16489_v23, %v5833_v62 }
 0xdab   :  { %v5908_v53 = vpop.f32.mrb[102].mxu1  ;;  %v5979_v8 = vpop.f32.mrb[78].mxu0 }
 0xdac   :  { %12794 = vtanh.f32 %v5834_v58  ;;  %v5983_v25 = vadd.f32 %v16490_v57, %v5908_v53  ;;  %v5910_v26 = vpop.f32.mrb[103].mxu1  ;;  %v9949_v61 = vpop.f32.mrb[79].mxu0  ;;  %v12935_v53 = vld [vmem:[%s16290_s27 + $0x8] sm:$0xff] }
 0xdad   :  { %v5990_v24 = vadd.f32 %v16491_v10, %v5910_v26  ;;  %12796 = vrcp.f32 %v5829_v29  ;;  %v5997_v26 = vadd.f32 %v15402_v47, %v5979_v8  ;;  %v16492_v10 = vld [vmem:[#allocation94_spill] sm:$0xff] }
 0xdae   :  { %v8393_v32 = vmul.f32 -1.442695, %v5983_v25 }
 0xdaf   :  { %v8394_v0 = vmul.f32 -1.442695, %v5990_v24 }
 0xdb0   :  { %12798 = vpow2.f32 %v8393_v32 }
 0xdb1   :  { %12800 = vpow2.f32 %v8394_v0 }
 0xdb6   :  { %v12795_v30 = vpop.eup %12794 }
 0xdb7   :  { %v5836_v28 = vsub.f32 %v15394_v50, %v12795_v30  ;;  %v12797_v48 = vpop.eup %12796 }
 0xdb9   :  { %v5837_v19 = vmul.f32 %v12797_v48, %v5836_v28 }
 0xdba   :  { %v12799_v23 = vpop.eup %12798 }
 0xdbb   :  { %v5838_v62 = vadd.f32 %v12795_v30, %v5837_v19  ;;  %v5987_v33 = vadd.f32 1.0, %v12799_v23  ;;  %v12801_v25 = vpop.eup %12800  ;;  %v12936_v23 = vld [vmem:[%s16290_s27 + $0x30] sm:$0xff] }
 0xdbc   :  { %v5994_v32 = vadd.f32 1.0, %v12801_v25  ;;  %v16497_v25 = vld [vmem:[#allocation89_spill] sm:$0xff] }
 0xdbd   :  { %12802 = vrcp.f32 %v5987_v33  ;;  %v5839_v58 = vsub.f32 %v5838_v62, %v15394_v50 }
 0xdbf   :  { %v5840_v29 = vmul.f32 %v12935_v53, %v5839_v58  ;;  %v16494_v58 = vld [vmem:[#allocation62_spill] sm:$0xff]  ;;  %v16495_v53 = vld [vmem:[#allocation60_spill] sm:$0xff] }
 0xdc1   :  { %v15492_v57 = vadd.f32 %v5840_v29, %v15394_v50  ;;  %v16496_v29 = vld [vmem:[#allocation55_spill] sm:$0xff] }
 0xdc3   :  { %6072 = vmatmul.mubr.f32.vlgmr.msra.gmra.mrb[104].mxu1 %v15492_v57  ;;  %9983 = vmatmul.mubr.f32.vlgmr.msra.gmra.mrb[80].mxu0 %v15492_v57 }
 0xdc4   :  { %11619 = vmatpush1.bf16.msra.mxu1 %v15101_v36  ;;  %11650 = vmatpush3.bf16.msra.mxu0 %v15107_v3 }
 0xdc5   :  { %11621 = vmatprep.subr.bf16.mxu1 %v15104_v42  ;;  %11651 = vmatprep.subr.bf16.mxu0 %v16292_v17 }
 0xdc6   :  { %6236 = vmatprep.mubr.f32.mxu1 %v16293_v52  ;;  %10017 = vmatprep.mubr.msk.f32.mxu0 %vm13368_vm12, %v16293_v52 }
 0xdc7   :  { %v12803_v50 = vpop.eup %12802 }
 0xdc8   :  { %v5998_v61 = vmul.f32 %v12803_v50, %v5997_v26  ;;  %11623 = vmatpush1.bf16.msra.mxu1 %v15112_v15  ;;  %11653 = vmatpush3.bf16.msra.mxu0 %v15120_v4  ;;  %v16498_v26 = vld [vmem:[#allocation88_spill] sm:$0xff] }
 0xdc9   :  { %11625 = vmatprep.subr.bf16.mxu1 %v15116_v18  ;;  %11654 = vmatprep.subr.bf16.mxu0 %v16292_v17  ;;  %v16499_v50 = vld [vmem:[#allocation84_spill] sm:$0xff] }
 0xdca   :  { %v5999_v24 = vadd.f32 %v16492_v10, %v5998_v61  ;;  %v16500_v61 = vld [vmem:[#allocation66_spill] sm:$0xff]  ;;  %v16501_v10 = vld [vmem:[#allocation65_spill] sm:$0xff] }
 0xdcc   :  { %12804 = vtanh.f32 %v5999_v24  ;;  %11627 = vmatpush1.bf16.msra.mxu1 %v15126_v34  ;;  %11656 = vmatpush3.bf16.msra.mxu0 %v15132_v20 }
 0xdcd   :  { %11629 = vmatprep.subr.bf16.mxu1 %v15129_v40  ;;  %11657 = vmatprep.subr.bf16.mxu0 %v16292_v17  ;;  %12806 = vrcp.f32 %v5994_v32 }
 0xdd0   :  { %11631 = vmatpush1.bf16.msra.mxu1 %v15136_v60  ;;  %11659 = vmatpush3.bf16.msra.mxu0 %v15142_v54 }
 0xdd1   :  { %11633 = vmatprep.subr.bf16.mxu1 %v15139_v14  ;;  %11660 = vmatprep.subr.bf16.mxu0 %v16292_v17 }
 0xdd4   :  { %11635 = vmatpush1.bf16.msra.mxu1 %v15146_v45  ;;  %11662 = vmatpush3.bf16.msra.mxu0 %v15152_v39 }
 0xdd5   :  { %11637 = vmatprep.subr.bf16.mxu1 %v15149_v46  ;;  %11663 = vmatprep.subr.bf16.mxu0 %v16292_v17 }
 0xdd6   :  { %v12805_v8 = vpop.eup %12804 }
 0xdd7   :  { %v6001_v30 = vsub.f32 %v15439_v12, %v12805_v8  ;;  %v12807_v28 = vpop.eup %12806 }
 0xdd8   :  { %11639 = vmatpush1.bf16.msra.mxu1 %v15156_v59  ;;  %11665 = vmatpush3.bf16.msra.mxu0 %v15162_v63 }
 0xdd9   :  { %v6002_v48 = vmul.f32 %v12807_v28, %v6001_v30  ;;  %11641 = vmatprep.subr.bf16.mxu1 %v15159_v11  ;;  %11666 = vmatprep.subr.bf16.mxu0 %v16292_v17 }
 0xddb   :  { %v6003_v0 = vadd.f32 %v12805_v8, %v6002_v48  ;;  %v16502_v8 = vld [vmem:[#allocation57_spill] sm:$0xff] }
 0xddc   :  { %11643 = vmatpush1.bf16.msra.mxu1 %v15166_v41  ;;  %11668 = vmatpush3.bf16.msra.mxu0 %v15172_v56 }
 0xddd   :  { %11645 = vmatprep.subr.bf16.mxu1 %v15169_v38  ;;  %11669 = vmatprep.subr.bf16.mxu0 %v16292_v17  ;;  %v6004_v19 = vsub.f32 %v6003_v0, %v15439_v12  ;;  %v16503_v0 = vld [vmem:[#allocation81_spill] sm:$0xff] }
 0xddf   :  { %v6005_v62 = vmul.f32 %v12936_v23, %v6004_v19 }
 0xde0   :  { %11647 = vmatpush1.bf16.msra.mxu1 %v15176_v9  ;;  %11671 = vmatpush3.bf16.msra.mxu0 %v15180_v1 }
 0xde1   :  { %v15537_v33 = vadd.f32 %v6005_v62, %v15439_v12  ;;  %11673 = vmatprep.subr.bf16.mxu1 %v15007_v43  ;;  %11704 = vmatprep.subr.bf16.mxu0 %v16292_v17  ;;  %v16493_v12 = vld [vmem:[#allocation87_spill] sm:$0xff] }
 0xde3   :  { %6237 = vmatmul.mubr.f32.vlgmr.msra.gmra.mrb[106].mxu1 %v15537_v33  ;;  %10018 = vmatmul.mubr.f32.vlgmr.msra.gmra.mrb[82].mxu0 %v15537_v33 }
 0xde4   :  { %11675 = vmatpush1.bf16.msra.mxu1 %v15009_v37  ;;  %11706 = vmatpush3.bf16.msra.mxu0 %v15015_v51 }
 0xde5   :  { %11677 = vmatprep.subr.bf16.mxu1 %v15012_v49  ;;  %11707 = vmatprep.subr.bf16.mxu0 %v16292_v17 }
 0xde6   :  { %6401 = vmatprep.mubr.f32.mxu1 %v16293_v52  ;;  %10052 = vmatprep.mubr.msk.f32.mxu0 %vm13368_vm12, %v16293_v52 }
 0xde8   :  { %11679 = vmatpush1.bf16.msra.mxu1 %v15020_v31  ;;  %11709 = vmatpush3.bf16.msra.mxu0 %v15028_v21 }
 0xde9   :  { %11681 = vmatprep.subr.bf16.mxu1 %v15024_v5  ;;  %11710 = vmatprep.subr.bf16.mxu0 %v16292_v17 }
 0xdec   :  { %11683 = vmatpush1.bf16.msra.mxu1 %v15032_v27  ;;  %11712 = vmatpush3.bf16.msra.mxu0 %v15038_v55 }
 0xded   :  { %11685 = vmatprep.subr.bf16.mxu1 %v15035_v35  ;;  %11713 = vmatprep.subr.bf16.mxu0 %v16292_v17 }
 0xdf0   :  { %11687 = vmatpush1.bf16.msra.mxu1 %v15044_v13  ;;  %11715 = vmatpush3.bf16.msra.mxu0 %v15051_v7 }
 0xdf1   :  { %11689 = vmatprep.subr.bf16.mxu1 %v16473_v22  ;;  %11716 = vmatprep.subr.bf16.mxu0 %v16292_v17 }
 0xdf4   :  { %11691 = vmatpush1.bf16.msra.mxu1 %v16474_v2  ;;  %11718 = vmatpush3.bf16.msra.mxu0 %v16475_v44 }
 0xdf5   :  { %11693 = vmatprep.subr.bf16.mxu1 %v16476_v6  ;;  %11719 = vmatprep.subr.bf16.mxu0 %v16292_v17 }
 0xdf8   :  { %11695 = vmatpush1.bf16.msra.mxu1 %v16493_v12  ;;  %11721 = vmatpush3.bf16.msra.mxu0 %v16494_v58 }
 0xdf9   :  { %11697 = vmatprep.subr.bf16.mxu1 %v16495_v53  ;;  %11722 = vmatprep.subr.bf16.mxu0 %v16292_v17  ;;  %v16504_v53 = vld [vmem:[#allocation61_spill] sm:$0xff] }
 0xdfc   :  { %11699 = vmatpush1.bf16.msra.mxu1 %v16496_v29  ;;  %11724 = vmatpush3.bf16.msra.mxu0 %v16497_v25 }
 0xdfd   :  { %11701 = vmatprep.subr.bf16.mxu1 %v16498_v26  ;;  %11725 = vmatprep.subr.bf16.mxu0 %v16292_v17 }
 0xe00   :  { %11703 = vmatpush1.bf16.msra.mxu1 %v16499_v50  ;;  %11727 = vmatpush3.bf16.msra.mxu0 %v16500_v61 }
 0xe01   :  { %11729 = vmatprep.subr.bf16.mxu1 %v16501_v10  ;;  %11760 = vmatprep.subr.bf16.mxu0 %v16292_v17 }
 0xe96   :  { %v6073_v24 = vpop.f32.mrb[104].mxu1  ;;  %v6144_v32 = vpop.f32.mrb[80].mxu0 }
 0xe97   :  { %v6148_v30 = vadd.f32 %v16502_v8, %v6073_v24  ;;  %v6075_v28 = vpop.f32.mrb[105].mxu1  ;;  %v9984_v48 = vpop.f32.mrb[81].mxu0  ;;  %v6162_v10 = vadd.f32 %v16488_v16, %v6144_v32 }
 0xe98   :  { %v6155_v19 = vadd.f32 %v16503_v0, %v6075_v28  ;;  %v16505_v48 = vld [vmem:[#allocation82_spill] sm:$0xff] }
 0xe99   :  { %v8395_v23 = vmul.f32 -1.442695, %v6148_v30 }
 0xe9a   :  { %v8396_v62 = vmul.f32 -1.442695, %v6155_v19  ;;  %v16506_v19 = vld [vmem:[#allocation92_spill] sm:$0xff] }
 0xe9b   :  { %12808 = vpow2.f32 %v8395_v23 }
 0xe9c   :  { %12810 = vpow2.f32 %v8396_v62 }
 0xea5   :  { %v12809_v26 = vpop.eup %12808 }
 0xea6   :  { %v6152_v25 = vadd.f32 1.0, %v12809_v26  ;;  %v12811_v61 = vpop.eup %12810 }
 0xea7   :  { %v6159_v12 = vadd.f32 1.0, %v12811_v61 }
 0xea8   :  { %12812 = vrcp.f32 %v6152_v25 }
 0xeb2   :  { %v12813_v50 = vpop.eup %12812 }
 0xeb3   :  { %v6163_v29 = vmul.f32 %v12813_v50, %v6162_v10 }
 0xeb5   :  { %v6164_v58 = vadd.f32 %v16504_v53, %v6163_v29 }
 0xeb6   :  { %v6238_v24 = vpop.f32.mrb[106].mxu1  ;;  %v6309_v8 = vpop.f32.mrb[82].mxu0 }
 0xeb7   :  { %12814 = vtanh.f32 %v6164_v58  ;;  %v6313_v28 = vadd.f32 %v16505_v48, %v6238_v24  ;;  %v6240_v30 = vpop.f32.mrb[107].mxu1  ;;  %v10019_v0 = vpop.f32.mrb[83].mxu0  ;;  %v15589_v24 = vld [vmem:[%s16290_s27 + $0x10] sm:$0xff] }
 0xeb8   :  { %v6320_v23 = vadd.f32 %v16506_v19, %v6240_v30  ;;  %12816 = vrcp.f32 %v6159_v12  ;;  %16507 = vst [vmem:[#allocation50_spill] sm:$0xff] %v15589_v24  ;;  %v6327_v30 = vadd.f32 %v15402_v47, %v6309_v8  ;;  %v16508_v19 = vld [vmem:[#allocation73_spill] sm:$0xff] }
 0xeb9   :  { %v8397_v26 = vmul.f32 -1.442695, %v6313_v28 }
 0xeba   :  { %v8398_v50 = vmul.f32 -1.442695, %v6320_v23 }
 0xebb   :  { %12818 = vpow2.f32 %v8397_v26 }
 0xebc   :  { %12820 = vpow2.f32 %v8398_v50 }
 0xec1   :  { %v12815_v25 = vpop.eup %12814 }
 0xec2   :  { %v6166_v32 = vsub.f32 %v15492_v57, %v12815_v25  ;;  %v12817_v62 = vpop.eup %12816 }
 0xec4   :  { %v6167_v10 = vmul.f32 %v12817_v62, %v6166_v32 }
 0xec5   :  { %v12819_v53 = vpop.eup %12818 }
 0xec6   :  { %v6168_v29 = vadd.f32 %v12815_v25, %v6167_v10  ;;  %v6317_v61 = vadd.f32 1.0, %v12819_v53  ;;  %v12821_v28 = vpop.eup %12820  ;;  %v15635_v53 = vld [vmem:[%s16290_s27 + $0x28] sm:$0xff] }
 0xec7   :  { %v6324_v26 = vadd.f32 1.0, %v12821_v28  ;;  %16509 = vst [vmem:[#allocation51_spill] sm:$0xff] %v15635_v53  ;;  %v16513_v28 = vld [vmem:[#allocation55_spill] sm:$0xff] }
 0xec8   :  { %12822 = vrcp.f32 %v6317_v61  ;;  %v6169_v58 = vsub.f32 %v6168_v29, %v15492_v57 }
 0xeca   :  { %v6170_v12 = vmul.f32 %v15589_v24, %v6169_v58  ;;  %v16511_v58 = vld [vmem:[#allocation62_spill] sm:$0xff] }
 0xecc   :  { %v15593_v48 = vadd.f32 %v6170_v12, %v15492_v57  ;;  %v16512_v12 = vld [vmem:[#allocation60_spill] sm:$0xff] }
 0xece   :  { %6402 = vmatmul.mubr.f32.vlgmr.msra.gmra.mrb[108].mxu1 %v15593_v48  ;;  %10053 = vmatmul.mubr.f32.vlgmr.msra.gmra.mrb[84].mxu0 %v15593_v48 }
 0xecf   :  { %11731 = vmatpush1.bf16.msra.mxu1 %v15101_v36  ;;  %11762 = vmatpush3.bf16.msra.mxu0 %v15107_v3 }
 0xed0   :  { %11733 = vmatprep.subr.bf16.mxu1 %v15104_v42  ;;  %11763 = vmatprep.subr.bf16.mxu0 %v16292_v17 }
 0xed1   :  { %6566 = vmatprep.mubr.f32.mxu1 %v16293_v52  ;;  %10087 = vmatprep.mubr.msk.f32.mxu0 %vm13368_vm12, %v16293_v52 }
 0xed2   :  { %v12823_v57 = vpop.eup %12822 }
 0xed3   :  { %v6328_v0 = vmul.f32 %v12823_v57, %v6327_v30  ;;  %11735 = vmatpush1.bf16.msra.mxu1 %v15112_v15  ;;  %11765 = vmatpush3.bf16.msra.mxu0 %v15120_v4  ;;  %v16514_v30 = vld [vmem:[#allocation89_spill] sm:$0xff]  ;;  %v16515_v57 = vld [vmem:[#allocation88_spill] sm:$0xff] }
 0xed4   :  { %11737 = vmatprep.subr.bf16.mxu1 %v15116_v18  ;;  %11766 = vmatprep.subr.bf16.mxu0 %v16292_v17 }
 0xed5   :  { %v6329_v23 = vadd.f32 %v16508_v19, %v6328_v0  ;;  %v16516_v0 = vld [vmem:[#allocation84_spill] sm:$0xff]  ;;  %v16517_v19 = vld [vmem:[#allocation66_spill] sm:$0xff] }
 0xed7   :  { %12824 = vtanh.f32 %v6329_v23  ;;  %11739 = vmatpush1.bf16.msra.mxu1 %v15126_v34  ;;  %11768 = vmatpush3.bf16.msra.mxu0 %v15132_v20  ;;  %v16518_v23 = vld [vmem:[#allocation65_spill] sm:$0xff] }
 0xed8   :  { %11741 = vmatprep.subr.bf16.mxu1 %v15129_v40  ;;  %11769 = vmatprep.subr.bf16.mxu0 %v16292_v17  ;;  %12826 = vrcp.f32 %v6324_v26 }
 0xedb   :  { %11743 = vmatpush1.bf16.msra.mxu1 %v15136_v60  ;;  %11771 = vmatpush3.bf16.msra.mxu0 %v15142_v54 }
 0xedc   :  { %11745 = vmatprep.subr.bf16.mxu1 %v15139_v14  ;;  %11772 = vmatprep.subr.bf16.mxu0 %v16292_v17 }
 0xedf   :  { %11747 = vmatpush1.bf16.msra.mxu1 %v15146_v45  ;;  %11774 = vmatpush3.bf16.msra.mxu0 %v15152_v39 }
 0xee0   :  { %11749 = vmatprep.subr.bf16.mxu1 %v15149_v46  ;;  %11775 = vmatprep.subr.bf16.mxu0 %v16292_v17 }
 0xee1   :  { %v12825_v8 = vpop.eup %12824 }
 0xee2   :  { %v6331_v25 = vsub.f32 %v15537_v33, %v12825_v8  ;;  %v12827_v32 = vpop.eup %12826 }
 0xee3   :  { %11751 = vmatpush1.bf16.msra.mxu1 %v15156_v59  ;;  %11777 = vmatpush3.bf16.msra.mxu0 %v15162_v63 }
 0xee4   :  { %v6332_v62 = vmul.f32 %v12827_v32, %v6331_v25  ;;  %11753 = vmatprep.subr.bf16.mxu1 %v15159_v11  ;;  %11778 = vmatprep.subr.bf16.mxu0 %v16292_v17  ;;  %v16519_v25 = vld [vmem:[#allocation56_spill] sm:$0xff] }
 0xee6   :  { %v6333_v50 = vadd.f32 %v12825_v8, %v6332_v62 }
 0xee7   :  { %11755 = vmatpush1.bf16.msra.mxu1 %v15166_v41  ;;  %11780 = vmatpush3.bf16.msra.mxu0 %v15172_v56 }
 0xee8   :  { %11757 = vmatprep.subr.bf16.mxu1 %v15169_v38  ;;  %11781 = vmatprep.subr.bf16.mxu0 %v16292_v17  ;;  %v6334_v10 = vsub.f32 %v6333_v50, %v15537_v33 }
 0xeea   :  { %v6335_v29 = vmul.f32 %v15635_v53, %v6334_v10  ;;  %v16520_v10 = vld [vmem:[#allocation54_spill] sm:$0xff] }
 0xeeb   :  { %11759 = vmatpush1.bf16.msra.mxu1 %v15176_v9  ;;  %11783 = vmatpush3.bf16.msra.mxu0 %v15180_v1 }
 0xeec   :  { %v15641_v61 = vadd.f32 %v6335_v29, %v15537_v33  ;;  %11785 = vmatprep.subr.bf16.mxu1 %v15007_v43  ;;  %11816 = vmatprep.subr.bf16.mxu0 %v16292_v17  ;;  %v16510_v33 = vld [vmem:[#allocation87_spill] sm:$0xff] }
 0xeee   :  { %6567 = vmatmul.mubr.f32.vlgmr.msra.gmra.mrb[110].mxu1 %v15641_v61  ;;  %10088 = vmatmul.mubr.f32.vlgmr.msra.gmra.mrb[86].mxu0 %v15641_v61 }
 0xeef   :  { %11787 = vmatpush1.bf16.msra.mxu1 %v15009_v37  ;;  %11818 = vmatpush3.bf16.msra.mxu0 %v15015_v51 }
 0xef0   :  { %11789 = vmatprep.subr.bf16.mxu1 %v15012_v49  ;;  %11819 = vmatprep.subr.bf16.mxu0 %v16292_v17 }
 0xef1   :  { %6731 = vmatprep.mubr.f32.mxu1 %v16293_v52  ;;  %10122 = vmatprep.mubr.msk.f32.mxu0 %vm13368_vm12, %v16293_v52 }
 0xef3   :  { %11791 = vmatpush1.bf16.msra.mxu1 %v15020_v31  ;;  %11821 = vmatpush3.bf16.msra.mxu0 %v15028_v21 }
 0xef4   :  { %11793 = vmatprep.subr.bf16.mxu1 %v15024_v5  ;;  %11822 = vmatprep.subr.bf16.mxu0 %v16292_v17 }
 0xef7   :  { %11795 = vmatpush1.bf16.msra.mxu1 %v15032_v27  ;;  %11824 = vmatpush3.bf16.msra.mxu0 %v15038_v55 }
 0xef8   :  { %11797 = vmatprep.subr.bf16.mxu1 %v15035_v35  ;;  %11825 = vmatprep.subr.bf16.mxu0 %v16292_v17 }
 0xefb   :  { %11799 = vmatpush1.bf16.msra.mxu1 %v15044_v13  ;;  %11827 = vmatpush3.bf16.msra.mxu0 %v15051_v7 }
 0xefc   :  { %11801 = vmatprep.subr.bf16.mxu1 %v16473_v22  ;;  %11828 = vmatprep.subr.bf16.mxu0 %v16292_v17 }
 0xeff   :  { %11803 = vmatpush1.bf16.msra.mxu1 %v16474_v2  ;;  %11830 = vmatpush3.bf16.msra.mxu0 %v16475_v44 }
 0xf00   :  { %11805 = vmatprep.subr.bf16.mxu1 %v16476_v6  ;;  %11831 = vmatprep.subr.bf16.mxu0 %v16292_v17 }
 0xf03   :  { %11807 = vmatpush1.bf16.msra.mxu1 %v16510_v33  ;;  %11833 = vmatpush3.bf16.msra.mxu0 %v16511_v58 }
 0xf04   :  { %11809 = vmatprep.subr.bf16.mxu1 %v16512_v12  ;;  %11834 = vmatprep.subr.bf16.mxu0 %v16292_v17  ;;  %v16521_v12 = vld [vmem:[#allocation85_spill] sm:$0xff] }
 0xf07   :  { %11811 = vmatpush1.bf16.msra.mxu1 %v16513_v28  ;;  %11836 = vmatpush3.bf16.msra.mxu0 %v16514_v30 }
 0xf08   :  { %11813 = vmatprep.subr.bf16.mxu1 %v16515_v57  ;;  %11837 = vmatprep.subr.bf16.mxu0 %v16292_v17 }
 0xf0b   :  { %11815 = vmatpush1.bf16.msra.mxu1 %v16516_v0  ;;  %11839 = vmatpush3.bf16.msra.mxu0 %v16517_v19 }
 0xf0c   :  { %11841 = vmatprep.subr.bf16.mxu1 %v16518_v23  ;;  %11872 = vmatprep.subr.bf16.mxu0 %v16292_v17 }
 0xfa1   :  { %v6403_v26 = vpop.f32.mrb[108].mxu1  ;;  %v6474_v8 = vpop.f32.mrb[84].mxu0 }
 0xfa2   :  { %v6478_v32 = vadd.f32 %v16519_v25, %v6403_v26  ;;  %v6405_v62 = vpop.f32.mrb[109].mxu1  ;;  %v10054_v50 = vpop.f32.mrb[85].mxu0  ;;  %v6492_v23 = vadd.f32 %v16488_v16, %v6474_v8  ;;  %v15693_v8 = vld [vmem:[%s16290_s27 + $0x18] sm:$0xff] }
 0xfa3   :  { %v6485_v29 = vadd.f32 %v16520_v10, %v6405_v62  ;;  %v16522_v50 = vld [vmem:[#allocation75_spill] sm:$0xff]  ;;  %v16523_v10 = vld [vmem:[#allocation76_spill] sm:$0xff] }
 0xfa4   :  { %v8399_v24 = vmul.f32 -1.442695, %v6478_v32 }
 0xfa5   :  { %v8400_v53 = vmul.f32 -1.442695, %v6485_v29 }
 0xfa6   :  { %12828 = vpow2.f32 %v8399_v24 }
 0xfa7   :  { %12830 = vpow2.f32 %v8400_v53 }
 0xfb0   :  { %v12829_v57 = vpop.eup %12828 }
 0xfb1   :  { %v6482_v30 = vadd.f32 1.0, %v12829_v57  ;;  %v12831_v19 = vpop.eup %12830 }
 0xfb2   :  { %v6489_v33 = vadd.f32 1.0, %v12831_v19 }
 0xfb3   :  { %12832 = vrcp.f32 %v6482_v30 }
 0xfbd   :  { %v12833_v0 = vpop.eup %12832 }
 0xfbe   :  { %v6493_v28 = vmul.f32 %v12833_v0, %v6492_v23 }
 0xfc0   :  { %v6494_v58 = vadd.f32 %v16521_v12, %v6493_v28 }
 0xfc1   :  { %v6568_v26 = vpop.f32.mrb[110].mxu1  ;;  %v6639_v25 = vpop.f32.mrb[86].mxu0 }
 0xfc2   :  { %12834 = vtanh.f32 %v6494_v58  ;;  %v6643_v62 = vadd.f32 %v16522_v50, %v6568_v26  ;;  %v6570_v32 = vpop.f32.mrb[111].mxu1  ;;  %v10089_v24 = vpop.f32.mrb[87].mxu0 }
 0xfc3   :  { %v6650_v29 = vadd.f32 %v16523_v10, %v6570_v32  ;;  %12836 = vrcp.f32 %v6489_v33  ;;  %v16524_v24 = vld [vmem:[#allocation71_spill] sm:$0xff] }
 0xfc4   :  { %v8401_v53 = vmul.f32 -1.442695, %v6643_v62  ;;  %v6657_v62 = vadd.f32 %v15402_v47, %v6639_v25 }
 0xfc5   :  { %v8402_v0 = vmul.f32 -1.442695, %v6650_v29 }
 0xfc6   :  { %12838 = vpow2.f32 %v8401_v53 }
 0xfc7   :  { %12840 = vpow2.f32 %v8402_v0  ;;  %v15739_v0 = vld [vmem:[%s16290_s27 + $0x20] sm:$0xff] }
 0xfcc   :  { %v12835_v30 = vpop.eup %12834 }
 0xfcd   :  { %v6496_v16 = vsub.f32 %v15593_v48, %v12835_v30  ;;  %v12837_v57 = vpop.eup %12836 }
 0xfcf   :  { %v6497_v23 = vmul.f32 %v12837_v57, %v6496_v16 }
 0xfd0   :  { %v12839_v12 = vpop.eup %12838 }
 0xfd1   :  { %v6498_v28 = vadd.f32 %v12835_v30, %v6497_v23  ;;  %v6647_v19 = vadd.f32 1.0, %v12839_v12  ;;  %v12841_v50 = vpop.eup %12840 }
 0xfd2   :  { %v6654_v29 = vadd.f32 1.0, %v12841_v50  ;;  %v16530_v50 = vld [vmem:[#allocation88_spill] sm:$0xff] }
 0xfd3   :  { %12842 = vrcp.f32 %v6647_v19  ;;  %v6499_v58 = vsub.f32 %v6498_v28, %v15593_v48  ;;  %v16526_v28 = vld [vmem:[#allocation62_spill] sm:$0xff]  ;;  %v16527_v19 = vld [vmem:[#allocation60_spill] sm:$0xff] }
 0xfd5   :  { %v6500_v33 = vmul.f32 %v15693_v8, %v6499_v58  ;;  %v16528_v58 = vld [vmem:[#allocation55_spill] sm:$0xff] }
 0xfd7   :  { %v15697_v26 = vadd.f32 %v6500_v33, %v15593_v48  ;;  %v16529_v33 = vld [vmem:[#allocation89_spill] sm:$0xff] }
 0xfd9   :  { %6732 = vmatmul.mubr.f32.vlgmr.msra.gmra.mrb[112].mxu1 %v15697_v26  ;;  %10123 = vmatmul.mubr.f32.vlgmr.msra.gmra.mrb[88].mxu0 %v15697_v26 }
 0xfda   :  { %11843 = vmatpush1.bf16.msra.mxu1 %v15101_v36  ;;  %11874 = vmatpush3.bf16.msra.mxu0 %v15107_v3 }
 0xfdb   :  { %11845 = vmatprep.subr.bf16.mxu1 %v15104_v42  ;;  %11875 = vmatprep.subr.bf16.mxu0 %v16292_v17 }
 0xfdc   :  { %6896 = vmatprep.mubr.f32.mxu1 %v16293_v52  ;;  %10157 = vmatprep.mubr.msk.f32.mxu0 %vm13368_vm12, %v16293_v52 }
 0xfdd   :  { %v12843_v48 = vpop.eup %12842 }
 0xfde   :  { %v6658_v32 = vmul.f32 %v12843_v48, %v6657_v62  ;;  %11847 = vmatpush1.bf16.msra.mxu1 %v15112_v15  ;;  %11877 = vmatpush3.bf16.msra.mxu0 %v15120_v4  ;;  %v16531_v62 = vld [vmem:[#allocation84_spill] sm:$0xff]  ;;  %v16532_v48 = vld [vmem:[#allocation66_spill] sm:$0xff] }
 0xfdf   :  { %11849 = vmatprep.subr.bf16.mxu1 %v15116_v18  ;;  %11878 = vmatprep.subr.bf16.mxu0 %v16292_v17 }
 0xfe0   :  { %v6659_v10 = vadd.f32 %v16524_v24, %v6658_v32  ;;  %v16533_v32 = vld [vmem:[#allocation65_spill] sm:$0xff] }
 0xfe2   :  { %12844 = vtanh.f32 %v6659_v10  ;;  %11851 = vmatpush1.bf16.msra.mxu1 %v15126_v34  ;;  %11880 = vmatpush3.bf16.msra.mxu0 %v15132_v20 }
 0xfe3   :  { %11853 = vmatprep.subr.bf16.mxu1 %v15129_v40  ;;  %11881 = vmatprep.subr.bf16.mxu0 %v16292_v17  ;;  %12846 = vrcp.f32 %v6654_v29  ;;  %v16534_v29 = vld [vmem:[#allocation40_spill] sm:$0xff] }
 0xfe6   :  { %11855 = vmatpush1.bf16.msra.mxu1 %v15136_v60  ;;  %11883 = vmatpush3.bf16.msra.mxu0 %v15142_v54 }
 0xfe7   :  { %11857 = vmatprep.subr.bf16.mxu1 %v15139_v14  ;;  %11884 = vmatprep.subr.bf16.mxu0 %v16292_v17 }
 0xfea   :  { %11859 = vmatpush1.bf16.msra.mxu1 %v15146_v45  ;;  %11886 = vmatpush3.bf16.msra.mxu0 %v15152_v39 }
 0xfeb   :  { %11861 = vmatprep.subr.bf16.mxu1 %v15149_v46  ;;  %11887 = vmatprep.subr.bf16.mxu0 %v16292_v17 }
 0xfec   :  { %v12845_v47 = vpop.eup %12844 }
 0xfed   :  { %v6661_v25 = vsub.f32 %v15641_v61, %v12845_v47  ;;  %v12847_v53 = vpop.eup %12846 }
 0xfee   :  { %11863 = vmatpush1.bf16.msra.mxu1 %v15156_v59  ;;  %11889 = vmatpush3.bf16.msra.mxu0 %v15162_v63 }
 0xfef   :  { %v6662_v30 = vmul.f32 %v12847_v53, %v6661_v25  ;;  %11865 = vmatprep.subr.bf16.mxu1 %v15159_v11  ;;  %11890 = vmatprep.subr.bf16.mxu0 %v16292_v17 }
 0xff1   :  { %v6663_v16 = vadd.f32 %v12845_v47, %v6662_v30  ;;  %v16535_v30 = vld [vmem:[#allocation42_spill] sm:$0xff] }
 0xff2   :  { %11867 = vmatpush1.bf16.msra.mxu1 %v15166_v41  ;;  %11892 = vmatpush3.bf16.msra.mxu0 %v15172_v56 }
 0xff3   :  { %11869 = vmatprep.subr.bf16.mxu1 %v15169_v38  ;;  %11893 = vmatprep.subr.bf16.mxu0 %v16292_v17  ;;  %v6664_v57 = vsub.f32 %v6663_v16, %v15641_v61 }
 0xff5   :  { %v6665_v23 = vmul.f32 %v15739_v0, %v6664_v57 }
 0xff6   :  { %11871 = vmatpush1.bf16.msra.mxu1 %v15176_v9  ;;  %11895 = vmatpush3.bf16.msra.mxu0 %v15180_v1 }
 0xff7   :  { %v15745_v12 = vadd.f32 %v6665_v23, %v15641_v61  ;;  %11897 = vmatprep.subr.bf16.mxu1 %v15007_v43  ;;  %11928 = vmatprep.subr.bf16.mxu0 %v16292_v17  ;;  %v16525_v61 = vld [vmem:[#allocation87_spill] sm:$0xff] }
 0xff9   :  { %6897 = vmatmul.mubr.f32.vlgmr.msra.gmra.mrb[114].mxu1 %v15745_v12  ;;  %10158 = vmatmul.mubr.f32.vlgmr.msra.gmra.mrb[90].mxu0 %v15745_v12 }
 0xffa   :  { %11899 = vmatpush1.bf16.msra.mxu1 %v15009_v37  ;;  %11930 = vmatpush3.bf16.msra.mxu0 %v15015_v51 }
 0xffb   :  { %11901 = vmatprep.subr.bf16.mxu1 %v15012_v49  ;;  %11931 = vmatprep.subr.bf16.mxu0 %v16292_v17 }
 0xffc   :  { %7061 = vmatprep.mubr.f32.mxu1 %v16293_v52  ;;  %10192 = vmatprep.mubr.msk.f32.mxu0 %vm13368_vm12, %v16293_v52 }
 0xffe   :  { %11903 = vmatpush1.bf16.msra.mxu1 %v15020_v31  ;;  %11933 = vmatpush3.bf16.msra.mxu0 %v15028_v21 }
 0xfff   :  { %11905 = vmatprep.subr.bf16.mxu1 %v15024_v5  ;;  %11934 = vmatprep.subr.bf16.mxu0 %v16292_v17 }
0x1002   :  { %11907 = vmatpush1.bf16.msra.mxu1 %v15032_v27  ;;  %11936 = vmatpush3.bf16.msra.mxu0 %v15038_v55 }
0x1003   :  { %11909 = vmatprep.subr.bf16.mxu1 %v15035_v35  ;;  %11937 = vmatprep.subr.bf16.mxu0 %v16292_v17 }
0x1006   :  { %11911 = vmatpush1.bf16.msra.mxu1 %v15044_v13  ;;  %11939 = vmatpush3.bf16.msra.mxu0 %v15051_v7 }
0x1007   :  { %11913 = vmatprep.subr.bf16.mxu1 %v16473_v22  ;;  %11940 = vmatprep.subr.bf16.mxu0 %v16292_v17 }
0x100a   :  { %11915 = vmatpush1.bf16.msra.mxu1 %v16474_v2  ;;  %11942 = vmatpush3.bf16.msra.mxu0 %v16475_v44 }
0x100b   :  { %11917 = vmatprep.subr.bf16.mxu1 %v16476_v6  ;;  %11943 = vmatprep.subr.bf16.mxu0 %v16292_v17 }
0x100e   :  { %11919 = vmatpush1.bf16.msra.mxu1 %v16525_v61  ;;  %11945 = vmatpush3.bf16.msra.mxu0 %v16526_v28 }
0x100f   :  { %11921 = vmatprep.subr.bf16.mxu1 %v16527_v19  ;;  %11946 = vmatprep.subr.bf16.mxu0 %v16292_v17 }
0x1012   :  { %11923 = vmatpush1.bf16.msra.mxu1 %v16528_v58  ;;  %11948 = vmatpush3.bf16.msra.mxu0 %v16529_v33 }
0x1013   :  { %11925 = vmatprep.subr.bf16.mxu1 %v16530_v50  ;;  %11949 = vmatprep.subr.bf16.mxu0 %v16292_v17 }
0x1016   :  { %11927 = vmatpush1.bf16.msra.mxu1 %v16531_v62  ;;  %11951 = vmatpush3.bf16.msra.mxu0 %v16532_v48 }
0x1017   :  { %11953 = vmatprep.subr.bf16.mxu1 %v16533_v32  ;;  %11984 = vmatprep.subr.bf16.mxu0 %v16292_v17  ;;  %v15791_v32 = vld [vmem:[%s16112_s15] ss:$0 sm:$0xff] }
0x1018   :  { %16536 = vst [vmem:[#allocation58_spill] sm:$0xff] %v15791_v32 }
0x10ac   :  { %v6733_v24 = vpop.f32.mrb[112].mxu1  ;;  %v6804_v10 = vpop.f32.mrb[88].mxu0 }
0x10ad   :  { %v6808_v47 = vadd.f32 %v16534_v29, %v6733_v24  ;;  %v6735_v25 = vpop.f32.mrb[113].mxu1  ;;  %v10124_v53 = vpop.f32.mrb[89].mxu0  ;;  %v6822_v62 = vadd.f32 %v15791_v32, %v6804_v10 }
0x10ae   :  { %v6815_v16 = vadd.f32 %v16535_v30, %v6735_v25  ;;  %v16537_v53 = vld [vmem:[#allocation64_spill] sm:$0xff] }
0x10af   :  { %v8403_v57 = vmul.f32 -1.442695, %v6808_v47 }
0x10b0   :  { %v8404_v23 = vmul.f32 -1.442695, %v6815_v16  ;;  %v16538_v16 = vld [vmem:[#allocation72_spill] sm:$0xff] }
0x10b1   :  { %12848 = vpow2.f32 %v8403_v57 }
0x10b2   :  { %12850 = vpow2.f32 %v8404_v23  ;;  %v16539_v23 = vld [vmem:[#allocation63_spill] sm:$0xff] }
0x10bb   :  { %v12849_v50 = vpop.eup %12848 }
0x10bc   :  { %v6812_v33 = vadd.f32 1.0, %v12849_v50  ;;  %v12851_v48 = vpop.eup %12850 }
0x10bd   :  { %v6819_v25 = vadd.f32 1.0, %v12851_v48 }
0x10be   :  { %12852 = vrcp.f32 %v6812_v33 }
0x10c8   :  { %v12853_v24 = vpop.eup %12852 }
0x10c9   :  { %v6823_v29 = vmul.f32 %v12853_v24, %v6822_v62 }
0x10cb   :  { %v6824_v58 = vadd.f32 %v16537_v53, %v6823_v29 }
0x10cc   :  { %v6898_v47 = vpop.f32.mrb[114].mxu1  ;;  %v6969_v30 = vpop.f32.mrb[90].mxu0 }
0x10cd   :  { %12854 = vtanh.f32 %v6824_v58  ;;  %v6973_v50 = vadd.f32 %v16538_v16, %v6898_v47  ;;  %v6900_v57 = vpop.f32.mrb[115].mxu1  ;;  %v10159_v33 = vpop.f32.mrb[91].mxu0 }
0x10ce   :  { %v6980_v19 = vadd.f32 %v16539_v23, %v6900_v57  ;;  %12856 = vrcp.f32 %v6819_v25 }
0x10cf   :  { %v8405_v28 = vmul.f32 -1.442695, %v6973_v50 }
0x10d0   :  { %v8406_v62 = vmul.f32 -1.442695, %v6980_v19 }
0x10d1   :  { %12858 = vpow2.f32 %v8405_v28  ;;  %v15809_v28 = vld [vmem:[#allocation23] ss:$0 sm:$0xff] }
0x10d2   :  { %12860 = vpow2.f32 %v8406_v62 }
0x10d7   :  { %v12855_v61 = vpop.eup %12854 }
0x10d8   :  { %v6826_v10 = vsub.f32 %v15697_v26, %v12855_v61  ;;  %v12857_v32 = vpop.eup %12856 }
0x10da   :  { %v6827_v24 = vmul.f32 %v12857_v32, %v6826_v10  ;;  %v16540_v32 = vld [vmem:[#allocation79_spill] sm:$0xff] }
0x10db   :  { %v12859_v29 = vpop.eup %12858 }
0x10dc   :  { %v6828_v48 = vadd.f32 %v12855_v61, %v6827_v24  ;;  %v6977_v53 = vadd.f32 1.0, %v12859_v29  ;;  %v12861_v61 = vpop.eup %12860 }
0x10dd   :  { %v6984_v50 = vadd.f32 1.0, %v12861_v61  ;;  %v16547_v61 = vld [vmem:[#allocation84_spill] sm:$0xff] }
0x10de   :  { %12862 = vrcp.f32 %v6977_v53  ;;  %v6829_v58 = vsub.f32 %v6828_v48, %v15697_v26  ;;  %v16543_v48 = vld [vmem:[#allocation60_spill] sm:$0xff]  ;;  %v16544_v53 = vld [vmem:[#allocation55_spill] sm:$0xff] }
0x10e0   :  { %v6830_v47 = vmul.f32 %v15739_v0, %v6829_v58  ;;  %v6987_v0 = vadd.f32 %v15809_v28, %v6969_v30  ;;  %v16545_v58 = vld [vmem:[#allocation89_spill] sm:$0xff] }
0x10e2   :  { %v15801_v16 = vadd.f32 %v6830_v47, %v15697_v26  ;;  %v16546_v47 = vld [vmem:[#allocation88_spill] sm:$0xff] }
0x10e4   :  { %7062 = vmatmul.mubr.f32.vlgmr.msra.gmra.mrb[116].mxu1 %v15801_v16  ;;  %10193 = vmatmul.mubr.f32.vlgmr.msra.gmra.mrb[92].mxu0 %v15801_v16 }
0x10e5   :  { %11955 = vmatpush1.bf16.msra.mxu1 %v15101_v36  ;;  %11986 = vmatpush3.bf16.msra.mxu0 %v15107_v3 }
0x10e6   :  { %11957 = vmatprep.subr.bf16.mxu1 %v15104_v42  ;;  %11987 = vmatprep.subr.bf16.mxu0 %v16292_v17 }
0x10e7   :  { %7226 = vmatprep.mubr.f32.mxu1 %v16293_v52  ;;  %10227 = vmatprep.mubr.msk.f32.mxu0 %vm13368_vm12, %v16293_v52 }
0x10e8   :  { %v12863_v26 = vpop.eup %12862 }
0x10e9   :  { %v6988_v19 = vmul.f32 %v12863_v26, %v6987_v0  ;;  %11959 = vmatpush1.bf16.msra.mxu1 %v15112_v15  ;;  %11989 = vmatpush3.bf16.msra.mxu0 %v15120_v4  ;;  %v16548_v0 = vld [vmem:[#allocation66_spill] sm:$0xff]  ;;  %v16549_v26 = vld [vmem:[#allocation65_spill] sm:$0xff] }
0x10ea   :  { %11961 = vmatprep.subr.bf16.mxu1 %v15116_v18  ;;  %11990 = vmatprep.subr.bf16.mxu0 %v16292_v17 }
0x10eb   :  { %v6989_v25 = vadd.f32 %v16540_v32, %v6988_v19 }
0x10ed   :  { %12864 = vtanh.f32 %v6989_v25  ;;  %11963 = vmatpush1.bf16.msra.mxu1 %v15126_v34  ;;  %11992 = vmatpush3.bf16.msra.mxu0 %v15132_v20  ;;  %v16550_v25 = vld [vmem:[#allocation41_spill] sm:$0xff] }
0x10ee   :  { %11965 = vmatprep.subr.bf16.mxu1 %v15129_v40  ;;  %11993 = vmatprep.subr.bf16.mxu0 %v16292_v17  ;;  %12866 = vrcp.f32 %v6984_v50 }
0x10f1   :  { %11967 = vmatpush1.bf16.msra.mxu1 %v15136_v60  ;;  %11995 = vmatpush3.bf16.msra.mxu0 %v15142_v54 }
0x10f2   :  { %11969 = vmatprep.subr.bf16.mxu1 %v15139_v14  ;;  %11996 = vmatprep.subr.bf16.mxu0 %v16292_v17 }
0x10f5   :  { %11971 = vmatpush1.bf16.msra.mxu1 %v15146_v45  ;;  %11998 = vmatpush3.bf16.msra.mxu0 %v15152_v39 }
0x10f6   :  { %11973 = vmatprep.subr.bf16.mxu1 %v15149_v46  ;;  %11999 = vmatprep.subr.bf16.mxu0 %v16292_v17 }
0x10f7   :  { %v12865_v30 = vpop.eup %12864 }
0x10f8   :  { %v6991_v57 = vsub.f32 %v15745_v12, %v12865_v30  ;;  %v12867_v33 = vpop.eup %12866 }
0x10f9   :  { %11975 = vmatpush1.bf16.msra.mxu1 %v15156_v59  ;;  %12001 = vmatpush3.bf16.msra.mxu0 %v15162_v63 }
0x10fa   :  { %v6992_v23 = vmul.f32 %v12867_v33, %v6991_v57  ;;  %11977 = vmatprep.subr.bf16.mxu1 %v15159_v11  ;;  %12002 = vmatprep.subr.bf16.mxu0 %v16292_v17  ;;  %v16551_v33 = vld [vmem:[#allocation43_spill] sm:$0xff] }
0x10fc   :  { %v6993_v10 = vadd.f32 %v12865_v30, %v6992_v23 }
0x10fd   :  { %11979 = vmatpush1.bf16.msra.mxu1 %v15166_v41  ;;  %12004 = vmatpush3.bf16.msra.mxu0 %v15172_v56 }
0x10fe   :  { %11981 = vmatprep.subr.bf16.mxu1 %v15169_v38  ;;  %12005 = vmatprep.subr.bf16.mxu0 %v16292_v17  ;;  %v6994_v62 = vsub.f32 %v6993_v10, %v15745_v12 }
0x1100   :  { %v6995_v24 = vmul.f32 %v15693_v8, %v6994_v62  ;;  %v16541_v8 = vld [vmem:[#allocation87_spill] sm:$0xff] }
0x1101   :  { %11983 = vmatpush1.bf16.msra.mxu1 %v15176_v9  ;;  %12007 = vmatpush3.bf16.msra.mxu0 %v15180_v1 }
0x1102   :  { %v15846_v29 = vadd.f32 %v6995_v24, %v15745_v12  ;;  %12009 = vmatprep.subr.bf16.mxu1 %v15007_v43  ;;  %12040 = vmatprep.subr.bf16.mxu0 %v16292_v17  ;;  %v16542_v12 = vld [vmem:[#allocation62_spill] sm:$0xff] }
0x1104   :  { %7227 = vmatmul.mubr.f32.vlgmr.msra.gmra.mrb[118].mxu1 %v15846_v29  ;;  %10228 = vmatmul.mubr.f32.vlgmr.msra.gmra.mrb[94].mxu0 %v15846_v29 }
0x1105   :  { %12011 = vmatpush1.bf16.msra.mxu1 %v15009_v37  ;;  %12042 = vmatpush3.bf16.msra.mxu0 %v15015_v51 }
0x1106   :  { %12013 = vmatprep.subr.bf16.mxu1 %v15012_v49  ;;  %12043 = vmatprep.subr.bf16.mxu0 %v16292_v17 }
0x1107   :  { %7391 = vmatprep.mubr.f32.mxu1 %v16293_v52  ;;  %10262 = vmatprep.mubr.msk.f32.mxu0 %vm13368_vm12, %v16293_v52 }
0x1109   :  { %12015 = vmatpush1.bf16.msra.mxu1 %v15020_v31  ;;  %12045 = vmatpush3.bf16.msra.mxu0 %v15028_v21 }
0x110a   :  { %12017 = vmatprep.subr.bf16.mxu1 %v15024_v5  ;;  %12046 = vmatprep.subr.bf16.mxu0 %v16292_v17 }
0x110d   :  { %12019 = vmatpush1.bf16.msra.mxu1 %v15032_v27  ;;  %12048 = vmatpush3.bf16.msra.mxu0 %v15038_v55 }
0x110e   :  { %12021 = vmatprep.subr.bf16.mxu1 %v15035_v35  ;;  %12049 = vmatprep.subr.bf16.mxu0 %v16292_v17 }
0x1111   :  { %12023 = vmatpush1.bf16.msra.mxu1 %v15044_v13  ;;  %12051 = vmatpush3.bf16.msra.mxu0 %v15051_v7 }
0x1112   :  { %12025 = vmatprep.subr.bf16.mxu1 %v16473_v22  ;;  %12052 = vmatprep.subr.bf16.mxu0 %v16292_v17 }
0x1115   :  { %12027 = vmatpush1.bf16.msra.mxu1 %v16474_v2  ;;  %12054 = vmatpush3.bf16.msra.mxu0 %v16475_v44 }
0x1116   :  { %12029 = vmatprep.subr.bf16.mxu1 %v16476_v6  ;;  %12055 = vmatprep.subr.bf16.mxu0 %v16292_v17 }
0x1119   :  { %12031 = vmatpush1.bf16.msra.mxu1 %v16541_v8  ;;  %12057 = vmatpush3.bf16.msra.mxu0 %v16542_v12 }
0x111a   :  { %12033 = vmatprep.subr.bf16.mxu1 %v16543_v48  ;;  %12058 = vmatprep.subr.bf16.mxu0 %v16292_v17  ;;  %v16553_v48 = vld [vmem:[#allocation74_spill] sm:$0xff] }
0x111d   :  { %12035 = vmatpush1.bf16.msra.mxu1 %v16544_v53  ;;  %12060 = vmatpush3.bf16.msra.mxu0 %v16545_v58 }
0x111e   :  { %12037 = vmatprep.subr.bf16.mxu1 %v16546_v47  ;;  %12061 = vmatprep.subr.bf16.mxu0 %v16292_v17 }
0x1121   :  { %12039 = vmatpush1.bf16.msra.mxu1 %v16547_v61  ;;  %12063 = vmatpush3.bf16.msra.mxu0 %v16548_v0  ;;  %v16552_v61 = vld [vmem:[#allocation58_spill] sm:$0xff] }
0x1122   :  { %12065 = vmatprep.subr.bf16.mxu1 %v16549_v26  ;;  %12096 = vmatprep.subr.bf16.mxu0 %v16292_v17 }
0x11b7   :  { %v7063_v19 = vpop.f32.mrb[116].mxu1  ;;  %v7134_v32 = vpop.f32.mrb[92].mxu0 }
0x11b8   :  { %v7138_v50 = vadd.f32 %v16550_v25, %v7063_v19  ;;  %v7065_v30 = vpop.f32.mrb[117].mxu1  ;;  %v10194_v57 = vpop.f32.mrb[93].mxu0  ;;  %v7152_v26 = vadd.f32 %v16552_v61, %v7134_v32 }
0x11b9   :  { %v7145_v23 = vadd.f32 %v16551_v33, %v7065_v30  ;;  %v16554_v57 = vld [vmem:[#allocation39_spill] sm:$0xff] }
0x11ba   :  { %v8407_v10 = vmul.f32 -1.442695, %v7138_v50 }
0x11bb   :  { %v8408_v62 = vmul.f32 -1.442695, %v7145_v23  ;;  %v16555_v23 = vld [vmem:[#allocation93_spill] sm:$0xff] }
0x11bc   :  { %12868 = vpow2.f32 %v8407_v10 }
0x11bd   :  { %12870 = vpow2.f32 %v8408_v62 }
0x11c6   :  { %v12869_v24 = vpop.eup %12868 }
0x11c7   :  { %v7142_v47 = vadd.f32 1.0, %v12869_v24  ;;  %v12871_v0 = vpop.eup %12870 }
0x11c8   :  { %v7149_v8 = vadd.f32 1.0, %v12871_v0 }
0x11c9   :  { %12872 = vrcp.f32 %v7142_v47 }
0x11d3   :  { %v12873_v58 = vpop.eup %12872 }
0x11d4   :  { %v7153_v53 = vmul.f32 %v12873_v58, %v7152_v26 }
0x11d6   :  { %v7154_v12 = vadd.f32 %v16553_v48, %v7153_v53 }
0x11d7   :  { %v7228_v19 = vpop.f32.mrb[118].mxu1  ;;  %v7299_v25 = vpop.f32.mrb[94].mxu0 }
0x11d8   :  { %12874 = vtanh.f32 %v7154_v12  ;;  %v7303_v30 = vadd.f32 %v16554_v57, %v7228_v19  ;;  %v7230_v50 = vpop.f32.mrb[119].mxu1  ;;  %v10229_v33 = vpop.f32.mrb[95].mxu0  ;;  %v16556_v19 = vld [vmem:[#allocation51_spill] sm:$0xff] }
0x11d9   :  { %v7310_v10 = vadd.f32 %v16555_v23, %v7230_v50  ;;  %12876 = vrcp.f32 %v7149_v8  ;;  %v16557_v23 = vld [vmem:[#allocation69_spill] sm:$0xff] }
0x11da   :  { %v8409_v62 = vmul.f32 -1.442695, %v7303_v30  ;;  %v7317_v30 = vadd.f32 %v15809_v28, %v7299_v25 }
0x11db   :  { %v8410_v58 = vmul.f32 -1.442695, %v7310_v10 }
0x11dc   :  { %12878 = vpow2.f32 %v8409_v62 }
0x11dd   :  { %12880 = vpow2.f32 %v8410_v58 }
0x11e2   :  { %v12875_v47 = vpop.eup %12874 }
0x11e3   :  { %v7156_v32 = vsub.f32 %v15801_v16, %v12875_v47  ;;  %v12877_v24 = vpop.eup %12876 }
0x11e5   :  { %v7157_v26 = vmul.f32 %v12877_v24, %v7156_v32 }
0x11e6   :  { %v12879_v48 = vpop.eup %12878 }
0x11e7   :  { %v7158_v53 = vadd.f32 %v12875_v47, %v7157_v26  ;;  %v7307_v0 = vadd.f32 1.0, %v12879_v48  ;;  %v12881_v8 = vpop.eup %12880  ;;  %v16558_v48 = vld [vmem:[#allocation50_spill] sm:$0xff] }
0x11e8   :  { %v7314_v62 = vadd.f32 1.0, %v12881_v8 }
0x11e9   :  { %12882 = vrcp.f32 %v7307_v0  ;;  %v7159_v12 = vsub.f32 %v7158_v53, %v15801_v16 }
0x11eb   :  { %v7160_v57 = vmul.f32 %v16556_v19, %v7159_v12 }
0x11ed   :  { %v15897_v50 = vadd.f32 %v7160_v57, %v15801_v16 }
0x11ef   :  { %7392 = vmatmul.mubr.f32.vlgmr.msra.gmra.mrb[120].mxu1 %v15897_v50  ;;  %10263 = vmatmul.mubr.f32.vlgmr.msra.gmra.mrb[96].mxu0 %v15897_v50 }
0x11f0   :  { %12067 = vmatpush1.bf16.msra.mxu1 %v15101_v36  ;;  %12098 = vmatpush3.bf16.msra.mxu0 %v15107_v3 }
0x11f1   :  { %12069 = vmatprep.subr.bf16.mxu1 %v15104_v42  ;;  %12099 = vmatprep.subr.bf16.mxu0 %v16292_v17 }
0x11f2   :  { %7556 = vmatprep.mubr.f32.mxu1 %v16293_v52  ;;  %10297 = vmatprep.mubr.msk.f32.mxu0 %vm13368_vm12, %v16293_v52 }
0x11f3   :  { %v12883_v16 = vpop.eup %12882 }
0x11f4   :  { %v7318_v33 = vmul.f32 %v12883_v16, %v7317_v30  ;;  %12071 = vmatpush1.bf16.msra.mxu1 %v15112_v15  ;;  %12101 = vmatpush3.bf16.msra.mxu0 %v15120_v4 }
0x11f5   :  { %12073 = vmatprep.subr.bf16.mxu1 %v15116_v18  ;;  %12102 = vmatprep.subr.bf16.mxu0 %v16292_v17 }
0x11f6   :  { %v7319_v10 = vadd.f32 %v16557_v23, %v7318_v33 }
0x11f8   :  { %12884 = vtanh.f32 %v7319_v10  ;;  %12075 = vmatpush1.bf16.msra.mxu1 %v15126_v34  ;;  %12104 = vmatpush3.bf16.msra.mxu0 %v15132_v20  ;;  %v16570_v10 = vld [vmem:[#allocation68_spill] sm:$0xff] }
0x11f9   :  { %12077 = vmatprep.subr.bf16.mxu1 %v15129_v40  ;;  %12105 = vmatprep.subr.bf16.mxu0 %v16292_v17  ;;  %12886 = vrcp.f32 %v7314_v62 }
0x11fc   :  { %12079 = vmatpush1.bf16.msra.mxu1 %v15136_v60  ;;  %12107 = vmatpush3.bf16.msra.mxu0 %v15142_v54 }
0x11fd   :  { %12081 = vmatprep.subr.bf16.mxu1 %v15139_v14  ;;  %12108 = vmatprep.subr.bf16.mxu0 %v16292_v17 }
0x1200   :  { %12083 = vmatpush1.bf16.msra.mxu1 %v15146_v45  ;;  %12110 = vmatpush3.bf16.msra.mxu0 %v15152_v39 }
0x1201   :  { %12085 = vmatprep.subr.bf16.mxu1 %v15149_v46  ;;  %12111 = vmatprep.subr.bf16.mxu0 %v16292_v17 }
0x1202   :  { %v12885_v25 = vpop.eup %12884 }
0x1203   :  { %v7321_v47 = vsub.f32 %v15846_v29, %v12885_v25  ;;  %v12887_v32 = vpop.eup %12886 }
0x1204   :  { %12087 = vmatpush1.bf16.msra.mxu1 %v15156_v59  ;;  %12113 = vmatpush3.bf16.msra.mxu0 %v15162_v63 }
0x1205   :  { %v7322_v24 = vmul.f32 %v12887_v32, %v7321_v47  ;;  %12089 = vmatprep.subr.bf16.mxu1 %v15159_v11  ;;  %12114 = vmatprep.subr.bf16.mxu0 %v16292_v17 }
0x1207   :  { %v7323_v58 = vadd.f32 %v12885_v25, %v7322_v24  ;;  %v16571_v24 = vld [vmem:[#allocation77_spill] sm:$0xff] }
0x1208   :  { %12091 = vmatpush1.bf16.msra.mxu1 %v15166_v41  ;;  %12116 = vmatpush3.bf16.msra.mxu0 %v15172_v56 }
0x1209   :  { %12093 = vmatprep.subr.bf16.mxu1 %v15169_v38  ;;  %12117 = vmatprep.subr.bf16.mxu0 %v16292_v17  ;;  %v7324_v26 = vsub.f32 %v7323_v58, %v15846_v29 }
0x120b   :  { %v7325_v53 = vmul.f32 %v16558_v48, %v7324_v26 }
0x120c   :  { %12095 = vmatpush1.bf16.msra.mxu1 %v15176_v9  ;;  %12119 = vmatpush3.bf16.msra.mxu0 %v15180_v1 }
0x120d   :  { %v15940_v0 = vadd.f32 %v7325_v53, %v15846_v29  ;;  %12121 = vmatprep.subr.bf16.mxu1 %v15007_v43  ;;  %12152 = vmatprep.subr.bf16.mxu0 %v16292_v17  ;;  %v16559_v43 = vld [vmem:[#allocation87_spill] sm:$0xff]  ;;  %v16572_v53 = vld [vmem:[#allocation80_spill] sm:$0xff] }
0x120f   :  { %7557 = vmatmul.mubr.f32.vlgmr.msra.gmra.mrb[122].mxu1 %v15940_v0  ;;  %10298 = vmatmul.mubr.f32.vlgmr.msra.gmra.mrb[98].mxu0 %v15940_v0 }
0x1210   :  { %12123 = vmatpush1.bf16.msra.mxu1 %v15009_v37  ;;  %12154 = vmatpush3.bf16.msra.mxu0 %v15015_v51  ;;  %v16560_v37 = vld [vmem:[#allocation62_spill] sm:$0xff]  ;;  %v16562_v51 = vld [vmem:[#allocation55_spill] sm:$0xff] }
0x1211   :  { %12125 = vmatprep.subr.bf16.mxu1 %v15012_v49  ;;  %12155 = vmatprep.subr.bf16.mxu0 %v16292_v17  ;;  %v16561_v49 = vld [vmem:[#allocation60_spill] sm:$0xff] }
0x1212   :  { %7721 = vmatprep.mubr.f32.mxu1 %v16293_v52  ;;  %10332 = vmatprep.mubr.msk.f32.mxu0 %vm13368_vm12, %v16293_v52 }
0x1214   :  { %12127 = vmatpush1.bf16.msra.mxu1 %v15020_v31  ;;  %12157 = vmatpush3.bf16.msra.mxu0 %v15028_v21  ;;  %v16563_v31 = vld [vmem:[#allocation89_spill] sm:$0xff]  ;;  %v16565_v21 = vld [vmem:[#allocation84_spill] sm:$0xff] }
0x1215   :  { %12129 = vmatprep.subr.bf16.mxu1 %v15024_v5  ;;  %12158 = vmatprep.subr.bf16.mxu0 %v16292_v17  ;;  %v16564_v5 = vld [vmem:[#allocation88_spill] sm:$0xff] }
0x1218   :  { %12131 = vmatpush1.bf16.msra.mxu1 %v15032_v27  ;;  %12160 = vmatpush3.bf16.msra.mxu0 %v15038_v55  ;;  %v16566_v27 = vld [vmem:[#allocation66_spill] sm:$0xff] }
0x1219   :  { %12133 = vmatprep.subr.bf16.mxu1 %v15035_v35  ;;  %12161 = vmatprep.subr.bf16.mxu0 %v16292_v17  ;;  %v16567_v35 = vld [vmem:[#allocation65_spill] sm:$0xff] }
0x121c   :  { %12135 = vmatpush1.bf16.msra.mxu1 %v15044_v13  ;;  %12163 = vmatpush3.bf16.msra.mxu0 %v15051_v7  ;;  %v16568_v7 = vld [vmem:[#allocation45_spill] sm:$0xff] }
0x121d   :  { %12137 = vmatprep.subr.bf16.mxu1 %v16473_v22  ;;  %12164 = vmatprep.subr.bf16.mxu0 %v16292_v17 }
0x1220   :  { %12139 = vmatpush1.bf16.msra.mxu1 %v16474_v2  ;;  %12166 = vmatpush3.bf16.msra.mxu0 %v16475_v44 }
0x1221   :  { %12141 = vmatprep.subr.bf16.mxu1 %v16476_v6  ;;  %12167 = vmatprep.subr.bf16.mxu0 %v16292_v17  ;;  %v16569_v6 = vld [vmem:[#allocation44_spill] sm:$0xff] }
0x1224   :  { %12143 = vmatpush1.bf16.msra.mxu1 %v16559_v43  ;;  %12169 = vmatpush3.bf16.msra.mxu0 %v16560_v37 }
0x1225   :  { %12145 = vmatprep.subr.bf16.mxu1 %v16561_v49  ;;  %12170 = vmatprep.subr.bf16.mxu0 %v16292_v17 }
0x1228   :  { %12147 = vmatpush1.bf16.msra.mxu1 %v16562_v51  ;;  %12172 = vmatpush3.bf16.msra.mxu0 %v16563_v31 }
0x1229   :  { %12149 = vmatprep.subr.bf16.mxu1 %v16564_v5  ;;  %12173 = vmatprep.subr.bf16.mxu0 %v16292_v17 }
0x122c   :  { %12151 = vmatpush1.bf16.msra.mxu1 %v16565_v21  ;;  %12175 = vmatpush3.bf16.msra.mxu0 %v16566_v27 }
0x122d   :  { %12177 = vmatprep.subr.bf16.mxu1 %v16567_v35  ;;  %12208 = vmatprep.subr.bf16.mxu0 %v16292_v17 }
0x12c2   :  { %v7393_v55 = vpop.f32.mrb[120].mxu1  ;;  %v7464_v13 = vpop.f32.mrb[96].mxu0 }
0x12c3   :  { %v7468_v22 = vadd.f32 %v16568_v7, %v7393_v55  ;;  %v7395_v2 = vpop.f32.mrb[121].mxu1  ;;  %v10264_v44 = vpop.f32.mrb[97].mxu0  ;;  %v7482_v16 = vadd.f32 %v16552_v61, %v7464_v13  ;;  %v12943_v7 = vld [vmem:[%s16290_s27 + $0x30] sm:$0xff] }
0x12c4   :  { %v7475_v29 = vadd.f32 %v16569_v6, %v7395_v2 }
0x12c5   :  { %v8411_v12 = vmul.f32 -1.442695, %v7468_v22 }
0x12c6   :  { %v8412_v19 = vmul.f32 -1.442695, %v7475_v29 }
0x12c7   :  { %12888 = vpow2.f32 %v8411_v12  ;;  %v7996_v12 = vld [vmem:[#allocation25 + $0x48] sm:$0xff] }
0x12c8   :  { %12890 = vpow2.f32 %v8412_v19 }
0x12d1   :  { %v12889_v57 = vpop.eup %12888 }
0x12d2   :  { %v7472_v8 = vadd.f32 1.0, %v12889_v57  ;;  %v12891_v30 = vpop.eup %12890  ;;  %v7997_v57 = vld [vmem:[#allocation25 + $0x50] sm:$0xff] }
0x12d3   :  { %v7479_v25 = vadd.f32 1.0, %v12891_v30 }
0x12d4   :  { %12892 = vrcp.f32 %v7472_v8  ;;  %v7998_v8 = vld [vmem:[#allocation25 + $0x58] sm:$0xff] }
0x12d5   :  { %v12272_v30 = vpack.c.bf16 %v7998_v8, %v7997_v57 }
0x12de   :  { %v12893_v33 = vpop.eup %12892 }
0x12df   :  { %v7483_v23 = vmul.f32 %v12893_v33, %v7482_v16  ;;  %v7999_v16 = vld [vmem:[#allocation25 + $0x60] sm:$0xff]  ;;  %v8000_v33 = vld [vmem:[#allocation25 + $0x68] sm:$0xff] }
0x12e1   :  { %v7484_v62 = vadd.f32 %v16570_v10, %v7483_v23  ;;  %v12275_v23 = vpack.c.bf16 %v8000_v33, %v7999_v16  ;;  %v8001_v10 = vld [vmem:[#allocation25 + $0x70] sm:$0xff] }
0x12e2   :  { %v7558_v47 = vpop.f32.mrb[122].mxu1  ;;  %v7629_v32 = vpop.f32.mrb[98].mxu0 }
0x12e3   :  { %12894 = vtanh.f32 %v7484_v62  ;;  %v7633_v58 = vadd.f32 %v16571_v24, %v7558_v47  ;;  %v7560_v26 = vpop.f32.mrb[123].mxu1  ;;  %v10299_v48 = vpop.f32.mrb[99].mxu0  ;;  %v7647_v6 = vadd.f32 %v15809_v28, %v7629_v32  ;;  %v8002_v62 = vld [vmem:[#allocation25 + $0x78] sm:$0xff]  ;;  %v8003_v47 = vld [vmem:[#allocation26] sm:$0xff]  ;;  %v8004_v32 = vld [vmem:[#allocation26 + $0x8] sm:$0xff] }
0x12e4   :  { %v7640_v43 = vadd.f32 %v16572_v53, %v7560_v26  ;;  %12896 = vrcp.f32 %v7479_v25  ;;  %v12278_v25 = vpack.c.bf16 %v8002_v62, %v8001_v10  ;;  %v12233_v24 = vpack.c.bf16 %v8004_v32, %v8003_v47  ;;  %v8006_v26 = vld [vmem:[#allocation26 + $0x18] sm:$0xff]  ;;  %v8007_v53 = vld [vmem:[#allocation26 + $0x20] sm:$0xff]  ;;  %v12945_v47 = vld [vmem:[%s16290_s27 + $0x38] sm:$0xff] }
0x12e5   :  { %v8413_v37 = vmul.f32 -1.442695, %v7633_v58  ;;  %v8005_v58 = vld [vmem:[#allocation26 + $0x10] sm:$0xff] }
0x12e6   :  { %v8414_v5 = vmul.f32 -1.442695, %v7640_v43  ;;  %v12236_v48 = vpack.c.bf16 %v8006_v26, %v8005_v58  ;;  %v8008_v43 = vld [vmem:[#allocation26 + $0x28] sm:$0xff] }
0x12e7   :  { %12898 = vpow2.f32 %v8413_v37  ;;  %v12239_v37 = vpack.c.bf16 %v8008_v43, %v8007_v53  ;;  %v16579_v43 = vld [vmem:[#allocation59_spill] sm:$0xff] }
0x12e8   :  { %12900 = vpow2.f32 %v8414_v5  ;;  %v8011_v5 = vld [vmem:[#allocation26 + $0x40] sm:$0xff] }
0x12ed   :  { %v12895_v49 = vpop.eup %12894 }
0x12ee   :  { %v7486_v51 = vsub.f32 %v15897_v50, %v12895_v49  ;;  %v12897_v31 = vpop.eup %12896 }
0x12f0   :  { %v7487_v21 = vmul.f32 %v12897_v31, %v7486_v51  ;;  %v8010_v51 = vld [vmem:[#allocation26 + $0x38] sm:$0xff] }
0x12f1   :  { %v12899_v27 = vpop.eup %12898 }
0x12f2   :  { %v7488_v35 = vadd.f32 %v12895_v49, %v7487_v21  ;;  %v7637_v55 = vadd.f32 1.0, %v12899_v27  ;;  %v12901_v44 = vpop.eup %12900  ;;  %v8009_v49 = vld [vmem:[#allocation26 + $0x30] sm:$0xff]  ;;  %v8012_v21 = vld [vmem:[#allocation26 + $0x48] sm:$0xff] }
0x12f3   :  { %v12242_v31 = vpack.c.bf16 %v8010_v51, %v8009_v49  ;;  %v12245_v27 = vpack.c.bf16 %v8012_v21, %v8011_v5 }
0x12f4   :  { %12902 = vrcp.f32 %v7637_v55  ;;  %v7489_v13 = vsub.f32 %v7488_v35, %v15897_v50  ;;  %v8013_v35 = vld [vmem:[#allocation26 + $0x50] sm:$0xff]  ;;  %v8014_v55 = vld [vmem:[#allocation26 + $0x58] sm:$0xff] }
0x12f6   :  { %v7490_v22 = vmul.f32 %v12943_v7, %v7489_v13  ;;  %v12248_v13 = vpack.c.bf16 %v8014_v55, %v8013_v35  ;;  %v8015_v7 = vld [vmem:[#allocation26 + $0x60] sm:$0xff] }
0x12f8   :  { %v15993_v2 = vadd.f32 %v7490_v22, %v15897_v50  ;;  %v8016_v22 = vld [vmem:[#allocation26 + $0x68] sm:$0xff] }
0x12fa   :  { %7722 = vmatmul.mubr.f32.vlgmr.msra.gmra.mrb[124].mxu1 %v15993_v2  ;;  %10333 = vmatmul.mubr.f32.vlgmr.msra.gmra.mrb[100].mxu0 %v15993_v2 }
0x12fb   :  { %12179 = vmatpush1.bf16.msra.mxu1 %v15101_v36  ;;  %12210 = vmatpush3.bf16.msra.mxu0 %v15107_v3  ;;  %v16573_v36 = vld [vmem:[#allocation95_spill] sm:$0xff]  ;;  %v7644_v3 = vadd.f32 1.0, %v12901_v44  ;;  %v12251_v44 = vpack.c.bf16 %v8016_v22, %v8015_v7 }
0x12fc   :  { %12181 = vmatprep.subr.bf16.mxu1 %v15104_v42  ;;  %12211 = vmatprep.subr.bf16.mxu0 %v16292_v17 }
0x12fd   :  { %7886 = vmatprep.mubr.f32.mxu1 %v16293_v52  ;;  %10367 = vmatprep.mubr.msk.f32.mxu0 %vm13368_vm12, %v16293_v52 }
0x12fe   :  { %v12903_v50 = vpop.eup %12902 }
0x12ff   :  { %v7648_v29 = vmul.f32 %v12903_v50, %v7647_v6  ;;  %12183 = vmatpush1.bf16.msra.mxu1 %v15112_v15  ;;  %12213 = vmatpush3.bf16.msra.mxu0 %v15120_v4  ;;  %v8017_v6 = vld [vmem:[#allocation26 + $0x70] sm:$0xff]  ;;  %v8018_v50 = vld [vmem:[#allocation26 + $0x78] sm:$0xff] }
0x1300   :  { %12185 = vmatprep.subr.bf16.mxu1 %v15116_v18  ;;  %12214 = vmatprep.subr.bf16.mxu0 %v16292_v17 }
0x1301   :  { %v7649_v42 = vadd.f32 %v16573_v36, %v7648_v29  ;;  %v12254_v29 = vpack.c.bf16 %v8018_v50, %v8017_v6 }
0x1303   :  { %12904 = vtanh.f32 %v7649_v42  ;;  %12187 = vmatpush1.bf16.msra.mxu1 %v15126_v34  ;;  %12216 = vmatpush3.bf16.msra.mxu0 %v15132_v20 }
0x1304   :  { %12189 = vmatprep.subr.bf16.mxu1 %v15129_v40  ;;  %12217 = vmatprep.subr.bf16.mxu0 %v16292_v17  ;;  %12906 = vrcp.f32 %v7644_v3  ;;  %v16574_v3 = vld [vmem:[#allocation46_spill] sm:$0xff] }
0x1307   :  { %12191 = vmatpush1.bf16.msra.mxu1 %v15136_v60  ;;  %12219 = vmatpush3.bf16.msra.mxu0 %v15142_v54  ;;  %v12944_v60 = vld [vmem:[%s16290_s27 + $0x8] sm:$0xff] }
0x1308   :  { %12193 = vmatprep.subr.bf16.mxu1 %v15139_v14  ;;  %12220 = vmatprep.subr.bf16.mxu0 %v16292_v17 }
0x130b   :  { %12195 = vmatpush1.bf16.msra.mxu1 %v15146_v45  ;;  %12222 = vmatpush3.bf16.msra.mxu0 %v15152_v39  ;;  %v7987_v45 = vld [vmem:[#allocation25] sm:$0xff] }
0x130c   :  { %12197 = vmatprep.subr.bf16.mxu1 %v15149_v46  ;;  %12223 = vmatprep.subr.bf16.mxu0 %v16292_v17  ;;  %v7988_v46 = vld [vmem:[#allocation25 + $0x8] sm:$0xff] }
0x130d   :  { %v12905_v15 = vpop.eup %12904  ;;  %v12257_v39 = vpack.c.bf16 %v7988_v46, %v7987_v45 }
0x130e   :  { %v7651_v18 = vsub.f32 %v15940_v0, %v12905_v15  ;;  %v12907_v4 = vpop.eup %12906 }
0x130f   :  { %12199 = vmatpush1.bf16.msra.mxu1 %v15156_v59  ;;  %12225 = vmatpush3.bf16.msra.mxu0 %v15162_v63  ;;  %v7989_v59 = vld [vmem:[#allocation25 + $0x10] sm:$0xff] }
0x1310   :  { %v7652_v34 = vmul.f32 %v12907_v4, %v7651_v18  ;;  %12201 = vmatprep.subr.bf16.mxu1 %v15159_v11  ;;  %12226 = vmatprep.subr.bf16.mxu0 %v16292_v17  ;;  %v7990_v11 = vld [vmem:[#allocation25 + $0x18] sm:$0xff] }
0x1311   :  { %v12260_v63 = vpack.c.bf16 %v7990_v11, %v7989_v59  ;;  %v16576_v11 = vld [vmem:[#allocation83_spill] sm:$0xff] }
0x1312   :  { %v7653_v40 = vadd.f32 %v12905_v15, %v7652_v34  ;;  %v16575_v34 = vld [vmem:[#allocation48_spill] sm:$0xff] }
0x1313   :  { %12203 = vmatpush1.bf16.msra.mxu1 %v15166_v41  ;;  %12228 = vmatpush3.bf16.msra.mxu0 %v15172_v56  ;;  %v7991_v41 = vld [vmem:[#allocation25 + $0x20] sm:$0xff] }
0x1314   :  { %12205 = vmatprep.subr.bf16.mxu1 %v15169_v38  ;;  %12229 = vmatprep.subr.bf16.mxu0 %v16292_v17  ;;  %v7654_v20 = vsub.f32 %v7653_v40, %v15940_v0  ;;  %v7992_v38 = vld [vmem:[#allocation25 + $0x28] sm:$0xff] }
0x1315   :  { %v12263_v56 = vpack.c.bf16 %v7992_v38, %v7991_v41 }
0x1316   :  { %v7655_v14 = vmul.f32 %v12944_v60, %v7654_v20 }
0x1317   :  { %12207 = vmatpush1.bf16.msra.mxu1 %v15176_v9  ;;  %12231 = vmatpush3.bf16.msra.mxu0 %v15180_v1  ;;  %v7993_v9 = vld [vmem:[#allocation25 + $0x30] sm:$0xff] }
0x1318   :  { %v16038_v54 = vadd.f32 %v7655_v14, %v15940_v0  ;;  %12256 = vmatprep.subr.bf16.mxu0 %v16292_v17  ;;  %12232 = vmatprep.subr.bf16.mxu1 %v16292_v17  ;;  %v7995_v0 = vld [vmem:[#allocation25 + $0x40] sm:$0xff] }
0x1319   :  { %v12269_v19 = vpack.c.bf16 %v7996_v12, %v7995_v0  ;;  %v16578_v12 = vld [vmem:[#allocation70_spill] sm:$0xff] }
0x131a   :  { %7887 = vmatmul.mubr.f32.vlgmr.msra.gmra.mrb[126].mxu1 %v16038_v54  ;;  %10368 = vmatmul.mubr.f32.vlgmr.msra.gmra.mrb[102].mxu0 %v16038_v54 }
0x131b   :  { %10437 = vmatprep.mubr.msk.f32.mxu0 %vm13368_vm12, %v16293_v52  ;;  %10402 = vmatprep.mubr.msk.f32.mxu1 %vm13368_vm12, %v16293_v52  ;;  %v7994_v52 = vld [vmem:[#allocation25 + $0x38] sm:$0xff] }
0x131c   :  { %12258 = vmatpush3.bf16.msra.mxu0 %v12257_v39  ;;  %v12266_v1 = vpack.c.bf16 %v7994_v52, %v7993_v9  ;;  %12234 = vmatpush3.bf16.msra.mxu1 %v12233_v24  ;;  %v16577_v9 = vld [vmem:[#allocation47_spill] sm:$0xff] }
0x131d   :  { %12259 = vmatprep.subr.bf16.mxu0 %v16292_v17  ;;  %12235 = vmatprep.subr.bf16.mxu1 %v16292_v17 }
0x1320   :  { %12261 = vmatpush3.bf16.msra.mxu0 %v12260_v63  ;;  %12237 = vmatpush3.bf16.msra.mxu1 %v12236_v48 }
0x1321   :  { %12262 = vmatprep.subr.bf16.mxu0 %v16292_v17  ;;  %12238 = vmatprep.subr.bf16.mxu1 %v16292_v17 }
0x1324   :  { %12264 = vmatpush3.bf16.msra.mxu0 %v12263_v56  ;;  %12240 = vmatpush3.bf16.msra.mxu1 %v12239_v37 }
0x1325   :  { %12265 = vmatprep.subr.bf16.mxu0 %v16292_v17  ;;  %12241 = vmatprep.subr.bf16.mxu1 %v16292_v17 }
0x1328   :  { %12267 = vmatpush3.bf16.msra.mxu0 %v12266_v1  ;;  %12243 = vmatpush3.bf16.msra.mxu1 %v12242_v31 }
0x1329   :  { %12268 = vmatprep.subr.bf16.mxu0 %v16292_v17  ;;  %12244 = vmatprep.subr.bf16.mxu1 %v16292_v17 }
0x132c   :  { %12270 = vmatpush3.bf16.msra.mxu0 %v12269_v19  ;;  %12246 = vmatpush3.bf16.msra.mxu1 %v12245_v27 }
0x132d   :  { %12271 = vmatprep.subr.bf16.mxu0 %v16292_v17  ;;  %12247 = vmatprep.subr.bf16.mxu1 %v16292_v17 }
0x1330   :  { %12273 = vmatpush3.bf16.msra.mxu0 %v12272_v30  ;;  %12249 = vmatpush3.bf16.msra.mxu1 %v12248_v13 }
0x1331   :  { %12274 = vmatprep.subr.bf16.mxu0 %v16292_v17  ;;  %12250 = vmatprep.subr.bf16.mxu1 %v16292_v17 }
0x1334   :  { %12276 = vmatpush3.bf16.msra.mxu0 %v12275_v23  ;;  %12252 = vmatpush3.bf16.msra.mxu1 %v12251_v44  ;;  %v8419_v44 = vld [vmem:[%s16580_s4] ss:$0 sm:$0xff] }
0x1335   :  { %12277 = vmatprep.subr.bf16.mxu0 %v16292_v17  ;;  %12253 = vmatprep.subr.bf16.mxu1 %v16292_v17 }
0x1338   :  { %12279 = vmatpush3.bf16.msra.mxu0 %v12278_v25  ;;  %12255 = vmatpush3.bf16.msra.mxu1 %v12254_v29 }
0x13cd   :  { %v7723_v36 = vpop.f32.mrb[124].mxu1  ;;  %v7794_v42 = vpop.f32.mrb[100].mxu0 }
0x13ce   :  { %v7798_v15 = vadd.f32 %v16574_v3, %v7723_v36  ;;  %v7725_v18 = vpop.f32.mrb[125].mxu1  ;;  %v10334_v4 = vpop.f32.mrb[101].mxu0  ;;  %v7812_v39 = vadd.f32 %v16552_v61, %v7794_v42 }
0x13cf   :  { %v7805_v40 = vadd.f32 %v16575_v34, %v7725_v18 }
0x13d0   :  { %v8415_v20 = vmul.f32 -1.442695, %v7798_v15 }
0x13d1   :  { %v8416_v60 = vmul.f32 -1.442695, %v7805_v40 }
0x13d2   :  { %12908 = vpow2.f32 %v8415_v20 }
0x13d3   :  { %12910 = vpow2.f32 %v8416_v60 }
0x13dc   :  { %v12909_v14 = vpop.eup %12908 }
0x13dd   :  { %v7802_v45 = vadd.f32 1.0, %v12909_v14  ;;  %v12911_v46 = vpop.eup %12910 }
0x13de   :  { %v7809_v41 = vadd.f32 1.0, %v12911_v46 }
0x13df   :  { %12912 = vrcp.f32 %v7802_v45 }
0x13e9   :  { %v12913_v17 = vpop.eup %12912 }
0x13ea   :  { %v7813_v59 = vmul.f32 %v12913_v17, %v7812_v39 }
0x13ec   :  { %v7814_v63 = vadd.f32 %v16576_v11, %v7813_v59 }
0x13ed   :  { %v7888_v38 = vpop.f32.mrb[126].mxu1  ;;  %v7959_v56 = vpop.f32.mrb[102].mxu0 }
0x13ee   :  { %12914 = vtanh.f32 %v7814_v63  ;;  %v7963_v52 = vadd.f32 %v16577_v9, %v7888_v38  ;;  %v7890_v1 = vpop.f32.mrb[127].mxu1  ;;  %v10369_v0 = vpop.f32.mrb[103].mxu0  ;;  %v7977_v26 = vadd.f32 %v15809_v28, %v7959_v56 }
0x13ef   :  { %v7970_v19 = vadd.f32 %v16578_v12, %v7890_v1  ;;  %12916 = vrcp.f32 %v7809_v41 }
0x13f0   :  { %v8417_v57 = vmul.f32 -1.442695, %v7963_v52 }
0x13f1   :  { %v8418_v16 = vmul.f32 -1.442695, %v7970_v19 }
0x13f2   :  { %12918 = vpow2.f32 %v8417_v57 }
0x13f3   :  { %12920 = vpow2.f32 %v8418_v16 }
0x13f8   :  { %v12915_v8 = vpop.eup %12914 }
0x13f9   :  { %v7816_v61 = vsub.f32 %v15993_v2, %v12915_v8  ;;  %v12917_v30 = vpop.eup %12916 }
0x13fb   :  { %v7817_v33 = vmul.f32 %v12917_v30, %v7816_v61 }
0x13fc   :  { %v12919_v23 = vpop.eup %12918 }
0x13fd   :  { %v7967_v10 = vadd.f32 1.0, %v12919_v23  ;;  %v7818_v62 = vadd.f32 %v12915_v8, %v7817_v33  ;;  %v12921_v58 = vpop.eup %12920 }
0x13fe   :  { %v7974_v49 = vadd.f32 1.0, %v12921_v58 }
0x13ff   :  { %12922 = vrcp.f32 %v7967_v10  ;;  %v7819_v25 = vsub.f32 %v7818_v62, %v15993_v2 }
0x1401   :  { %v7820_v32 = vmul.f32 %v12945_v47, %v7819_v25 }
0x1403   :  { %v7821_v24 = vadd.f32 %v7820_v32, %v15993_v2  ;;  %v12946_v2 = vld [vmem:[%s16290_s27] sm:$0xff] }
0x1405   :  { %10438 = vmatmul.mubr.f32.vlgmr.msra.gmra.mrb[104].mxu0 %v7821_v24 }
0x1409   :  { %v12923_v48 = vpop.eup %12922 }
0x140a   :  { %v7978_v53 = vmul.f32 %v12923_v48, %v7977_v26 }
0x140c   :  { %v7979_v37 = vadd.f32 %v16579_v43, %v7978_v53 }
0x140e   :  { %12924 = vtanh.f32 %v7979_v37 }
0x140f   :  { %12926 = vrcp.f32 %v7974_v49 }
0x1418   :  { %v12925_v51 = vpop.eup %12924 }
0x1419   :  { %v7981_v31 = vsub.f32 %v16038_v54, %v12925_v51  ;;  %v12927_v5 = vpop.eup %12926 }
0x141b   :  { %v7982_v21 = vmul.f32 %v12927_v5, %v7981_v31 }
0x141d   :  { %v7983_v27 = vadd.f32 %v12925_v51, %v7982_v21 }
0x141f   :  { %v7984_v35 = vsub.f32 %v7983_v27, %v16038_v54 }
0x1421   :  { %v7985_v28 = vmul.f32 %v12946_v2, %v7984_v35 }
0x1423   :  { %v7986_v55 = vadd.f32 %v7985_v28, %v16038_v54 }
0x1425   :  { %10403 = vmatmul.mubr.f32.vlgmr.msra.gmra.mrb[128].mxu1 %v7986_v55 }
0x14d8   :  { %v8155_v13 = vpop.f32.mrb[104].mxu0 }
0x14d9   :  { %v10439_v7 = vpop.f32.mrb[105].mxu0 }
0x14f8   :  { %v8085_v22 = vpop.f32.mrb[128].mxu1 }
0x14f9   :  { %v8156_v6 = vadd.f32 %v8155_v13, %v8085_v22  ;;  %v10404_v50 = vpop.f32.mrb[129].mxu1 }
0x14fb   :  { %v8166_v29 = vadd.f32 %v8419_v44, %v8156_v6 }
0x14fd   :  { %8167 = vst [vmem:[#allocation28] sm:$0xff] %v8166_v29 }
0x14fe   :  { %13310 = shalt.err (!%p13307_p6)
}
0x14ff   :  { %s16581_s9 = sld [smem:[#allocation107_spill]] }
0x1505   :  { %s13311_s16 = scalar_lea.hbm %s16581_s9, 128 }
0x1506   :  { %p13312_p7 = scmp.ne.s32.totalorder %s16581_s9, %s13311_s16  ;;  %p13315_p8 = scmp.lt.u32.totalorder %s13311_s16, %s16581_s9 }
0x1508   :  { %p13317_p9 = pnand %p13315_p8, %p13312_p7 }
0x150a   :  { %13320 = shalt.err (!%p13317_p9)
}
0x150b   :  { %8177 = dma.vmem_to_hbm [thread:$0]  %s8175_s14, 128, %s16581_s9, [#allocation4]  }
0x150c   :  { %13339 = dma.done.wait [#allocation4], 128  }
0x150d   :  { %13340 = vsyncadd [#allocation4], 4294967168 }
0x150e   :  { %8181 = vsyncpa [#allocation3], 1 }
0x150f   :  { %8182 = vsyncpa [#allocation6], 1 }
0x1510   :  { %8183 = vsyncpa [#allocation9], 1 }
0x1511   :  { %8184 = vsyncpa [#allocation12], 1 }
0x1512   :  { %8185 = vsyncpa [#allocation15], 1 }
0x1513   :  { %8186 = vsyncpa [#allocation18], 1 }
0x1514   :  { %8187 = vsyncpa [#allocation21], 1 }
0x1515   :  { %8188 = vsyncpa [#allocation24], 1 }
0x1516   :  { %8189 = vsyncpa [#allocation27], 1 }
0x1517   :  { %8190 = vsyncpa [#allocation4], 1 }

</bundles_post_ra>
